<compile_context>
chip_gen: v6e
topology: v6e:2x2x1
jax: 0.10.0
libtpu: 0.0.40
codegen_flags: <defaults>
</compile_context>

<pallas_src>
import math

import jax
import jax.numpy as jnp
from jax.experimental import pallas as pl
from jax.experimental.pallas import tpu as pltpu

# ---------------- configuration (small, consistent with the module) -------------
B = 2            # batch
C_IN = 3         # image channels
IMG = 16         # image H = W
PATCH = 4        # patch size
GH = GW = IMG // PATCH          # 4x4 patch grid
NUM_PATCHES = GH * GW           # 16
SEQ = NUM_PATCHES + 1           # 17 (CLS token prepended)
D = 32           # hidden size        (analog of 768)
HEADS = 4
DH = D // HEADS  # 8
LAYERS = 2
MLP = 64
SEQ_KEEP = NUM_PATCHES          # analog of [:, :196, :]
DEC_MID = 8      # analog of 256
N_CLASSES = 3
OUT_H = OUT_W = 16              # analog of (224, 224)
LN_EPS = 1e-12   # HF ViT default
BN_EPS = 1e-5    # torch BatchNorm2d default
ATT_SCALE = 1.0 / math.sqrt(DH)


# ----------------------------- in-kernel helpers --------------------------------

def _layernorm(x, g, b, eps):
    mean = jnp.mean(x, axis=-1, keepdims=True)
    xc = x - mean
    var = jnp.mean(xc * xc, axis=-1, keepdims=True)
    return xc * jax.lax.rsqrt(var + eps) * g + b


def _gelu_exact(x):
    # exact (erf-based) GELU; erf via Abramowitz–Stegun 7.1.26 (|err| <= 1.5e-7),
    # using only ops with guaranteed Mosaic lowerings (exp / mul / where).
    z = x * 0.7071067811865476
    a = jnp.abs(z)
    t = 1.0 / (1.0 + 0.3275911 * a)
    poly = t * (0.254829592 + t * (-0.284496736 + t * (1.421413741
             + t * (-1.453152027 + t * 1.061405429))))
    erf_abs = 1.0 - poly * jnp.exp(-a * a)
    return 0.5 * x * (1.0 + jnp.where(z < 0.0, -erf_abs, erf_abs))


# ------------------------------ the fused kernel ---------------------------------

def _setr_kernel(
    # encoder inputs
    patches_ref, patch_w_ref, patch_b_ref, cls_pos_ref, pos_patch_ref,
    # stacked per-layer weights (leading dim = LAYERS)
    ln1_g_ref, ln1_b_ref, wqkv_ref, bqkv_ref, wo_ref, bo_ref,
    ln2_g_ref, ln2_b_ref, w1_ref, b1_ref, w2_ref, b2_ref,
    # final LN
    lnf_g_ref, lnf_b_ref,
    # decoder (weights pre-transposed in the wrapper -> all matmuls are standard)
    wlt_ref, wrt_ref, dc1_b_ref, bn_g_ref, bn_b_ref, dc2_wt_ref, dc2_b_ref,
    rcombt_ref,
    # output (B, N_CLASSES, OUT_H*OUT_W) — lane-dense 256-wide last dim
    out_ref,
    # VMEM scratch
    h_ref, qkv_ref, ctx_ref,
):
    f32 = jnp.float32

    # ---- patch embedding + CLS + position embedding ----
    for b in range(B):
        emb_b = (jnp.dot(patches_ref[b * NUM_PATCHES:(b + 1) * NUM_PATCHES, :],
                         patch_w_ref[...], preferred_element_type=f32)
                 + patch_b_ref[...])                              # (16, D)
        h_ref[b, 0:1, :] = cls_pos_ref[...]                       # CLS + pos[0]
        h_ref[b, 1:SEQ, :] = emb_b + pos_patch_ref[...]

    # ---- transformer encoder (layers unrolled; everything VMEM-resident) ----
    for l in range(LAYERS):
        for b in range(B):
            x = h_ref[b]                                          # (SEQ, D)
            ln1 = _layernorm(x, ln1_g_ref[l], ln1_b_ref[l], LN_EPS)
            # fused QKV projection: one (D, 3D) matmul
            qkv_ref[...] = (jnp.dot(ln1, wqkv_ref[l], preferred_element_type=f32)
                            + bqkv_ref[l])                        # (SEQ, 3D)
            for hd in range(HEADS):                               # head split in-kernel
                q = qkv_ref[:, hd * DH:(hd + 1) * DH]
                k = qkv_ref[:, D + hd * DH:D + (hd + 1) * DH]
                v = qkv_ref[:, 2 * D + hd * DH:2 * D + (hd + 1) * DH]
                s = jnp.dot(q, k.T, preferred_element_type=f32) * ATT_SCALE
                m = jnp.max(s, axis=-1, keepdims=True)
                p = jnp.exp(s - m)
                denom = jnp.sum(p, axis=-1, keepdims=True)
                p = p * pl.reciprocal(denom, approx=True)         # EUP reciprocal
                ctx_ref[:, hd * DH:(hd + 1) * DH] = jnp.dot(
                    p, v, preferred_element_type=f32)             # head merge in-kernel
            x = x + (jnp.dot(ctx_ref[...], wo_ref[l], preferred_element_type=f32)
                     + bo_ref[l])                                 # attention residual
            ln2 = _layernorm(x, ln2_g_ref[l], ln2_b_ref[l], LN_EPS)
            mid = _gelu_exact(jnp.dot(ln2, w1_ref[l], preferred_element_type=f32)
                              + b1_ref[l])
            x = x + (jnp.dot(mid, w2_ref[l], preferred_element_type=f32)
                     + b2_ref[l])                                 # MLP residual
            h_ref[b] = x

    # ---- final encoder LayerNorm ----
    for b in range(B):
        h_ref[b] = _layernorm(h_ref[b], lnf_g_ref[...], lnf_b_ref[...], LN_EPS)

    # ---- decoder (channels-first formulation) ----
    # torch.reshape(kept, (B, D, GH, GW)) followed by a 1x1 conv is equivalent to
    #   y1T_b[m, p] = sum_a dc1_w[2a, m]*kept_b[a, p] + dc1_w[2a+1, m]*kept_b[a, 16+p]
    # with wlt = dc1_w[0::2].T and wrt = dc1_w[1::2].T supplied by the wrapper.
    y1t = []
    for b in range(B):
        left = h_ref[b, 0:NUM_PATCHES, 0:D // 2]                  # (16, 16)
        right = h_ref[b, 0:NUM_PATCHES, D // 2:D]                 # (16, 16)
        y1t.append(jnp.dot(wlt_ref[...], left, preferred_element_type=f32)
                   + jnp.dot(wrt_ref[...], right, preferred_element_type=f32)
                   + dc1_b_ref[...])                              # (DEC_MID, 16)

    # BatchNorm2d, training-mode biased batch stats over all B*GH*GW positions.
    n_pos = float(B * NUM_PATCHES)
    tot = jnp.zeros((DEC_MID, 1), f32)
    for b in range(B):
        tot = tot + jnp.sum(y1t[b], axis=1, keepdims=True)
    mean = tot / n_pos
    xc = [y1t[b] - mean for b in range(B)]
    tot2 = jnp.zeros((DEC_MID, 1), f32)
    for b in range(B):
        tot2 = tot2 + jnp.sum(xc[b] * xc[b], axis=1, keepdims=True)
    inv = jax.lax.rsqrt(tot2 / n_pos + BN_EPS)

    for b in range(B):
        r = jnp.maximum(xc[b] * inv * bn_g_ref[...] + bn_b_ref[...], 0.0)  # BN + ReLU
        y2t = (jnp.dot(dc2_wt_ref[...], r, preferred_element_type=f32)
               + dc2_b_ref[...])                                  # (N_CLASSES, 16)
        # bilinear upsample (align_corners=True) folded into one matmul:
        #   out[b, n, oh*W+ow] = sum_p kron(rh, rw)[oh*W+ow, p] * y2t[n, p]
        out_ref[b] = jnp.dot(y2t, rcombt_ref[...], preferred_element_type=f32)  # (N_CLASSES, 256)


# ================================ model (glue) ==================================

def _bilinear_matrix(out_size, in_size):
    # align_corners=True interpolation matrix (UpsamplingBilinear2d semantics).
    if in_size == 1:
        return jnp.ones((out_size, 1), jnp.float32)
    src = jnp.arange(out_size, dtype=jnp.float32) * (in_size - 1) / (out_size - 1)
    lo = jnp.clip(jnp.floor(src).astype(jnp.int32), 0, in_size - 2)
    frac = src - lo.astype(jnp.float32)
    rows = jnp.arange(out_size)
    m = jnp.zeros((out_size, in_size), jnp.float32)
    m = m.at[rows, lo].add(1.0 - frac)
    m = m.at[rows, lo + 1].add(frac)
    return m


def init_params(key):
    keys = iter(jax.random.split(key, 128))

    def nrm(shape, scale=0.02):
        return scale * jax.random.normal(next(keys), shape, jnp.float32)

    params = {
        "patch_w": nrm((C_IN * PATCH * PATCH, D)),
        "patch_b": jnp.zeros((D,), jnp.float32),
        "cls": nrm((1, 1, D)),
        "pos": nrm((1, SEQ, D)),
        "lnf_g": jnp.ones((D,), jnp.float32),
        "lnf_b": jnp.zeros((D,), jnp.float32),
        "layers": [],
        # decoder
        "dc1_w": nrm((D, DEC_MID)),
        "dc1_b": jnp.zeros((DEC_MID,), jnp.float32),
        "bn_g": jnp.ones((DEC_MID,), jnp.float32),
        "bn_b": jnp.zeros((DEC_MID,), jnp.float32),
        "dc2_w": nrm((DEC_MID, N_CLASSES)),
        "dc2_b": jnp.zeros((N_CLASSES,), jnp.float32),
    }
    for _ in range(LAYERS):
        params["layers"].append({
            "ln1_g": jnp.ones((D,), jnp.float32), "ln1_b": jnp.zeros((D,), jnp.float32),
            "wq": nrm((D, D)), "bq": jnp.zeros((D,), jnp.float32),
            "wk": nrm((D, D)), "bk": jnp.zeros((D,), jnp.float32),
            "wv": nrm((D, D)), "bv": jnp.zeros((D,), jnp.float32),
            "wo": nrm((D, D)), "bo": jnp.zeros((D,), jnp.float32),
            "ln2_g": jnp.ones((D,), jnp.float32), "ln2_b": jnp.zeros((D,), jnp.float32),
            "w1": nrm((D, MLP)), "b1": jnp.zeros((MLP,), jnp.float32),
            "w2": nrm((MLP, D)), "b2": jnp.zeros((D,), jnp.float32),
        })
    return params


def setr_forward(x, params):
    assert x.shape == (B, C_IN, IMG, IMG)
    # patch extraction for the stride=PATCH conv (the only host-side relayout).
    patches = (x.reshape(B, C_IN, GH, PATCH, GW, PATCH)
                .transpose(0, 2, 4, 1, 3, 5)
                .reshape(B * NUM_PATCHES, C_IN * PATCH * PATCH))

    lyrs = params["layers"]

    def stk(name, shape):
        return jnp.stack([l[name] for l in lyrs]).reshape((LAYERS,) + shape)

    # fused QKV weights / biases
    wqkv = jnp.stack([jnp.concatenate([l["wq"], l["wk"], l["wv"]], axis=1) for l in lyrs])
    bqkv = jnp.stack([jnp.concatenate([l["bq"], l["bk"], l["bv"]]) for l in lyrs]
                     ).reshape(LAYERS, 1, 3 * D)

    cls_pos = params["cls"].reshape(1, D) + params["pos"][0, 0:1, :]     # (1, D)
    pos_patch = params["pos"][0, 1:, :]                                   # (16, D)

    # decoder weight re-layout (pure parameter reshuffles; see kernel comments)
    dc1_w = params["dc1_w"]                         # (D, DEC_MID)
    wlt = dc1_w[0::2, :].T                          # (DEC_MID, 16)
    wrt = dc1_w[1::2, :].T                          # (DEC_MID, 16)
    rh = _bilinear_matrix(OUT_H, GH)                # (16, 4)
    rw = _bilinear_matrix(OUT_W, GW)                # (16, 4)
    rcombt = jnp.kron(rh, rw).T                     # (16, 256), lane-dense

    out_flat = pl.pallas_call(
        _setr_kernel,
        out_shape=jax.ShapeDtypeStruct((B, N_CLASSES, OUT_H * OUT_W), jnp.float32),
        scratch_shapes=[
            pltpu.VMEM((B, SEQ, D), jnp.float32),       # residual stream
            pltpu.VMEM((SEQ, 3 * D), jnp.float32),      # fused QKV (reused per batch)
            pltpu.VMEM((SEQ, D), jnp.float32),          # merged attention context
        ],
    )(
        patches, params["patch_w"], params["patch_b"].reshape(1, D), cls_pos, pos_patch,
        stk("ln1_g", (1, D)), stk("ln1_b", (1, D)),
        wqkv, bqkv,
        stk("wo", (D, D)), stk("bo", (1, D)),
        stk("ln2_g", (1, D)), stk("ln2_b", (1, D)),
        stk("w1", (D, MLP)), stk("b1", (1, MLP)),
        stk("w2", (MLP, D)), stk("b2", (1, D)),
        params["lnf_g"].reshape(1, D), params["lnf_b"].reshape(1, D),
        wlt, wrt,
        params["dc1_b"].reshape(DEC_MID, 1),
        params["bn_g"].reshape(DEC_MID, 1), params["bn_b"].reshape(DEC_MID, 1),
        params["dc2_w"].T, params["dc2_b"].reshape(N_CLASSES, 1),
        rcombt,
    )
    return out_flat.reshape(B, N_CLASSES, OUT_H, OUT_W)


# ==================================== main ======================================

if __name__ == "__main__":
    key = jax.random.PRNGKey(0)
    k_param, k_x = jax.random.split(key)
    params = init_params(k_param)
    x = jax.random.normal(k_x, (B, C_IN, IMG, IMG), jnp.float32)

    out = jax.jit(setr_forward)(x, params)
    out = jax.block_until_ready(out)
    assert out.shape == (B, N_CLASSES, OUT_H, OUT_W), out.shape
    assert bool(jnp.all(jnp.isfinite(out)))
    print("KERNEL_OK")
</pallas_src>

<mosaic_0001>
module attributes {stable_mosaic.version = 11 : i64} {
  func.func private @main(%arg0: i32) attributes {dimension_semantics = [#tpu.dimension_semantics<core_parallel>], iteration_bounds = array<i64: 2>, tpu.core_type = #tpu.core_type<sc_scalar_subcore>, window_params = []} {
    return
  }
}

module attributes {stable_mosaic.version = 11 : i64} {
  func.func private @main(%arg0: i32) attributes {dimension_semantics = [#tpu.dimension_semantics<core_parallel>], iteration_bounds = array<i64: 2>, tpu.core_type = #tpu.core_type<sc_scalar_subcore>, window_params = []} {
    return
  }
}

module attributes {stable_mosaic.version = 11 : i64} {
  func.func @_setr_kernel(%arg0: memref<32x48xf32, #tpu.memory_space<vmem>>, %arg1: memref<48x32xf32, #tpu.memory_space<vmem>>, %arg2: memref<1x32xf32, #tpu.memory_space<vmem>>, %arg3: memref<1x32xf32, #tpu.memory_space<vmem>>, %arg4: memref<16x32xf32, #tpu.memory_space<vmem>>, %arg5: memref<2x1x32xf32, #tpu.memory_space<vmem>>, %arg6: memref<2x1x32xf32, #tpu.memory_space<vmem>>, %arg7: memref<2x32x96xf32, #tpu.memory_space<vmem>>, %arg8: memref<2x1x96xf32, #tpu.memory_space<vmem>>, %arg9: memref<2x32x32xf32, #tpu.memory_space<vmem>>, %arg10: memref<2x1x32xf32, #tpu.memory_space<vmem>>, %arg11: memref<2x1x32xf32, #tpu.memory_space<vmem>>, %arg12: memref<2x1x32xf32, #tpu.memory_space<vmem>>, %arg13: memref<2x32x64xf32, #tpu.memory_space<vmem>>, %arg14: memref<2x1x64xf32, #tpu.memory_space<vmem>>, %arg15: memref<2x64x32xf32, #tpu.memory_space<vmem>>, %arg16: memref<2x1x32xf32, #tpu.memory_space<vmem>>, %arg17: memref<1x32xf32, #tpu.memory_space<vmem>>, %arg18: memref<1x32xf32, #tpu.memory_space<vmem>>, %arg19: memref<8x16xf32, #tpu.memory_space<vmem>>, %arg20: memref<8x16xf32, #tpu.memory_space<vmem>>, %arg21: memref<8x1xf32, #tpu.memory_space<vmem>>, %arg22: memref<8x1xf32, #tpu.memory_space<vmem>>, %arg23: memref<8x1xf32, #tpu.memory_space<vmem>>, %arg24: memref<3x8xf32, #tpu.memory_space<vmem>>, %arg25: memref<3x1xf32, #tpu.memory_space<vmem>>, %arg26: memref<16x256xf32, #tpu.memory_space<vmem>>, %arg27: memref<2x3x256xf32, #tpu.memory_space<vmem>>, %arg28: memref<2x17x32xf32, #tpu.memory_space<vmem>>, %arg29: memref<17x96xf32, #tpu.memory_space<vmem>>, %arg30: memref<17x32xf32, #tpu.memory_space<vmem>>) attributes {dimension_semantics = [], scalar_prefetch = 0 : i64, scratch_operands = 3 : i64, tpu.core_type = #tpu.core_type<tc>} {
    %c0 = arith.constant 0 : index
    %c0_0 = arith.constant 0 : index
    %0 = vector.load %arg0[%c0, %c0_0] : memref<32x48xf32, #tpu.memory_space<vmem>>, vector<16x48xf32>
    %c0_1 = arith.constant 0 : index
    %c0_2 = arith.constant 0 : index
    %1 = vector.load %arg1[%c0_1, %c0_2] : memref<48x32xf32, #tpu.memory_space<vmem>>, vector<48x32xf32>
    %cst = arith.constant dense<0.000000e+00> : vector<16x32xf32>
    %2 = tpu.matmul %0, %1, %cst {dimension_numbers = #tpu.dot_dimension_numbers<[1], [0], [0], [1], [0, 0, 1, 1], [], []>} : vector<16x48xf32>, vector<48x32xf32>, vector<16x32xf32> -> vector<16x32xf32>
    %c0_3 = arith.constant 0 : index
    %c0_4 = arith.constant 0 : index
    %3 = vector.load %arg2[%c0_3, %c0_4] : memref<1x32xf32, #tpu.memory_space<vmem>>, vector<1x32xf32>
    %4 = vector.broadcast %3 : vector<1x32xf32> to vector<16x32xf32>
    %5 = arith.addf %2, %4 : vector<16x32xf32>
    %c0_5 = arith.constant 0 : index
    %c0_6 = arith.constant 0 : index
    %6 = vector.load %arg3[%c0_5, %c0_6] : memref<1x32xf32, #tpu.memory_space<vmem>>, vector<1x32xf32>
    %c0_7 = arith.constant 0 : index
    %c0_8 = arith.constant 0 : index
    %c0_9 = arith.constant 0 : index
    %7 = vector.load %arg28[%c0_7, %c0_8, %c0_9] : memref<2x17x32xf32, #tpu.memory_space<vmem>>, vector<1x1x32xf32>
    %8 = vector.shape_cast %7 : vector<1x1x32xf32> to vector<1x32xf32>
    %9 = vector.shape_cast %6 : vector<1x32xf32> to vector<1x1x32xf32>
    tpu.vector_store %arg28[%c0_7, %c0_8, %c0_9], %9 {strides = array<i32>} : memref<2x17x32xf32, #tpu.memory_space<vmem>>, vector<1x1x32xf32>,
    %c0_10 = arith.constant 0 : index
    %c0_11 = arith.constant 0 : index
    %10 = vector.load %arg4[%c0_10, %c0_11] : memref<16x32xf32, #tpu.memory_space<vmem>>, vector<16x32xf32>
    %11 = arith.addf %5, %10 : vector<16x32xf32>
    %c0_12 = arith.constant 0 : index
    %c1 = arith.constant 1 : index
    %c0_13 = arith.constant 0 : index
    %12 = vector.load %arg28[%c0_12, %c1, %c0_13] : memref<2x17x32xf32, #tpu.memory_space<vmem>>, vector<1x16x32xf32>
    %13 = vector.shape_cast %12 : vector<1x16x32xf32> to vector<16x32xf32>
    %14 = vector.shape_cast %11 : vector<16x32xf32> to vector<1x16x32xf32>
    tpu.vector_store %arg28[%c0_12, %c1, %c0_13], %14 {strides = array<i32>} : memref<2x17x32xf32, #tpu.memory_space<vmem>>, vector<1x16x32xf32>,
    %c16 = arith.constant 16 : index
    %c0_14 = arith.constant 0 : index
    %15 = vector.load %arg0[%c16, %c0_14] : memref<32x48xf32, #tpu.memory_space<vmem>>, vector<16x48xf32>
    %c0_15 = arith.constant 0 : index
    %c0_16 = arith.constant 0 : index
    %16 = vector.load %arg1[%c0_15, %c0_16] : memref<48x32xf32, #tpu.memory_space<vmem>>, vector<48x32xf32>
    %cst_17 = arith.constant dense<0.000000e+00> : vector<16x32xf32>
    %17 = tpu.matmul %15, %16, %cst_17 {dimension_numbers = #tpu.dot_dimension_numbers<[1], [0], [0], [1], [0, 0, 1, 1], [], []>} : vector<16x48xf32>, vector<48x32xf32>, vector<16x32xf32> -> vector<16x32xf32>
    %c0_18 = arith.constant 0 : index
    %c0_19 = arith.constant 0 : index
    %18 = vector.load %arg2[%c0_18, %c0_19] : memref<1x32xf32, #tpu.memory_space<vmem>>, vector<1x32xf32>
    %19 = vector.broadcast %18 : vector<1x32xf32> to vector<16x32xf32>
    %20 = arith.addf %17, %19 : vector<16x32xf32>
    %c0_20 = arith.constant 0 : index
    %c0_21 = arith.constant 0 : index
    %21 = vector.load %arg3[%c0_20, %c0_21] : memref<1x32xf32, #tpu.memory_space<vmem>>, vector<1x32xf32>
    %c1_22 = arith.constant 1 : index
    %c0_23 = arith.constant 0 : index
    %c0_24 = arith.constant 0 : index
    %22 = vector.load %arg28[%c1_22, %c0_23, %c0_24] : memref<2x17x32xf32, #tpu.memory_space<vmem>>, vector<1x1x32xf32>
    %23 = vector.shape_cast %22 : vector<1x1x32xf32> to vector<1x32xf32>
    %24 = vector.shape_cast %21 : vector<1x32xf32> to vector<1x1x32xf32>
    tpu.vector_store %arg28[%c1_22, %c0_23, %c0_24], %24 {strides = array<i32>} : memref<2x17x32xf32, #tpu.memory_space<vmem>>, vector<1x1x32xf32>,
    %c0_25 = arith.constant 0 : index
    %c0_26 = arith.constant 0 : index
    %25 = vector.load %arg4[%c0_25, %c0_26] : memref<16x32xf32, #tpu.memory_space<vmem>>, vector<16x32xf32>
    %26 = arith.addf %20, %25 : vector<16x32xf32>
    %c1_27 = arith.constant 1 : index
    %c1_28 = arith.constant 1 : index
    %c0_29 = arith.constant 0 : index
    %27 = vector.load %arg28[%c1_27, %c1_28, %c0_29] : memref<2x17x32xf32, #tpu.memory_space<vmem>>, vector<1x16x32xf32>
    %28 = vector.shape_cast %27 : vector<1x16x32xf32> to vector<16x32xf32>
    %29 = vector.shape_cast %26 : vector<16x32xf32> to vector<1x16x32xf32>
    tpu.vector_store %arg28[%c1_27, %c1_28, %c0_29], %29 {strides = array<i32>} : memref<2x17x32xf32, #tpu.memory_space<vmem>>, vector<1x16x32xf32>,
    %c0_30 = arith.constant 0 : index
    %c0_31 = arith.constant 0 : index
    %c0_32 = arith.constant 0 : index
    %30 = vector.load %arg28[%c0_30, %c0_31, %c0_32] : memref<2x17x32xf32, #tpu.memory_space<vmem>>, vector<1x17x32xf32>
    %31 = vector.shape_cast %30 : vector<1x17x32xf32> to vector<17x32xf32>
    %c0_33 = arith.constant 0 : index
    %c0_34 = arith.constant 0 : index
    %c0_35 = arith.constant 0 : index
    %32 = vector.load %arg5[%c0_33, %c0_34, %c0_35] : memref<2x1x32xf32, #tpu.memory_space<vmem>>, vector<1x1x32xf32>
    %33 = vector.shape_cast %32 : vector<1x1x32xf32> to vector<1x32xf32>
    %c0_36 = arith.constant 0 : index
    %c0_37 = arith.constant 0 : index
    %c0_38 = arith.constant 0 : index
    %34 = vector.load %arg6[%c0_36, %c0_37, %c0_38] : memref<2x1x32xf32, #tpu.memory_space<vmem>>, vector<1x1x32xf32>
    %35 = vector.shape_cast %34 : vector<1x1x32xf32> to vector<1x32xf32>
    %cst_39 = arith.constant dense<0.000000e+00> : vector<17xf32>
    %36 = vector.multi_reduction <add>, %31, %cst_39 [1] : vector<17x32xf32> to vector<17xf32>
    %37 = vector.shape_cast %36 : vector<17xf32> to vector<17x1xf32>
    %cst_40 = arith.constant 3.200000e+01 : f32
    %38 = vector.broadcast %cst_40 : f32 to vector<17x1xf32>
    %39 = arith.divf %37, %38 : vector<17x1xf32>
    %40 = vector.broadcast %39 : vector<17x1xf32> to vector<17x32xf32>
    %41 = arith.subf %31, %40 : vector<17x32xf32>
    %42 = arith.mulf %41, %41 : vector<17x32xf32>
    %cst_41 = arith.constant dense<0.000000e+00> : vector<17xf32>
    %43 = vector.multi_reduction <add>, %42, %cst_41 [1] : vector<17x32xf32> to vector<17xf32>
    %44 = vector.shape_cast %43 : vector<17xf32> to vector<17x1xf32>
    %cst_42 = arith.constant 3.200000e+01 : f32
    %45 = vector.broadcast %cst_42 : f32 to vector<17x1xf32>
    %46 = arith.divf %44, %45 : vector<17x1xf32>
    %cst_43 = arith.constant 9.99999996E-13 : f32
    %47 = vector.broadcast %cst_43 : f32 to vector<17x1xf32>
    %48 = arith.addf %46, %47 : vector<17x1xf32>
    %49 = math.rsqrt %48 : vector<17x1xf32>
    %50 = vector.broadcast %49 : vector<17x1xf32> to vector<17x32xf32>
    %51 = arith.mulf %41, %50 : vector<17x32xf32>
    %52 = vector.broadcast %33 : vector<1x32xf32> to vector<17x32xf32>
    %53 = arith.mulf %51, %52 : vector<17x32xf32>
    %54 = vector.broadcast %35 : vector<1x32xf32> to vector<17x32xf32>
    %55 = arith.addf %53, %54 : vector<17x32xf32>
    %c0_44 = arith.constant 0 : index
    %c0_45 = arith.constant 0 : index
    %c0_46 = arith.constant 0 : index
    %56 = vector.load %arg7[%c0_44, %c0_45, %c0_46] : memref<2x32x96xf32, #tpu.memory_space<vmem>>, vector<1x32x96xf32>
    %57 = vector.shape_cast %56 : vector<1x32x96xf32> to vector<32x96xf32>
    %cst_47 = arith.constant dense<0.000000e+00> : vector<17x96xf32>
    %58 = tpu.matmul %55, %57, %cst_47 {dimension_numbers = #tpu.dot_dimension_numbers<[1], [0], [0], [1], [0, 0, 1, 1], [], []>} : vector<17x32xf32>, vector<32x96xf32>, vector<17x96xf32> -> vector<17x96xf32>
    %c0_48 = arith.constant 0 : index
    %c0_49 = arith.constant 0 : index
    %c0_50 = arith.constant 0 : index
    %59 = vector.load %arg8[%c0_48, %c0_49, %c0_50] : memref<2x1x96xf32, #tpu.memory_space<vmem>>, vector<1x1x96xf32>
    %60 = vector.shape_cast %59 : vector<1x1x96xf32> to vector<1x96xf32>
    %61 = vector.broadcast %60 : vector<1x96xf32> to vector<17x96xf32>
    %62 = arith.addf %58, %61 : vector<17x96xf32>
    %c0_51 = arith.constant 0 : index
    %c0_52 = arith.constant 0 : index
    %63 = vector.load %arg29[%c0_51, %c0_52] : memref<17x96xf32, #tpu.memory_space<vmem>>, vector<17x96xf32>
    tpu.vector_store %arg29[%c0_51, %c0_52], %62 {strides = array<i32>} : memref<17x96xf32, #tpu.memory_space<vmem>>, vector<17x96xf32>,
    %c0_53 = arith.constant 0 : index
    %c0_54 = arith.constant 0 : index
    %64 = vector.load %arg29[%c0_53, %c0_54] : memref<17x96xf32, #tpu.memory_space<vmem>>, vector<17x8xf32>
    %c0_55 = arith.constant 0 : index
    %c32 = arith.constant 32 : index
    %65 = vector.load %arg29[%c0_55, %c32] : memref<17x96xf32, #tpu.memory_space<vmem>>, vector<17x8xf32>
    %c0_56 = arith.constant 0 : index
    %c64 = arith.constant 64 : index
    %66 = vector.load %arg29[%c0_56, %c64] : memref<17x96xf32, #tpu.memory_space<vmem>>, vector<17x8xf32>
    %67 = tpu.transpose %65, [1, 0] : vector<17x8xf32> -> vector<8x17xf32>
    %cst_57 = arith.constant dense<0.000000e+00> : vector<17x17xf32>
    %68 = tpu.matmul %64, %67, %cst_57 {dimension_numbers = #tpu.dot_dimension_numbers<[1], [0], [0], [1], [0, 0, 1, 1], [], []>} : vector<17x8xf32>, vector<8x17xf32>, vector<17x17xf32> -> vector<17x17xf32>
    %cst_58 = arith.constant 0.353553385 : f32
    %69 = vector.broadcast %cst_58 : f32 to vector<17x17xf32>
    %70 = arith.mulf %68, %69 : vector<17x17xf32>
    %cst_59 = arith.constant dense<0xFF800000> : vector<17xf32>
    %71 = vector.multi_reduction <maximumf>, %70, %cst_59 [1] : vector<17x17xf32> to vector<17xf32>
    %72 = vector.shape_cast %71 : vector<17xf32> to vector<17x1xf32>
    %73 = vector.broadcast %72 : vector<17x1xf32> to vector<17x17xf32>
    %74 = arith.subf %70, %73 : vector<17x17xf32>
    %75 = math.exp %74 : vector<17x17xf32>
    %cst_60 = arith.constant dense<0.000000e+00> : vector<17xf32>
    %76 = vector.multi_reduction <add>, %75, %cst_60 [1] : vector<17x17xf32> to vector<17xf32>
    %77 = vector.shape_cast %76 : vector<17xf32> to vector<17x1xf32>
    %78 = tpu.reciprocal %77 {approx = true} : vector<17x1xf32> -> vector<17x1xf32>
    %79 = vector.broadcast %78 : vector<17x1xf32> to vector<17x17xf32>
    %80 = arith.mulf %75, %79 : vector<17x17xf32>
    %cst_61 = arith.constant dense<0.000000e+00> : vector<17x8xf32>
    %81 = tpu.matmul %80, %66, %cst_61 {dimension_numbers = #tpu.dot_dimension_numbers<[1], [0], [0], [1], [0, 0, 1, 1], [], []>} : vector<17x17xf32>, vector<17x8xf32>, vector<17x8xf32> -> vector<17x8xf32>
    %c0_62 = arith.constant 0 : index
    %c0_63 = arith.constant 0 : index
    %82 = vector.load %arg30[%c0_62, %c0_63] : memref<17x32xf32, #tpu.memory_space<vmem>>, vector<17x8xf32>
    tpu.vector_store %arg30[%c0_62, %c0_63], %81 {strides = array<i32>} : memref<17x32xf32, #tpu.memory_space<vmem>>, vector<17x8xf32>,
    %c0_64 = arith.constant 0 : index
    %c8 = arith.constant 8 : index
    %83 = vector.load %arg29[%c0_64, %c8] : memref<17x96xf32, #tpu.memory_space<vmem>>, vector<17x8xf32>
    %c0_65 = arith.constant 0 : index
    %c40 = arith.constant 40 : index
    %84 = vector.load %arg29[%c0_65, %c40] : memref<17x96xf32, #tpu.memory_space<vmem>>, vector<17x8xf32>
    %c0_66 = arith.constant 0 : index
    %c72 = arith.constant 72 : index
    %85 = vector.load %arg29[%c0_66, %c72] : memref<17x96xf32, #tpu.memory_space<vmem>>, vector<17x8xf32>
    %86 = tpu.transpose %84, [1, 0] : vector<17x8xf32> -> vector<8x17xf32>
    %cst_67 = arith.constant dense<0.000000e+00> : vector<17x17xf32>
    %87 = tpu.matmul %83, %86, %cst_67 {dimension_numbers = #tpu.dot_dimension_numbers<[1], [0], [0], [1], [0, 0, 1, 1], [], []>} : vector<17x8xf32>, vector<8x17xf32>, vector<17x17xf32> -> vector<17x17xf32>
    %cst_68 = arith.constant 0.353553385 : f32
    %88 = vector.broadcast %cst_68 : f32 to vector<17x17xf32>
    %89 = arith.mulf %87, %88 : vector<17x17xf32>
    %cst_69 = arith.constant dense<0xFF800000> : vector<17xf32>
    %90 = vector.multi_reduction <maximumf>, %89, %cst_69 [1] : vector<17x17xf32> to vector<17xf32>
    %91 = vector.shape_cast %90 : vector<17xf32> to vector<17x1xf32>
    %92 = vector.broadcast %91 : vector<17x1xf32> to vector<17x17xf32>
    %93 = arith.subf %89, %92 : vector<17x17xf32>
    %94 = math.exp %93 : vector<17x17xf32>
    %cst_70 = arith.constant dense<0.000000e+00> : vector<17xf32>
    %95 = vector.multi_reduction <add>, %94, %cst_70 [1] : vector<17x17xf32> to vector<17xf32>
    %96 = vector.shape_cast %95 : vector<17xf32> to vector<17x1xf32>
    %97 = tpu.reciprocal %96 {approx = true} : vector<17x1xf32> -> vector<17x1xf32>
    %98 = vector.broadcast %97 : vector<17x1xf32> to vector<17x17xf32>
    %99 = arith.mulf %94, %98 : vector<17x17xf32>
    %cst_71 = arith.constant dense<0.000000e+00> : vector<17x8xf32>
    %100 = tpu.matmul %99, %85, %cst_71 {dimension_numbers = #tpu.dot_dimension_numbers<[1], [0], [0], [1], [0, 0, 1, 1], [], []>} : vector<17x17xf32>, vector<17x8xf32>, vector<17x8xf32> -> vector<17x8xf32>
    %c0_72 = arith.constant 0 : index
    %c8_73 = arith.constant 8 : index
    %101 = vector.load %arg30[%c0_72, %c8_73] : memref<17x32xf32, #tpu.memory_space<vmem>>, vector<17x8xf32>
    tpu.vector_store %arg30[%c0_72, %c8_73], %100 {strides = array<i32>} : memref<17x32xf32, #tpu.memory_space<vmem>>, vector<17x8xf32>,
    %c0_74 = arith.constant 0 : index
    %c16_75 = arith.constant 16 : index
    %102 = vector.load %arg29[%c0_74, %c16_75] : memref<17x96xf32, #tpu.memory_space<vmem>>, vector<17x8xf32>
    %c0_76 = arith.constant 0 : index
    %c48 = arith.constant 48 : index
    %103 = vector.load %arg29[%c0_76, %c48] : memref<17x96xf32, #tpu.memory_space<vmem>>, vector<17x8xf32>
    %c0_77 = arith.constant 0 : index
    %c80 = arith.constant 80 : index
    %104 = vector.load %arg29[%c0_77, %c80] : memref<17x96xf32, #tpu.memory_space<vmem>>, vector<17x8xf32>
    %105 = tpu.transpose %103, [1, 0] : vector<17x8xf32> -> vector<8x17xf32>
    %cst_78 = arith.constant dense<0.000000e+00> : vector<17x17xf32>
    %106 = tpu.matmul %102, %105, %cst_78 {dimension_numbers = #tpu.dot_dimension_numbers<[1], [0], [0], [1], [0, 0, 1, 1], [], []>} : vector<17x8xf32>, vector<8x17xf32>, vector<17x17xf32> -> vector<17x17xf32>
    %cst_79 = arith.constant 0.353553385 : f32
    %107 = vector.broadcast %cst_79 : f32 to vector<17x17xf32>
    %108 = arith.mulf %106, %107 : vector<17x17xf32>
    %cst_80 = arith.constant dense<0xFF800000> : vector<17xf32>
    %109 = vector.multi_reduction <maximumf>, %108, %cst_80 [1] : vector<17x17xf32> to vector<17xf32>
    %110 = vector.shape_cast %109 : vector<17xf32> to vector<17x1xf32>
    %111 = vector.broadcast %110 : vector<17x1xf32> to vector<17x17xf32>
    %112 = arith.subf %108, %111 : vector<17x17xf32>
    %113 = math.exp %112 : vector<17x17xf32>
    %cst_81 = arith.constant dense<0.000000e+00> : vector<17xf32>
    %114 = vector.multi_reduction <add>, %113, %cst_81 [1] : vector<17x17xf32> to vector<17xf32>
    %115 = vector.shape_cast %114 : vector<17xf32> to vector<17x1xf32>
    %116 = tpu.reciprocal %115 {approx = true} : vector<17x1xf32> -> vector<17x1xf32>
    %117 = vector.broadcast %116 : vector<17x1xf32> to vector<17x17xf32>
    %118 = arith.mulf %113, %117 : vector<17x17xf32>
    %cst_82 = arith.constant dense<0.000000e+00> : vector<17x8xf32>
    %119 = tpu.matmul %118, %104, %cst_82 {dimension_numbers = #tpu.dot_dimension_numbers<[1], [0], [0], [1], [0, 0, 1, 1], [], []>} : vector<17x17xf32>, vector<17x8xf32>, vector<17x8xf32> -> vector<17x8xf32>
    %c0_83 = arith.constant 0 : index
    %c16_84 = arith.constant 16 : index
    %120 = vector.load %arg30[%c0_83, %c16_84] : memref<17x32xf32, #tpu.memory_space<vmem>>, vector<17x8xf32>
    tpu.vector_store %arg30[%c0_83, %c16_84], %119 {strides = array<i32>} : memref<17x32xf32, #tpu.memory_space<vmem>>, vector<17x8xf32>,
    %c0_85 = arith.constant 0 : index
    %c24 = arith.constant 24 : index
    %121 = vector.load %arg29[%c0_85, %c24] : memref<17x96xf32, #tpu.memory_space<vmem>>, vector<17x8xf32>
    %c0_86 = arith.constant 0 : index
    %c56 = arith.constant 56 : index
    %122 = vector.load %arg29[%c0_86, %c56] : memref<17x96xf32, #tpu.memory_space<vmem>>, vector<17x8xf32>
    %c0_87 = arith.constant 0 : index
    %c88 = arith.constant 88 : index
    %123 = vector.load %arg29[%c0_87, %c88] : memref<17x96xf32, #tpu.memory_space<vmem>>, vector<17x8xf32>
    %124 = tpu.transpose %122, [1, 0] : vector<17x8xf32> -> vector<8x17xf32>
    %cst_88 = arith.constant dense<0.000000e+00> : vector<17x17xf32>
    %125 = tpu.matmul %121, %124, %cst_88 {dimension_numbers = #tpu.dot_dimension_numbers<[1], [0], [0], [1], [0, 0, 1, 1], [], []>} : vector<17x8xf32>, vector<8x17xf32>, vector<17x17xf32> -> vector<17x17xf32>
    %cst_89 = arith.constant 0.353553385 : f32
    %126 = vector.broadcast %cst_89 : f32 to vector<17x17xf32>
    %127 = arith.mulf %125, %126 : vector<17x17xf32>
    %cst_90 = arith.constant dense<0xFF800000> : vector<17xf32>
    %128 = vector.multi_reduction <maximumf>, %127, %cst_90 [1] : vector<17x17xf32> to vector<17xf32>
    %129 = vector.shape_cast %128 : vector<17xf32> to vector<17x1xf32>
    %130 = vector.broadcast %129 : vector<17x1xf32> to vector<17x17xf32>
    %131 = arith.subf %127, %130 : vector<17x17xf32>
    %132 = math.exp %131 : vector<17x17xf32>
    %cst_91 = arith.constant dense<0.000000e+00> : vector<17xf32>
    %133 = vector.multi_reduction <add>, %132, %cst_91 [1] : vector<17x17xf32> to vector<17xf32>
    %134 = vector.shape_cast %133 : vector<17xf32> to vector<17x1xf32>
    %135 = tpu.reciprocal %134 {approx = true} : vector<17x1xf32> -> vector<17x1xf32>
    %136 = vector.broadcast %135 : vector<17x1xf32> to vector<17x17xf32>
    %137 = arith.mulf %132, %136 : vector<17x17xf32>
    %cst_92 = arith.constant dense<0.000000e+00> : vector<17x8xf32>
    %138 = tpu.matmul %137, %123, %cst_92 {dimension_numbers = #tpu.dot_dimension_numbers<[1], [0], [0], [1], [0, 0, 1, 1], [], []>} : vector<17x17xf32>, vector<17x8xf32>, vector<17x8xf32> -> vector<17x8xf32>
    %c0_93 = arith.constant 0 : index
    %c24_94 = arith.constant 24 : index
    %139 = vector.load %arg30[%c0_93, %c24_94] : memref<17x32xf32, #tpu.memory_space<vmem>>, vector<17x8xf32>
    tpu.vector_store %arg30[%c0_93, %c24_94], %138 {strides = array<i32>} : memref<17x32xf32, #tpu.memory_space<vmem>>, vector<17x8xf32>,
    %c0_95 = arith.constant 0 : index
    %c0_96 = arith.constant 0 : index
    %140 = vector.load %arg30[%c0_95, %c0_96] : memref<17x32xf32, #tpu.memory_space<vmem>>, vector<17x32xf32>
    %c0_97 = arith.constant 0 : index
    %c0_98 = arith.constant 0 : index
    %c0_99 = arith.constant 0 : index
    %141 = vector.load %arg9[%c0_97, %c0_98, %c0_99] : memref<2x32x32xf32, #tpu.memory_space<vmem>>, vector<1x32x32xf32>
    %142 = vector.shape_cast %141 : vector<1x32x32xf32> to vector<32x32xf32>
    %cst_100 = arith.constant dense<0.000000e+00> : vector<17x32xf32>
    %143 = tpu.matmul %140, %142, %cst_100 {dimension_numbers = #tpu.dot_dimension_numbers<[1], [0], [0], [1], [0, 0, 1, 1], [], []>} : vector<17x32xf32>, vector<32x32xf32>, vector<17x32xf32> -> vector<17x32xf32>
    %c0_101 = arith.constant 0 : index
    %c0_102 = arith.constant 0 : index
    %c0_103 = arith.constant 0 : index
    %144 = vector.load %arg10[%c0_101, %c0_102, %c0_103] : memref<2x1x32xf32, #tpu.memory_space<vmem>>, vector<1x1x32xf32>
    %145 = vector.shape_cast %144 : vector<1x1x32xf32> to vector<1x32xf32>
    %146 = vector.broadcast %145 : vector<1x32xf32> to vector<17x32xf32>
    %147 = arith.addf %143, %146 : vector<17x32xf32>
    %148 = arith.addf %31, %147 : vector<17x32xf32>
    %c0_104 = arith.constant 0 : index
    %c0_105 = arith.constant 0 : index
    %c0_106 = arith.constant 0 : index
    %149 = vector.load %arg11[%c0_104, %c0_105, %c0_106] : memref<2x1x32xf32, #tpu.memory_space<vmem>>, vector<1x1x32xf32>
    %150 = vector.shape_cast %149 : vector<1x1x32xf32> to vector<1x32xf32>
    %c0_107 = arith.constant 0 : index
    %c0_108 = arith.constant 0 : index
    %c0_109 = arith.constant 0 : index
    %151 = vector.load %arg12[%c0_107, %c0_108, %c0_109] : memref<2x1x32xf32, #tpu.memory_space<vmem>>, vector<1x1x32xf32>
    %152 = vector.shape_cast %151 : vector<1x1x32xf32> to vector<1x32xf32>
    %cst_110 = arith.constant dense<0.000000e+00> : vector<17xf32>
    %153 = vector.multi_reduction <add>, %148, %cst_110 [1] : vector<17x32xf32> to vector<17xf32>
    %154 = vector.shape_cast %153 : vector<17xf32> to vector<17x1xf32>
    %cst_111 = arith.constant 3.200000e+01 : f32
    %155 = vector.broadcast %cst_111 : f32 to vector<17x1xf32>
    %156 = arith.divf %154, %155 : vector<17x1xf32>
    %157 = vector.broadcast %156 : vector<17x1xf32> to vector<17x32xf32>
    %158 = arith.subf %148, %157 : vector<17x32xf32>
    %159 = arith.mulf %158, %158 : vector<17x32xf32>
    %cst_112 = arith.constant dense<0.000000e+00> : vector<17xf32>
    %160 = vector.multi_reduction <add>, %159, %cst_112 [1] : vector<17x32xf32> to vector<17xf32>
    %161 = vector.shape_cast %160 : vector<17xf32> to vector<17x1xf32>
    %cst_113 = arith.constant 3.200000e+01 : f32
    %162 = vector.broadcast %cst_113 : f32 to vector<17x1xf32>
    %163 = arith.divf %161, %162 : vector<17x1xf32>
    %cst_114 = arith.constant 9.99999996E-13 : f32
    %164 = vector.broadcast %cst_114 : f32 to vector<17x1xf32>
    %165 = arith.addf %163, %164 : vector<17x1xf32>
    %166 = math.rsqrt %165 : vector<17x1xf32>
    %167 = vector.broadcast %166 : vector<17x1xf32> to vector<17x32xf32>
    %168 = arith.mulf %158, %167 : vector<17x32xf32>
    %169 = vector.broadcast %150 : vector<1x32xf32> to vector<17x32xf32>
    %170 = arith.mulf %168, %169 : vector<17x32xf32>
    %171 = vector.broadcast %152 : vector<1x32xf32> to vector<17x32xf32>
    %172 = arith.addf %170, %171 : vector<17x32xf32>
    %c0_115 = arith.constant 0 : index
    %c0_116 = arith.constant 0 : index
    %c0_117 = arith.constant 0 : index
    %173 = vector.load %arg13[%c0_115, %c0_116, %c0_117] : memref<2x32x64xf32, #tpu.memory_space<vmem>>, vector<1x32x64xf32>
    %174 = vector.shape_cast %173 : vector<1x32x64xf32> to vector<32x64xf32>
    %cst_118 = arith.constant dense<0.000000e+00> : vector<17x64xf32>
    %175 = tpu.matmul %172, %174, %cst_118 {dimension_numbers = #tpu.dot_dimension_numbers<[1], [0], [0], [1], [0, 0, 1, 1], [], []>} : vector<17x32xf32>, vector<32x64xf32>, vector<17x64xf32> -> vector<17x64xf32>
    %c0_119 = arith.constant 0 : index
    %c0_120 = arith.constant 0 : index
    %c0_121 = arith.constant 0 : index
    %176 = vector.load %arg14[%c0_119, %c0_120, %c0_121] : memref<2x1x64xf32, #tpu.memory_space<vmem>>, vector<1x1x64xf32>
    %177 = vector.shape_cast %176 : vector<1x1x64xf32> to vector<1x64xf32>
    %178 = vector.broadcast %177 : vector<1x64xf32> to vector<17x64xf32>
    %179 = arith.addf %175, %178 : vector<17x64xf32>
    %cst_122 = arith.constant 0.707106769 : f32
    %180 = vector.broadcast %cst_122 : f32 to vector<17x64xf32>
    %181 = arith.mulf %179, %180 : vector<17x64xf32>
    %182 = math.absf %181 : vector<17x64xf32>
    %cst_123 = arith.constant 0.327591091 : f32
    %183 = vector.broadcast %cst_123 : f32 to vector<17x64xf32>
    %184 = arith.mulf %183, %182 : vector<17x64xf32>
    %cst_124 = arith.constant 1.000000e+00 : f32
    %185 = vector.broadcast %cst_124 : f32 to vector<17x64xf32>
    %186 = arith.addf %185, %184 : vector<17x64xf32>
    %cst_125 = arith.constant 1.000000e+00 : f32
    %187 = vector.broadcast %cst_125 : f32 to vector<17x64xf32>
    %188 = arith.divf %187, %186 : vector<17x64xf32>
    %cst_126 = arith.constant 1.06140542 : f32
    %189 = vector.broadcast %cst_126 : f32 to vector<17x64xf32>
    %190 = arith.mulf %188, %189 : vector<17x64xf32>
    %cst_127 = arith.constant -1.45315206 : f32
    %191 = vector.broadcast %cst_127 : f32 to vector<17x64xf32>
    %192 = arith.addf %191, %190 : vector<17x64xf32>
    %193 = arith.mulf %188, %192 : vector<17x64xf32>
    %cst_128 = arith.constant 1.42141378 : f32
    %194 = vector.broadcast %cst_128 : f32 to vector<17x64xf32>
    %195 = arith.addf %194, %193 : vector<17x64xf32>
    %196 = arith.mulf %188, %195 : vector<17x64xf32>
    %cst_129 = arith.constant -0.284496725 : f32
    %197 = vector.broadcast %cst_129 : f32 to vector<17x64xf32>
    %198 = arith.addf %197, %196 : vector<17x64xf32>
    %199 = arith.mulf %188, %198 : vector<17x64xf32>
    %cst_130 = arith.constant 0.254829586 : f32
    %200 = vector.broadcast %cst_130 : f32 to vector<17x64xf32>
    %201 = arith.addf %200, %199 : vector<17x64xf32>
    %202 = arith.mulf %188, %201 : vector<17x64xf32>
    %cst_131 = arith.constant 0.000000e+00 : f32
    %203 = vector.broadcast %cst_131 : f32 to vector<17x64xf32>
    %204 = arith.subf %203, %182 : vector<17x64xf32>
    %205 = arith.mulf %204, %182 : vector<17x64xf32>
    %206 = math.exp %205 : vector<17x64xf32>
    %207 = arith.mulf %202, %206 : vector<17x64xf32>
    %cst_132 = arith.constant 1.000000e+00 : f32
    %208 = vector.broadcast %cst_132 : f32 to vector<17x64xf32>
    %209 = arith.subf %208, %207 : vector<17x64xf32>
    %cst_133 = arith.constant 5.000000e-01 : f32
    %210 = vector.broadcast %cst_133 : f32 to vector<17x64xf32>
    %211 = arith.mulf %210, %179 : vector<17x64xf32>
    %cst_134 = arith.constant 0.000000e+00 : f32
    %212 = vector.broadcast %cst_134 : f32 to vector<17x64xf32>
    %213 = arith.cmpf olt, %181, %212 : vector<17x64xf32>
    %cst_135 = arith.constant 0.000000e+00 : f32
    %214 = vector.broadcast %cst_135 : f32 to vector<17x64xf32>
    %215 = arith.subf %214, %209 : vector<17x64xf32>
    %216 = arith.select %213, %215, %209 : vector<17x64xi1>, vector<17x64xf32>
    %cst_136 = arith.constant 1.000000e+00 : f32
    %217 = vector.broadcast %cst_136 : f32 to vector<17x64xf32>
    %218 = arith.addf %217, %216 : vector<17x64xf32>
    %219 = arith.mulf %211, %218 : vector<17x64xf32>
    %c0_137 = arith.constant 0 : index
    %c0_138 = arith.constant 0 : index
    %c0_139 = arith.constant 0 : index
    %220 = vector.load %arg15[%c0_137, %c0_138, %c0_139] : memref<2x64x32xf32, #tpu.memory_space<vmem>>, vector<1x64x32xf32>
    %221 = vector.shape_cast %220 : vector<1x64x32xf32> to vector<64x32xf32>
    %cst_140 = arith.constant dense<0.000000e+00> : vector<17x32xf32>
    %222 = tpu.matmul %219, %221, %cst_140 {dimension_numbers = #tpu.dot_dimension_numbers<[1], [0], [0], [1], [0, 0, 1, 1], [], []>} : vector<17x64xf32>, vector<64x32xf32>, vector<17x32xf32> -> vector<17x32xf32>
    %c0_141 = arith.constant 0 : index
    %c0_142 = arith.constant 0 : index
    %c0_143 = arith.constant 0 : index
    %223 = vector.load %arg16[%c0_141, %c0_142, %c0_143] : memref<2x1x32xf32, #tpu.memory_space<vmem>>, vector<1x1x32xf32>
    %224 = vector.shape_cast %223 : vector<1x1x32xf32> to vector<1x32xf32>
    %225 = vector.broadcast %224 : vector<1x32xf32> to vector<17x32xf32>
    %226 = arith.addf %222, %225 : vector<17x32xf32>
    %227 = arith.addf %148, %226 : vector<17x32xf32>
    %c0_144 = arith.constant 0 : index
    %c0_145 = arith.constant 0 : index
    %c0_146 = arith.constant 0 : index
    %228 = vector.load %arg28[%c0_144, %c0_145, %c0_146] : memref<2x17x32xf32, #tpu.memory_space<vmem>>, vector<1x17x32xf32>
    %229 = vector.shape_cast %228 : vector<1x17x32xf32> to vector<17x32xf32>
    %230 = vector.shape_cast %227 : vector<17x32xf32> to vector<1x17x32xf32>
    tpu.vector_store %arg28[%c0_144, %c0_145, %c0_146], %230 {strides = array<i32>} : memref<2x17x32xf32, #tpu.memory_space<vmem>>, vector<1x17x32xf32>,
    %c1_147 = arith.constant 1 : index
    %c0_148 = arith.constant 0 : index
    %c0_149 = arith.constant 0 : index
    %231 = vector.load %arg28[%c1_147, %c0_148, %c0_149] : memref<2x17x32xf32, #tpu.memory_space<vmem>>, vector<1x17x32xf32>
    %232 = vector.shape_cast %231 : vector<1x17x32xf32> to vector<17x32xf32>
    %c0_150 = arith.constant 0 : index
    %c0_151 = arith.constant 0 : index
    %c0_152 = arith.constant 0 : index
    %233 = vector.load %arg5[%c0_150, %c0_151, %c0_152] : memref<2x1x32xf32, #tpu.memory_space<vmem>>, vector<1x1x32xf32>
    %234 = vector.shape_cast %233 : vector<1x1x32xf32> to vector<1x32xf32>
    %c0_153 = arith.constant 0 : index
    %c0_154 = arith.constant 0 : index
    %c0_155 = arith.constant 0 : index
    %235 = vector.load %arg6[%c0_153, %c0_154, %c0_155] : memref<2x1x32xf32, #tpu.memory_space<vmem>>, vector<1x1x32xf32>
    %236 = vector.shape_cast %235 : vector<1x1x32xf32> to vector<1x32xf32>
    %cst_156 = arith.constant dense<0.000000e+00> : vector<17xf32>
    %237 = vector.multi_reduction <add>, %232, %cst_156 [1] : vector<17x32xf32> to vector<17xf32>
    %238 = vector.shape_cast %237 : vector<17xf32> to vector<17x1xf32>
    %cst_157 = arith.constant 3.200000e+01 : f32
    %239 = vector.broadcast %cst_157 : f32 to vector<17x1xf32>
    %240 = arith.divf %238, %239 : vector<17x1xf32>
    %241 = vector.broadcast %240 : vector<17x1xf32> to vector<17x32xf32>
    %242 = arith.subf %232, %241 : vector<17x32xf32>
    %243 = arith.mulf %242, %242 : vector<17x32xf32>
    %cst_158 = arith.constant dense<0.000000e+00> : vector<17xf32>
    %244 = vector.multi_reduction <add>, %243, %cst_158 [1] : vector<17x32xf32> to vector<17xf32>
    %245 = vector.shape_cast %244 : vector<17xf32> to vector<17x1xf32>
    %cst_159 = arith.constant 3.200000e+01 : f32
    %246 = vector.broadcast %cst_159 : f32 to vector<17x1xf32>
    %247 = arith.divf %245, %246 : vector<17x1xf32>
    %cst_160 = arith.constant 9.99999996E-13 : f32
    %248 = vector.broadcast %cst_160 : f32 to vector<17x1xf32>
    %249 = arith.addf %247, %248 : vector<17x1xf32>
    %250 = math.rsqrt %249 : vector<17x1xf32>
    %251 = vector.broadcast %250 : vector<17x1xf32> to vector<17x32xf32>
    %252 = arith.mulf %242, %251 : vector<17x32xf32>
    %253 = vector.broadcast %234 : vector<1x32xf32> to vector<17x32xf32>
    %254 = arith.mulf %252, %253 : vector<17x32xf32>
    %255 = vector.broadcast %236 : vector<1x32xf32> to vector<17x32xf32>
    %256 = arith.addf %254, %255 : vector<17x32xf32>
    %c0_161 = arith.constant 0 : index
    %c0_162 = arith.constant 0 : index
    %c0_163 = arith.constant 0 : index
    %257 = vector.load %arg7[%c0_161, %c0_162, %c0_163] : memref<2x32x96xf32, #tpu.memory_space<vmem>>, vector<1x32x96xf32>
    %258 = vector.shape_cast %257 : vector<1x32x96xf32> to vector<32x96xf32>
    %cst_164 = arith.constant dense<0.000000e+00> : vector<17x96xf32>
    %259 = tpu.matmul %256, %258, %cst_164 {dimension_numbers = #tpu.dot_dimension_numbers<[1], [0], [0], [1], [0, 0, 1, 1], [], []>} : vector<17x32xf32>, vector<32x96xf32>, vector<17x96xf32> -> vector<17x96xf32>
    %c0_165 = arith.constant 0 : index
    %c0_166 = arith.constant 0 : index
    %c0_167 = arith.constant 0 : index
    %260 = vector.load %arg8[%c0_165, %c0_166, %c0_167] : memref<2x1x96xf32, #tpu.memory_space<vmem>>, vector<1x1x96xf32>
    %261 = vector.shape_cast %260 : vector<1x1x96xf32> to vector<1x96xf32>
    %262 = vector.broadcast %261 : vector<1x96xf32> to vector<17x96xf32>
    %263 = arith.addf %259, %262 : vector<17x96xf32>
    %c0_168 = arith.constant 0 : index
    %c0_169 = arith.constant 0 : index
    %264 = vector.load %arg29[%c0_168, %c0_169] : memref<17x96xf32, #tpu.memory_space<vmem>>, vector<17x96xf32>
    tpu.vector_store %arg29[%c0_168, %c0_169], %263 {strides = array<i32>} : memref<17x96xf32, #tpu.memory_space<vmem>>, vector<17x96xf32>,
    %c0_170 = arith.constant 0 : index
    %c0_171 = arith.constant 0 : index
    %265 = vector.load %arg29[%c0_170, %c0_171] : memref<17x96xf32, #tpu.memory_space<vmem>>, vector<17x8xf32>
    %c0_172 = arith.constant 0 : index
    %c32_173 = arith.constant 32 : index
    %266 = vector.load %arg29[%c0_172, %c32_173] : memref<17x96xf32, #tpu.memory_space<vmem>>, vector<17x8xf32>
    %c0_174 = arith.constant 0 : index
    %c64_175 = arith.constant 64 : index
    %267 = vector.load %arg29[%c0_174, %c64_175] : memref<17x96xf32, #tpu.memory_space<vmem>>, vector<17x8xf32>
    %268 = tpu.transpose %266, [1, 0] : vector<17x8xf32> -> vector<8x17xf32>
    %cst_176 = arith.constant dense<0.000000e+00> : vector<17x17xf32>
    %269 = tpu.matmul %265, %268, %cst_176 {dimension_numbers = #tpu.dot_dimension_numbers<[1], [0], [0], [1], [0, 0, 1, 1], [], []>} : vector<17x8xf32>, vector<8x17xf32>, vector<17x17xf32> -> vector<17x17xf32>
    %cst_177 = arith.constant 0.353553385 : f32
    %270 = vector.broadcast %cst_177 : f32 to vector<17x17xf32>
    %271 = arith.mulf %269, %270 : vector<17x17xf32>
    %cst_178 = arith.constant dense<0xFF800000> : vector<17xf32>
    %272 = vector.multi_reduction <maximumf>, %271, %cst_178 [1] : vector<17x17xf32> to vector<17xf32>
    %273 = vector.shape_cast %272 : vector<17xf32> to vector<17x1xf32>
    %274 = vector.broadcast %273 : vector<17x1xf32> to vector<17x17xf32>
    %275 = arith.subf %271, %274 : vector<17x17xf32>
    %276 = math.exp %275 : vector<17x17xf32>
    %cst_179 = arith.constant dense<0.000000e+00> : vector<17xf32>
    %277 = vector.multi_reduction <add>, %276, %cst_179 [1] : vector<17x17xf32> to vector<17xf32>
    %278 = vector.shape_cast %277 : vector<17xf32> to vector<17x1xf32>
    %279 = tpu.reciprocal %278 {approx = true} : vector<17x1xf32> -> vector<17x1xf32>
    %280 = vector.broadcast %279 : vector<17x1xf32> to vector<17x17xf32>
    %281 = arith.mulf %276, %280 : vector<17x17xf32>
    %cst_180 = arith.constant dense<0.000000e+00> : vector<17x8xf32>
    %282 = tpu.matmul %281, %267, %cst_180 {dimension_numbers = #tpu.dot_dimension_numbers<[1], [0], [0], [1], [0, 0, 1, 1], [], []>} : vector<17x17xf32>, vector<17x8xf32>, vector<17x8xf32> -> vector<17x8xf32>
    %c0_181 = arith.constant 0 : index
    %c0_182 = arith.constant 0 : index
    %283 = vector.load %arg30[%c0_181, %c0_182] : memref<17x32xf32, #tpu.memory_space<vmem>>, vector<17x8xf32>
    tpu.vector_store %arg30[%c0_181, %c0_182], %282 {strides = array<i32>} : memref<17x32xf32, #tpu.memory_space<vmem>>, vector<17x8xf32>,
    %c0_183 = arith.constant 0 : index
    %c8_184 = arith.constant 8 : index
    %284 = vector.load %arg29[%c0_183, %c8_184] : memref<17x96xf32, #tpu.memory_space<vmem>>, vector<17x8xf32>
    %c0_185 = arith.constant 0 : index
    %c40_186 = arith.constant 40 : index
    %285 = vector.load %arg29[%c0_185, %c40_186] : memref<17x96xf32, #tpu.memory_space<vmem>>, vector<17x8xf32>
    %c0_187 = arith.constant 0 : index
    %c72_188 = arith.constant 72 : index
    %286 = vector.load %arg29[%c0_187, %c72_188] : memref<17x96xf32, #tpu.memory_space<vmem>>, vector<17x8xf32>
    %287 = tpu.transpose %285, [1, 0] : vector<17x8xf32> -> vector<8x17xf32>
    %cst_189 = arith.constant dense<0.000000e+00> : vector<17x17xf32>
    %288 = tpu.matmul %284, %287, %cst_189 {dimension_numbers = #tpu.dot_dimension_numbers<[1], [0], [0], [1], [0, 0, 1, 1], [], []>} : vector<17x8xf32>, vector<8x17xf32>, vector<17x17xf32> -> vector<17x17xf32>
    %cst_190 = arith.constant 0.353553385 : f32
    %289 = vector.broadcast %cst_190 : f32 to vector<17x17xf32>
    %290 = arith.mulf %288, %289 : vector<17x17xf32>
    %cst_191 = arith.constant dense<0xFF800000> : vector<17xf32>
    %291 = vector.multi_reduction <maximumf>, %290, %cst_191 [1] : vector<17x17xf32> to vector<17xf32>
    %292 = vector.shape_cast %291 : vector<17xf32> to vector<17x1xf32>
    %293 = vector.broadcast %292 : vector<17x1xf32> to vector<17x17xf32>
    %294 = arith.subf %290, %293 : vector<17x17xf32>
    %295 = math.exp %294 : vector<17x17xf32>
    %cst_192 = arith.constant dense<0.000000e+00> : vector<17xf32>
    %296 = vector.multi_reduction <add>, %295, %cst_192 [1] : vector<17x17xf32> to vector<17xf32>
    %297 = vector.shape_cast %296 : vector<17xf32> to vector<17x1xf32>
    %298 = tpu.reciprocal %297 {approx = true} : vector<17x1xf32> -> vector<17x1xf32>
    %299 = vector.broadcast %298 : vector<17x1xf32> to vector<17x17xf32>
    %300 = arith.mulf %295, %299 : vector<17x17xf32>
    %cst_193 = arith.constant dense<0.000000e+00> : vector<17x8xf32>
    %301 = tpu.matmul %300, %286, %cst_193 {dimension_numbers = #tpu.dot_dimension_numbers<[1], [0], [0], [1], [0, 0, 1, 1], [], []>} : vector<17x17xf32>, vector<17x8xf32>, vector<17x8xf32> -> vector<17x8xf32>
    %c0_194 = arith.constant 0 : index
    %c8_195 = arith.constant 8 : index
    %302 = vector.load %arg30[%c0_194, %c8_195] : memref<17x32xf32, #tpu.memory_space<vmem>>, vector<17x8xf32>
    tpu.vector_store %arg30[%c0_194, %c8_195], %301 {strides = array<i32>} : memref<17x32xf32, #tpu.memory_space<vmem>>, vector<17x8xf32>,
    %c0_196 = arith.constant 0 : index
    %c16_197 = arith.constant 16 : index
    %303 = vector.load %arg29[%c0_196, %c16_197] : memref<17x96xf32, #tpu.memory_space<vmem>>, vector<17x8xf32>
    %c0_198 = arith.constant 0 : index
    %c48_199 = arith.constant 48 : index
    %304 = vector.load %arg29[%c0_198, %c48_199] : memref<17x96xf32, #tpu.memory_space<vmem>>, vector<17x8xf32>
    %c0_200 = arith.constant 0 : index
    %c80_201 = arith.constant 80 : index
    %305 = vector.load %arg29[%c0_200, %c80_201] : memref<17x96xf32, #tpu.memory_space<vmem>>, vector<17x8xf32>
    %306 = tpu.transpose %304, [1, 0] : vector<17x8xf32> -> vector<8x17xf32>
    %cst_202 = arith.constant dense<0.000000e+00> : vector<17x17xf32>
    %307 = tpu.matmul %303, %306, %cst_202 {dimension_numbers = #tpu.dot_dimension_numbers<[1], [0], [0], [1], [0, 0, 1, 1], [], []>} : vector<17x8xf32>, vector<8x17xf32>, vector<17x17xf32> -> vector<17x17xf32>
    %cst_203 = arith.constant 0.353553385 : f32
    %308 = vector.broadcast %cst_203 : f32 to vector<17x17xf32>
    %309 = arith.mulf %307, %308 : vector<17x17xf32>
    %cst_204 = arith.constant dense<0xFF800000> : vector<17xf32>
    %310 = vector.multi_reduction <maximumf>, %309, %cst_204 [1] : vector<17x17xf32> to vector<17xf32>
    %311 = vector.shape_cast %310 : vector<17xf32> to vector<17x1xf32>
    %312 = vector.broadcast %311 : vector<17x1xf32> to vector<17x17xf32>
    %313 = arith.subf %309, %312 : vector<17x17xf32>
    %314 = math.exp %313 : vector<17x17xf32>
    %cst_205 = arith.constant dense<0.000000e+00> : vector<17xf32>
    %315 = vector.multi_reduction <add>, %314, %cst_205 [1] : vector<17x17xf32> to vector<17xf32>
    %316 = vector.shape_cast %315 : vector<17xf32> to vector<17x1xf32>
    %317 = tpu.reciprocal %316 {approx = true} : vector<17x1xf32> -> vector<17x1xf32>
    %318 = vector.broadcast %317 : vector<17x1xf32> to vector<17x17xf32>
    %319 = arith.mulf %314, %318 : vector<17x17xf32>
    %cst_206 = arith.constant dense<0.000000e+00> : vector<17x8xf32>
    %320 = tpu.matmul %319, %305, %cst_206 {dimension_numbers = #tpu.dot_dimension_numbers<[1], [0], [0], [1], [0, 0, 1, 1], [], []>} : vector<17x17xf32>, vector<17x8xf32>, vector<17x8xf32> -> vector<17x8xf32>
    %c0_207 = arith.constant 0 : index
    %c16_208 = arith.constant 16 : index
    %321 = vector.load %arg30[%c0_207, %c16_208] : memref<17x32xf32, #tpu.memory_space<vmem>>, vector<17x8xf32>
    tpu.vector_store %arg30[%c0_207, %c16_208], %320 {strides = array<i32>} : memref<17x32xf32, #tpu.memory_space<vmem>>, vector<17x8xf32>,
    %c0_209 = arith.constant 0 : index
    %c24_210 = arith.constant 24 : index
    %322 = vector.load %arg29[%c0_209, %c24_210] : memref<17x96xf32, #tpu.memory_space<vmem>>, vector<17x8xf32>
    %c0_211 = arith.constant 0 : index
    %c56_212 = arith.constant 56 : index
    %323 = vector.load %arg29[%c0_211, %c56_212] : memref<17x96xf32, #tpu.memory_space<vmem>>, vector<17x8xf32>
    %c0_213 = arith.constant 0 : index
    %c88_214 = arith.constant 88 : index
    %324 = vector.load %arg29[%c0_213, %c88_214] : memref<17x96xf32, #tpu.memory_space<vmem>>, vector<17x8xf32>
    %325 = tpu.transpose %323, [1, 0] : vector<17x8xf32> -> vector<8x17xf32>
    %cst_215 = arith.constant dense<0.000000e+00> : vector<17x17xf32>
    %326 = tpu.matmul %322, %325, %cst_215 {dimension_numbers = #tpu.dot_dimension_numbers<[1], [0], [0], [1], [0, 0, 1, 1], [], []>} : vector<17x8xf32>, vector<8x17xf32>, vector<17x17xf32> -> vector<17x17xf32>
    %cst_216 = arith.constant 0.353553385 : f32
    %327 = vector.broadcast %cst_216 : f32 to vector<17x17xf32>
    %328 = arith.mulf %326, %327 : vector<17x17xf32>
    %cst_217 = arith.constant dense<0xFF800000> : vector<17xf32>
    %329 = vector.multi_reduction <maximumf>, %328, %cst_217 [1] : vector<17x17xf32> to vector<17xf32>
    %330 = vector.shape_cast %329 : vector<17xf32> to vector<17x1xf32>
    %331 = vector.broadcast %330 : vector<17x1xf32> to vector<17x17xf32>
    %332 = arith.subf %328, %331 : vector<17x17xf32>
    %333 = math.exp %332 : vector<17x17xf32>
    %cst_218 = arith.constant dense<0.000000e+00> : vector<17xf32>
    %334 = vector.multi_reduction <add>, %333, %cst_218 [1] : vector<17x17xf32> to vector<17xf32>
    %335 = vector.shape_cast %334 : vector<17xf32> to vector<17x1xf32>
    %336 = tpu.reciprocal %335 {approx = true} : vector<17x1xf32> -> vector<17x1xf32>
    %337 = vector.broadcast %336 : vector<17x1xf32> to vector<17x17xf32>
    %338 = arith.mulf %333, %337 : vector<17x17xf32>
    %cst_219 = arith.constant dense<0.000000e+00> : vector<17x8xf32>
    %339 = tpu.matmul %338, %324, %cst_219 {dimension_numbers = #tpu.dot_dimension_numbers<[1], [0], [0], [1], [0, 0, 1, 1], [], []>} : vector<17x17xf32>, vector<17x8xf32>, vector<17x8xf32> -> vector<17x8xf32>
    %c0_220 = arith.constant 0 : index
    %c24_221 = arith.constant 24 : index
    %340 = vector.load %arg30[%c0_220, %c24_221] : memref<17x32xf32, #tpu.memory_space<vmem>>, vector<17x8xf32>
    tpu.vector_store %arg30[%c0_220, %c24_221], %339 {strides = array<i32>} : memref<17x32xf32, #tpu.memory_space<vmem>>, vector<17x8xf32>,
    %c0_222 = arith.constant 0 : index
    %c0_223 = arith.constant 0 : index
    %341 = vector.load %arg30[%c0_222, %c0_223] : memref<17x32xf32, #tpu.memory_space<vmem>>, vector<17x32xf32>
    %c0_224 = arith.constant 0 : index
    %c0_225 = arith.constant 0 : index
    %c0_226 = arith.constant 0 : index
    %342 = vector.load %arg9[%c0_224, %c0_225, %c0_226] : memref<2x32x32xf32, #tpu.memory_space<vmem>>, vector<1x32x32xf32>
    %343 = vector.shape_cast %342 : vector<1x32x32xf32> to vector<32x32xf32>
    %cst_227 = arith.constant dense<0.000000e+00> : vector<17x32xf32>
    %344 = tpu.matmul %341, %343, %cst_227 {dimension_numbers = #tpu.dot_dimension_numbers<[1], [0], [0], [1], [0, 0, 1, 1], [], []>} : vector<17x32xf32>, vector<32x32xf32>, vector<17x32xf32> -> vector<17x32xf32>
    %c0_228 = arith.constant 0 : index
    %c0_229 = arith.constant 0 : index
    %c0_230 = arith.constant 0 : index
    %345 = vector.load %arg10[%c0_228, %c0_229, %c0_230] : memref<2x1x32xf32, #tpu.memory_space<vmem>>, vector<1x1x32xf32>
    %346 = vector.shape_cast %345 : vector<1x1x32xf32> to vector<1x32xf32>
    %347 = vector.broadcast %346 : vector<1x32xf32> to vector<17x32xf32>
    %348 = arith.addf %344, %347 : vector<17x32xf32>
    %349 = arith.addf %232, %348 : vector<17x32xf32>
    %c0_231 = arith.constant 0 : index
    %c0_232 = arith.constant 0 : index
    %c0_233 = arith.constant 0 : index
    %350 = vector.load %arg11[%c0_231, %c0_232, %c0_233] : memref<2x1x32xf32, #tpu.memory_space<vmem>>, vector<1x1x32xf32>
    %351 = vector.shape_cast %350 : vector<1x1x32xf32> to vector<1x32xf32>
    %c0_234 = arith.constant 0 : index
    %c0_235 = arith.constant 0 : index
    %c0_236 = arith.constant 0 : index
    %352 = vector.load %arg12[%c0_234, %c0_235, %c0_236] : memref<2x1x32xf32, #tpu.memory_space<vmem>>, vector<1x1x32xf32>
    %353 = vector.shape_cast %352 : vector<1x1x32xf32> to vector<1x32xf32>
    %cst_237 = arith.constant dense<0.000000e+00> : vector<17xf32>
    %354 = vector.multi_reduction <add>, %349, %cst_237 [1] : vector<17x32xf32> to vector<17xf32>
    %355 = vector.shape_cast %354 : vector<17xf32> to vector<17x1xf32>
    %cst_238 = arith.constant 3.200000e+01 : f32
    %356 = vector.broadcast %cst_238 : f32 to vector<17x1xf32>
    %357 = arith.divf %355, %356 : vector<17x1xf32>
    %358 = vector.broadcast %357 : vector<17x1xf32> to vector<17x32xf32>
    %359 = arith.subf %349, %358 : vector<17x32xf32>
    %360 = arith.mulf %359, %359 : vector<17x32xf32>
    %cst_239 = arith.constant dense<0.000000e+00> : vector<17xf32>
    %361 = vector.multi_reduction <add>, %360, %cst_239 [1] : vector<17x32xf32> to vector<17xf32>
    %362 = vector.shape_cast %361 : vector<17xf32> to vector<17x1xf32>
    %cst_240 = arith.constant 3.200000e+01 : f32
    %363 = vector.broadcast %cst_240 : f32 to vector<17x1xf32>
    %364 = arith.divf %362, %363 : vector<17x1xf32>
    %cst_241 = arith.constant 9.99999996E-13 : f32
    %365 = vector.broadcast %cst_241 : f32 to vector<17x1xf32>
    %366 = arith.addf %364, %365 : vector<17x1xf32>
    %367 = math.rsqrt %366 : vector<17x1xf32>
    %368 = vector.broadcast %367 : vector<17x1xf32> to vector<17x32xf32>
    %369 = arith.mulf %359, %368 : vector<17x32xf32>
    %370 = vector.broadcast %351 : vector<1x32xf32> to vector<17x32xf32>
    %371 = arith.mulf %369, %370 : vector<17x32xf32>
    %372 = vector.broadcast %353 : vector<1x32xf32> to vector<17x32xf32>
    %373 = arith.addf %371, %372 : vector<17x32xf32>
    %c0_242 = arith.constant 0 : index
    %c0_243 = arith.constant 0 : index
    %c0_244 = arith.constant 0 : index
    %374 = vector.load %arg13[%c0_242, %c0_243, %c0_244] : memref<2x32x64xf32, #tpu.memory_space<vmem>>, vector<1x32x64xf32>
    %375 = vector.shape_cast %374 : vector<1x32x64xf32> to vector<32x64xf32>
    %cst_245 = arith.constant dense<0.000000e+00> : vector<17x64xf32>
    %376 = tpu.matmul %373, %375, %cst_245 {dimension_numbers = #tpu.dot_dimension_numbers<[1], [0], [0], [1], [0, 0, 1, 1], [], []>} : vector<17x32xf32>, vector<32x64xf32>, vector<17x64xf32> -> vector<17x64xf32>
    %c0_246 = arith.constant 0 : index
    %c0_247 = arith.constant 0 : index
    %c0_248 = arith.constant 0 : index
    %377 = vector.load %arg14[%c0_246, %c0_247, %c0_248] : memref<2x1x64xf32, #tpu.memory_space<vmem>>, vector<1x1x64xf32>
    %378 = vector.shape_cast %377 : vector<1x1x64xf32> to vector<1x64xf32>
    %379 = vector.broadcast %378 : vector<1x64xf32> to vector<17x64xf32>
    %380 = arith.addf %376, %379 : vector<17x64xf32>
    %cst_249 = arith.constant 0.707106769 : f32
    %381 = vector.broadcast %cst_249 : f32 to vector<17x64xf32>
    %382 = arith.mulf %380, %381 : vector<17x64xf32>
    %383 = math.absf %382 : vector<17x64xf32>
    %cst_250 = arith.constant 0.327591091 : f32
    %384 = vector.broadcast %cst_250 : f32 to vector<17x64xf32>
    %385 = arith.mulf %384, %383 : vector<17x64xf32>
    %cst_251 = arith.constant 1.000000e+00 : f32
    %386 = vector.broadcast %cst_251 : f32 to vector<17x64xf32>
    %387 = arith.addf %386, %385 : vector<17x64xf32>
    %cst_252 = arith.constant 1.000000e+00 : f32
    %388 = vector.broadcast %cst_252 : f32 to vector<17x64xf32>
    %389 = arith.divf %388, %387 : vector<17x64xf32>
    %cst_253 = arith.constant 1.06140542 : f32
    %390 = vector.broadcast %cst_253 : f32 to vector<17x64xf32>
    %391 = arith.mulf %389, %390 : vector<17x64xf32>
    %cst_254 = arith.constant -1.45315206 : f32
    %392 = vector.broadcast %cst_254 : f32 to vector<17x64xf32>
    %393 = arith.addf %392, %391 : vector<17x64xf32>
    %394 = arith.mulf %389, %393 : vector<17x64xf32>
    %cst_255 = arith.constant 1.42141378 : f32
    %395 = vector.broadcast %cst_255 : f32 to vector<17x64xf32>
    %396 = arith.addf %395, %394 : vector<17x64xf32>
    %397 = arith.mulf %389, %396 : vector<17x64xf32>
    %cst_256 = arith.constant -0.284496725 : f32
    %398 = vector.broadcast %cst_256 : f32 to vector<17x64xf32>
    %399 = arith.addf %398, %397 : vector<17x64xf32>
    %400 = arith.mulf %389, %399 : vector<17x64xf32>
    %cst_257 = arith.constant 0.254829586 : f32
    %401 = vector.broadcast %cst_257 : f32 to vector<17x64xf32>
    %402 = arith.addf %401, %400 : vector<17x64xf32>
    %403 = arith.mulf %389, %402 : vector<17x64xf32>
    %cst_258 = arith.constant 0.000000e+00 : f32
    %404 = vector.broadcast %cst_258 : f32 to vector<17x64xf32>
    %405 = arith.subf %404, %383 : vector<17x64xf32>
    %406 = arith.mulf %405, %383 : vector<17x64xf32>
    %407 = math.exp %406 : vector<17x64xf32>
    %408 = arith.mulf %403, %407 : vector<17x64xf32>
    %cst_259 = arith.constant 1.000000e+00 : f32
    %409 = vector.broadcast %cst_259 : f32 to vector<17x64xf32>
    %410 = arith.subf %409, %408 : vector<17x64xf32>
    %cst_260 = arith.constant 5.000000e-01 : f32
    %411 = vector.broadcast %cst_260 : f32 to vector<17x64xf32>
    %412 = arith.mulf %411, %380 : vector<17x64xf32>
    %cst_261 = arith.constant 0.000000e+00 : f32
    %413 = vector.broadcast %cst_261 : f32 to vector<17x64xf32>
    %414 = arith.cmpf olt, %382, %413 : vector<17x64xf32>
    %cst_262 = arith.constant 0.000000e+00 : f32
    %415 = vector.broadcast %cst_262 : f32 to vector<17x64xf32>
    %416 = arith.subf %415, %410 : vector<17x64xf32>
    %417 = arith.select %414, %416, %410 : vector<17x64xi1>, vector<17x64xf32>
    %cst_263 = arith.constant 1.000000e+00 : f32
    %418 = vector.broadcast %cst_263 : f32 to vector<17x64xf32>
    %419 = arith.addf %418, %417 : vector<17x64xf32>
    %420 = arith.mulf %412, %419 : vector<17x64xf32>
    %c0_264 = arith.constant 0 : index
    %c0_265 = arith.constant 0 : index
    %c0_266 = arith.constant 0 : index
    %421 = vector.load %arg15[%c0_264, %c0_265, %c0_266] : memref<2x64x32xf32, #tpu.memory_space<vmem>>, vector<1x64x32xf32>
    %422 = vector.shape_cast %421 : vector<1x64x32xf32> to vector<64x32xf32>
    %cst_267 = arith.constant dense<0.000000e+00> : vector<17x32xf32>
    %423 = tpu.matmul %420, %422, %cst_267 {dimension_numbers = #tpu.dot_dimension_numbers<[1], [0], [0], [1], [0, 0, 1, 1], [], []>} : vector<17x64xf32>, vector<64x32xf32>, vector<17x32xf32> -> vector<17x32xf32>
    %c0_268 = arith.constant 0 : index
    %c0_269 = arith.constant 0 : index
    %c0_270 = arith.constant 0 : index
    %424 = vector.load %arg16[%c0_268, %c0_269, %c0_270] : memref<2x1x32xf32, #tpu.memory_space<vmem>>, vector<1x1x32xf32>
    %425 = vector.shape_cast %424 : vector<1x1x32xf32> to vector<1x32xf32>
    %426 = vector.broadcast %425 : vector<1x32xf32> to vector<17x32xf32>
    %427 = arith.addf %423, %426 : vector<17x32xf32>
    %428 = arith.addf %349, %427 : vector<17x32xf32>
    %c1_271 = arith.constant 1 : index
    %c0_272 = arith.constant 0 : index
    %c0_273 = arith.constant 0 : index
    %429 = vector.load %arg28[%c1_271, %c0_272, %c0_273] : memref<2x17x32xf32, #tpu.memory_space<vmem>>, vector<1x17x32xf32>
    %430 = vector.shape_cast %429 : vector<1x17x32xf32> to vector<17x32xf32>
    %431 = vector.shape_cast %428 : vector<17x32xf32> to vector<1x17x32xf32>
    tpu.vector_store %arg28[%c1_271, %c0_272, %c0_273], %431 {strides = array<i32>} : memref<2x17x32xf32, #tpu.memory_space<vmem>>, vector<1x17x32xf32>,
    %c0_274 = arith.constant 0 : index
    %c0_275 = arith.constant 0 : index
    %c0_276 = arith.constant 0 : index
    %432 = vector.load %arg28[%c0_274, %c0_275, %c0_276] : memref<2x17x32xf32, #tpu.memory_space<vmem>>, vector<1x17x32xf32>
    %433 = vector.shape_cast %432 : vector<1x17x32xf32> to vector<17x32xf32>
    %c1_277 = arith.constant 1 : index
    %c0_278 = arith.constant 0 : index
    %c0_279 = arith.constant 0 : index
    %434 = vector.load %arg5[%c1_277, %c0_278, %c0_279] : memref<2x1x32xf32, #tpu.memory_space<vmem>>, vector<1x1x32xf32>
    %435 = vector.shape_cast %434 : vector<1x1x32xf32> to vector<1x32xf32>
    %c1_280 = arith.constant 1 : index
    %c0_281 = arith.constant 0 : index
    %c0_282 = arith.constant 0 : index
    %436 = vector.load %arg6[%c1_280, %c0_281, %c0_282] : memref<2x1x32xf32, #tpu.memory_space<vmem>>, vector<1x1x32xf32>
    %437 = vector.shape_cast %436 : vector<1x1x32xf32> to vector<1x32xf32>
    %cst_283 = arith.constant dense<0.000000e+00> : vector<17xf32>
    %438 = vector.multi_reduction <add>, %433, %cst_283 [1] : vector<17x32xf32> to vector<17xf32>
    %439 = vector.shape_cast %438 : vector<17xf32> to vector<17x1xf32>
    %cst_284 = arith.constant 3.200000e+01 : f32
    %440 = vector.broadcast %cst_284 : f32 to vector<17x1xf32>
    %441 = arith.divf %439, %440 : vector<17x1xf32>
    %442 = vector.broadcast %441 : vector<17x1xf32> to vector<17x32xf32>
    %443 = arith.subf %433, %442 : vector<17x32xf32>
    %444 = arith.mulf %443, %443 : vector<17x32xf32>
    %cst_285 = arith.constant dense<0.000000e+00> : vector<17xf32>
    %445 = vector.multi_reduction <add>, %444, %cst_285 [1] : vector<17x32xf32> to vector<17xf32>
    %446 = vector.shape_cast %445 : vector<17xf32> to vector<17x1xf32>
    %cst_286 = arith.constant 3.200000e+01 : f32
    %447 = vector.broadcast %cst_286 : f32 to vector<17x1xf32>
    %448 = arith.divf %446, %447 : vector<17x1xf32>
    %cst_287 = arith.constant 9.99999996E-13 : f32
    %449 = vector.broadcast %cst_287 : f32 to vector<17x1xf32>
    %450 = arith.addf %448, %449 : vector<17x1xf32>
    %451 = math.rsqrt %450 : vector<17x1xf32>
    %452 = vector.broadcast %451 : vector<17x1xf32> to vector<17x32xf32>
    %453 = arith.mulf %443, %452 : vector<17x32xf32>
    %454 = vector.broadcast %435 : vector<1x32xf32> to vector<17x32xf32>
    %455 = arith.mulf %453, %454 : vector<17x32xf32>
    %456 = vector.broadcast %437 : vector<1x32xf32> to vector<17x32xf32>
    %457 = arith.addf %455, %456 : vector<17x32xf32>
    %c1_288 = arith.constant 1 : index
    %c0_289 = arith.constant 0 : index
    %c0_290 = arith.constant 0 : index
    %458 = vector.load %arg7[%c1_288, %c0_289, %c0_290] : memref<2x32x96xf32, #tpu.memory_space<vmem>>, vector<1x32x96xf32>
    %459 = vector.shape_cast %458 : vector<1x32x96xf32> to vector<32x96xf32>
    %cst_291 = arith.constant dense<0.000000e+00> : vector<17x96xf32>
    %460 = tpu.matmul %457, %459, %cst_291 {dimension_numbers = #tpu.dot_dimension_numbers<[1], [0], [0], [1], [0, 0, 1, 1], [], []>} : vector<17x32xf32>, vector<32x96xf32>, vector<17x96xf32> -> vector<17x96xf32>
    %c1_292 = arith.constant 1 : index
    %c0_293 = arith.constant 0 : index
    %c0_294 = arith.constant 0 : index
    %461 = vector.load %arg8[%c1_292, %c0_293, %c0_294] : memref<2x1x96xf32, #tpu.memory_space<vmem>>, vector<1x1x96xf32>
    %462 = vector.shape_cast %461 : vector<1x1x96xf32> to vector<1x96xf32>
    %463 = vector.broadcast %462 : vector<1x96xf32> to vector<17x96xf32>
    %464 = arith.addf %460, %463 : vector<17x96xf32>
    %c0_295 = arith.constant 0 : index
    %c0_296 = arith.constant 0 : index
    %465 = vector.load %arg29[%c0_295, %c0_296] : memref<17x96xf32, #tpu.memory_space<vmem>>, vector<17x96xf32>
    tpu.vector_store %arg29[%c0_295, %c0_296], %464 {strides = array<i32>} : memref<17x96xf32, #tpu.memory_space<vmem>>, vector<17x96xf32>,
    %c0_297 = arith.constant 0 : index
    %c0_298 = arith.constant 0 : index
    %466 = vector.load %arg29[%c0_297, %c0_298] : memref<17x96xf32, #tpu.memory_space<vmem>>, vector<17x8xf32>
    %c0_299 = arith.constant 0 : index
    %c32_300 = arith.constant 32 : index
    %467 = vector.load %arg29[%c0_299, %c32_300] : memref<17x96xf32, #tpu.memory_space<vmem>>, vector<17x8xf32>
    %c0_301 = arith.constant 0 : index
    %c64_302 = arith.constant 64 : index
    %468 = vector.load %arg29[%c0_301, %c64_302] : memref<17x96xf32, #tpu.memory_space<vmem>>, vector<17x8xf32>
    %469 = tpu.transpose %467, [1, 0] : vector<17x8xf32> -> vector<8x17xf32>
    %cst_303 = arith.constant dense<0.000000e+00> : vector<17x17xf32>
    %470 = tpu.matmul %466, %469, %cst_303 {dimension_numbers = #tpu.dot_dimension_numbers<[1], [0], [0], [1], [0, 0, 1, 1], [], []>} : vector<17x8xf32>, vector<8x17xf32>, vector<17x17xf32> -> vector<17x17xf32>
    %cst_304 = arith.constant 0.353553385 : f32
    %471 = vector.broadcast %cst_304 : f32 to vector<17x17xf32>
    %472 = arith.mulf %470, %471 : vector<17x17xf32>
    %cst_305 = arith.constant dense<0xFF800000> : vector<17xf32>
    %473 = vector.multi_reduction <maximumf>, %472, %cst_305 [1] : vector<17x17xf32> to vector<17xf32>
    %474 = vector.shape_cast %473 : vector<17xf32> to vector<17x1xf32>
    %475 = vector.broadcast %474 : vector<17x1xf32> to vector<17x17xf32>
    %476 = arith.subf %472, %475 : vector<17x17xf32>
    %477 = math.exp %476 : vector<17x17xf32>
    %cst_306 = arith.constant dense<0.000000e+00> : vector<17xf32>
    %478 = vector.multi_reduction <add>, %477, %cst_306 [1] : vector<17x17xf32> to vector<17xf32>
    %479 = vector.shape_cast %478 : vector<17xf32> to vector<17x1xf32>
    %480 = tpu.reciprocal %479 {approx = true} : vector<17x1xf32> -> vector<17x1xf32>
    %481 = vector.broadcast %480 : vector<17x1xf32> to vector<17x17xf32>
    %482 = arith.mulf %477, %481 : vector<17x17xf32>
    %cst_307 = arith.constant dense<0.000000e+00> : vector<17x8xf32>
    %483 = tpu.matmul %482, %468, %cst_307 {dimension_numbers = #tpu.dot_dimension_numbers<[1], [0], [0], [1], [0, 0, 1, 1], [], []>} : vector<17x17xf32>, vector<17x8xf32>, vector<17x8xf32> -> vector<17x8xf32>
    %c0_308 = arith.constant 0 : index
    %c0_309 = arith.constant 0 : index
    %484 = vector.load %arg30[%c0_308, %c0_309] : memref<17x32xf32, #tpu.memory_space<vmem>>, vector<17x8xf32>
    tpu.vector_store %arg30[%c0_308, %c0_309], %483 {strides = array<i32>} : memref<17x32xf32, #tpu.memory_space<vmem>>, vector<17x8xf32>,
    %c0_310 = arith.constant 0 : index
    %c8_311 = arith.constant 8 : index
    %485 = vector.load %arg29[%c0_310, %c8_311] : memref<17x96xf32, #tpu.memory_space<vmem>>, vector<17x8xf32>
    %c0_312 = arith.constant 0 : index
    %c40_313 = arith.constant 40 : index
    %486 = vector.load %arg29[%c0_312, %c40_313] : memref<17x96xf32, #tpu.memory_space<vmem>>, vector<17x8xf32>
    %c0_314 = arith.constant 0 : index
    %c72_315 = arith.constant 72 : index
    %487 = vector.load %arg29[%c0_314, %c72_315] : memref<17x96xf32, #tpu.memory_space<vmem>>, vector<17x8xf32>
    %488 = tpu.transpose %486, [1, 0] : vector<17x8xf32> -> vector<8x17xf32>
    %cst_316 = arith.constant dense<0.000000e+00> : vector<17x17xf32>
    %489 = tpu.matmul %485, %488, %cst_316 {dimension_numbers = #tpu.dot_dimension_numbers<[1], [0], [0], [1], [0, 0, 1, 1], [], []>} : vector<17x8xf32>, vector<8x17xf32>, vector<17x17xf32> -> vector<17x17xf32>
    %cst_317 = arith.constant 0.353553385 : f32
    %490 = vector.broadcast %cst_317 : f32 to vector<17x17xf32>
    %491 = arith.mulf %489, %490 : vector<17x17xf32>
    %cst_318 = arith.constant dense<0xFF800000> : vector<17xf32>
    %492 = vector.multi_reduction <maximumf>, %491, %cst_318 [1] : vector<17x17xf32> to vector<17xf32>
    %493 = vector.shape_cast %492 : vector<17xf32> to vector<17x1xf32>
    %494 = vector.broadcast %493 : vector<17x1xf32> to vector<17x17xf32>
    %495 = arith.subf %491, %494 : vector<17x17xf32>
    %496 = math.exp %495 : vector<17x17xf32>
    %cst_319 = arith.constant dense<0.000000e+00> : vector<17xf32>
    %497 = vector.multi_reduction <add>, %496, %cst_319 [1] : vector<17x17xf32> to vector<17xf32>
    %498 = vector.shape_cast %497 : vector<17xf32> to vector<17x1xf32>
    %499 = tpu.reciprocal %498 {approx = true} : vector<17x1xf32> -> vector<17x1xf32>
    %500 = vector.broadcast %499 : vector<17x1xf32> to vector<17x17xf32>
    %501 = arith.mulf %496, %500 : vector<17x17xf32>
    %cst_320 = arith.constant dense<0.000000e+00> : vector<17x8xf32>
    %502 = tpu.matmul %501, %487, %cst_320 {dimension_numbers = #tpu.dot_dimension_numbers<[1], [0], [0], [1], [0, 0, 1, 1], [], []>} : vector<17x17xf32>, vector<17x8xf32>, vector<17x8xf32> -> vector<17x8xf32>
    %c0_321 = arith.constant 0 : index
    %c8_322 = arith.constant 8 : index
    %503 = vector.load %arg30[%c0_321, %c8_322] : memref<17x32xf32, #tpu.memory_space<vmem>>, vector<17x8xf32>
    tpu.vector_store %arg30[%c0_321, %c8_322], %502 {strides = array<i32>} : memref<17x32xf32, #tpu.memory_space<vmem>>, vector<17x8xf32>,
    %c0_323 = arith.constant 0 : index
    %c16_324 = arith.constant 16 : index
    %504 = vector.load %arg29[%c0_323, %c16_324] : memref<17x96xf32, #tpu.memory_space<vmem>>, vector<17x8xf32>
    %c0_325 = arith.constant 0 : index
    %c48_326 = arith.constant 48 : index
    %505 = vector.load %arg29[%c0_325, %c48_326] : memref<17x96xf32, #tpu.memory_space<vmem>>, vector<17x8xf32>
    %c0_327 = arith.constant 0 : index
    %c80_328 = arith.constant 80 : index
    %506 = vector.load %arg29[%c0_327, %c80_328] : memref<17x96xf32, #tpu.memory_space<vmem>>, vector<17x8xf32>
    %507 = tpu.transpose %505, [1, 0] : vector<17x8xf32> -> vector<8x17xf32>
    %cst_329 = arith.constant dense<0.000000e+00> : vector<17x17xf32>
    %508 = tpu.matmul %504, %507, %cst_329 {dimension_numbers = #tpu.dot_dimension_numbers<[1], [0], [0], [1], [0, 0, 1, 1], [], []>} : vector<17x8xf32>, vector<8x17xf32>, vector<17x17xf32> -> vector<17x17xf32>
    %cst_330 = arith.constant 0.353553385 : f32
    %509 = vector.broadcast %cst_330 : f32 to vector<17x17xf32>
    %510 = arith.mulf %508, %509 : vector<17x17xf32>
    %cst_331 = arith.constant dense<0xFF800000> : vector<17xf32>
    %511 = vector.multi_reduction <maximumf>, %510, %cst_331 [1] : vector<17x17xf32> to vector<17xf32>
    %512 = vector.shape_cast %511 : vector<17xf32> to vector<17x1xf32>
    %513 = vector.broadcast %512 : vector<17x1xf32> to vector<17x17xf32>
    %514 = arith.subf %510, %513 : vector<17x17xf32>
    %515 = math.exp %514 : vector<17x17xf32>
    %cst_332 = arith.constant dense<0.000000e+00> : vector<17xf32>
    %516 = vector.multi_reduction <add>, %515, %cst_332 [1] : vector<17x17xf32> to vector<17xf32>
    %517 = vector.shape_cast %516 : vector<17xf32> to vector<17x1xf32>
    %518 = tpu.reciprocal %517 {approx = true} : vector<17x1xf32> -> vector<17x1xf32>
    %519 = vector.broadcast %518 : vector<17x1xf32> to vector<17x17xf32>
    %520 = arith.mulf %515, %519 : vector<17x17xf32>
    %cst_333 = arith.constant dense<0.000000e+00> : vector<17x8xf32>
    %521 = tpu.matmul %520, %506, %cst_333 {dimension_numbers = #tpu.dot_dimension_numbers<[1], [0], [0], [1], [0, 0, 1, 1], [], []>} : vector<17x17xf32>, vector<17x8xf32>, vector<17x8xf32> -> vector<17x8xf32>
    %c0_334 = arith.constant 0 : index
    %c16_335 = arith.constant 16 : index
    %522 = vector.load %arg30[%c0_334, %c16_335] : memref<17x32xf32, #tpu.memory_space<vmem>>, vector<17x8xf32>
    tpu.vector_store %arg30[%c0_334, %c16_335], %521 {strides = array<i32>} : memref<17x32xf32, #tpu.memory_space<vmem>>, vector<17x8xf32>,
    %c0_336 = arith.constant 0 : index
    %c24_337 = arith.constant 24 : index
    %523 = vector.load %arg29[%c0_336, %c24_337] : memref<17x96xf32, #tpu.memory_space<vmem>>, vector<17x8xf32>
    %c0_338 = arith.constant 0 : index
    %c56_339 = arith.constant 56 : index
    %524 = vector.load %arg29[%c0_338, %c56_339] : memref<17x96xf32, #tpu.memory_space<vmem>>, vector<17x8xf32>
    %c0_340 = arith.constant 0 : index
    %c88_341 = arith.constant 88 : index
    %525 = vector.load %arg29[%c0_340, %c88_341] : memref<17x96xf32, #tpu.memory_space<vmem>>, vector<17x8xf32>
    %526 = tpu.transpose %524, [1, 0] : vector<17x8xf32> -> vector<8x17xf32>
    %cst_342 = arith.constant dense<0.000000e+00> : vector<17x17xf32>
    %527 = tpu.matmul %523, %526, %cst_342 {dimension_numbers = #tpu.dot_dimension_numbers<[1], [0], [0], [1], [0, 0, 1, 1], [], []>} : vector<17x8xf32>, vector<8x17xf32>, vector<17x17xf32> -> vector<17x17xf32>
    %cst_343 = arith.constant 0.353553385 : f32
    %528 = vector.broadcast %cst_343 : f32 to vector<17x17xf32>
    %529 = arith.mulf %527, %528 : vector<17x17xf32>
    %cst_344 = arith.constant dense<0xFF800000> : vector<17xf32>
    %530 = vector.multi_reduction <maximumf>, %529, %cst_344 [1] : vector<17x17xf32> to vector<17xf32>
    %531 = vector.shape_cast %530 : vector<17xf32> to vector<17x1xf32>
    %532 = vector.broadcast %531 : vector<17x1xf32> to vector<17x17xf32>
    %533 = arith.subf %529, %532 : vector<17x17xf32>
    %534 = math.exp %533 : vector<17x17xf32>
    %cst_345 = arith.constant dense<0.000000e+00> : vector<17xf32>
    %535 = vector.multi_reduction <add>, %534, %cst_345 [1] : vector<17x17xf32> to vector<17xf32>
    %536 = vector.shape_cast %535 : vector<17xf32> to vector<17x1xf32>
    %537 = tpu.reciprocal %536 {approx = true} : vector<17x1xf32> -> vector<17x1xf32>
    %538 = vector.broadcast %537 : vector<17x1xf32> to vector<17x17xf32>
    %539 = arith.mulf %534, %538 : vector<17x17xf32>
    %cst_346 = arith.constant dense<0.000000e+00> : vector<17x8xf32>
    %540 = tpu.matmul %539, %525, %cst_346 {dimension_numbers = #tpu.dot_dimension_numbers<[1], [0], [0], [1], [0, 0, 1, 1], [], []>} : vector<17x17xf32>, vector<17x8xf32>, vector<17x8xf32> -> vector<17x8xf32>
    %c0_347 = arith.constant 0 : index
    %c24_348 = arith.constant 24 : index
    %541 = vector.load %arg30[%c0_347, %c24_348] : memref<17x32xf32, #tpu.memory_space<vmem>>, vector<17x8xf32>
    tpu.vector_store %arg30[%c0_347, %c24_348], %540 {strides = array<i32>} : memref<17x32xf32, #tpu.memory_space<vmem>>, vector<17x8xf32>,
    %c0_349 = arith.constant 0 : index
    %c0_350 = arith.constant 0 : index
    %542 = vector.load %arg30[%c0_349, %c0_350] : memref<17x32xf32, #tpu.memory_space<vmem>>, vector<17x32xf32>
    %c1_351 = arith.constant 1 : index
    %c0_352 = arith.constant 0 : index
    %c0_353 = arith.constant 0 : index
    %543 = vector.load %arg9[%c1_351, %c0_352, %c0_353] : memref<2x32x32xf32, #tpu.memory_space<vmem>>, vector<1x32x32xf32>
    %544 = vector.shape_cast %543 : vector<1x32x32xf32> to vector<32x32xf32>
    %cst_354 = arith.constant dense<0.000000e+00> : vector<17x32xf32>
    %545 = tpu.matmul %542, %544, %cst_354 {dimension_numbers = #tpu.dot_dimension_numbers<[1], [0], [0], [1], [0, 0, 1, 1], [], []>} : vector<17x32xf32>, vector<32x32xf32>, vector<17x32xf32> -> vector<17x32xf32>
    %c1_355 = arith.constant 1 : index
    %c0_356 = arith.constant 0 : index
    %c0_357 = arith.constant 0 : index
    %546 = vector.load %arg10[%c1_355, %c0_356, %c0_357] : memref<2x1x32xf32, #tpu.memory_space<vmem>>, vector<1x1x32xf32>
    %547 = vector.shape_cast %546 : vector<1x1x32xf32> to vector<1x32xf32>
    %548 = vector.broadcast %547 : vector<1x32xf32> to vector<17x32xf32>
    %549 = arith.addf %545, %548 : vector<17x32xf32>
    %550 = arith.addf %433, %549 : vector<17x32xf32>
    %c1_358 = arith.constant 1 : index
    %c0_359 = arith.constant 0 : index
    %c0_360 = arith.constant 0 : index
    %551 = vector.load %arg11[%c1_358, %c0_359, %c0_360] : memref<2x1x32xf32, #tpu.memory_space<vmem>>, vector<1x1x32xf32>
    %552 = vector.shape_cast %551 : vector<1x1x32xf32> to vector<1x32xf32>
    %c1_361 = arith.constant 1 : index
    %c0_362 = arith.constant 0 : index
    %c0_363 = arith.constant 0 : index
    %553 = vector.load %arg12[%c1_361, %c0_362, %c0_363] : memref<2x1x32xf32, #tpu.memory_space<vmem>>, vector<1x1x32xf32>
    %554 = vector.shape_cast %553 : vector<1x1x32xf32> to vector<1x32xf32>
    %cst_364 = arith.constant dense<0.000000e+00> : vector<17xf32>
    %555 = vector.multi_reduction <add>, %550, %cst_364 [1] : vector<17x32xf32> to vector<17xf32>
    %556 = vector.shape_cast %555 : vector<17xf32> to vector<17x1xf32>
    %cst_365 = arith.constant 3.200000e+01 : f32
    %557 = vector.broadcast %cst_365 : f32 to vector<17x1xf32>
    %558 = arith.divf %556, %557 : vector<17x1xf32>
    %559 = vector.broadcast %558 : vector<17x1xf32> to vector<17x32xf32>
    %560 = arith.subf %550, %559 : vector<17x32xf32>
    %561 = arith.mulf %560, %560 : vector<17x32xf32>
    %cst_366 = arith.constant dense<0.000000e+00> : vector<17xf32>
    %562 = vector.multi_reduction <add>, %561, %cst_366 [1] : vector<17x32xf32> to vector<17xf32>
    %563 = vector.shape_cast %562 : vector<17xf32> to vector<17x1xf32>
    %cst_367 = arith.constant 3.200000e+01 : f32
    %564 = vector.broadcast %cst_367 : f32 to vector<17x1xf32>
    %565 = arith.divf %563, %564 : vector<17x1xf32>
    %cst_368 = arith.constant 9.99999996E-13 : f32
    %566 = vector.broadcast %cst_368 : f32 to vector<17x1xf32>
    %567 = arith.addf %565, %566 : vector<17x1xf32>
    %568 = math.rsqrt %567 : vector<17x1xf32>
    %569 = vector.broadcast %568 : vector<17x1xf32> to vector<17x32xf32>
    %570 = arith.mulf %560, %569 : vector<17x32xf32>
    %571 = vector.broadcast %552 : vector<1x32xf32> to vector<17x32xf32>
    %572 = arith.mulf %570, %571 : vector<17x32xf32>
    %573 = vector.broadcast %554 : vector<1x32xf32> to vector<17x32xf32>
    %574 = arith.addf %572, %573 : vector<17x32xf32>
    %c1_369 = arith.constant 1 : index
    %c0_370 = arith.constant 0 : index
    %c0_371 = arith.constant 0 : index
    %575 = vector.load %arg13[%c1_369, %c0_370, %c0_371] : memref<2x32x64xf32, #tpu.memory_space<vmem>>, vector<1x32x64xf32>
    %576 = vector.shape_cast %575 : vector<1x32x64xf32> to vector<32x64xf32>
    %cst_372 = arith.constant dense<0.000000e+00> : vector<17x64xf32>
    %577 = tpu.matmul %574, %576, %cst_372 {dimension_numbers = #tpu.dot_dimension_numbers<[1], [0], [0], [1], [0, 0, 1, 1], [], []>} : vector<17x32xf32>, vector<32x64xf32>, vector<17x64xf32> -> vector<17x64xf32>
    %c1_373 = arith.constant 1 : index
    %c0_374 = arith.constant 0 : index
    %c0_375 = arith.constant 0 : index
    %578 = vector.load %arg14[%c1_373, %c0_374, %c0_375] : memref<2x1x64xf32, #tpu.memory_space<vmem>>, vector<1x1x64xf32>
    %579 = vector.shape_cast %578 : vector<1x1x64xf32> to vector<1x64xf32>
    %580 = vector.broadcast %579 : vector<1x64xf32> to vector<17x64xf32>
    %581 = arith.addf %577, %580 : vector<17x64xf32>
    %cst_376 = arith.constant 0.707106769 : f32
    %582 = vector.broadcast %cst_376 : f32 to vector<17x64xf32>
    %583 = arith.mulf %581, %582 : vector<17x64xf32>
    %584 = math.absf %583 : vector<17x64xf32>
    %cst_377 = arith.constant 0.327591091 : f32
    %585 = vector.broadcast %cst_377 : f32 to vector<17x64xf32>
    %586 = arith.mulf %585, %584 : vector<17x64xf32>
    %cst_378 = arith.constant 1.000000e+00 : f32
    %587 = vector.broadcast %cst_378 : f32 to vector<17x64xf32>
    %588 = arith.addf %587, %586 : vector<17x64xf32>
    %cst_379 = arith.constant 1.000000e+00 : f32
    %589 = vector.broadcast %cst_379 : f32 to vector<17x64xf32>
    %590 = arith.divf %589, %588 : vector<17x64xf32>
    %cst_380 = arith.constant 1.06140542 : f32
    %591 = vector.broadcast %cst_380 : f32 to vector<17x64xf32>
    %592 = arith.mulf %590, %591 : vector<17x64xf32>
    %cst_381 = arith.constant -1.45315206 : f32
    %593 = vector.broadcast %cst_381 : f32 to vector<17x64xf32>
    %594 = arith.addf %593, %592 : vector<17x64xf32>
    %595 = arith.mulf %590, %594 : vector<17x64xf32>
    %cst_382 = arith.constant 1.42141378 : f32
    %596 = vector.broadcast %cst_382 : f32 to vector<17x64xf32>
    %597 = arith.addf %596, %595 : vector<17x64xf32>
    %598 = arith.mulf %590, %597 : vector<17x64xf32>
    %cst_383 = arith.constant -0.284496725 : f32
    %599 = vector.broadcast %cst_383 : f32 to vector<17x64xf32>
    %600 = arith.addf %599, %598 : vector<17x64xf32>
    %601 = arith.mulf %590, %600 : vector<17x64xf32>
    %cst_384 = arith.constant 0.254829586 : f32
    %602 = vector.broadcast %cst_384 : f32 to vector<17x64xf32>
    %603 = arith.addf %602, %601 : vector<17x64xf32>
    %604 = arith.mulf %590, %603 : vector<17x64xf32>
    %cst_385 = arith.constant 0.000000e+00 : f32
    %605 = vector.broadcast %cst_385 : f32 to vector<17x64xf32>
    %606 = arith.subf %605, %584 : vector<17x64xf32>
    %607 = arith.mulf %606, %584 : vector<17x64xf32>
    %608 = math.exp %607 : vector<17x64xf32>
    %609 = arith.mulf %604, %608 : vector<17x64xf32>
    %cst_386 = arith.constant 1.000000e+00 : f32
    %610 = vector.broadcast %cst_386 : f32 to vector<17x64xf32>
    %611 = arith.subf %610, %609 : vector<17x64xf32>
    %cst_387 = arith.constant 5.000000e-01 : f32
    %612 = vector.broadcast %cst_387 : f32 to vector<17x64xf32>
    %613 = arith.mulf %612, %581 : vector<17x64xf32>
    %cst_388 = arith.constant 0.000000e+00 : f32
    %614 = vector.broadcast %cst_388 : f32 to vector<17x64xf32>
    %615 = arith.cmpf olt, %583, %614 : vector<17x64xf32>
    %cst_389 = arith.constant 0.000000e+00 : f32
    %616 = vector.broadcast %cst_389 : f32 to vector<17x64xf32>
    %617 = arith.subf %616, %611 : vector<17x64xf32>
    %618 = arith.select %615, %617, %611 : vector<17x64xi1>, vector<17x64xf32>
    %cst_390 = arith.constant 1.000000e+00 : f32
    %619 = vector.broadcast %cst_390 : f32 to vector<17x64xf32>
    %620 = arith.addf %619, %618 : vector<17x64xf32>
    %621 = arith.mulf %613, %620 : vector<17x64xf32>
    %c1_391 = arith.constant 1 : index
    %c0_392 = arith.constant 0 : index
    %c0_393 = arith.constant 0 : index
    %622 = vector.load %arg15[%c1_391, %c0_392, %c0_393] : memref<2x64x32xf32, #tpu.memory_space<vmem>>, vector<1x64x32xf32>
    %623 = vector.shape_cast %622 : vector<1x64x32xf32> to vector<64x32xf32>
    %cst_394 = arith.constant dense<0.000000e+00> : vector<17x32xf32>
    %624 = tpu.matmul %621, %623, %cst_394 {dimension_numbers = #tpu.dot_dimension_numbers<[1], [0], [0], [1], [0, 0, 1, 1], [], []>} : vector<17x64xf32>, vector<64x32xf32>, vector<17x32xf32> -> vector<17x32xf32>
    %c1_395 = arith.constant 1 : index
    %c0_396 = arith.constant 0 : index
    %c0_397 = arith.constant 0 : index
    %625 = vector.load %arg16[%c1_395, %c0_396, %c0_397] : memref<2x1x32xf32, #tpu.memory_space<vmem>>, vector<1x1x32xf32>
    %626 = vector.shape_cast %625 : vector<1x1x32xf32> to vector<1x32xf32>
    %627 = vector.broadcast %626 : vector<1x32xf32> to vector<17x32xf32>
    %628 = arith.addf %624, %627 : vector<17x32xf32>
    %629 = arith.addf %550, %628 : vector<17x32xf32>
    %c0_398 = arith.constant 0 : index
    %c0_399 = arith.constant 0 : index
    %c0_400 = arith.constant 0 : index
    %630 = vector.load %arg28[%c0_398, %c0_399, %c0_400] : memref<2x17x32xf32, #tpu.memory_space<vmem>>, vector<1x17x32xf32>
    %631 = vector.shape_cast %630 : vector<1x17x32xf32> to vector<17x32xf32>
    %632 = vector.shape_cast %629 : vector<17x32xf32> to vector<1x17x32xf32>
    tpu.vector_store %arg28[%c0_398, %c0_399, %c0_400], %632 {strides = array<i32>} : memref<2x17x32xf32, #tpu.memory_space<vmem>>, vector<1x17x32xf32>,
    %c1_401 = arith.constant 1 : index
    %c0_402 = arith.constant 0 : index
    %c0_403 = arith.constant 0 : index
    %633 = vector.load %arg28[%c1_401, %c0_402, %c0_403] : memref<2x17x32xf32, #tpu.memory_space<vmem>>, vector<1x17x32xf32>
    %634 = vector.shape_cast %633 : vector<1x17x32xf32> to vector<17x32xf32>
    %c1_404 = arith.constant 1 : index
    %c0_405 = arith.constant 0 : index
    %c0_406 = arith.constant 0 : index
    %635 = vector.load %arg5[%c1_404, %c0_405, %c0_406] : memref<2x1x32xf32, #tpu.memory_space<vmem>>, vector<1x1x32xf32>
    %636 = vector.shape_cast %635 : vector<1x1x32xf32> to vector<1x32xf32>
    %c1_407 = arith.constant 1 : index
    %c0_408 = arith.constant 0 : index
    %c0_409 = arith.constant 0 : index
    %637 = vector.load %arg6[%c1_407, %c0_408, %c0_409] : memref<2x1x32xf32, #tpu.memory_space<vmem>>, vector<1x1x32xf32>
    %638 = vector.shape_cast %637 : vector<1x1x32xf32> to vector<1x32xf32>
    %cst_410 = arith.constant dense<0.000000e+00> : vector<17xf32>
    %639 = vector.multi_reduction <add>, %634, %cst_410 [1] : vector<17x32xf32> to vector<17xf32>
    %640 = vector.shape_cast %639 : vector<17xf32> to vector<17x1xf32>
    %cst_411 = arith.constant 3.200000e+01 : f32
    %641 = vector.broadcast %cst_411 : f32 to vector<17x1xf32>
    %642 = arith.divf %640, %641 : vector<17x1xf32>
    %643 = vector.broadcast %642 : vector<17x1xf32> to vector<17x32xf32>
    %644 = arith.subf %634, %643 : vector<17x32xf32>
    %645 = arith.mulf %644, %644 : vector<17x32xf32>
    %cst_412 = arith.constant dense<0.000000e+00> : vector<17xf32>
    %646 = vector.multi_reduction <add>, %645, %cst_412 [1] : vector<17x32xf32> to vector<17xf32>
    %647 = vector.shape_cast %646 : vector<17xf32> to vector<17x1xf32>
    %cst_413 = arith.constant 3.200000e+01 : f32
    %648 = vector.broadcast %cst_413 : f32 to vector<17x1xf32>
    %649 = arith.divf %647, %648 : vector<17x1xf32>
    %cst_414 = arith.constant 9.99999996E-13 : f32
    %650 = vector.broadcast %cst_414 : f32 to vector<17x1xf32>
    %651 = arith.addf %649, %650 : vector<17x1xf32>
    %652 = math.rsqrt %651 : vector<17x1xf32>
    %653 = vector.broadcast %652 : vector<17x1xf32> to vector<17x32xf32>
    %654 = arith.mulf %644, %653 : vector<17x32xf32>
    %655 = vector.broadcast %636 : vector<1x32xf32> to vector<17x32xf32>
    %656 = arith.mulf %654, %655 : vector<17x32xf32>
    %657 = vector.broadcast %638 : vector<1x32xf32> to vector<17x32xf32>
    %658 = arith.addf %656, %657 : vector<17x32xf32>
    %c1_415 = arith.constant 1 : index
    %c0_416 = arith.constant 0 : index
    %c0_417 = arith.constant 0 : index
    %659 = vector.load %arg7[%c1_415, %c0_416, %c0_417] : memref<2x32x96xf32, #tpu.memory_space<vmem>>, vector<1x32x96xf32>
    %660 = vector.shape_cast %659 : vector<1x32x96xf32> to vector<32x96xf32>
    %cst_418 = arith.constant dense<0.000000e+00> : vector<17x96xf32>
    %661 = tpu.matmul %658, %660, %cst_418 {dimension_numbers = #tpu.dot_dimension_numbers<[1], [0], [0], [1], [0, 0, 1, 1], [], []>} : vector<17x32xf32>, vector<32x96xf32>, vector<17x96xf32> -> vector<17x96xf32>
    %c1_419 = arith.constant 1 : index
    %c0_420 = arith.constant 0 : index
    %c0_421 = arith.constant 0 : index
    %662 = vector.load %arg8[%c1_419, %c0_420, %c0_421] : memref<2x1x96xf32, #tpu.memory_space<vmem>>, vector<1x1x96xf32>
    %663 = vector.shape_cast %662 : vector<1x1x96xf32> to vector<1x96xf32>
    %664 = vector.broadcast %663 : vector<1x96xf32> to vector<17x96xf32>
    %665 = arith.addf %661, %664 : vector<17x96xf32>
    %c0_422 = arith.constant 0 : index
    %c0_423 = arith.constant 0 : index
    %666 = vector.load %arg29[%c0_422, %c0_423] : memref<17x96xf32, #tpu.memory_space<vmem>>, vector<17x96xf32>
    tpu.vector_store %arg29[%c0_422, %c0_423], %665 {strides = array<i32>} : memref<17x96xf32, #tpu.memory_space<vmem>>, vector<17x96xf32>,
    %c0_424 = arith.constant 0 : index
    %c0_425 = arith.constant 0 : index
    %667 = vector.load %arg29[%c0_424, %c0_425] : memref<17x96xf32, #tpu.memory_space<vmem>>, vector<17x8xf32>
    %c0_426 = arith.constant 0 : index
    %c32_427 = arith.constant 32 : index
    %668 = vector.load %arg29[%c0_426, %c32_427] : memref<17x96xf32, #tpu.memory_space<vmem>>, vector<17x8xf32>
    %c0_428 = arith.constant 0 : index
    %c64_429 = arith.constant 64 : index
    %669 = vector.load %arg29[%c0_428, %c64_429] : memref<17x96xf32, #tpu.memory_space<vmem>>, vector<17x8xf32>
    %670 = tpu.transpose %668, [1, 0] : vector<17x8xf32> -> vector<8x17xf32>
    %cst_430 = arith.constant dense<0.000000e+00> : vector<17x17xf32>
    %671 = tpu.matmul %667, %670, %cst_430 {dimension_numbers = #tpu.dot_dimension_numbers<[1], [0], [0], [1], [0, 0, 1, 1], [], []>} : vector<17x8xf32>, vector<8x17xf32>, vector<17x17xf32> -> vector<17x17xf32>
    %cst_431 = arith.constant 0.353553385 : f32
    %672 = vector.broadcast %cst_431 : f32 to vector<17x17xf32>
    %673 = arith.mulf %671, %672 : vector<17x17xf32>
    %cst_432 = arith.constant dense<0xFF800000> : vector<17xf32>
    %674 = vector.multi_reduction <maximumf>, %673, %cst_432 [1] : vector<17x17xf32> to vector<17xf32>
    %675 = vector.shape_cast %674 : vector<17xf32> to vector<17x1xf32>
    %676 = vector.broadcast %675 : vector<17x1xf32> to vector<17x17xf32>
    %677 = arith.subf %673, %676 : vector<17x17xf32>
    %678 = math.exp %677 : vector<17x17xf32>
    %cst_433 = arith.constant dense<0.000000e+00> : vector<17xf32>
    %679 = vector.multi_reduction <add>, %678, %cst_433 [1] : vector<17x17xf32> to vector<17xf32>
    %680 = vector.shape_cast %679 : vector<17xf32> to vector<17x1xf32>
    %681 = tpu.reciprocal %680 {approx = true} : vector<17x1xf32> -> vector<17x1xf32>
    %682 = vector.broadcast %681 : vector<17x1xf32> to vector<17x17xf32>
    %683 = arith.mulf %678, %682 : vector<17x17xf32>
    %cst_434 = arith.constant dense<0.000000e+00> : vector<17x8xf32>
    %684 = tpu.matmul %683, %669, %cst_434 {dimension_numbers = #tpu.dot_dimension_numbers<[1], [0], [0], [1], [0, 0, 1, 1], [], []>} : vector<17x17xf32>, vector<17x8xf32>, vector<17x8xf32> -> vector<17x8xf32>
    %c0_435 = arith.constant 0 : index
    %c0_436 = arith.constant 0 : index
    %685 = vector.load %arg30[%c0_435, %c0_436] : memref<17x32xf32, #tpu.memory_space<vmem>>, vector<17x8xf32>
    tpu.vector_store %arg30[%c0_435, %c0_436], %684 {strides = array<i32>} : memref<17x32xf32, #tpu.memory_space<vmem>>, vector<17x8xf32>,
    %c0_437 = arith.constant 0 : index
    %c8_438 = arith.constant 8 : index
    %686 = vector.load %arg29[%c0_437, %c8_438] : memref<17x96xf32, #tpu.memory_space<vmem>>, vector<17x8xf32>
    %c0_439 = arith.constant 0 : index
    %c40_440 = arith.constant 40 : index
    %687 = vector.load %arg29[%c0_439, %c40_440] : memref<17x96xf32, #tpu.memory_space<vmem>>, vector<17x8xf32>
    %c0_441 = arith.constant 0 : index
    %c72_442 = arith.constant 72 : index
    %688 = vector.load %arg29[%c0_441, %c72_442] : memref<17x96xf32, #tpu.memory_space<vmem>>, vector<17x8xf32>
    %689 = tpu.transpose %687, [1, 0] : vector<17x8xf32> -> vector<8x17xf32>
    %cst_443 = arith.constant dense<0.000000e+00> : vector<17x17xf32>
    %690 = tpu.matmul %686, %689, %cst_443 {dimension_numbers = #tpu.dot_dimension_numbers<[1], [0], [0], [1], [0, 0, 1, 1], [], []>} : vector<17x8xf32>, vector<8x17xf32>, vector<17x17xf32> -> vector<17x17xf32>
    %cst_444 = arith.constant 0.353553385 : f32
    %691 = vector.broadcast %cst_444 : f32 to vector<17x17xf32>
    %692 = arith.mulf %690, %691 : vector<17x17xf32>
    %cst_445 = arith.constant dense<0xFF800000> : vector<17xf32>
    %693 = vector.multi_reduction <maximumf>, %692, %cst_445 [1] : vector<17x17xf32> to vector<17xf32>
    %694 = vector.shape_cast %693 : vector<17xf32> to vector<17x1xf32>
    %695 = vector.broadcast %694 : vector<17x1xf32> to vector<17x17xf32>
    %696 = arith.subf %692, %695 : vector<17x17xf32>
    %697 = math.exp %696 : vector<17x17xf32>
    %cst_446 = arith.constant dense<0.000000e+00> : vector<17xf32>
    %698 = vector.multi_reduction <add>, %697, %cst_446 [1] : vector<17x17xf32> to vector<17xf32>
    %699 = vector.shape_cast %698 : vector<17xf32> to vector<17x1xf32>
    %700 = tpu.reciprocal %699 {approx = true} : vector<17x1xf32> -> vector<17x1xf32>
    %701 = vector.broadcast %700 : vector<17x1xf32> to vector<17x17xf32>
    %702 = arith.mulf %697, %701 : vector<17x17xf32>
    %cst_447 = arith.constant dense<0.000000e+00> : vector<17x8xf32>
    %703 = tpu.matmul %702, %688, %cst_447 {dimension_numbers = #tpu.dot_dimension_numbers<[1], [0], [0], [1], [0, 0, 1, 1], [], []>} : vector<17x17xf32>, vector<17x8xf32>, vector<17x8xf32> -> vector<17x8xf32>
    %c0_448 = arith.constant 0 : index
    %c8_449 = arith.constant 8 : index
    %704 = vector.load %arg30[%c0_448, %c8_449] : memref<17x32xf32, #tpu.memory_space<vmem>>, vector<17x8xf32>
    tpu.vector_store %arg30[%c0_448, %c8_449], %703 {strides = array<i32>} : memref<17x32xf32, #tpu.memory_space<vmem>>, vector<17x8xf32>,
    %c0_450 = arith.constant 0 : index
    %c16_451 = arith.constant 16 : index
    %705 = vector.load %arg29[%c0_450, %c16_451] : memref<17x96xf32, #tpu.memory_space<vmem>>, vector<17x8xf32>
    %c0_452 = arith.constant 0 : index
    %c48_453 = arith.constant 48 : index
    %706 = vector.load %arg29[%c0_452, %c48_453] : memref<17x96xf32, #tpu.memory_space<vmem>>, vector<17x8xf32>
    %c0_454 = arith.constant 0 : index
    %c80_455 = arith.constant 80 : index
    %707 = vector.load %arg29[%c0_454, %c80_455] : memref<17x96xf32, #tpu.memory_space<vmem>>, vector<17x8xf32>
    %708 = tpu.transpose %706, [1, 0] : vector<17x8xf32> -> vector<8x17xf32>
    %cst_456 = arith.constant dense<0.000000e+00> : vector<17x17xf32>
    %709 = tpu.matmul %705, %708, %cst_456 {dimension_numbers = #tpu.dot_dimension_numbers<[1], [0], [0], [1], [0, 0, 1, 1], [], []>} : vector<17x8xf32>, vector<8x17xf32>, vector<17x17xf32> -> vector<17x17xf32>
    %cst_457 = arith.constant 0.353553385 : f32
    %710 = vector.broadcast %cst_457 : f32 to vector<17x17xf32>
    %711 = arith.mulf %709, %710 : vector<17x17xf32>
    %cst_458 = arith.constant dense<0xFF800000> : vector<17xf32>
    %712 = vector.multi_reduction <maximumf>, %711, %cst_458 [1] : vector<17x17xf32> to vector<17xf32>
    %713 = vector.shape_cast %712 : vector<17xf32> to vector<17x1xf32>
    %714 = vector.broadcast %713 : vector<17x1xf32> to vector<17x17xf32>
    %715 = arith.subf %711, %714 : vector<17x17xf32>
    %716 = math.exp %715 : vector<17x17xf32>
    %cst_459 = arith.constant dense<0.000000e+00> : vector<17xf32>
    %717 = vector.multi_reduction <add>, %716, %cst_459 [1] : vector<17x17xf32> to vector<17xf32>
    %718 = vector.shape_cast %717 : vector<17xf32> to vector<17x1xf32>
    %719 = tpu.reciprocal %718 {approx = true} : vector<17x1xf32> -> vector<17x1xf32>
    %720 = vector.broadcast %719 : vector<17x1xf32> to vector<17x17xf32>
    %721 = arith.mulf %716, %720 : vector<17x17xf32>
    %cst_460 = arith.constant dense<0.000000e+00> : vector<17x8xf32>
    %722 = tpu.matmul %721, %707, %cst_460 {dimension_numbers = #tpu.dot_dimension_numbers<[1], [0], [0], [1], [0, 0, 1, 1], [], []>} : vector<17x17xf32>, vector<17x8xf32>, vector<17x8xf32> -> vector<17x8xf32>
    %c0_461 = arith.constant 0 : index
    %c16_462 = arith.constant 16 : index
    %723 = vector.load %arg30[%c0_461, %c16_462] : memref<17x32xf32, #tpu.memory_space<vmem>>, vector<17x8xf32>
    tpu.vector_store %arg30[%c0_461, %c16_462], %722 {strides = array<i32>} : memref<17x32xf32, #tpu.memory_space<vmem>>, vector<17x8xf32>,
    %c0_463 = arith.constant 0 : index
    %c24_464 = arith.constant 24 : index
    %724 = vector.load %arg29[%c0_463, %c24_464] : memref<17x96xf32, #tpu.memory_space<vmem>>, vector<17x8xf32>
    %c0_465 = arith.constant 0 : index
    %c56_466 = arith.constant 56 : index
    %725 = vector.load %arg29[%c0_465, %c56_466] : memref<17x96xf32, #tpu.memory_space<vmem>>, vector<17x8xf32>
    %c0_467 = arith.constant 0 : index
    %c88_468 = arith.constant 88 : index
    %726 = vector.load %arg29[%c0_467, %c88_468] : memref<17x96xf32, #tpu.memory_space<vmem>>, vector<17x8xf32>
    %727 = tpu.transpose %725, [1, 0] : vector<17x8xf32> -> vector<8x17xf32>
    %cst_469 = arith.constant dense<0.000000e+00> : vector<17x17xf32>
    %728 = tpu.matmul %724, %727, %cst_469 {dimension_numbers = #tpu.dot_dimension_numbers<[1], [0], [0], [1], [0, 0, 1, 1], [], []>} : vector<17x8xf32>, vector<8x17xf32>, vector<17x17xf32> -> vector<17x17xf32>
    %cst_470 = arith.constant 0.353553385 : f32
    %729 = vector.broadcast %cst_470 : f32 to vector<17x17xf32>
    %730 = arith.mulf %728, %729 : vector<17x17xf32>
    %cst_471 = arith.constant dense<0xFF800000> : vector<17xf32>
    %731 = vector.multi_reduction <maximumf>, %730, %cst_471 [1] : vector<17x17xf32> to vector<17xf32>
    %732 = vector.shape_cast %731 : vector<17xf32> to vector<17x1xf32>
    %733 = vector.broadcast %732 : vector<17x1xf32> to vector<17x17xf32>
    %734 = arith.subf %730, %733 : vector<17x17xf32>
    %735 = math.exp %734 : vector<17x17xf32>
    %cst_472 = arith.constant dense<0.000000e+00> : vector<17xf32>
    %736 = vector.multi_reduction <add>, %735, %cst_472 [1] : vector<17x17xf32> to vector<17xf32>
    %737 = vector.shape_cast %736 : vector<17xf32> to vector<17x1xf32>
    %738 = tpu.reciprocal %737 {approx = true} : vector<17x1xf32> -> vector<17x1xf32>
    %739 = vector.broadcast %738 : vector<17x1xf32> to vector<17x17xf32>
    %740 = arith.mulf %735, %739 : vector<17x17xf32>
    %cst_473 = arith.constant dense<0.000000e+00> : vector<17x8xf32>
    %741 = tpu.matmul %740, %726, %cst_473 {dimension_numbers = #tpu.dot_dimension_numbers<[1], [0], [0], [1], [0, 0, 1, 1], [], []>} : vector<17x17xf32>, vector<17x8xf32>, vector<17x8xf32> -> vector<17x8xf32>
    %c0_474 = arith.constant 0 : index
    %c24_475 = arith.constant 24 : index
    %742 = vector.load %arg30[%c0_474, %c24_475] : memref<17x32xf32, #tpu.memory_space<vmem>>, vector<17x8xf32>
    tpu.vector_store %arg30[%c0_474, %c24_475], %741 {strides = array<i32>} : memref<17x32xf32, #tpu.memory_space<vmem>>, vector<17x8xf32>,
    %c0_476 = arith.constant 0 : index
    %c0_477 = arith.constant 0 : index
    %743 = vector.load %arg30[%c0_476, %c0_477] : memref<17x32xf32, #tpu.memory_space<vmem>>, vector<17x32xf32>
    %c1_478 = arith.constant 1 : index
    %c0_479 = arith.constant 0 : index
    %c0_480 = arith.constant 0 : index
    %744 = vector.load %arg9[%c1_478, %c0_479, %c0_480] : memref<2x32x32xf32, #tpu.memory_space<vmem>>, vector<1x32x32xf32>
    %745 = vector.shape_cast %744 : vector<1x32x32xf32> to vector<32x32xf32>
    %cst_481 = arith.constant dense<0.000000e+00> : vector<17x32xf32>
    %746 = tpu.matmul %743, %745, %cst_481 {dimension_numbers = #tpu.dot_dimension_numbers<[1], [0], [0], [1], [0, 0, 1, 1], [], []>} : vector<17x32xf32>, vector<32x32xf32>, vector<17x32xf32> -> vector<17x32xf32>
    %c1_482 = arith.constant 1 : index
    %c0_483 = arith.constant 0 : index
    %c0_484 = arith.constant 0 : index
    %747 = vector.load %arg10[%c1_482, %c0_483, %c0_484] : memref<2x1x32xf32, #tpu.memory_space<vmem>>, vector<1x1x32xf32>
    %748 = vector.shape_cast %747 : vector<1x1x32xf32> to vector<1x32xf32>
    %749 = vector.broadcast %748 : vector<1x32xf32> to vector<17x32xf32>
    %750 = arith.addf %746, %749 : vector<17x32xf32>
    %751 = arith.addf %634, %750 : vector<17x32xf32>
    %c1_485 = arith.constant 1 : index
    %c0_486 = arith.constant 0 : index
    %c0_487 = arith.constant 0 : index
    %752 = vector.load %arg11[%c1_485, %c0_486, %c0_487] : memref<2x1x32xf32, #tpu.memory_space<vmem>>, vector<1x1x32xf32>
    %753 = vector.shape_cast %752 : vector<1x1x32xf32> to vector<1x32xf32>
    %c1_488 = arith.constant 1 : index
    %c0_489 = arith.constant 0 : index
    %c0_490 = arith.constant 0 : index
    %754 = vector.load %arg12[%c1_488, %c0_489, %c0_490] : memref<2x1x32xf32, #tpu.memory_space<vmem>>, vector<1x1x32xf32>
    %755 = vector.shape_cast %754 : vector<1x1x32xf32> to vector<1x32xf32>
    %cst_491 = arith.constant dense<0.000000e+00> : vector<17xf32>
    %756 = vector.multi_reduction <add>, %751, %cst_491 [1] : vector<17x32xf32> to vector<17xf32>
    %757 = vector.shape_cast %756 : vector<17xf32> to vector<17x1xf32>
    %cst_492 = arith.constant 3.200000e+01 : f32
    %758 = vector.broadcast %cst_492 : f32 to vector<17x1xf32>
    %759 = arith.divf %757, %758 : vector<17x1xf32>
    %760 = vector.broadcast %759 : vector<17x1xf32> to vector<17x32xf32>
    %761 = arith.subf %751, %760 : vector<17x32xf32>
    %762 = arith.mulf %761, %761 : vector<17x32xf32>
    %cst_493 = arith.constant dense<0.000000e+00> : vector<17xf32>
    %763 = vector.multi_reduction <add>, %762, %cst_493 [1] : vector<17x32xf32> to vector<17xf32>
    %764 = vector.shape_cast %763 : vector<17xf32> to vector<17x1xf32>
    %cst_494 = arith.constant 3.200000e+01 : f32
    %765 = vector.broadcast %cst_494 : f32 to vector<17x1xf32>
    %766 = arith.divf %764, %765 : vector<17x1xf32>
    %cst_495 = arith.constant 9.99999996E-13 : f32
    %767 = vector.broadcast %cst_495 : f32 to vector<17x1xf32>
    %768 = arith.addf %766, %767 : vector<17x1xf32>
    %769 = math.rsqrt %768 : vector<17x1xf32>
    %770 = vector.broadcast %769 : vector<17x1xf32> to vector<17x32xf32>
    %771 = arith.mulf %761, %770 : vector<17x32xf32>
    %772 = vector.broadcast %753 : vector<1x32xf32> to vector<17x32xf32>
    %773 = arith.mulf %771, %772 : vector<17x32xf32>
    %774 = vector.broadcast %755 : vector<1x32xf32> to vector<17x32xf32>
    %775 = arith.addf %773, %774 : vector<17x32xf32>
    %c1_496 = arith.constant 1 : index
    %c0_497 = arith.constant 0 : index
    %c0_498 = arith.constant 0 : index
    %776 = vector.load %arg13[%c1_496, %c0_497, %c0_498] : memref<2x32x64xf32, #tpu.memory_space<vmem>>, vector<1x32x64xf32>
    %777 = vector.shape_cast %776 : vector<1x32x64xf32> to vector<32x64xf32>
    %cst_499 = arith.constant dense<0.000000e+00> : vector<17x64xf32>
    %778 = tpu.matmul %775, %777, %cst_499 {dimension_numbers = #tpu.dot_dimension_numbers<[1], [0], [0], [1], [0, 0, 1, 1], [], []>} : vector<17x32xf32>, vector<32x64xf32>, vector<17x64xf32> -> vector<17x64xf32>
    %c1_500 = arith.constant 1 : index
    %c0_501 = arith.constant 0 : index
    %c0_502 = arith.constant 0 : index
    %779 = vector.load %arg14[%c1_500, %c0_501, %c0_502] : memref<2x1x64xf32, #tpu.memory_space<vmem>>, vector<1x1x64xf32>
    %780 = vector.shape_cast %779 : vector<1x1x64xf32> to vector<1x64xf32>
    %781 = vector.broadcast %780 : vector<1x64xf32> to vector<17x64xf32>
    %782 = arith.addf %778, %781 : vector<17x64xf32>
    %cst_503 = arith.constant 0.707106769 : f32
    %783 = vector.broadcast %cst_503 : f32 to vector<17x64xf32>
    %784 = arith.mulf %782, %783 : vector<17x64xf32>
    %785 = math.absf %784 : vector<17x64xf32>
    %cst_504 = arith.constant 0.327591091 : f32
    %786 = vector.broadcast %cst_504 : f32 to vector<17x64xf32>
    %787 = arith.mulf %786, %785 : vector<17x64xf32>
    %cst_505 = arith.constant 1.000000e+00 : f32
    %788 = vector.broadcast %cst_505 : f32 to vector<17x64xf32>
    %789 = arith.addf %788, %787 : vector<17x64xf32>
    %cst_506 = arith.constant 1.000000e+00 : f32
    %790 = vector.broadcast %cst_506 : f32 to vector<17x64xf32>
    %791 = arith.divf %790, %789 : vector<17x64xf32>
    %cst_507 = arith.constant 1.06140542 : f32
    %792 = vector.broadcast %cst_507 : f32 to vector<17x64xf32>
    %793 = arith.mulf %791, %792 : vector<17x64xf32>
    %cst_508 = arith.constant -1.45315206 : f32
    %794 = vector.broadcast %cst_508 : f32 to vector<17x64xf32>
    %795 = arith.addf %794, %793 : vector<17x64xf32>
    %796 = arith.mulf %791, %795 : vector<17x64xf32>
    %cst_509 = arith.constant 1.42141378 : f32
    %797 = vector.broadcast %cst_509 : f32 to vector<17x64xf32>
    %798 = arith.addf %797, %796 : vector<17x64xf32>
    %799 = arith.mulf %791, %798 : vector<17x64xf32>
    %cst_510 = arith.constant -0.284496725 : f32
    %800 = vector.broadcast %cst_510 : f32 to vector<17x64xf32>
    %801 = arith.addf %800, %799 : vector<17x64xf32>
    %802 = arith.mulf %791, %801 : vector<17x64xf32>
    %cst_511 = arith.constant 0.254829586 : f32
    %803 = vector.broadcast %cst_511 : f32 to vector<17x64xf32>
    %804 = arith.addf %803, %802 : vector<17x64xf32>
    %805 = arith.mulf %791, %804 : vector<17x64xf32>
    %cst_512 = arith.constant 0.000000e+00 : f32
    %806 = vector.broadcast %cst_512 : f32 to vector<17x64xf32>
    %807 = arith.subf %806, %785 : vector<17x64xf32>
    %808 = arith.mulf %807, %785 : vector<17x64xf32>
    %809 = math.exp %808 : vector<17x64xf32>
    %810 = arith.mulf %805, %809 : vector<17x64xf32>
    %cst_513 = arith.constant 1.000000e+00 : f32
    %811 = vector.broadcast %cst_513 : f32 to vector<17x64xf32>
    %812 = arith.subf %811, %810 : vector<17x64xf32>
    %cst_514 = arith.constant 5.000000e-01 : f32
    %813 = vector.broadcast %cst_514 : f32 to vector<17x64xf32>
    %814 = arith.mulf %813, %782 : vector<17x64xf32>
    %cst_515 = arith.constant 0.000000e+00 : f32
    %815 = vector.broadcast %cst_515 : f32 to vector<17x64xf32>
    %816 = arith.cmpf olt, %784, %815 : vector<17x64xf32>
    %cst_516 = arith.constant 0.000000e+00 : f32
    %817 = vector.broadcast %cst_516 : f32 to vector<17x64xf32>
    %818 = arith.subf %817, %812 : vector<17x64xf32>
    %819 = arith.select %816, %818, %812 : vector<17x64xi1>, vector<17x64xf32>
    %cst_517 = arith.constant 1.000000e+00 : f32
    %820 = vector.broadcast %cst_517 : f32 to vector<17x64xf32>
    %821 = arith.addf %820, %819 : vector<17x64xf32>
    %822 = arith.mulf %814, %821 : vector<17x64xf32>
    %c1_518 = arith.constant 1 : index
    %c0_519 = arith.constant 0 : index
    %c0_520 = arith.constant 0 : index
    %823 = vector.load %arg15[%c1_518, %c0_519, %c0_520] : memref<2x64x32xf32, #tpu.memory_space<vmem>>, vector<1x64x32xf32>
    %824 = vector.shape_cast %823 : vector<1x64x32xf32> to vector<64x32xf32>
    %cst_521 = arith.constant dense<0.000000e+00> : vector<17x32xf32>
    %825 = tpu.matmul %822, %824, %cst_521 {dimension_numbers = #tpu.dot_dimension_numbers<[1], [0], [0], [1], [0, 0, 1, 1], [], []>} : vector<17x64xf32>, vector<64x32xf32>, vector<17x32xf32> -> vector<17x32xf32>
    %c1_522 = arith.constant 1 : index
    %c0_523 = arith.constant 0 : index
    %c0_524 = arith.constant 0 : index
    %826 = vector.load %arg16[%c1_522, %c0_523, %c0_524] : memref<2x1x32xf32, #tpu.memory_space<vmem>>, vector<1x1x32xf32>
    %827 = vector.shape_cast %826 : vector<1x1x32xf32> to vector<1x32xf32>
    %828 = vector.broadcast %827 : vector<1x32xf32> to vector<17x32xf32>
    %829 = arith.addf %825, %828 : vector<17x32xf32>
    %830 = arith.addf %751, %829 : vector<17x32xf32>
    %c1_525 = arith.constant 1 : index
    %c0_526 = arith.constant 0 : index
    %c0_527 = arith.constant 0 : index
    %831 = vector.load %arg28[%c1_525, %c0_526, %c0_527] : memref<2x17x32xf32, #tpu.memory_space<vmem>>, vector<1x17x32xf32>
    %832 = vector.shape_cast %831 : vector<1x17x32xf32> to vector<17x32xf32>
    %833 = vector.shape_cast %830 : vector<17x32xf32> to vector<1x17x32xf32>
    tpu.vector_store %arg28[%c1_525, %c0_526, %c0_527], %833 {strides = array<i32>} : memref<2x17x32xf32, #tpu.memory_space<vmem>>, vector<1x17x32xf32>,
    %c0_528 = arith.constant 0 : index
    %c0_529 = arith.constant 0 : index
    %c0_530 = arith.constant 0 : index
    %834 = vector.load %arg28[%c0_528, %c0_529, %c0_530] : memref<2x17x32xf32, #tpu.memory_space<vmem>>, vector<1x17x32xf32>
    %835 = vector.shape_cast %834 : vector<1x17x32xf32> to vector<17x32xf32>
    %c0_531 = arith.constant 0 : index
    %c0_532 = arith.constant 0 : index
    %836 = vector.load %arg17[%c0_531, %c0_532] : memref<1x32xf32, #tpu.memory_space<vmem>>, vector<1x32xf32>
    %c0_533 = arith.constant 0 : index
    %c0_534 = arith.constant 0 : index
    %837 = vector.load %arg18[%c0_533, %c0_534] : memref<1x32xf32, #tpu.memory_space<vmem>>, vector<1x32xf32>
    %cst_535 = arith.constant dense<0.000000e+00> : vector<17xf32>
    %838 = vector.multi_reduction <add>, %835, %cst_535 [1] : vector<17x32xf32> to vector<17xf32>
    %839 = vector.shape_cast %838 : vector<17xf32> to vector<17x1xf32>
    %cst_536 = arith.constant 3.200000e+01 : f32
    %840 = vector.broadcast %cst_536 : f32 to vector<17x1xf32>
    %841 = arith.divf %839, %840 : vector<17x1xf32>
    %842 = vector.broadcast %841 : vector<17x1xf32> to vector<17x32xf32>
    %843 = arith.subf %835, %842 : vector<17x32xf32>
    %844 = arith.mulf %843, %843 : vector<17x32xf32>
    %cst_537 = arith.constant dense<0.000000e+00> : vector<17xf32>
    %845 = vector.multi_reduction <add>, %844, %cst_537 [1] : vector<17x32xf32> to vector<17xf32>
    %846 = vector.shape_cast %845 : vector<17xf32> to vector<17x1xf32>
    %cst_538 = arith.constant 3.200000e+01 : f32
    %847 = vector.broadcast %cst_538 : f32 to vector<17x1xf32>
    %848 = arith.divf %846, %847 : vector<17x1xf32>
    %cst_539 = arith.constant 9.99999996E-13 : f32
    %849 = vector.broadcast %cst_539 : f32 to vector<17x1xf32>
    %850 = arith.addf %848, %849 : vector<17x1xf32>
    %851 = math.rsqrt %850 : vector<17x1xf32>
    %852 = vector.broadcast %851 : vector<17x1xf32> to vector<17x32xf32>
    %853 = arith.mulf %843, %852 : vector<17x32xf32>
    %854 = vector.broadcast %836 : vector<1x32xf32> to vector<17x32xf32>
    %855 = arith.mulf %853, %854 : vector<17x32xf32>
    %856 = vector.broadcast %837 : vector<1x32xf32> to vector<17x32xf32>
    %857 = arith.addf %855, %856 : vector<17x32xf32>
    %c0_540 = arith.constant 0 : index
    %c0_541 = arith.constant 0 : index
    %c0_542 = arith.constant 0 : index
    %858 = vector.load %arg28[%c0_540, %c0_541, %c0_542] : memref<2x17x32xf32, #tpu.memory_space<vmem>>, vector<1x17x32xf32>
    %859 = vector.shape_cast %858 : vector<1x17x32xf32> to vector<17x32xf32>
    %860 = vector.shape_cast %857 : vector<17x32xf32> to vector<1x17x32xf32>
    tpu.vector_store %arg28[%c0_540, %c0_541, %c0_542], %860 {strides = array<i32>} : memref<2x17x32xf32, #tpu.memory_space<vmem>>, vector<1x17x32xf32>,
    %c1_543 = arith.constant 1 : index
    %c0_544 = arith.constant 0 : index
    %c0_545 = arith.constant 0 : index
    %861 = vector.load %arg28[%c1_543, %c0_544, %c0_545] : memref<2x17x32xf32, #tpu.memory_space<vmem>>, vector<1x17x32xf32>
    %862 = vector.shape_cast %861 : vector<1x17x32xf32> to vector<17x32xf32>
    %c0_546 = arith.constant 0 : index
    %c0_547 = arith.constant 0 : index
    %863 = vector.load %arg17[%c0_546, %c0_547] : memref<1x32xf32, #tpu.memory_space<vmem>>, vector<1x32xf32>
    %c0_548 = arith.constant 0 : index
    %c0_549 = arith.constant 0 : index
    %864 = vector.load %arg18[%c0_548, %c0_549] : memref<1x32xf32, #tpu.memory_space<vmem>>, vector<1x32xf32>
    %cst_550 = arith.constant dense<0.000000e+00> : vector<17xf32>
    %865 = vector.multi_reduction <add>, %862, %cst_550 [1] : vector<17x32xf32> to vector<17xf32>
    %866 = vector.shape_cast %865 : vector<17xf32> to vector<17x1xf32>
    %cst_551 = arith.constant 3.200000e+01 : f32
    %867 = vector.broadcast %cst_551 : f32 to vector<17x1xf32>
    %868 = arith.divf %866, %867 : vector<17x1xf32>
    %869 = vector.broadcast %868 : vector<17x1xf32> to vector<17x32xf32>
    %870 = arith.subf %862, %869 : vector<17x32xf32>
    %871 = arith.mulf %870, %870 : vector<17x32xf32>
    %cst_552 = arith.constant dense<0.000000e+00> : vector<17xf32>
    %872 = vector.multi_reduction <add>, %871, %cst_552 [1] : vector<17x32xf32> to vector<17xf32>
    %873 = vector.shape_cast %872 : vector<17xf32> to vector<17x1xf32>
    %cst_553 = arith.constant 3.200000e+01 : f32
    %874 = vector.broadcast %cst_553 : f32 to vector<17x1xf32>
    %875 = arith.divf %873, %874 : vector<17x1xf32>
    %cst_554 = arith.constant 9.99999996E-13 : f32
    %876 = vector.broadcast %cst_554 : f32 to vector<17x1xf32>
    %877 = arith.addf %875, %876 : vector<17x1xf32>
    %878 = math.rsqrt %877 : vector<17x1xf32>
    %879 = vector.broadcast %878 : vector<17x1xf32> to vector<17x32xf32>
    %880 = arith.mulf %870, %879 : vector<17x32xf32>
    %881 = vector.broadcast %863 : vector<1x32xf32> to vector<17x32xf32>
    %882 = arith.mulf %880, %881 : vector<17x32xf32>
    %883 = vector.broadcast %864 : vector<1x32xf32> to vector<17x32xf32>
    %884 = arith.addf %882, %883 : vector<17x32xf32>
    %c1_555 = arith.constant 1 : index
    %c0_556 = arith.constant 0 : index
    %c0_557 = arith.constant 0 : index
    %885 = vector.load %arg28[%c1_555, %c0_556, %c0_557] : memref<2x17x32xf32, #tpu.memory_space<vmem>>, vector<1x17x32xf32>
    %886 = vector.shape_cast %885 : vector<1x17x32xf32> to vector<17x32xf32>
    %887 = vector.shape_cast %884 : vector<17x32xf32> to vector<1x17x32xf32>
    tpu.vector_store %arg28[%c1_555, %c0_556, %c0_557], %887 {strides = array<i32>} : memref<2x17x32xf32, #tpu.memory_space<vmem>>, vector<1x17x32xf32>,
    %c0_558 = arith.constant 0 : index
    %c0_559 = arith.constant 0 : index
    %c0_560 = arith.constant 0 : index
    %888 = vector.load %arg28[%c0_558, %c0_559, %c0_560] : memref<2x17x32xf32, #tpu.memory_space<vmem>>, vector<1x16x16xf32>
    %889 = vector.shape_cast %888 : vector<1x16x16xf32> to vector<16x16xf32>
    %c0_561 = arith.constant 0 : index
    %c0_562 = arith.constant 0 : index
    %c16_563 = arith.constant 16 : index
    %890 = vector.load %arg28[%c0_561, %c0_562, %c16_563] : memref<2x17x32xf32, #tpu.memory_space<vmem>>, vector<1x16x16xf32>
    %891 = vector.shape_cast %890 : vector<1x16x16xf32> to vector<16x16xf32>
    %c0_564 = arith.constant 0 : index
    %c0_565 = arith.constant 0 : index
    %892 = vector.load %arg19[%c0_564, %c0_565] : memref<8x16xf32, #tpu.memory_space<vmem>>, vector<8x16xf32>
    %cst_566 = arith.constant dense<0.000000e+00> : vector<8x16xf32>
    %893 = tpu.matmul %892, %889, %cst_566 {dimension_numbers = #tpu.dot_dimension_numbers<[1], [0], [0], [1], [0, 0, 1, 1], [], []>} : vector<8x16xf32>, vector<16x16xf32>, vector<8x16xf32> -> vector<8x16xf32>
    %c0_567 = arith.constant 0 : index
    %c0_568 = arith.constant 0 : index
    %894 = vector.load %arg20[%c0_567, %c0_568] : memref<8x16xf32, #tpu.memory_space<vmem>>, vector<8x16xf32>
    %cst_569 = arith.constant dense<0.000000e+00> : vector<8x16xf32>
    %895 = tpu.matmul %894, %891, %cst_569 {dimension_numbers = #tpu.dot_dimension_numbers<[1], [0], [0], [1], [0, 0, 1, 1], [], []>} : vector<8x16xf32>, vector<16x16xf32>, vector<8x16xf32> -> vector<8x16xf32>
    %896 = arith.addf %893, %895 : vector<8x16xf32>
    %c0_570 = arith.constant 0 : index
    %c0_571 = arith.constant 0 : index
    %897 = vector.load %arg21[%c0_570, %c0_571] : memref<8x1xf32, #tpu.memory_space<vmem>>, vector<8x1xf32>
    %898 = vector.broadcast %897 : vector<8x1xf32> to vector<8x16xf32>
    %899 = arith.addf %896, %898 : vector<8x16xf32>
    %c1_572 = arith.constant 1 : index
    %c0_573 = arith.constant 0 : index
    %c0_574 = arith.constant 0 : index
    %900 = vector.load %arg28[%c1_572, %c0_573, %c0_574] : memref<2x17x32xf32, #tpu.memory_space<vmem>>, vector<1x16x16xf32>
    %901 = vector.shape_cast %900 : vector<1x16x16xf32> to vector<16x16xf32>
    %c1_575 = arith.constant 1 : index
    %c0_576 = arith.constant 0 : index
    %c16_577 = arith.constant 16 : index
    %902 = vector.load %arg28[%c1_575, %c0_576, %c16_577] : memref<2x17x32xf32, #tpu.memory_space<vmem>>, vector<1x16x16xf32>
    %903 = vector.shape_cast %902 : vector<1x16x16xf32> to vector<16x16xf32>
    %c0_578 = arith.constant 0 : index
    %c0_579 = arith.constant 0 : index
    %904 = vector.load %arg19[%c0_578, %c0_579] : memref<8x16xf32, #tpu.memory_space<vmem>>, vector<8x16xf32>
    %cst_580 = arith.constant dense<0.000000e+00> : vector<8x16xf32>
    %905 = tpu.matmul %904, %901, %cst_580 {dimension_numbers = #tpu.dot_dimension_numbers<[1], [0], [0], [1], [0, 0, 1, 1], [], []>} : vector<8x16xf32>, vector<16x16xf32>, vector<8x16xf32> -> vector<8x16xf32>
    %c0_581 = arith.constant 0 : index
    %c0_582 = arith.constant 0 : index
    %906 = vector.load %arg20[%c0_581, %c0_582] : memref<8x16xf32, #tpu.memory_space<vmem>>, vector<8x16xf32>
    %cst_583 = arith.constant dense<0.000000e+00> : vector<8x16xf32>
    %907 = tpu.matmul %906, %903, %cst_583 {dimension_numbers = #tpu.dot_dimension_numbers<[1], [0], [0], [1], [0, 0, 1, 1], [], []>} : vector<8x16xf32>, vector<16x16xf32>, vector<8x16xf32> -> vector<8x16xf32>
    %908 = arith.addf %905, %907 : vector<8x16xf32>
    %c0_584 = arith.constant 0 : index
    %c0_585 = arith.constant 0 : index
    %909 = vector.load %arg21[%c0_584, %c0_585] : memref<8x1xf32, #tpu.memory_space<vmem>>, vector<8x1xf32>
    %910 = vector.broadcast %909 : vector<8x1xf32> to vector<8x16xf32>
    %911 = arith.addf %908, %910 : vector<8x16xf32>
    %cst_586 = arith.constant 0.000000e+00 : f32
    %912 = vector.broadcast %cst_586 : f32 to vector<8x1xf32>
    %cst_587 = arith.constant dense<0.000000e+00> : vector<8xf32>
    %913 = vector.multi_reduction <add>, %899, %cst_587 [1] : vector<8x16xf32> to vector<8xf32>
    %914 = vector.shape_cast %913 : vector<8xf32> to vector<8x1xf32>
    %915 = arith.addf %912, %914 : vector<8x1xf32>
    %cst_588 = arith.constant dense<0.000000e+00> : vector<8xf32>
    %916 = vector.multi_reduction <add>, %911, %cst_588 [1] : vector<8x16xf32> to vector<8xf32>
    %917 = vector.shape_cast %916 : vector<8xf32> to vector<8x1xf32>
    %918 = arith.addf %915, %917 : vector<8x1xf32>
    %cst_589 = arith.constant 3.200000e+01 : f32
    %919 = vector.broadcast %cst_589 : f32 to vector<8x1xf32>
    %920 = arith.divf %918, %919 : vector<8x1xf32>
    %921 = vector.broadcast %920 : vector<8x1xf32> to vector<8x16xf32>
    %922 = arith.subf %899, %921 : vector<8x16xf32>
    %923 = vector.broadcast %920 : vector<8x1xf32> to vector<8x16xf32>
    %924 = arith.subf %911, %923 : vector<8x16xf32>
    %cst_590 = arith.constant 0.000000e+00 : f32
    %925 = vector.broadcast %cst_590 : f32 to vector<8x1xf32>
    %926 = arith.mulf %922, %922 : vector<8x16xf32>
    %cst_591 = arith.constant dense<0.000000e+00> : vector<8xf32>
    %927 = vector.multi_reduction <add>, %926, %cst_591 [1] : vector<8x16xf32> to vector<8xf32>
    %928 = vector.shape_cast %927 : vector<8xf32> to vector<8x1xf32>
    %929 = arith.addf %925, %928 : vector<8x1xf32>
    %930 = arith.mulf %924, %924 : vector<8x16xf32>
    %cst_592 = arith.constant dense<0.000000e+00> : vector<8xf32>
    %931 = vector.multi_reduction <add>, %930, %cst_592 [1] : vector<8x16xf32> to vector<8xf32>
    %932 = vector.shape_cast %931 : vector<8xf32> to vector<8x1xf32>
    %933 = arith.addf %929, %932 : vector<8x1xf32>
    %cst_593 = arith.constant 3.200000e+01 : f32
    %934 = vector.broadcast %cst_593 : f32 to vector<8x1xf32>
    %935 = arith.divf %933, %934 : vector<8x1xf32>
    %cst_594 = arith.constant 9.99999974E-6 : f32
    %936 = vector.broadcast %cst_594 : f32 to vector<8x1xf32>
    %937 = arith.addf %935, %936 : vector<8x1xf32>
    %938 = math.rsqrt %937 : vector<8x1xf32>
    %939 = vector.broadcast %938 : vector<8x1xf32> to vector<8x16xf32>
    %940 = arith.mulf %922, %939 : vector<8x16xf32>
    %c0_595 = arith.constant 0 : index
    %c0_596 = arith.constant 0 : index
    %941 = vector.load %arg22[%c0_595, %c0_596] : memref<8x1xf32, #tpu.memory_space<vmem>>, vector<8x1xf32>
    %942 = vector.broadcast %941 : vector<8x1xf32> to vector<8x16xf32>
    %943 = arith.mulf %940, %942 : vector<8x16xf32>
    %c0_597 = arith.constant 0 : index
    %c0_598 = arith.constant 0 : index
    %944 = vector.load %arg23[%c0_597, %c0_598] : memref<8x1xf32, #tpu.memory_space<vmem>>, vector<8x1xf32>
    %945 = vector.broadcast %944 : vector<8x1xf32> to vector<8x16xf32>
    %946 = arith.addf %943, %945 : vector<8x16xf32>
    %cst_599 = arith.constant 0.000000e+00 : f32
    %947 = vector.broadcast %cst_599 : f32 to vector<8x16xf32>
    %948 = arith.maximumf %946, %947 : vector<8x16xf32>
    %c0_600 = arith.constant 0 : index
    %c0_601 = arith.constant 0 : index
    %949 = vector.load %arg24[%c0_600, %c0_601] : memref<3x8xf32, #tpu.memory_space<vmem>>, vector<3x8xf32>
    %cst_602 = arith.constant dense<0.000000e+00> : vector<3x16xf32>
    %950 = tpu.matmul %949, %948, %cst_602 {dimension_numbers = #tpu.dot_dimension_numbers<[1], [0], [0], [1], [0, 0, 1, 1], [], []>} : vector<3x8xf32>, vector<8x16xf32>, vector<3x16xf32> -> vector<3x16xf32>
    %c0_603 = arith.constant 0 : index
    %c0_604 = arith.constant 0 : index
    %951 = vector.load %arg25[%c0_603, %c0_604] : memref<3x1xf32, #tpu.memory_space<vmem>>, vector<3x1xf32>
    %952 = vector.broadcast %951 : vector<3x1xf32> to vector<3x16xf32>
    %953 = arith.addf %950, %952 : vector<3x16xf32>
    %c0_605 = arith.constant 0 : index
    %c0_606 = arith.constant 0 : index
    %954 = vector.load %arg26[%c0_605, %c0_606] : memref<16x256xf32, #tpu.memory_space<vmem>>, vector<16x256xf32>
    %cst_607 = arith.constant dense<0.000000e+00> : vector<3x256xf32>
    %955 = tpu.matmul %953, %954, %cst_607 {dimension_numbers = #tpu.dot_dimension_numbers<[1], [0], [0], [1], [0, 0, 1, 1], [], []>} : vector<3x16xf32>, vector<16x256xf32>, vector<3x256xf32> -> vector<3x256xf32>
    %c0_608 = arith.constant 0 : index
    %c0_609 = arith.constant 0 : index
    %c0_610 = arith.constant 0 : index
    %956 = vector.load %arg27[%c0_608, %c0_609, %c0_610] : memref<2x3x256xf32, #tpu.memory_space<vmem>>, vector<1x3x256xf32>
    %957 = vector.shape_cast %956 : vector<1x3x256xf32> to vector<3x256xf32>
    %958 = vector.shape_cast %955 : vector<3x256xf32> to vector<1x3x256xf32>
    tpu.vector_store %arg27[%c0_608, %c0_609, %c0_610], %958 {strides = array<i32>} : memref<2x3x256xf32, #tpu.memory_space<vmem>>, vector<1x3x256xf32>,
    %959 = vector.broadcast %938 : vector<8x1xf32> to vector<8x16xf32>
    %960 = arith.mulf %924, %959 : vector<8x16xf32>
    %c0_611 = arith.constant 0 : index
    %c0_612 = arith.constant 0 : index
    %961 = vector.load %arg22[%c0_611, %c0_612] : memref<8x1xf32, #tpu.memory_space<vmem>>, vector<8x1xf32>
    %962 = vector.broadcast %961 : vector<8x1xf32> to vector<8x16xf32>
    %963 = arith.mulf %960, %962 : vector<8x16xf32>
    %c0_613 = arith.constant 0 : index
    %c0_614 = arith.constant 0 : index
    %964 = vector.load %arg23[%c0_613, %c0_614] : memref<8x1xf32, #tpu.memory_space<vmem>>, vector<8x1xf32>
    %965 = vector.broadcast %964 : vector<8x1xf32> to vector<8x16xf32>
    %966 = arith.addf %963, %965 : vector<8x16xf32>
    %cst_615 = arith.constant 0.000000e+00 : f32
    %967 = vector.broadcast %cst_615 : f32 to vector<8x16xf32>
    %968 = arith.maximumf %966, %967 : vector<8x16xf32>
    %c0_616 = arith.constant 0 : index
    %c0_617 = arith.constant 0 : index
    %969 = vector.load %arg24[%c0_616, %c0_617] : memref<3x8xf32, #tpu.memory_space<vmem>>, vector<3x8xf32>
    %cst_618 = arith.constant dense<0.000000e+00> : vector<3x16xf32>
    %970 = tpu.matmul %969, %968, %cst_618 {dimension_numbers = #tpu.dot_dimension_numbers<[1], [0], [0], [1], [0, 0, 1, 1], [], []>} : vector<3x8xf32>, vector<8x16xf32>, vector<3x16xf32> -> vector<3x16xf32>
    %c0_619 = arith.constant 0 : index
    %c0_620 = arith.constant 0 : index
    %971 = vector.load %arg25[%c0_619, %c0_620] : memref<3x1xf32, #tpu.memory_space<vmem>>, vector<3x1xf32>
    %972 = vector.broadcast %971 : vector<3x1xf32> to vector<3x16xf32>
    %973 = arith.addf %970, %972 : vector<3x16xf32>
    %c0_621 = arith.constant 0 : index
    %c0_622 = arith.constant 0 : index
    %974 = vector.load %arg26[%c0_621, %c0_622] : memref<16x256xf32, #tpu.memory_space<vmem>>, vector<16x256xf32>
    %cst_623 = arith.constant dense<0.000000e+00> : vector<3x256xf32>
    %975 = tpu.matmul %973, %974, %cst_623 {dimension_numbers = #tpu.dot_dimension_numbers<[1], [0], [0], [1], [0, 0, 1, 1], [], []>} : vector<3x16xf32>, vector<16x256xf32>, vector<3x256xf32> -> vector<3x256xf32>
    %c1_624 = arith.constant 1 : index
    %c0_625 = arith.constant 0 : index
    %c0_626 = arith.constant 0 : index
    %976 = vector.load %arg27[%c1_624, %c0_625, %c0_626] : memref<2x3x256xf32, #tpu.memory_space<vmem>>, vector<1x3x256xf32>
    %977 = vector.shape_cast %976 : vector<1x3x256xf32> to vector<3x256xf32>
    %978 = vector.shape_cast %975 : vector<3x256xf32> to vector<1x3x256xf32>
    tpu.vector_store %arg27[%c1_624, %c0_625, %c0_626], %978 {strides = array<i32>} : memref<2x3x256xf32, #tpu.memory_space<vmem>>, vector<1x3x256xf32>,
    return
  }
}

</mosaic_0001>

<bundles_post_ra>
// kernel: setr_forward.1
= control target key start
LH: loop header
LB: loop body
LE: loop exit
PB: predicated region body
PF: predicated region fallthrough
CT: control target
= control target key end

     0   :  { %vm101_vm0 = vcmask 392192   ;;  %vm184_vm1 = vcmask 253952   ;;  %vm190_vm2 = vcmask 261120   ;;  %v9584_v39 = vmov 0.0   ;;  %s12137_s1 = inlined_call_operand.vmem [shape: f32[48,32], index: 1, kind: input, shape index: {}]   ;;  %s12138_s0 = inlined_call_operand.vmem [shape: f32[32,48], index: 0, kind: input, shape index: {}]   ;;  %s12139_s3 = inlined_call_operand.vmem [shape: f32[1,32], index: 3, kind: input, shape index: {}]   ;;  %s12140_s2 = inlined_call_operand.vmem [shape: f32[1,32], index: 2, kind: input, shape index: {}]   ;;  %s12141_s4 = inlined_call_operand.vmem [shape: f32[16,32], index: 4, kind: input, shape index: {}]   ;;  %s12142_s7 = inlined_call_operand.vmem [shape: f32[2,32,96], index: 7, kind: input, shape index: {}]   ;;  %s12143_s5 = inlined_call_operand.vmem [shape: f32[2,1,32], index: 5, kind: input, shape index: {}]   ;;  %s12144_s6 = inlined_call_operand.vmem [shape: f32[2,1,32], index: 6, kind: input, shape index: {}]   ;;  %s12145_s8 = inlined_call_operand.vmem [shape: f32[2,1,96], index: 8, kind: input, shape index: {}]   ;;  %s12146_s9 = inlined_call_operand.vmem [shape: f32[2,32,32], index: 9, kind: input, shape index: {}]   ;;  %s12147_s10 = inlined_call_operand.vmem [shape: f32[2,1,32], index: 10, kind: input, shape index: {}]   ;;  %s12148_s13 = inlined_call_operand.vmem [shape: f32[2,32,64], index: 13, kind: input, shape index: {}]   ;;  %s12149_s11 = inlined_call_operand.vmem [shape: f32[2,1,32], index: 11, kind: input, shape index: {}]   ;;  %s12150_s12 = inlined_call_operand.vmem [shape: f32[2,1,32], index: 12, kind: input, shape index: {}]   ;;  %s12151_s15 = inlined_call_operand.vmem [shape: f32[2,64,32], index: 15, kind: input, shape index: {}]   ;;  %s12152_s14 = inlined_call_operand.vmem [shape: f32[2,1,64], index: 14, kind: input, shape index: {}]   ;;  %s12153_s16 = inlined_call_operand.vmem [shape: f32[2,1,32], index: 16, kind: input, shape index: {}]   ;;  %s12154_s17 = inlined_call_operand.vmem [shape: f32[1,32], index: 17, kind: input, shape index: {}]   ;;  %s12155_s18 = inlined_call_operand.vmem [shape: f32[1,32], index: 18, kind: input, shape index: {}]   ;;  %s12156_s20 = inlined_call_operand.vmem [shape: f32[8,16], index: 20, kind: input, shape index: {}]   ;;  %s12157_s21 = inlined_call_operand.vmem [shape: f32[8,1], index: 21, kind: input, shape index: {}]   ;;  %s12158_s19 = inlined_call_operand.vmem [shape: f32[8,16], index: 19, kind: input, shape index: {}]   ;;  %s12159_s22 = inlined_call_operand.vmem [shape: f32[8,1], index: 22, kind: input, shape index: {}]   ;;  %s12160_s23 = inlined_call_operand.vmem [shape: f32[8,1], index: 23, kind: input, shape index: {}]   ;;  %s12161_s25 = inlined_call_operand.vmem [shape: f32[3,1], index: 25, kind: input, shape index: {}]   ;;  %s12162_s24 = inlined_call_operand.vmem [shape: f32[3,8], index: 24, kind: input, shape index: {}]   ;;  %s12163_s26 = inlined_call_operand.vmem [shape: f32[16,256], index: 26, kind: input, shape index: {}]   ;;  %s12164_s27 = inlined_call_operand.vmem [shape: f32[2,3,256], index: 27, kind: output, shape index: {}]  }
   0x1   :  { %12216 = sst [smem:[#allocation5_spill]] %s12137_s1  ;;  %vm9585_vm3 = vmmov 0   ;;  %vm12203_vm4 = vcmask 785408   ;;  %vm12202_vm5 = vcmask 778240   ;;  %s12182_s1 = smov 56   ;;  %vm478_vm6 = vcmask 64512  }
   0x2   :  { %12217 = sst [smem:[#allocation6_spill]] %s12138_s0  ;;  %s12184_s0 = smov 104   ;;  %vm626_vm7 = vcmask 1040384   ;;  %vm574_vm8 = vcmask 138240   ;;  %vm581_vm9 = vcmask 131072   ;;  %vm711_vm10 = vcmask 57344  }
   0x3   :  { %12218 = sst [smem:[#allocation7_spill]] %s12139_s3  ;;  %s12192_s3 = smov 120   ;;  %vm970_vm11 = vcmask 130112   ;;  %vm1232_vm12 = vcmask 195712   ;;  %vm1494_vm13 = vcmask 261312   ;;  %vm973_vm14 = vcmask 122944  }
   0x4   :  { %12219 = sst [smem:[#allocation8_spill]] %s12140_s2  ;;  %vm12212_vm15 = vcmask 188544  }
   0x5   :  { %12220 = sst [smem:[#allocation9_spill]] %s12141_s4 }
   0x6   :  { %12221 = sst [smem:[#allocation10_spill]] %s12142_s7  ;;  %s12186_s7 = smov 72  }
   0x7   :  { %12222 = sst [smem:[#allocation11_spill]] %s12143_s5  ;;  %s12200_s5 = smov 8  }
   0x8   :  { %12223 = sst [smem:[#allocation12_spill]] %s12144_s6  ;;  %s12190_s6 = smov 80  }
   0x9   :  { %12224 = sst [smem:[#allocation13_spill]] %s12145_s8 }
   0xa   :  { %12225 = sst [smem:[#allocation14_spill]] %s12146_s9  ;;  %s12188_s9 = smov 112  }
   0xb   :  { %12226 = sst [smem:[#allocation15_spill]] %s12147_s10 }
   0xc   :  { %12227 = sst [smem:[#allocation16_spill]] %s12148_s13 }
   0xd   :  { %12228 = sst [smem:[#allocation17_spill]] %s12154_s17  ;;  %s12269_s17 = smov 40  }
   0xe   :  { %12229 = sst [smem:[#allocation18_spill]] %s12155_s18 }
   0xf   :  { %12230 = sst [smem:[#allocation19_spill]] %s12156_s20 }
  0x10   :  { %12231 = sst [smem:[#allocation20_spill]] %s12157_s21 }
  0x11   :  { %12232 = sst [smem:[#allocation21_spill]] %s12158_s19  ;;  %s12263_s19 = smov 24  }
  0x12   :  { %12233 = sst [smem:[#allocation22_spill]] %s12159_s22  ;;  %s12268_s22 = smov 96  }
  0x13   :  { %12234 = sst [smem:[#allocation23_spill]] %s12160_s23 }
  0x14   :  { %12235 = sst [smem:[#allocation24_spill]] %s12161_s25  ;;  %s12262_s25 = smov 16  }
  0x15   :  { %12236 = sst [smem:[#allocation25_spill]] %s12162_s24  ;;  %s12261_s24 = smov 8  }
  0x16   :  { %12237 = sst [smem:[#allocation26_spill]] %s12163_s26  ;;  %s12259_s26 = smov 48  }
  0x17   :  { %12238 = sst [smem:[#allocation27_spill]] %s12164_s27  ;;  %s12260_s27 = smov 40  }
  0x18   :  { %s12239_s8 = sld [smem:[#allocation5_spill]] }
  0x19   :  { %s12240_s29 = sld [smem:[#allocation6_spill]] }
  0x1a   :  { %s12242_s10 = sld [smem:[#allocation8_spill]] }
  0x1b   :  { %s12243_s13 = sld [smem:[#allocation9_spill]] }
  0x1c   :  { %s12244_s30 = sld [smem:[#allocation10_spill]] }
  0x1d   :  { %s12245_s2 = sld [smem:[#allocation11_spill]] }
  0x1e   :  { %v93_v0 = vld [vmem:[%s12239_s8 + $0x28] sm:$0xff]  ;;  %v92_v1 = vld [vmem:[%s12239_s8 + $0x20] sm:$0xff]  ;;  %v91_v2 = vld [vmem:[%s12239_s8 + $0x18] sm:$0xff]  ;;  %s12246_s4 = sld [smem:[#allocation12_spill]] }
  0x1f   :  { %8398 = vmatprep.subr.mxu0 %v93_v0  ;;  %8413 = vmatprep.subr.mxu1 %v93_v0  ;;  %v86_v3 = vld [vmem:[%s12240_s29] sm:$0xff]  ;;  %v90_v4 = vld [vmem:[%s12239_s8 + $0x10] sm:$0xff]  ;;  %v89_v5 = vld [vmem:[%s12239_s8 + $0x8] sm:$0xff]  ;;  %s12247_s28 = sld [smem:[#allocation13_spill]] }
  0x20   :  { %8399 = vmatpush3.msra.mxu0 %v93_v0  ;;  %8414 = vmatpush3.msra.mxu1 %v93_v0  ;;  %v88_v6 = vld [vmem:[%s12239_s8] sm:$0xff]  ;;  %v87_v7 = vld [vmem:[%s12240_s29 + $0x8] sm:$0xff]  ;;  %s12241_s8 = sld [smem:[#allocation7_spill]] }
  0x21   :  { %8400 = vmatprep.subr.mxu0 %v92_v1  ;;  %8410 = vmatprep.mubr.msk.f32.mxu0 %vm101_vm0, %v86_v3  ;;  %v9774_v9 = vld [vmem:[%s12242_s10] ss:$0 sm:$0xff]  ;;  %v9779_v11 = vld [vmem:[%s12243_s13 + $0x8] sm:$0xff]  ;;  %s12176_s10 = smov 64   ;;  %s12280_s21 = sld [smem:[#allocation17_spill]] }
  0x22   :  { %8401 = vmatpush3.msra.mxu0 %v92_v1  ;;  %8415 = vmatprep.subr.mxu1 %v92_v1  ;;  %v9785_v14 = vld [vmem:[%s12243_s13] sm:$0xff]  ;;  %v364_v40 = vld [vmem:[%s12244_s30 + $0x18] sm:$0xff]  ;;  %v363_v41 = vld [vmem:[%s12244_s30 + $0x10] sm:$0xff]  ;;  %s12194_s13 = smov 88   ;;  %s12288_s20 = sld [smem:[#allocation25_spill]] }
  0x23   :  { %8402 = vmatprep.subr.mxu0 %v91_v2  ;;  %8416 = vmatpush3.msra.mxu1 %v92_v1  ;;  %v362_v42 = vld [vmem:[%s12244_s30 + $0x8] sm:$0xff]  ;;  %v361_v43 = vld [vmem:[%s12244_s30] sm:$0xff] }
  0x24   :  { %8403 = vmatpush3.msra.mxu0 %v91_v2  ;;  %8417 = vmatprep.subr.mxu1 %v91_v2  ;;  %v7737_v54 = vld [vmem:[%s12245_s2] ss:$0 sm:$0xff] }
  0x25   :  { %8404 = vmatprep.subr.mxu0 %v90_v4  ;;  %8418 = vmatpush3.msra.mxu1 %v91_v2  ;;  %v7738_v56 = vld [vmem:[%s12246_s4] ss:$0 sm:$0xff] }
  0x26   :  { %8405 = vmatpush3.msra.mxu0 %v90_v4  ;;  %8419 = vmatprep.subr.mxu1 %v90_v4  ;;  %v183_v8 = vld [vmem:[%s12241_s8] sm:$0x1] }
  0x27   :  { %8406 = vmatprep.subr.mxu0 %v89_v5  ;;  %8420 = vmatpush3.msra.mxu1 %v90_v4  ;;  %185 = vst.msk [vmem:[#allocation2] sm:$0x1] %vm184_vm1, %v183_v8  ;;  %v7739_v3 = vld [vmem:[%s12247_s28] ss:$0 sm:$0xff]  ;;  %v194_v8 = vld [vmem:[%s12240_s29 + $0x18] sm:$0xff] }
  0x28   :  { %8407 = vmatpush3.msra.mxu0 %v89_v5  ;;  %8421 = vmatprep.subr.mxu1 %v89_v5 }
  0x29   :  { %8408 = vmatprep.subr.mxu0 %v88_v6  ;;  %8422 = vmatpush3.msra.mxu1 %v89_v5 }
  0x2a   :  { %8409 = vmatpush3.msra.mxu0 %v88_v6  ;;  %8423 = vmatprep.subr.mxu1 %v88_v6 }
  0x2b   :  { %8411 = vmatmul.mubr.msk.f32.vlgmr.msra.gmra.mxu0 %vm101_vm0, %v87_v7  ;;  %8424 = vmatpush3.msra.mxu1 %v88_v6  ;;  %v193_v7 = vld [vmem:[%s12240_s29 + $0x10] sm:$0xff]  ;;  %s12205_s29 = smov 96  }
  0x2c   :  { %8428 = vmatprep.subr.mxu0 %v9584_v39  ;;  %8436 = vmatprep.mubr.msk.f32.mxu0 %vm9585_vm3, %v9584_v39 }
  0x2d   :  { %8429 = vmatpush3.msra.mxu0 %v364_v40  ;;  %8445 = vmatprep.subr.mxu1 %v9584_v39 }
  0x2e   :  { %8430 = vmatprep.subr.mxu0 %v9584_v39  ;;  %8425 = vmatprep.mubr.msk.f32.mxu1 %vm101_vm0, %v193_v7 }
  0x2f   :  { %8431 = vmatpush3.msra.mxu0 %v363_v41  ;;  %8426 = vmatmul.mubr.msk.f32.vlgmr.msra.gmra.mxu1 %vm101_vm0, %v194_v8  ;;  %vm12204_vm0 = vcmask 254144  }
  0x30   :  { %8432 = vmatprep.subr.mxu0 %v9584_v39  ;;  %8451 = vmatprep.mubr.msk.f32.mxu1 %vm9585_vm3, %v9584_v39 }
  0x31   :  { %8433 = vmatpush3.msra.mxu0 %v362_v42 }
  0x32   :  { %8434 = vmatprep.subr.mxu0 %v9584_v39 }
  0x33   :  { %8435 = vmatpush3.msra.mxu0 %v361_v43 }
  0x34   :  { %8460 = vmatprep.subr.mxu0 %v9584_v39 }
  0xeb   :  { %v8412_v10 = vpop.f32.mrf.mxu0 }
  0xec   :  { %v180_v12 = vadd.f32 %v8412_v10, %v9774_v9 }
  0xed   :  { %v174_v13 = vpop.f32.mrf.mxu0 }
  0xee   :  { %v189_v15 = vadd.f32 %v9779_v11, %v180_v12  ;;  %v175_v16 = vadd.f32 %v9774_v9, %v174_v13 }
  0xf0   :  { %192 = vst.msk [vmem:[#allocation2 + $0x9] sm:$0xff] %vm190_vm2, %v189_v15  ;;  %v188_v17 = vadd.f32 %v9785_v14, %v175_v16 }
  0xf2   :  { %191 = vst.msk [vmem:[#allocation2 + $0x1] sm:$0xff] %vm190_vm2, %v188_v17 }
  0xf7   :  { %v300_v18 = vld [vmem:[#allocation2 + $0x10] sm:$0x1] }
  0xf8   :  { %v309_v19 = vsel %vm184_vm1, %v300_v18, 0.0 }
  0xf9   :  { %310 = vadd.xlane.f32.xlu1 %v309_v19  ;;  %v298_v20 = vld [vmem:[#allocation2] sm:$0xff]  ;;  %v299_v22 = vld [vmem:[#allocation2 + $0x8] sm:$0xff] }
  0xfa   :  { %v303_v21 = vsel %vm190_vm2, %v298_v20, 0.0  ;;  %v306_v23 = vsel %vm190_vm2, %v299_v22, 0.0 }
  0xfb   :  { %304 = vadd.xlane.f32.xlu0 %v303_v21 }
  0xff   :  { %307 = vadd.xlane.f32.xlu0 %v306_v23 }
 0x182   :  { %v311_v24 = vpop.xlane.xlu1 %310 }
 0x183   :  { %v315_v25 = vmul.f32 0.03125, %v311_v24 }
 0x184   :  { %v305_v26 = vpop.xlane.xlu0 %304 }
 0x185   :  { %v313_v27 = vmul.f32 0.03125, %v305_v26  ;;  %v318_v28 = vsub.f32 %v300_v18, %v315_v25 }
 0x187   :  { %v316_v29 = vsub.f32 %v298_v20, %v313_v27  ;;  %v321_v35 = vmul.f32 %v318_v28, %v318_v28 }
 0x188   :  { %v308_v30 = vpop.xlane.xlu0 %307 }
 0x189   :  { %v314_v31 = vmul.f32 0.03125, %v308_v30  ;;  %v319_v32 = vmul.f32 %v316_v29, %v316_v29  ;;  %v328_v37 = vsel %vm184_vm1, %v321_v35, 0.0 }
 0x18b   :  { %v317_v33 = vsub.f32 %v299_v22, %v314_v31  ;;  %v322_v34 = vsel %vm190_vm2, %v319_v32, 0.0 }
 0x18c   :  { %323 = vadd.xlane.f32.xlu1 %v322_v34 }
 0x18d   :  { %v320_v36 = vmul.f32 %v317_v33, %v317_v33 }
 0x18f   :  { %v325_v38 = vsel %vm190_vm2, %v320_v36, 0.0 }
 0x190   :  { %329 = vadd.xlane.f32.xlu1 %v328_v37  ;;  %326 = vadd.xlane.f32.xlu0 %v325_v38 }
 0x215   :  { %v324_v44 = vpop.xlane.xlu1 %323 }
 0x216   :  { %v331_v45 = vmul.f32 0.03125, %v324_v44 }
 0x218   :  { %v334_v46 = vadd.f32 1e-12, %v331_v45 }
 0x219   :  { %v330_v47 = vpop.xlane.xlu1 %329  ;;  %v327_v48 = vpop.xlane.xlu0 %326 }
 0x21a   :  { %9269 = vrsqrt.f32 %v334_v46  ;;  %v333_v49 = vmul.f32 0.03125, %v330_v47  ;;  %v332_v50 = vmul.f32 0.03125, %v327_v48 }
 0x21c   :  { %v336_v51 = vadd.f32 1e-12, %v333_v49  ;;  %v335_v52 = vadd.f32 1e-12, %v332_v50  ;;  %v8427_v49 = vpop.f32.mrf.mxu1 }
 0x21d   :  { %v286_v50 = vadd.f32 %v8427_v49, %v9774_v9 }
 0x21e   :  { %9271 = vrsqrt.f32 %v336_v51  ;;  %v280_v51 = vpop.f32.mrf.mxu1 }
 0x21f   :  { %9273 = vrsqrt.f32 %v335_v52  ;;  %v295_v52 = vadd.f32 %v286_v50, %v9779_v11 }
 0x221   :  { %297 = vst.msk [vmem:[#allocation2 + $0x21] sm:$0xff] %vm190_vm2, %v295_v52 }
 0x227   :  { %v9270_v53 = vpop.eup %9269 }
 0x228   :  { %v340_v55 = vmul.f32 %v9270_v53, %v316_v29  ;;  %v281_v53 = vadd.f32 %v9774_v9, %v280_v51 }
 0x22a   :  { %v349_v57 = vmul.f32 %v7737_v54, %v340_v55  ;;  %v289_v55 = vld [vmem:[%s12241_s8] sm:$0x1]  ;;  %s12180_s8 = smov 48  }
 0x22b   :  { %v9272_v58 = vpop.eup %9271  ;;  %291 = vst.msk [vmem:[#allocation2 + $0x18] sm:$0x1] %vm184_vm1, %v289_v55 }
 0x22c   :  { %v9274_v59 = vpop.eup %9273  ;;  %v358_v60 = vadd.f32 %v7738_v56, %v349_v57  ;;  %v342_v62 = vmul.f32 %v9272_v58, %v318_v28 }
 0x22d   :  { %v341_v61 = vmul.f32 %v9274_v59, %v317_v33 }
 0x22e   :  { %8437 = vmatmul.mubr.msk.f32.vlgmr.msra.gmra.mxu0 %vm190_vm2, %v358_v60  ;;  %v351_v1 = vmul.f32 %v7737_v54, %v342_v62 }
 0x22f   :  { %8439 = vmatprep.mubr.msk.f32.mxu0 %vm9585_vm3, %v9584_v39  ;;  %v350_v63 = vmul.f32 %v7737_v54, %v341_v61  ;;  %v294_v54 = vadd.f32 %v281_v53, %v9785_v14 }
 0x230   :  { %v360_v2 = vadd.f32 %v7738_v56, %v351_v1 }
 0x231   :  { %v359_v0 = vadd.f32 %v7738_v56, %v350_v63  ;;  %296 = vst.msk [vmem:[#allocation2 + $0x19] sm:$0xff] %vm190_vm2, %v294_v54 }
 0x233   :  { %8440 = vmatmul.mubr.msk.f32.gmra.mxu0 %vm190_vm2, %v359_v0 }
 0x234   :  { %8442 = vmatprep.mubr.msk.f32.mxu0 %vm9585_vm3, %v9584_v39 }
 0x237   :  { %8443 = vmatmul.mubr.msk.f32.gmra.mxu0 %vm190_vm2, %v360_v2 }
 0x238   :  { %8466 = vmatprep.mubr.msk.f32.mxu0 %vm9585_vm3, %v9584_v39 }
 0x2ee   :  { %v447_v4 = vpop.f32.mrf.mxu0 }
 0x2ef   :  { %v448_v5 = vadd.f32 %v7739_v3, %v447_v4 }
 0x2f0   :  { %v8438_v6 = vpop.f32.mrf.mxu0 }
 0x2f1   :  { %462 = vst.msk [vmem:[#allocation3] sm:$0xff] %vm12203_vm4, %v448_v5 }
 0x2f3   :  { %v452_v10 = vpop.f32.mrf.mxu0 }
 0x2f4   :  { %v453_v12 = vadd.f32 %v7739_v3, %v452_v10 }
 0x2f5   :  { %v8441_v13 = vpop.f32.mrf.mxu0 }
 0x2f6   :  { %463 = vst.msk [vmem:[#allocation3 + $0x8] sm:$0xff] %vm12203_vm4, %v453_v12 }
 0x2f7   :  { %v457_v15 = vpop.f32.mrf.mxu0 }
 0x2f8   :  { %v458_v16 = vadd.f32 %v7739_v3, %v457_v15  ;;  %v9853_v19 = vld [vmem:[#allocation3] sm:$0xff] }
 0x2f9   :  { %v8444_v17 = vpop.f32.mrf.mxu0 }
 0x2fa   :  { %465 = vst.msk [vmem:[#allocation3 + $0x10] sm:$0x1] %vm12202_vm5, %v458_v16 }
 0x2fd   :  { %v9849_v18 = vld [vmem:[#allocation3 + $0x8] sm:$0xff] }
 0x2fe   :  { %474 = vrot.lane.b32.xlu1 %v9849_v18, %s12205_s29 }
 0x301   :  { %v9855_v20 = vld [vmem:[#allocation3 + $0x10] sm:$0x1] }
 0x302   :  { %472 = vrot.lane.b32.xlu1 %v9853_v19, %s12205_s29  ;;  %476 = vrot.lane.b32.xlu0 %v9855_v20, %s12205_s29  ;;  %v715_v21 = vld [vmem:[#allocation3 + $0x10] sm:$0x1] }
 0x303   :  { %v9868_v22 = vld [vmem:[#allocation3 + $0x10] sm:$0x1] }
 0x304   :  { %v9881_v23 = vld [vmem:[#allocation3 + $0x10] sm:$0x1] }
 0x306   :  { %729 = vrot.lane.b32.xlu1 %v715_v21, %s12194_s13  ;;  %727 = vrot.lane.b32.xlu0 %v9849_v18, %s12194_s13 }
 0x30a   :  { %725 = vrot.lane.b32.xlu1 %v9853_v19, %s12194_s13  ;;  %719 = vrot.lane.b32.xlu0 %v9853_v19, %s12192_s3  ;;  %s12254_s13 = smov 112  }
 0x30e   :  { %991 = vrot.lane.b32.xlu1 %v9868_v22, %s12190_s6  ;;  %721 = vrot.lane.b32.xlu0 %v9849_v18, %s12192_s3 }
 0x312   :  { %989 = vrot.lane.b32.xlu1 %v9849_v18, %s12190_s6  ;;  %723 = vrot.lane.b32.xlu0 %v715_v21, %s12192_s3  ;;  %s12196_s3 = smov 24  }
 0x316   :  { %987 = vrot.lane.b32.xlu1 %v9853_v19, %s12190_s6  ;;  %981 = vrot.lane.b32.xlu0 %v9853_v19, %s12188_s9  ;;  %s12255_s6 = smov 72  }
 0x31a   :  { %1253 = vrot.lane.b32.xlu1 %v9881_v23, %s12186_s7  ;;  %983 = vrot.lane.b32.xlu0 %v9849_v18, %s12188_s9 }
 0x31e   :  { %1251 = vrot.lane.b32.xlu1 %v9849_v18, %s12186_s7  ;;  %985 = vrot.lane.b32.xlu0 %v9868_v22, %s12188_s9  ;;  %s12249_s9 = sld [smem:[#allocation15_spill]] }
 0x322   :  { %1249 = vrot.lane.b32.xlu1 %v9853_v19, %s12186_s7  ;;  %1243 = vrot.lane.b32.xlu0 %v9853_v19, %s12184_s0  ;;  %s12256_s7 = smov 104  }
 0x326   :  { %1245 = vrot.lane.b32.xlu1 %v9849_v18, %s12184_s0  ;;  %1247 = vrot.lane.b32.xlu0 %v9881_v23, %s12184_s0  ;;  %s12248_s0 = sld [smem:[#allocation14_spill]] }
 0x32a   :  { %609 = vrot.lane.b32.xlu1 %v9853_v19, %s12176_s10  ;;  %611 = vrot.lane.b32.xlu0 %v9849_v18, %s12176_s10 }
 0x32e   :  { %613 = vrot.lane.b32.xlu1 %v9855_v20, %s12176_s10  ;;  %s12178_s10 = smov 40  }
 0x332   :  { %863 = vrot.lane.b32.xlu1 %v715_v21, %s12182_s1 }
 0x370   :  { %v475_v24 = vpop.permute.xlu1 %474 }
 0x374   :  { %v473_v25 = vpop.permute.xlu1 %472  ;;  %v477_v26 = vpop.permute.xlu0 %476 }
 0x375   :  { %8446 = vmatpush3.xpose.msk.msra.mxu1 %vm478_vm6, %v477_v26 }
 0x376   :  { %8447 = vmatprep.subr.mxu1 %v9584_v39 }
 0x378   :  { %v730_v27 = vpop.permute.xlu1 %729  ;;  %v728_v28 = vpop.permute.xlu0 %727 }
 0x379   :  { %8448 = vmatpush3.xpose.msk.msra.mxu1 %vm478_vm6, %v475_v24 }
 0x37a   :  { %8449 = vmatprep.subr.mxu1 %v9584_v39 }
 0x37c   :  { %v726_v29 = vpop.permute.xlu1 %725  ;;  %v720_v30 = vpop.permute.xlu0 %719 }
 0x37d   :  { %8450 = vmatpush3.xpose.msk.msra.mxu1 %vm478_vm6, %v473_v25 }
 0x37e   :  { %8475 = vmatprep.subr.mxu1 %v9584_v39 }
 0x380   :  { %v992_v31 = vpop.permute.xlu1 %991  ;;  %8452 = vmatmul.mubr.msk.f32.vlgmr.msra.gmra.mxu1 %vm478_vm6, %v9853_v19  ;;  %v722_v32 = vpop.permute.xlu0 %721 }
 0x381   :  { %8476 = vmatpush3.xpose.msk.msra.mxu1 %vm478_vm6, %v730_v27  ;;  %8454 = vmatprep.mubr.msk.f32.mxu1 %vm9585_vm3, %v9584_v39 }
 0x382   :  { %8477 = vmatprep.subr.mxu1 %v9584_v39 }
 0x384   :  { %v990_v33 = vpop.permute.xlu1 %989  ;;  %8455 = vmatmul.mubr.msk.f32.gmra.mxu1 %vm478_vm6, %v9849_v18  ;;  %v724_v34 = vpop.permute.xlu0 %723 }
 0x385   :  { %8478 = vmatpush3.xpose.msk.msra.mxu1 %vm478_vm6, %v728_v28  ;;  %8457 = vmatprep.mubr.msk.f32.mxu1 %vm9585_vm3, %v9584_v39 }
 0x386   :  { %8479 = vmatprep.subr.mxu1 %v9584_v39 }
 0x388   :  { %v988_v35 = vpop.permute.xlu1 %987  ;;  %8458 = vmatmul.mubr.msk.f32.gmra.mxu1 %vm478_vm6, %v9855_v20  ;;  %v982_v36 = vpop.permute.xlu0 %981 }
 0x389   :  { %8480 = vmatpush3.xpose.msk.msra.mxu1 %vm478_vm6, %v726_v29  ;;  %8481 = vmatprep.mubr.msk.f32.mxu1 %vm9585_vm3, %v9584_v39 }
 0x38a   :  { %8505 = vmatprep.subr.mxu1 %v9584_v39 }
 0x38c   :  { %v1254_v37 = vpop.permute.xlu1 %1253  ;;  %8482 = vmatmul.mubr.msk.f32.vlgmr.msra.gmra.mxu1 %vm478_vm6, %v720_v30  ;;  %v984_v38 = vpop.permute.xlu0 %983 }
 0x38d   :  { %8506 = vmatpush3.xpose.msk.msra.mxu1 %vm478_vm6, %v992_v31  ;;  %8484 = vmatprep.mubr.msk.f32.mxu1 %vm9585_vm3, %v9584_v39 }
 0x38e   :  { %8507 = vmatprep.subr.mxu1 %v9584_v39 }
 0x390   :  { %v1252_v40 = vpop.permute.xlu1 %1251  ;;  %8485 = vmatmul.mubr.msk.f32.gmra.mxu1 %vm478_vm6, %v722_v32  ;;  %v986_v41 = vpop.permute.xlu0 %985 }
 0x391   :  { %8508 = vmatpush3.xpose.msk.msra.mxu1 %vm478_vm6, %v990_v33  ;;  %8487 = vmatprep.mubr.msk.f32.mxu1 %vm9585_vm3, %v9584_v39 }
 0x392   :  { %8509 = vmatprep.subr.mxu1 %v9584_v39 }
 0x394   :  { %v1250_v42 = vpop.permute.xlu1 %1249  ;;  %8488 = vmatmul.mubr.msk.f32.gmra.mxu1 %vm478_vm6, %v724_v34  ;;  %v1244_v43 = vpop.permute.xlu0 %1243 }
 0x395   :  { %8510 = vmatpush3.xpose.msk.msra.mxu1 %vm478_vm6, %v988_v35  ;;  %8511 = vmatprep.mubr.msk.f32.mxu1 %vm9585_vm3, %v9584_v39 }
 0x396   :  { %8535 = vmatprep.subr.mxu1 %v9584_v39 }
 0x398   :  { %v1246_v44 = vpop.permute.xlu1 %1245  ;;  %8512 = vmatmul.mubr.msk.f32.vlgmr.msra.gmra.mxu1 %vm478_vm6, %v982_v36  ;;  %v1248_v45 = vpop.permute.xlu0 %1247 }
 0x399   :  { %8536 = vmatpush3.xpose.msk.msra.mxu1 %vm478_vm6, %v1254_v37  ;;  %8514 = vmatprep.mubr.msk.f32.mxu1 %vm9585_vm3, %v9584_v39 }
 0x39a   :  { %8537 = vmatprep.subr.mxu1 %v9584_v39 }
 0x39c   :  { %v610_v46 = vpop.permute.xlu1 %609  ;;  %8515 = vmatmul.mubr.msk.f32.gmra.mxu1 %vm478_vm6, %v984_v38  ;;  %v612_v48 = vpop.permute.xlu0 %611 }
 0x39d   :  { %8538 = vmatpush3.xpose.msk.msra.mxu1 %vm478_vm6, %v1252_v40  ;;  %8517 = vmatprep.mubr.msk.f32.mxu1 %vm9585_vm3, %v9584_v39 }
 0x39e   :  { %8539 = vmatprep.subr.mxu1 %v9584_v39 }
 0x3a0   :  { %v614_v47 = vpop.permute.xlu1 %613  ;;  %8518 = vmatmul.mubr.msk.f32.gmra.mxu1 %vm478_vm6, %v986_v41 }
 0x3a1   :  { %8461 = vmatpush3.msk.msra.mxu0 %vm626_vm7, %v614_v47  ;;  %8540 = vmatpush3.xpose.msk.msra.mxu1 %vm478_vm6, %v1250_v42 }
 0x3a2   :  { %8462 = vmatprep.subr.mxu0 %v9584_v39  ;;  %8541 = vmatprep.mubr.msk.f32.mxu1 %vm9585_vm3, %v9584_v39 }
 0x3a3   :  { %8463 = vmatpush3.msra.mxu0 %v612_v48  ;;  %8565 = vmatprep.subr.mxu1 %v9584_v39 }
 0x3a4   :  { %8464 = vmatprep.subr.mxu0 %v9584_v39  ;;  %8542 = vmatmul.mubr.msk.f32.vlgmr.msra.gmra.mxu1 %vm478_vm6, %v1244_v43 }
 0x3a5   :  { %8465 = vmatpush3.msra.mxu0 %v610_v46  ;;  %8544 = vmatprep.mubr.msk.f32.mxu1 %vm9585_vm3, %v9584_v39 }
 0x3a6   :  { %8490 = vmatprep.subr.mxu0 %v9584_v39 }
 0x3a8   :  { %8545 = vmatmul.mubr.msk.f32.gmra.mxu1 %vm478_vm6, %v1246_v44 }
 0x3a9   :  { %8547 = vmatprep.mubr.msk.f32.mxu1 %vm9585_vm3, %v9584_v39 }
 0x3ac   :  { %8548 = vmatmul.mubr.msk.f32.gmra.mxu1 %vm478_vm6, %v1248_v45  ;;  %v10037_v45 = vpop.permute.xlu1 %863 }
 0x3ad   :  { %8573 = vmatprep.mubr.msk.f32.mxu1 %vm9585_vm3, %v9584_v39 }
 0x440   :  { %v557_v56 = vpop.f32.mrf.mxu1 }
 0x441   :  { %v9983_v57 = vmul.f32 0.35355338, %v557_v56 }
 0x442   :  { %v8453_v58 = vpop.f32.mrf.mxu1 }
 0x443   :  { %v575_v9 = vsel %vm574_vm8, %v9983_v57, -inf }
 0x444   :  { %576 = vmax.xlane.f32.xlu1 %v575_v9  ;;  %v562_v11 = vpop.f32.mrf.mxu1 }
 0x445   :  { %v9987_v59 = vmul.f32 0.35355338, %v562_v11 }
 0x446   :  { %v8456_v14 = vpop.f32.mrf.mxu1 }
 0x447   :  { %v578_v60 = vsel %vm574_vm8, %v9987_v59, -inf }
 0x448   :  { %579 = vmax.xlane.f32.xlu0 %v578_v60  ;;  %v567_v61 = vpop.f32.mrf.mxu1 }
 0x449   :  { %v9991_v62 = vmul.f32 0.35355338, %v567_v61 }
 0x44a   :  { %v8459_v63 = vpop.f32.mrf.mxu1 }
 0x44b   :  { %v582_v0 = vsel %vm581_vm9, %v9991_v62, -inf }
 0x44c   :  { %583 = vmax.xlane.f32.xlu0 %v582_v0  ;;  %v809_v1 = vpop.f32.mrf.mxu1 }
 0x44d   :  { %v9995_v2 = vmul.f32 0.35355338, %v809_v1 }
 0x44e   :  { %v8483_v3 = vpop.f32.mrf.mxu1 }
 0x44f   :  { %v826_v4 = vsel %vm574_vm8, %v9995_v2, -inf }
 0x450   :  { %827 = vmax.xlane.f32.xlu0 %v826_v4  ;;  %v814_v5 = vpop.f32.mrf.mxu1 }
 0x451   :  { %v9999_v6 = vmul.f32 0.35355338, %v814_v5 }
 0x452   :  { %v8486_v7 = vpop.f32.mrf.mxu1 }
 0x453   :  { %v829_v8 = vsel %vm574_vm8, %v9999_v6, -inf }
 0x454   :  { %830 = vmax.xlane.f32.xlu1 %v829_v8  ;;  %v819_v10 = vpop.f32.mrf.mxu1 }
 0x455   :  { %v10003_v12 = vmul.f32 0.35355338, %v819_v10 }
 0x456   :  { %v8489_v13 = vpop.f32.mrf.mxu1 }
 0x457   :  { %v832_v15 = vsel %vm581_vm9, %v10003_v12, -inf }
 0x458   :  { %833 = vmax.xlane.f32.xlu0 %v832_v15  ;;  %v1071_v16 = vpop.f32.mrf.mxu1 }
 0x459   :  { %v10007_v17 = vmul.f32 0.35355338, %v1071_v16 }
 0x45a   :  { %v8513_v20 = vpop.f32.mrf.mxu1 }
 0x45b   :  { %v1088_v21 = vsel %vm574_vm8, %v10007_v17, -inf }
 0x45c   :  { %1089 = vmax.xlane.f32.xlu1 %v1088_v21  ;;  %v1076_v24 = vpop.f32.mrf.mxu1 }
 0x45d   :  { %v10011_v25 = vmul.f32 0.35355338, %v1076_v24 }
 0x45e   :  { %v8516_v26 = vpop.f32.mrf.mxu1 }
 0x45f   :  { %v1091_v27 = vsel %vm574_vm8, %v10011_v25, -inf }
 0x460   :  { %1092 = vmax.xlane.f32.xlu0 %v1091_v27  ;;  %v1081_v28 = vpop.f32.mrf.mxu1 }
 0x461   :  { %v10015_v29 = vmul.f32 0.35355338, %v1081_v28 }
 0x462   :  { %v8519_v30 = vpop.f32.mrf.mxu1 }
 0x463   :  { %v1094_v31 = vsel %vm581_vm9, %v10015_v29, -inf }
 0x464   :  { %1095 = vmax.xlane.f32.xlu1 %v1094_v31  ;;  %v1333_v32 = vpop.f32.mrf.mxu1 }
 0x465   :  { %v10019_v33 = vmul.f32 0.35355338, %v1333_v32 }
 0x466   :  { %v8543_v34 = vpop.f32.mrf.mxu1 }
 0x467   :  { %v1350_v35 = vsel %vm574_vm8, %v10019_v33, -inf }
 0x468   :  { %1351 = vmax.xlane.f32.xlu0 %v1350_v35  ;;  %v1338_v36 = vpop.f32.mrf.mxu1 }
 0x469   :  { %v10029_v41 = vmul.f32 0.35355338, %v1338_v36 }
 0x46a   :  { %v8546_v37 = vpop.f32.mrf.mxu1 }
 0x46b   :  { %v1353_v43 = vsel %vm574_vm8, %v10029_v41, -inf }
 0x46c   :  { %v1343_v38 = vpop.f32.mrf.mxu1 }
 0x46d   :  { %v10031_v42 = vmul.f32 0.35355338, %v1343_v38 }
 0x46e   :  { %v8549_v40 = vpop.f32.mrf.mxu1 }
 0x46f   :  { %v1356_v44 = vsel %vm581_vm9, %v10031_v42, -inf }
 0x475   :  { %859 = vrot.lane.b32.xlu1 %v9853_v19, %s12182_s1 }
 0x479   :  { %1125 = vrot.lane.b32.xlu1 %v9868_v22, %s12180_s8 }
 0x47e   :  { %861 = vrot.lane.b32.xlu0 %v9849_v18, %s12182_s1  ;;  %s12250_s1 = sld [smem:[#allocation16_spill]] }
 0x49d   :  { %1354 = vmax.xlane.f32.xlu1 %v1353_v43  ;;  %1357 = vmax.xlane.f32.xlu0 %v1356_v44 }
 0x4cd   :  { %v577_v46 = vpop.xlane.xlu1 %576 }
 0x4ce   :  { %v585_v22 = vsub.f32 %v9983_v57, %v577_v46 }
 0x4d0   :  { %v588_v47 = vmul.f32 1.442695, %v585_v22 }
 0x4d1   :  { %v580_v48 = vpop.xlane.xlu0 %579 }
 0x4d2   :  { %9275 = vpow2.f32 %v588_v47  ;;  %v586_v49 = vsub.f32 %v9987_v59, %v580_v48 }
 0x4d4   :  { %v590_v50 = vmul.f32 1.442695, %v586_v49 }
 0x4d5   :  { %v584_v55 = vpop.xlane.xlu0 %583 }
 0x4d6   :  { %9277 = vpow2.f32 %v590_v50  ;;  %v587_v56 = vsub.f32 %v9991_v62, %v584_v55 }
 0x4d8   :  { %v592_v11 = vmul.f32 1.442695, %v587_v56 }
 0x4d9   :  { %v828_v57 = vpop.xlane.xlu0 %827 }
 0x4da   :  { %v835_v9 = vsub.f32 %v9995_v2, %v828_v57  ;;  %9279 = vpow2.f32 %v592_v11 }
 0x4dc   :  { %v838_v60 = vmul.f32 1.442695, %v835_v9 }
 0x4dd   :  { %v831_v58 = vpop.xlane.xlu1 %830 }
 0x4de   :  { %v836_v59 = vsub.f32 %v9999_v6, %v831_v58  ;;  %9281 = vpow2.f32 %v838_v60 }
 0x4df   :  { %v10041_v51 = vpop.eup %9275 }
 0x4e0   :  { %v594_v52 = vsel %vm574_vm8, %v10041_v51, 0.0  ;;  %v840_v61 = vmul.f32 1.442695, %v836_v59 }
 0x4e1   :  { %595 = vadd.xlane.f32.xlu1 %v594_v52  ;;  %v834_v14 = vpop.xlane.xlu0 %833 }
 0x4e2   :  { %v837_v63 = vsub.f32 %v10003_v12, %v834_v14  ;;  %9283 = vpow2.f32 %v840_v61 }
 0x4e3   :  { %v10045_v53 = vpop.eup %9277 }
 0x4e4   :  { %v597_v54 = vsel %vm574_vm8, %v10045_v53, 0.0  ;;  %v842_v1 = vmul.f32 1.442695, %v837_v63 }
 0x4e5   :  { %598 = vadd.xlane.f32.xlu0 %v597_v54  ;;  %v1090_v0 = vpop.xlane.xlu1 %1089 }
 0x4e6   :  { %v1097_v3 = vsub.f32 %v10007_v17, %v1090_v0  ;;  %9285 = vpow2.f32 %v842_v1 }
 0x4e7   :  { %v10060_v10 = vpop.eup %9279 }
 0x4e8   :  { %v1100_v5 = vmul.f32 1.442695, %v1097_v3  ;;  %v600_v15 = vsel %vm581_vm9, %v10060_v10, 0.0 }
 0x4e9   :  { %v1093_v62 = vpop.xlane.xlu0 %1092 }
 0x4ea   :  { %9287 = vpow2.f32 %v1100_v5  ;;  %v1098_v38 = vsub.f32 %v10011_v25, %v1093_v62 }
 0x4eb   :  { %v10062_v12 = vpop.eup %9281 }
 0x4ec   :  { %v844_v20 = vsel %vm574_vm8, %v10062_v12, 0.0  ;;  %v1102_v44 = vmul.f32 1.442695, %v1098_v38 }
 0x4ed   :  { %v1096_v4 = vpop.xlane.xlu1 %1095 }
 0x4ee   :  { %v1099_v2 = vsub.f32 %v10015_v29, %v1096_v4 }
 0x4ef   :  { %v10066_v16 = vpop.eup %9283 }
 0x4f0   :  { %v1104_v6 = vmul.f32 1.442695, %v1099_v2  ;;  %v847_v17 = vsel %vm574_vm8, %v10066_v16, 0.0 }
 0x4f1   :  { %v1352_v7 = vpop.xlane.xlu0 %1351  ;;  %v860_v36 = vpop.permute.xlu1 %859 }
 0x4f2   :  { %1121 = vrot.lane.b32.xlu1 %v9853_v19, %s12180_s8  ;;  %v1359_v8 = vsub.f32 %v10019_v33, %v1352_v7  ;;  %9289 = vpow2.f32 %v1104_v6 }
 0x4f3   :  { %v10072_v21 = vpop.eup %9285 }
 0x4f4   :  { %v1362_v13 = vmul.f32 1.442695, %v1359_v8  ;;  %v850_v24 = vsel %vm581_vm9, %v10072_v21, 0.0 }
 0x4f5   :  { %v862_v29 = vpop.permute.xlu0 %861  ;;  %v1126_v37 = vpop.permute.xlu1 %1125 }
 0x4f6   :  { %9291 = vpow2.f32 %v1362_v13 }
 0x4f7   :  { %v10076_v26 = vpop.eup %9287 }
 0x4f8   :  { %v1106_v27 = vsel %vm574_vm8, %v10076_v26, 0.0 }
 0x4fb   :  { %1123 = vrot.lane.b32.xlu0 %v9849_v18, %s12180_s8  ;;  %s12253_s8 = smov 80  }
 0x4ff   :  { %v10080_v28 = vpop.eup %9289 }
 0x500   :  { %v1112_v30 = vsel %vm581_vm9, %v10080_v28, 0.0 }
 0x503   :  { %v10084_v31 = vpop.eup %9291 }
 0x504   :  { %v1368_v35 = vsel %vm574_vm8, %v10084_v31, 0.0 }
 0x516   :  { %601 = vadd.xlane.f32.xlu1 %v600_v15 }
 0x51a   :  { %848 = vadd.xlane.f32.xlu1 %v847_v17  ;;  %845 = vadd.xlane.f32.xlu0 %v844_v20 }
 0x51e   :  { %851 = vadd.xlane.f32.xlu0 %v850_v24 }
 0x522   :  { %1107 = vadd.xlane.f32.xlu0 %v1106_v27 }
 0x526   :  { %1113 = vadd.xlane.f32.xlu0 %v1112_v30  ;;  %v1358_v32 = vpop.xlane.xlu0 %1357  ;;  %v1355_v40 = vpop.xlane.xlu1 %1354 }
 0x527   :  { %v1361_v33 = vsub.f32 %v10031_v42, %v1358_v32  ;;  %v1360_v42 = vsub.f32 %v10029_v41, %v1355_v40 }
 0x529   :  { %v1366_v34 = vmul.f32 1.442695, %v1361_v33  ;;  %v1364_v22 = vmul.f32 1.442695, %v1360_v42  ;;  %v1504_v42 = vld [vmem:[%s12248_s0 + $0x10] sm:$0xff] }
 0x52a   :  { %1369 = vadd.xlane.f32.xlu0 %v1368_v35 }
 0x52b   :  { %1387 = vrot.lane.b32.xlu1 %v9881_v23, %s12178_s10  ;;  %9293 = vpow2.f32 %v1366_v34 }
 0x52c   :  { %9295 = vpow2.f32 %v1102_v44  ;;  %v1505_v44 = vld [vmem:[%s12248_s0 + $0x18] sm:$0xff] }
 0x52d   :  { %9297 = vpow2.f32 %v1364_v22  ;;  %8566 = vmatpush3.msra.mxu1 %v1505_v44  ;;  %v1503_v22 = vld [vmem:[%s12248_s0 + $0x8] sm:$0xff] }
 0x52e   :  { %8567 = vmatprep.subr.mxu1 %v9584_v39 }
 0x52f   :  { %8568 = vmatpush3.msra.mxu1 %v1504_v42 }
 0x530   :  { %8569 = vmatprep.subr.mxu1 %v9584_v39 }
 0x531   :  { %8570 = vmatpush3.msra.mxu1 %v1503_v22 }
 0x532   :  { %8571 = vmatprep.subr.mxu1 %v9584_v39 }
 0x538   :  { %v10092_v43 = vpop.eup %9293 }
 0x539   :  { %v1374_v46 = vsel %vm581_vm9, %v10092_v43, 0.0  ;;  %v10097_v47 = vpop.eup %9295 }
 0x53a   :  { %1375 = vadd.xlane.f32.xlu0 %v1374_v46  ;;  %v1109_v23 = vsel %vm574_vm8, %v10097_v47, 0.0  ;;  %v10101_v48 = vpop.eup %9297 }
 0x53b   :  { %v1371_v25 = vsel %vm574_vm8, %v10101_v48, 0.0 }
 0x54f   :  { %1110 = vadd.xlane.f32.xlu1 %v1109_v23 }
 0x550   :  { %1383 = vrot.lane.b32.xlu0 %v9853_v19, %s12178_s10 }
 0x553   :  { %1372 = vadd.xlane.f32.xlu1 %v1371_v25 }
 0x564   :  { %1385 = vrot.lane.b32.xlu1 %v9849_v18, %s12178_s10  ;;  %s12198_s10 = smov 16  }
 0x56a   :  { %v596_v41 = vpop.xlane.xlu1 %595 }
 0x56b   :  { %9299 = vrcp.f32 %v596_v41 }
 0x56e   :  { %v599_v49 = vpop.xlane.xlu0 %598  ;;  %v1122_v19 = vpop.permute.xlu1 %1121 }
 0x56f   :  { %9301 = vrcp.f32 %v599_v49 }
 0x578   :  { %v9300_v50 = vpop.eup %9299 }
 0x579   :  { %v606_v52 = vmul.f32 %v9300_v50, %v10041_v51 }
 0x57b   :  { %8467 = vmatmul.mubr.msk.f32.vlgmr.msra.gmra.mxu0 %vm574_vm8, %v606_v52 }
 0x57c   :  { %v9302_v54 = vpop.eup %9301  ;;  %8491 = vmatpush3.msk.msra.mxu0 %vm626_vm7, %v10037_v45  ;;  %8469 = vmatprep.mubr.msk.f32.mxu0 %vm9585_vm3, %v9584_v39  ;;  %v1124_v45 = vpop.permute.xlu0 %1123 }
 0x57d   :  { %8492 = vmatprep.subr.mxu0 %v9584_v39  ;;  %v607_v18 = vmul.f32 %v9302_v54, %v10045_v53 }
 0x57e   :  { %8493 = vmatpush3.msra.mxu0 %v862_v29 }
 0x57f   :  { %8494 = vmatprep.subr.mxu0 %v9584_v39  ;;  %8470 = vmatmul.mubr.msk.f32.gmra.mxu0 %vm574_vm8, %v607_v18 }
 0x580   :  { %8495 = vmatpush3.msra.mxu0 %v860_v36  ;;  %8472 = vmatprep.mubr.msk.f32.mxu0 %vm9585_vm3, %v9584_v39 }
 0x581   :  { %8520 = vmatprep.subr.mxu0 %v9584_v39 }
 0x59f   :  { %v602_v51 = vpop.xlane.xlu1 %601 }
 0x5a0   :  { %9303 = vrcp.f32 %v602_v51 }
 0x5a3   :  { %v846_v55 = vpop.xlane.xlu0 %845  ;;  %v849_v56 = vpop.xlane.xlu1 %848 }
 0x5a4   :  { %9305 = vrcp.f32 %v846_v55 }
 0x5a5   :  { %9307 = vrcp.f32 %v849_v56 }
 0x5a7   :  { %v852_v53 = vpop.xlane.xlu0 %851  ;;  %v1388_v3 = vpop.permute.xlu1 %1387 }
 0x5a8   :  { %9309 = vrcp.f32 %v852_v53 }
 0x5ab   :  { %v1108_v57 = vpop.xlane.xlu0 %1107 }
 0x5ac   :  { %9311 = vrcp.f32 %v1108_v57 }
 0x5ad   :  { %v9304_v58 = vpop.eup %9303 }
 0x5ae   :  { %v608_v9 = vmul.f32 %v9304_v58, %v10060_v10 }
 0x5af   :  { %v1114_v62 = vpop.xlane.xlu0 %1113 }
 0x5b0   :  { %8473 = vmatmul.mubr.msk.f32.gmra.mxu0 %vm574_vm8, %v608_v9 }
 0x5b1   :  { %8496 = vmatprep.mubr.msk.f32.mxu0 %vm9585_vm3, %v9584_v39  ;;  %v9306_v11 = vpop.eup %9305 }
 0x5b2   :  { %v856_v59 = vmul.f32 %v9306_v11, %v10062_v12  ;;  %v9308_v14 = vpop.eup %9307 }
 0x5b3   :  { %v857_v60 = vmul.f32 %v9308_v14, %v10066_v16  ;;  %v1370_v4 = vpop.xlane.xlu0 %1369 }
 0x5b4   :  { %8497 = vmatmul.mubr.msk.f32.vlgmr.msra.gmra.mxu0 %vm574_vm8, %v856_v59 }
 0x5b5   :  { %8521 = vmatpush3.msk.msra.mxu0 %vm626_vm7, %v1126_v37  ;;  %8499 = vmatprep.mubr.msk.f32.mxu0 %vm9585_vm3, %v9584_v39  ;;  %v9310_v61 = vpop.eup %9309 }
 0x5b6   :  { %8522 = vmatprep.subr.mxu0 %v9584_v39  ;;  %v858_v63 = vmul.f32 %v9310_v61, %v10072_v21 }
 0x5b7   :  { %8523 = vmatpush3.msra.mxu0 %v1124_v45 }
 0x5b8   :  { %8524 = vmatprep.subr.mxu0 %v9584_v39  ;;  %8500 = vmatmul.mubr.msk.f32.gmra.mxu0 %vm574_vm8, %v857_v60  ;;  %v7783_v60 = vld [vmem:[%s12249_s9] ss:$0 sm:$0xff] }
 0x5b9   :  { %8525 = vmatpush3.msra.mxu0 %v1122_v19  ;;  %8502 = vmatprep.mubr.msk.f32.mxu0 %vm9585_vm3, %v9584_v39  ;;  %v9312_v0 = vpop.eup %9311 }
 0x5ba   :  { %8550 = vmatprep.subr.mxu0 %v9584_v39  ;;  %v1118_v1 = vmul.f32 %v9312_v0, %v10076_v26 }
 0x5bc   :  { %8503 = vmatmul.mubr.msk.f32.gmra.mxu0 %vm574_vm8, %v858_v63 }
 0x5bd   :  { %8526 = vmatprep.mubr.msk.f32.mxu0 %vm9585_vm3, %v9584_v39 }
 0x5c0   :  { %8527 = vmatmul.mubr.msk.f32.vlgmr.msra.gmra.mxu0 %vm574_vm8, %v1118_v1  ;;  %v9571_v1 = vld [vmem:[#allocation2] sm:$0xff] }
 0x5c1   :  { %8551 = vmatpush3.msk.msra.mxu0 %vm626_vm7, %v1388_v3  ;;  %8529 = vmatprep.mubr.msk.f32.mxu0 %vm9585_vm3, %v9584_v39 }
 0x5c2   :  { %8552 = vmatprep.subr.mxu0 %v9584_v39 }
 0x5c3   :  { %v1376_v2 = vpop.xlane.xlu0 %1375 }
 0x5c7   :  { %v1384_v8 = vpop.permute.xlu0 %1383 }
 0x5d8   :  { %v1111_v5 = vpop.xlane.xlu1 %1110 }
 0x5d9   :  { %9313 = vrcp.f32 %v1111_v5 }
 0x5da   :  { %9315 = vrcp.f32 %v1114_v62 }
 0x5db   :  { %9317 = vrcp.f32 %v1370_v4 }
 0x5dc   :  { %v1373_v7 = vpop.xlane.xlu1 %1372 }
 0x5dd   :  { %9319 = vrcp.f32 %v1373_v7  ;;  %v9572_v7 = vld [vmem:[#allocation2 + $0x8] sm:$0xff] }
 0x5de   :  { %9321 = vrcp.f32 %v1376_v2 }
 0x5e0   :  { %v1386_v6 = vpop.permute.xlu1 %1385 }
 0x5e1   :  { %8553 = vmatpush3.msra.mxu0 %v1386_v6 }
 0x5e2   :  { %8554 = vmatprep.subr.mxu0 %v9584_v39 }
 0x5e3   :  { %8555 = vmatpush3.msra.mxu0 %v1384_v8 }
 0x5e4   :  { %8582 = vmatprep.subr.mxu0 %v9584_v39 }
 0x5e6   :  { %v9314_v10 = vpop.eup %9313 }
 0x5e7   :  { %v1119_v12 = vmul.f32 %v9314_v10, %v10097_v47  ;;  %v9316_v13 = vpop.eup %9315  ;;  %v1502_v47 = vld [vmem:[%s12248_s0] sm:$0xff] }
 0x5e8   :  { %v1120_v15 = vmul.f32 %v9316_v13, %v10080_v28  ;;  %v9318_v16 = vpop.eup %9317  ;;  %8572 = vmatpush3.msra.mxu1 %v1502_v47  ;;  %v1958_v13 = vld [vmem:[#allocation2 + $0x28] sm:$0x1] }
 0x5e9   :  { %8530 = vmatmul.mubr.msk.f32.gmra.mxu0 %vm574_vm8, %v1119_v12  ;;  %v1380_v17 = vmul.f32 %v9318_v16, %v10084_v31  ;;  %8599 = vmatprep.subr.mxu1 %v9584_v39  ;;  %v9573_v16 = vld [vmem:[#allocation2 + $0x10] sm:$0x1] }
 0x5ea   :  { %8532 = vmatprep.mubr.msk.f32.mxu0 %vm9585_vm3, %v9584_v39  ;;  %v9320_v20 = vpop.eup %9319 }
 0x5eb   :  { %v1381_v21 = vmul.f32 %v9320_v20, %v10101_v48  ;;  %v9322_v24 = vpop.eup %9321  ;;  %v1967_v20 = vsel %vm184_vm1, %v1958_v13, 0.0 }
 0x5ec   :  { %v1382_v26 = vmul.f32 %v9322_v24, %v10092_v43  ;;  %v1956_v24 = vld [vmem:[#allocation2 + $0x18] sm:$0xff] }
 0x5ed   :  { %8533 = vmatmul.mubr.msk.f32.gmra.mxu0 %vm574_vm8, %v1120_v15 }
 0x5ee   :  { %8556 = vmatprep.mubr.msk.f32.mxu0 %vm9585_vm3, %v9584_v39 }
 0x5f1   :  { %8557 = vmatmul.mubr.msk.f32.vlgmr.msra.gmra.mxu0 %vm574_vm8, %v1380_v17 }
 0x5f2   :  { %8559 = vmatprep.mubr.msk.f32.mxu0 %vm9585_vm3, %v9584_v39 }
 0x5f5   :  { %8560 = vmatmul.mubr.msk.f32.gmra.mxu0 %vm574_vm8, %v1381_v21 }
 0x5f6   :  { %8562 = vmatprep.mubr.msk.f32.mxu0 %vm9585_vm3, %v9584_v39 }
 0x5f9   :  { %8563 = vmatmul.mubr.msk.f32.gmra.mxu0 %vm574_vm8, %v1382_v26  ;;  %v1961_v26 = vsel %vm190_vm2, %v1956_v24, 0.0 }
 0x5fa   :  { %8590 = vmatprep.mubr.msk.f32.mxu0 %vm9585_vm3, %v9584_v39 }
 0x63b   :  { %v695_v27 = vpop.f32.mrf.mxu0 }
 0x63c   :  { %709 = vst.msk [vmem:[#allocation4] sm:$0xff] %vm478_vm6, %v695_v27  ;;  %v1957_v27 = vld [vmem:[#allocation2 + $0x20] sm:$0xff] }
 0x63d   :  { %v8468_v28 = vpop.f32.mrf.mxu0 }
 0x63e   :  { %v1964_v28 = vsel %vm190_vm2, %v1957_v27, 0.0 }
 0x63f   :  { %v700_v29 = vpop.f32.mrf.mxu0 }
 0x640   :  { %710 = vst.msk [vmem:[#allocation4 + $0x8] sm:$0xff] %vm478_vm6, %v700_v29 }
 0x641   :  { %v8471_v30 = vpop.f32.mrf.mxu0 }
 0x670   :  { %v705_v31 = vpop.f32.mrf.mxu0 }
 0x671   :  { %712 = vst.msk [vmem:[#allocation4 + $0x10] sm:$0x1] %vm711_vm10, %v705_v31 }
 0x672   :  { %v8474_v32 = vpop.f32.mrf.mxu0 }
 0x674   :  { %v944_v33 = vpop.f32.mrf.mxu0 }
 0x675   :  { %961 = vrot.lane.b32.xlu1 %v944_v33, %s12200_s5 }
 0x676   :  { %v8498_v34 = vpop.f32.mrf.mxu0 }
 0x678   :  { %v949_v35 = vpop.f32.mrf.mxu0 }
 0x679   :  { %963 = vrot.lane.b32.xlu0 %v949_v35, %s12200_s5 }
 0x67a   :  { %v8501_v36 = vpop.f32.mrf.mxu0 }
 0x67c   :  { %v954_v37 = vpop.f32.mrf.mxu0 }
 0x67e   :  { %v8504_v38 = vpop.f32.mrf.mxu0 }
 0x680   :  { %v1206_v40 = vpop.f32.mrf.mxu0 }
 0x681   :  { %1223 = vrot.lane.b32.xlu0 %v1206_v40, %s12198_s10 }
 0x682   :  { %v8528_v43 = vpop.f32.mrf.mxu0 }
 0x6a9   :  { %v1211_v46 = vpop.f32.mrf.mxu0 }
 0x6aa   :  { %1225 = vrot.lane.b32.xlu1 %v1211_v46, %s12198_s10 }
 0x6ab   :  { %v8531_v23 = vpop.f32.mrf.mxu0 }
 0x6ad   :  { %v1216_v48 = vpop.f32.mrf.mxu0 }
 0x6af   :  { %v8534_v25 = vpop.f32.mrf.mxu0 }
 0x6b1   :  { %v1468_v41 = vpop.f32.mrf.mxu0 }
 0x6b2   :  { %1485 = vrot.lane.b32.xlu1 %v1468_v41, %s12196_s3 }
 0x6b3   :  { %v8558_v49 = vpop.f32.mrf.mxu0 }
 0x6b5   :  { %v1473_v50 = vpop.f32.mrf.mxu0 }
 0x6b6   :  { %965 = vrot.lane.b32.xlu1 %v954_v37, %s12200_s5  ;;  %1487 = vrot.lane.b32.xlu0 %v1473_v50, %s12196_s3  ;;  %s12251_s5 = smov 88  }
 0x6b7   :  { %v8561_v52 = vpop.f32.mrf.mxu0 }
 0x6b9   :  { %v1478_v54 = vpop.f32.mrf.mxu0 }
 0x6ba   :  { %1227 = vrot.lane.b32.xlu0 %v1216_v48, %s12198_s10  ;;  %1489 = vrot.lane.b32.xlu1 %v1478_v54, %s12196_s3  ;;  %s12252_s3 = smov 120   ;;  %s12257_s10 = smov 64  }
 0x6bb   :  { %v8564_v18 = vpop.f32.mrf.mxu0 }
 0x6e7   :  { %v962_v19 = vpop.permute.xlu1 %961 }
 0x6e8   :  { %971 = vst.msk [vmem:[#allocation4] sm:$0xff] %vm970_vm11, %v962_v19 }
 0x6eb   :  { %v964_v45 = vpop.permute.xlu0 %963 }
 0x6ec   :  { %972 = vst.msk [vmem:[#allocation4 + $0x8] sm:$0xff] %vm970_vm11, %v964_v45 }
 0x6f3   :  { %v1224_v51 = vpop.permute.xlu0 %1223 }
 0x6f4   :  { %1233 = vst.msk [vmem:[#allocation4] sm:$0xff] %vm1232_vm12, %v1224_v51 }
 0x71c   :  { %v1226_v55 = vpop.permute.xlu1 %1225 }
 0x71d   :  { %1234 = vst.msk [vmem:[#allocation4 + $0x8] sm:$0xff] %vm1232_vm12, %v1226_v55 }
 0x724   :  { %v1486_v56 = vpop.permute.xlu1 %1485 }
 0x725   :  { %1495 = vst.msk [vmem:[#allocation4] sm:$0xff] %vm1494_vm13, %v1486_v56  ;;  %v1667_v56 = vld [vmem:[%s12250_s1 + $0x18] sm:$0xff] }
 0x726   :  { %8583 = vmatpush3.msra.mxu0 %v1667_v56  ;;  %v1846_v56 = vld [vmem:[%s12151_s15 + $0x8] sm:$0xff] }
 0x727   :  { %8584 = vmatprep.subr.mxu0 %v9584_v39 }
 0x728   :  { %v966_v53 = vpop.permute.xlu1 %965  ;;  %v1488_v57 = vpop.permute.xlu0 %1487 }
 0x729   :  { %974 = vst.msk [vmem:[#allocation4 + $0x10] sm:$0x1] %vm973_vm14, %v966_v53  ;;  %v1666_v53 = vld [vmem:[%s12250_s1 + $0x10] sm:$0xff] }
 0x72a   :  { %1496 = vst.msk [vmem:[#allocation4 + $0x8] sm:$0xff] %vm1494_vm13, %v1488_v57  ;;  %8585 = vmatpush3.msra.mxu0 %v1666_v53  ;;  %v1665_v57 = vld [vmem:[%s12250_s1 + $0x8] sm:$0xff]  ;;  %v1845_v53 = vld [vmem:[%s12151_s15] sm:$0xff] }
 0x72b   :  { %8586 = vmatprep.subr.mxu0 %v9584_v39 }
 0x72c   :  { %v1228_v58 = vpop.permute.xlu0 %1227  ;;  %v1490_v9 = vpop.permute.xlu1 %1489  ;;  %v1499_v11 = vld [vmem:[#allocation4] sm:$0xff]  ;;  %8587 = vmatpush3.msra.mxu0 %v1665_v57  ;;  %v7789_v57 = vld [vmem:[%s12152_s14] ss:$0 sm:$0xff] }
 0x72d   :  { %1236 = vst.msk [vmem:[#allocation4 + $0x10] sm:$0x1] %vm12212_vm15, %v1228_v58  ;;  %8574 = vmatmul.mubr.msk.f32.vlgmr.msra.gmra.mxu1 %vm190_vm2, %v1499_v11  ;;  %8588 = vmatprep.subr.mxu0 %v9584_v39  ;;  %v1664_v58 = vld [vmem:[%s12250_s1] sm:$0xff] }
 0x72e   :  { %1498 = vst.msk [vmem:[#allocation4 + $0x10] sm:$0x1] %vm12204_vm0, %v1490_v9  ;;  %8576 = vmatprep.mubr.msk.f32.mxu1 %vm9585_vm3, %v9584_v39  ;;  %8589 = vmatpush3.msra.mxu0 %v1664_v58 }
 0x72f   :  { %8624 = vmatprep.subr.mxu0 %v9584_v39 }
 0x731   :  { %v1500_v59 = vld [vmem:[#allocation4 + $0x8] sm:$0xff] }
 0x732   :  { %8577 = vmatmul.mubr.msk.f32.gmra.mxu1 %vm190_vm2, %v1500_v59 }
 0x733   :  { %8579 = vmatprep.mubr.msk.f32.mxu1 %vm9585_vm3, %v9584_v39 }
 0x735   :  { %v1501_v14 = vld [vmem:[#allocation4 + $0x10] sm:$0x1] }
 0x736   :  { %8580 = vmatmul.mubr.msk.f32.gmra.mxu1 %vm190_vm2, %v1501_v14 }
 0x737   :  { %8615 = vmatprep.mubr.msk.f32.mxu1 %vm9585_vm3, %v9584_v39 }
 0x7ed   :  { %v1588_v61 = vpop.f32.mrf.mxu1 }
 0x7ee   :  { %v1589_v63 = vadd.f32 %v7783_v60, %v1588_v61 }
 0x7ef   :  { %v8575_v0 = vpop.f32.mrf.mxu1 }
 0x7f0   :  { %v10219_v3 = vadd.f32 %v9571_v1, %v1589_v63 }
 0x7f2   :  { %v1593_v62 = vpop.f32.mrf.mxu1  ;;  %v1607_v5 = vsel %vm190_vm2, %v10219_v3, 0.0 }
 0x7f3   :  { %v1594_v4 = vadd.f32 %v7783_v60, %v1593_v62  ;;  %1608 = vadd.xlane.f32.xlu0 %v1607_v5 }
 0x7f4   :  { %v8578_v2 = vpop.f32.mrf.mxu1 }
 0x7f5   :  { %v10223_v6 = vadd.f32 %v9572_v7, %v1594_v4 }
 0x7f6   :  { %v1598_v8 = vpop.f32.mrf.mxu1 }
 0x7f7   :  { %v1610_v10 = vsel %vm190_vm2, %v10223_v6, 0.0  ;;  %v1599_v12 = vadd.f32 %v7783_v60, %v1598_v8 }
 0x7f8   :  { %1611 = vadd.xlane.f32.xlu1 %v1610_v10  ;;  %v8581_v15 = vpop.f32.mrf.mxu1  ;;  %v7787_v10 = vld [vmem:[%s12149_s11] ss:$0 sm:$0xff] }
 0x7f9   :  { %v10227_v17 = vadd.f32 %v9573_v16, %v1599_v12 }
 0x7fb   :  { %v1613_v21 = vsel %vm184_vm1, %v10227_v17, 0.0 }
 0x7fc   :  { %1968 = vadd.xlane.f32.xlu1 %v1967_v20  ;;  %1614 = vadd.xlane.f32.xlu0 %v1613_v21  ;;  %v7788_v21 = vld [vmem:[%s12150_s12] ss:$0 sm:$0xff] }
 0x800   :  { %1962 = vadd.xlane.f32.xlu0 %v1961_v26 }
 0x804   :  { %1965 = vadd.xlane.f32.xlu0 %v1964_v28 }
 0x87c   :  { %v1609_v29 = vpop.xlane.xlu0 %1608 }
 0x87d   :  { %v1616_v30 = vmul.f32 0.03125, %v1609_v29  ;;  %v2021_v29 = vld [vmem:[%s12244_s30 + $0x18] sm:$0xff] }
 0x87f   :  { %v10235_v31 = vsub.f32 %v10219_v3, %v1616_v30 }
 0x881   :  { %v1612_v32 = vpop.xlane.xlu1 %1611  ;;  %v1622_v34 = vmul.f32 %v10235_v31, %v10235_v31 }
 0x882   :  { %v1617_v33 = vmul.f32 0.03125, %v1612_v32 }
 0x883   :  { %v1625_v36 = vsel %vm190_vm2, %v1622_v34, 0.0  ;;  %v2019_v34 = vld [vmem:[%s12244_s30 + $0x8] sm:$0xff] }
 0x884   :  { %v10240_v35 = vsub.f32 %v10223_v6, %v1617_v33  ;;  %1626 = vadd.xlane.f32.xlu0 %v1625_v36  ;;  %v2018_v36 = vld [vmem:[%s12244_s30] sm:$0xff] }
 0x885   :  { %v1969_v37 = vpop.xlane.xlu1 %1968  ;;  %v1615_v38 = vpop.xlane.xlu0 %1614 }
 0x886   :  { %v1623_v40 = vmul.f32 %v10240_v35, %v10240_v35  ;;  %v1618_v43 = vmul.f32 0.03125, %v1615_v38  ;;  %v1972_v42 = vmul.f32 0.03125, %v1969_v37 }
 0x888   :  { %v1628_v44 = vsel %vm190_vm2, %v1623_v40, 0.0  ;;  %v10247_v46 = vsub.f32 %v10227_v17, %v1618_v43  ;;  %v10251_v48 = vsub.f32 %v1958_v13, %v1972_v42  ;;  %v7797_v40 = vld [vmem:[%s12245_s2] ss:$0 sm:$0xff] }
 0x889   :  { %1629 = vadd.xlane.f32.xlu1 %v1628_v44  ;;  %v1963_v22 = vpop.xlane.xlu0 %1962  ;;  %v7798_v42 = vld [vmem:[%s12246_s4] ss:$0 sm:$0xff] }
 0x88a   :  { %v1970_v47 = vmul.f32 0.03125, %v1963_v22  ;;  %v1624_v23 = vmul.f32 %v10247_v46, %v10247_v46  ;;  %v1978_v19 = vmul.f32 %v10251_v48, %v10251_v48 }
 0x88c   :  { %v10253_v25 = vsub.f32 %v1956_v24, %v1970_v47  ;;  %v1631_v41 = vsel %vm184_vm1, %v1624_v23, 0.0  ;;  %v1985_v55 = vsel %vm184_vm1, %v1978_v19, 0.0  ;;  %v1850_v19 = vld [vmem:[%s12151_s15 + $0x28] sm:$0xff] }
 0x88d   :  { %1632 = vadd.xlane.f32.xlu0 %v1631_v41  ;;  %v1966_v49 = vpop.xlane.xlu0 %1965 }
 0x88e   :  { %v1971_v50 = vmul.f32 0.03125, %v1966_v49  ;;  %v1976_v52 = vmul.f32 %v10253_v25, %v10253_v25 }
 0x890   :  { %v10258_v54 = vsub.f32 %v1957_v27, %v1971_v50  ;;  %v1979_v18 = vsel %vm190_vm2, %v1976_v52, 0.0 }
 0x891   :  { %1980 = vadd.xlane.f32.xlu1 %v1979_v18 }
 0x892   :  { %v1977_v45 = vmul.f32 %v10258_v54, %v10258_v54 }
 0x894   :  { %v1982_v51 = vsel %vm190_vm2, %v1977_v45, 0.0  ;;  %v1849_v45 = vld [vmem:[%s12151_s15 + $0x20] sm:$0xff] }
 0x895   :  { %1983 = vadd.xlane.f32.xlu0 %v1982_v51  ;;  %1986 = vadd.xlane.f32.xlu1 %v1985_v55  ;;  %v1848_v51 = vld [vmem:[%s12151_s15 + $0x18] sm:$0xff]  ;;  %v1847_v55 = vld [vmem:[%s12151_s15 + $0x10] sm:$0xff] }
 0x90d   :  { %v1627_v9 = vpop.xlane.xlu0 %1626 }
 0x90e   :  { %v1634_v11 = vmul.f32 0.03125, %v1627_v9 }
 0x910   :  { %v1637_v59 = vadd.f32 1e-12, %v1634_v11 }
 0x912   :  { %v1630_v14 = vpop.xlane.xlu1 %1629  ;;  %9323 = vrsqrt.f32 %v1637_v59 }
 0x913   :  { %v1635_v60 = vmul.f32 0.03125, %v1630_v14 }
 0x915   :  { %v1638_v61 = vadd.f32 1e-12, %v1635_v60 }
 0x916   :  { %v1633_v63 = vpop.xlane.xlu0 %1632 }
 0x917   :  { %9325 = vrsqrt.f32 %v1638_v61  ;;  %v1636_v0 = vmul.f32 0.03125, %v1633_v63 }
 0x919   :  { %v1639_v1 = vadd.f32 1e-12, %v1636_v0 }
 0x91a   :  { %v1981_v62 = vpop.xlane.xlu1 %1980 }
 0x91b   :  { %9327 = vrsqrt.f32 %v1639_v1  ;;  %v1988_v4 = vmul.f32 0.03125, %v1981_v62 }
 0x91d   :  { %v1991_v5 = vadd.f32 1e-12, %v1988_v4 }
 0x91e   :  { %v1984_v2 = vpop.xlane.xlu0 %1983  ;;  %v1987_v7 = vpop.xlane.xlu1 %1986 }
 0x91f   :  { %v9324_v8 = vpop.eup %9323  ;;  %9329 = vrsqrt.f32 %v1991_v5  ;;  %v1989_v12 = vmul.f32 0.03125, %v1984_v2  ;;  %v1990_v13 = vmul.f32 0.03125, %v1987_v7 }
 0x920   :  { %v1643_v15 = vmul.f32 %v9324_v8, %v10235_v31  ;;  %v2020_v31 = vld [vmem:[%s12244_s30 + $0x10] sm:$0xff] }
 0x921   :  { %v1992_v16 = vadd.f32 1e-12, %v1989_v12  ;;  %v1993_v20 = vadd.f32 1e-12, %v1990_v13 }
 0x922   :  { %v1652_v24 = vmul.f32 %v7787_v10, %v1643_v15 }
 0x923   :  { %9331 = vrsqrt.f32 %v1992_v16 }
 0x924   :  { %v9326_v26 = vpop.eup %9325  ;;  %9333 = vrsqrt.f32 %v1993_v20  ;;  %v1661_v27 = vadd.f32 %v7788_v21, %v1652_v24 }
 0x925   :  { %v1644_v28 = vmul.f32 %v9326_v26, %v10240_v35 }
 0x926   :  { %8591 = vmatmul.mubr.msk.f32.vlgmr.msra.gmra.mxu0 %vm190_vm2, %v1661_v27 }
 0x927   :  { %v1653_v30 = vmul.f32 %v7787_v10, %v1644_v28  ;;  %8593 = vmatprep.mubr.msk.f32.mxu0 %vm9585_vm3, %v9584_v39  ;;  %8625 = vmatpush3.msra.mxu0 %v2021_v29 }
 0x928   :  { %v9328_v32 = vpop.eup %9327  ;;  %8626 = vmatprep.subr.mxu0 %v9584_v39 }
 0x929   :  { %v1662_v33 = vadd.f32 %v7788_v21, %v1653_v30  ;;  %8627 = vmatpush3.msra.mxu0 %v2020_v31  ;;  %v1645_v35 = vmul.f32 %v9328_v32, %v10247_v46 }
 0x92a   :  { %8628 = vmatprep.subr.mxu0 %v9584_v39 }
 0x92b   :  { %8594 = vmatmul.mubr.msk.f32.gmra.mxu0 %vm190_vm2, %v1662_v33  ;;  %v1654_v37 = vmul.f32 %v7787_v10, %v1645_v35  ;;  %v7799_v10 = vld [vmem:[%s12247_s28] ss:$0 sm:$0xff] }
 0x92c   :  { %8596 = vmatprep.mubr.msk.f32.mxu0 %vm9585_vm3, %v9584_v39  ;;  %8629 = vmatpush3.msra.mxu0 %v2019_v34  ;;  %v9330_v38 = vpop.eup %9329 }
 0x92d   :  { %8630 = vmatprep.subr.mxu0 %v9584_v39  ;;  %v1997_v43 = vmul.f32 %v9330_v38, %v10253_v25  ;;  %v1663_v44 = vadd.f32 %v7788_v21, %v1654_v37 }
 0x92e   :  { %8631 = vmatpush3.msra.mxu0 %v2018_v36 }
 0x92f   :  { %8656 = vmatprep.subr.mxu0 %v9584_v39  ;;  %v2006_v46 = vmul.f32 %v7797_v40, %v1997_v43  ;;  %8597 = vmatmul.mubr.msk.f32.gmra.mxu0 %vm190_vm2, %v1663_v44 }
 0x930   :  { %v9332_v22 = vpop.eup %9331  ;;  %8632 = vmatprep.mubr.msk.f32.mxu0 %vm9585_vm3, %v9584_v39 }
 0x931   :  { %v9334_v47 = vpop.eup %9333  ;;  %v2015_v23 = vadd.f32 %v7798_v42, %v2006_v46  ;;  %v1998_v41 = vmul.f32 %v9332_v22, %v10258_v54  ;;  %v1851_v54 = vld [vmem:[%s12151_s15 + $0x30] sm:$0xff] }
 0x932   :  { %v1999_v25 = vmul.f32 %v9334_v47, %v10251_v48  ;;  %v1852_v48 = vld [vmem:[%s12151_s15 + $0x38] sm:$0xff] }
 0x933   :  { %8633 = vmatmul.mubr.msk.f32.vlgmr.msra.gmra.mxu0 %vm190_vm2, %v2015_v23  ;;  %v2007_v49 = vmul.f32 %v7797_v40, %v1998_v41  ;;  %8600 = vmatpush3.msra.mxu1 %v1852_v48 }
 0x934   :  { %8635 = vmatprep.mubr.msk.f32.mxu0 %vm9585_vm3, %v9584_v39  ;;  %v2008_v52 = vmul.f32 %v7797_v40, %v1999_v25  ;;  %8601 = vmatprep.subr.mxu1 %v9584_v39 }
 0x935   :  { %v2016_v50 = vadd.f32 %v7798_v42, %v2007_v49  ;;  %8602 = vmatpush3.msra.mxu1 %v1851_v54 }
 0x936   :  { %v2017_v18 = vadd.f32 %v7798_v42, %v2008_v52  ;;  %8603 = vmatprep.subr.mxu1 %v9584_v39 }
 0x937   :  { %8636 = vmatmul.mubr.msk.f32.gmra.mxu0 %vm190_vm2, %v2016_v50  ;;  %8604 = vmatpush3.msra.mxu1 %v1850_v19 }
 0x938   :  { %8638 = vmatprep.mubr.msk.f32.mxu0 %vm9585_vm3, %v9584_v39  ;;  %8605 = vmatprep.subr.mxu1 %v9584_v39 }
 0x939   :  { %8606 = vmatpush3.msra.mxu1 %v1849_v45 }
 0x93a   :  { %8607 = vmatprep.subr.mxu1 %v9584_v39 }
 0x93b   :  { %8639 = vmatmul.mubr.msk.f32.gmra.mxu0 %vm190_vm2, %v2017_v18  ;;  %8608 = vmatpush3.msra.mxu1 %v1848_v51 }
 0x93c   :  { %8662 = vmatprep.mubr.msk.f32.mxu0 %vm9585_vm3, %v9584_v39  ;;  %8609 = vmatprep.subr.mxu1 %v9584_v39 }
 0x93d   :  { %8610 = vmatpush3.msra.mxu1 %v1847_v55 }
 0x93e   :  { %8611 = vmatprep.subr.mxu1 %v9584_v39 }
 0x93f   :  { %8612 = vmatpush3.msra.mxu1 %v1846_v56 }
 0x940   :  { %8613 = vmatprep.subr.mxu1 %v9584_v39 }
 0x941   :  { %8614 = vmatpush3.msra.mxu1 %v1845_v53 }
 0x942   :  { %8641 = vmatprep.subr.mxu1 %v9584_v39 }
 0x9e6   :  { %v1750_v58 = vpop.f32.mrf.mxu0 }
 0x9e7   :  { %v10370_v9 = vadd.f32 %v7789_v57, %v1750_v58 }
 0x9e8   :  { %v8592_v11 = vpop.f32.mrf.mxu0 }
 0x9e9   :  { %v10373_v59 = vmul.f32 0.70710677, %v10370_v9 }
 0x9eb   :  { %v1755_v14 = vpop.f32.mrf.mxu0  ;;  %v1767_v60 = vand.u32 2147483647, %v10373_v59 }
 0x9ec   :  { %v10376_v61 = vadd.f32 %v7789_v57, %v1755_v14 }
 0x9ed   :  { %v8595_v63 = vpop.f32.mrf.mxu0  ;;  %v1770_v0 = vmul.f32 0.3275911, %v1767_v60  ;;  %v1809_v26 = vsub.f32 0.0, %v1767_v60 }
 0x9ee   :  { %v10379_v1 = vmul.f32 0.70710677, %v10376_v61 }
 0x9ef   :  { %v1773_v62 = vadd.f32 1.0, %v1770_v0  ;;  %v1760_v5 = vpop.f32.mrf.mxu0  ;;  %v1812_v31 = vmul.f32 %v1809_v26, %v1767_v60 }
 0x9f0   :  { %v1768_v4 = vand.u32 2147483647, %v10379_v1  ;;  %v10382_v2 = vadd.f32 %v7789_v57, %v1760_v5  ;;  %vm1831_vm0 = vcmp.lt.f32.partialorder %v10379_v1, 0.0 }
 0x9f1   :  { %9335 = vrcp.f32 %v1773_v62  ;;  %v8598_v8 = vpop.f32.mrf.mxu0  ;;  %v1815_v38 = vmul.f32 1.442695, %v1812_v31 }
 0x9f2   :  { %v1771_v7 = vmul.f32 0.3275911, %v1768_v4  ;;  %v10388_v12 = vmul.f32 0.70710677, %v10382_v2  ;;  %v1810_v32 = vsub.f32 0.0, %v1768_v4 }
 0x9f3   :  { %v2104_v15 = vpop.f32.mrf.mxu0 }
 0x9f4   :  { %v1774_v13 = vadd.f32 1.0, %v1771_v7  ;;  %v1769_v16 = vand.u32 2147483647, %v10388_v12  ;;  %v2105_v20 = vadd.f32 %v7799_v10, %v2104_v15  ;;  %v1813_v40 = vmul.f32 %v1810_v32, %v1768_v4 }
 0x9f5   :  { %v8634_v21 = vpop.f32.mrf.mxu0 }
 0x9f6   :  { %9337 = vrcp.f32 %v1774_v13  ;;  %v1772_v24 = vmul.f32 0.3275911, %v1769_v16  ;;  %2118 = vst.msk [vmem:[#allocation3] sm:$0xff] %vm12203_vm4, %v2105_v20  ;;  %v1811_v43 = vsub.f32 0.0, %v1769_v16  ;;  %v1817_v23 = vmul.f32 1.442695, %v1813_v40 }
 0x9f7   :  { %v2109_v27 = vpop.f32.mrf.mxu0 }
 0x9f8   :  { %v1775_v28 = vadd.f32 1.0, %v1772_v24  ;;  %v2110_v29 = vadd.f32 %v7799_v10, %v2109_v27  ;;  %v1814_v41 = vmul.f32 %v1811_v43, %v1769_v16 }
 0x9f9   :  { %v8637_v30 = vpop.f32.mrf.mxu0 }
 0x9fa   :  { %9339 = vrcp.f32 %v1775_v28  ;;  %2119 = vst.msk [vmem:[#allocation3 + $0x8] sm:$0xff] %vm12203_vm4, %v2110_v29  ;;  %v1819_v45 = vmul.f32 1.442695, %v1814_v41  ;;  %v1827_v30 = vmul.f32 0.5, %v10370_v9  ;;  %vm1860_vm4 = vcmask 523264  }
 0x9fb   :  { %v2114_v33 = vpop.f32.mrf.mxu0  ;;  %9341 = vpow2.f32 %v1815_v38 }
 0x9fc   :  { %v2115_v34 = vadd.f32 %v7799_v10, %v2114_v33  ;;  %9343 = vpow2.f32 %v1817_v23 }
 0x9fd   :  { %v8640_v35 = vpop.f32.mrf.mxu0  ;;  %v10398_v25 = vld [vmem:[#allocation3] sm:$0xff]  ;;  %9345 = vpow2.f32 %v1819_v45 }
 0x9fe   :  { %v9336_v36 = vpop.eup %9335  ;;  %2120 = vst.msk [vmem:[#allocation3 + $0x10] sm:$0x1] %vm12202_vm5, %v2115_v34  ;;  %vm1830_vm5 = vcmp.lt.f32.partialorder %v10373_v59, 0.0 }
 0x9ff   :  { %v1782_v37 = vmul.f32 1.0614054, %v9336_v36 }
 0xa01   :  { %v1785_v44 = vadd.f32 -1.4531521, %v1782_v37  ;;  %v10394_v42 = vld [vmem:[#allocation3 + $0x8] sm:$0xff]  ;;  %v1828_v37 = vmul.f32 0.5, %v10376_v61 }
 0xa02   :  { %2129 = vrot.lane.b32.xlu1 %v10394_v42, %s12205_s29 }
 0xa03   :  { %v9338_v46 = vpop.eup %9337  ;;  %v1788_v22 = vmul.f32 %v9336_v36, %v1785_v44  ;;  %v1829_v44 = vmul.f32 0.5, %v10382_v2 }
 0xa04   :  { %v1783_v47 = vmul.f32 1.0614054, %v9338_v46 }
 0xa05   :  { %v1791_v49 = vadd.f32 1.4214138, %v1788_v22  ;;  %v10400_v52 = vld [vmem:[#allocation3 + $0x10] sm:$0x1] }
 0xa06   :  { %v1786_v50 = vadd.f32 -1.4531521, %v1783_v47  ;;  %2127 = vrot.lane.b32.xlu1 %v10398_v25, %s12205_s29  ;;  %2131 = vrot.lane.b32.xlu0 %v10400_v52, %s12205_s29  ;;  %v10406_v56 = vld [vmem:[#allocation3 + $0x10] sm:$0x1]  ;;  %s12258_s29 = smov 56  }
 0xa07   :  { %v9340_v18 = vpop.eup %9339  ;;  %v1794_v48 = vmul.f32 %v9336_v36, %v1791_v49  ;;  %v10416_v10 = vld [vmem:[#allocation3 + $0x10] sm:$0x1] }
 0xa08   :  { %v1789_v54 = vmul.f32 %v9338_v46, %v1786_v50  ;;  %v1784_v19 = vmul.f32 1.0614054, %v9340_v18  ;;  %v9342_v4 = vpop.eup %9341  ;;  %v10435_v40 = vld [vmem:[#allocation3 + $0x10] sm:$0x1] }
 0xa09   :  { %v1797_v51 = vadd.f32 -0.28449672, %v1794_v48  ;;  %v9344_v20 = vpop.eup %9343 }
 0xa0a   :  { %v1792_v55 = vadd.f32 1.4214138, %v1789_v54  ;;  %v1787_v53 = vadd.f32 -1.4531521, %v1784_v19  ;;  %2379 = vrot.lane.b32.xlu1 %v10406_v56, %s12251_s5  ;;  %2377 = vrot.lane.b32.xlu0 %v10394_v42, %s12251_s5  ;;  %v9346_v33 = vpop.eup %9345 }
 0xa0b   :  { %v1800_v57 = vmul.f32 %v9336_v36, %v1797_v51 }
 0xa0c   :  { %v1795_v58 = vmul.f32 %v9338_v46, %v1792_v55  ;;  %v1790_v11 = vmul.f32 %v9340_v18, %v1787_v53 }
 0xa0d   :  { %v1803_v14 = vadd.f32 0.2548296, %v1800_v57 }
 0xa0e   :  { %v1798_v60 = vadd.f32 -0.28449672, %v1795_v58  ;;  %v1793_v63 = vadd.f32 1.4214138, %v1790_v11  ;;  %2375 = vrot.lane.b32.xlu1 %v10398_v25, %s12251_s5  ;;  %2369 = vrot.lane.b32.xlu0 %v10398_v25, %s12252_s3 }
 0xa0f   :  { %v1806_v0 = vmul.f32 %v9336_v36, %v1803_v14 }
 0xa10   :  { %v1801_v62 = vmul.f32 %v9338_v46, %v1798_v60  ;;  %v1796_v5 = vmul.f32 %v9340_v18, %v1793_v63 }
 0xa11   :  { %v1821_v7 = vmul.f32 %v9342_v4, %v1806_v0 }
 0xa12   :  { %v1804_v8 = vadd.f32 0.2548296, %v1801_v62  ;;  %v1799_v13 = vadd.f32 -0.28449672, %v1796_v5  ;;  %2639 = vrot.lane.b32.xlu1 %v10416_v10, %s12253_s8  ;;  %2371 = vrot.lane.b32.xlu0 %v10394_v42, %s12252_s3  ;;  %v7793_v62 = vld [vmem:[%s12153_s16] ss:$0 sm:$0xff] }
 0xa13   :  { %v1824_v15 = vsub.f32 1.0, %v1821_v7 }
 0xa14   :  { %v1807_v16 = vmul.f32 %v9338_v46, %v1804_v8  ;;  %v1802_v21 = vmul.f32 %v9340_v18, %v1799_v13 }
 0xa15   :  { %v1833_v24 = vsub.f32 0.0, %v1824_v15 }
 0xa16   :  { %v1822_v26 = vmul.f32 %v9344_v20, %v1807_v16  ;;  %v1805_v27 = vadd.f32 0.2548296, %v1802_v21  ;;  %2637 = vrot.lane.b32.xlu1 %v10394_v42, %s12253_s8  ;;  %2373 = vrot.lane.b32.xlu0 %v10406_v56, %s12252_s3 }
 0xa17   :  { %v1836_v28 = vsel %vm1830_vm5, %v1833_v24, %v1824_v15  ;;  %vm1832_vm5 = vcmp.lt.f32.partialorder %v10388_v12, 0.0 }
 0xa18   :  { %v1825_v29 = vsub.f32 1.0, %v1822_v26  ;;  %v1839_v31 = vadd.f32 1.0, %v1836_v28  ;;  %v1808_v32 = vmul.f32 %v9340_v18, %v1805_v27 }
 0xa1a   :  { %v1834_v34 = vsub.f32 0.0, %v1825_v29  ;;  %v1842_v35 = vmul.f32 %v1839_v31, %v1827_v30  ;;  %v1823_v59 = vmul.f32 %v9346_v33, %v1808_v32  ;;  %2635 = vrot.lane.b32.xlu1 %v10398_v25, %s12253_s8  ;;  %2629 = vrot.lane.b32.xlu0 %v10398_v25, %s12254_s13 }
 0xa1c   :  { %v1837_v36 = vsel %vm1831_vm0, %v1834_v34, %v1825_v29  ;;  %v1826_v9 = vsub.f32 1.0, %v1823_v59  ;;  %8616 = vmatmul.mubr.msk.f32.vlgmr.msra.gmra.mxu1 %vm1860_vm4, %v1842_v35  ;;  %vm12264_vm0 = vcmask 254144  }
 0xa1d   :  { %v1840_v38 = vadd.f32 1.0, %v1837_v36  ;;  %8618 = vmatprep.mubr.msk.f32.mxu1 %vm9585_vm3, %v9584_v39 }
 0xa1e   :  { %v1835_v43 = vsub.f32 0.0, %v1826_v9  ;;  %2899 = vrot.lane.b32.xlu1 %v10435_v40, %s12255_s6  ;;  %2631 = vrot.lane.b32.xlu0 %v10394_v42, %s12254_s13 }
 0xa1f   :  { %v1843_v1 = vmul.f32 %v1840_v38, %v1828_v37 }
 0xa20   :  { %v1838_v61 = vsel %vm1832_vm5, %v1835_v43, %v1826_v9  ;;  %vm12265_vm5 = vcmask 785408  }
 0xa21   :  { %8619 = vmatmul.mubr.msk.f32.gmra.mxu1 %vm1860_vm4, %v1843_v1  ;;  %v1841_v46 = vadd.f32 1.0, %v1838_v61 }
 0xa22   :  { %8621 = vmatprep.mubr.msk.f32.mxu1 %vm9585_vm3, %v9584_v39  ;;  %2897 = vrot.lane.b32.xlu1 %v10394_v42, %s12255_s6 }
 0xa23   :  { %2633 = vrot.lane.b32.xlu0 %v10416_v10, %s12254_s13  ;;  %v1844_v22 = vmul.f32 %v1841_v46, %v1829_v44 }
 0xa25   :  { %8622 = vmatmul.mubr.msk.f32.gmra.mxu1 %vm1860_vm4, %v1844_v22 }
 0xa26   :  { %2895 = vrot.lane.b32.xlu1 %v10398_v25, %s12255_s6  ;;  %8647 = vmatprep.mubr.msk.f32.mxu1 %vm9585_vm3, %v9584_v39 }
 0xa27   :  { %2889 = vrot.lane.b32.xlu0 %v10398_v25, %s12256_s7 }
 0xa2a   :  { %2891 = vrot.lane.b32.xlu1 %v10394_v42, %s12256_s7 }
 0xa2b   :  { %2893 = vrot.lane.b32.xlu0 %v10435_v40, %s12256_s7 }
 0xa2e   :  { %2261 = vrot.lane.b32.xlu1 %v10398_v25, %s12257_s10 }
 0xa2f   :  { %2263 = vrot.lane.b32.xlu0 %v10394_v42, %s12257_s10 }
 0xa32   :  { %2265 = vrot.lane.b32.xlu1 %v10400_v52, %s12257_s10 }
 0xa36   :  { %2513 = vrot.lane.b32.xlu1 %v10406_v56, %s12258_s29 }
 0xa74   :  { %v2130_v2 = vpop.permute.xlu1 %2129 }
 0xa78   :  { %v2128_v12 = vpop.permute.xlu1 %2127  ;;  %v2132_v47 = vpop.permute.xlu0 %2131 }
 0xa79   :  { %8642 = vmatpush3.xpose.msk.msra.mxu1 %vm478_vm6, %v2132_v47 }
 0xa7a   :  { %8643 = vmatprep.subr.mxu1 %v9584_v39 }
 0xa7c   :  { %v2380_v23 = vpop.permute.xlu1 %2379  ;;  %v2378_v41 = vpop.permute.xlu0 %2377 }
 0xa7d   :  { %8644 = vmatpush3.xpose.msk.msra.mxu1 %vm478_vm6, %v2130_v2 }
 0xa7e   :  { %8645 = vmatprep.subr.mxu1 %v9584_v39 }
 0xa80   :  { %v2376_v49 = vpop.permute.xlu1 %2375  ;;  %v2370_v50 = vpop.permute.xlu0 %2369 }
 0xa81   :  { %8646 = vmatpush3.xpose.msk.msra.mxu1 %vm478_vm6, %v2128_v12 }
 0xa82   :  { %8671 = vmatprep.subr.mxu1 %v9584_v39 }
 0xa84   :  { %v2640_v18 = vpop.permute.xlu1 %2639  ;;  %8648 = vmatmul.mubr.msk.f32.vlgmr.msra.gmra.mxu1 %vm478_vm6, %v10398_v25  ;;  %v2372_v48 = vpop.permute.xlu0 %2371 }
 0xa85   :  { %8672 = vmatpush3.xpose.msk.msra.mxu1 %vm478_vm6, %v2380_v23  ;;  %8650 = vmatprep.mubr.msk.f32.mxu1 %vm9585_vm3, %v9584_v39 }
 0xa86   :  { %8673 = vmatprep.subr.mxu1 %v9584_v39 }
 0xa88   :  { %v2638_v54 = vpop.permute.xlu1 %2637  ;;  %8651 = vmatmul.mubr.msk.f32.gmra.mxu1 %vm478_vm6, %v10394_v42  ;;  %v2374_v19 = vpop.permute.xlu0 %2373 }
 0xa89   :  { %8674 = vmatpush3.xpose.msk.msra.mxu1 %vm478_vm6, %v2378_v41  ;;  %8653 = vmatprep.mubr.msk.f32.mxu1 %vm9585_vm3, %v9584_v39 }
 0xa8a   :  { %8675 = vmatprep.subr.mxu1 %v9584_v39 }
 0xa8c   :  { %v2636_v45 = vpop.permute.xlu1 %2635  ;;  %8654 = vmatmul.mubr.msk.f32.gmra.mxu1 %vm478_vm6, %v10400_v52  ;;  %v2630_v51 = vpop.permute.xlu0 %2629 }
 0xa8d   :  { %8676 = vmatpush3.xpose.msk.msra.mxu1 %vm478_vm6, %v2376_v49  ;;  %8677 = vmatprep.mubr.msk.f32.mxu1 %vm9585_vm3, %v9584_v39 }
 0xa8e   :  { %8701 = vmatprep.subr.mxu1 %v9584_v39 }
 0xa90   :  { %v2900_v55 = vpop.permute.xlu1 %2899  ;;  %8678 = vmatmul.mubr.msk.f32.vlgmr.msra.gmra.mxu1 %vm478_vm6, %v2370_v50  ;;  %v2632_v56 = vpop.permute.xlu0 %2631 }
 0xa91   :  { %8702 = vmatpush3.xpose.msk.msra.mxu1 %vm478_vm6, %v2640_v18  ;;  %8680 = vmatprep.mubr.msk.f32.mxu1 %vm9585_vm3, %v9584_v39 }
 0xa92   :  { %8703 = vmatprep.subr.mxu1 %v9584_v39 }
 0xa94   :  { %v2898_v52 = vpop.permute.xlu1 %2897  ;;  %8681 = vmatmul.mubr.msk.f32.gmra.mxu1 %vm478_vm6, %v2372_v48 }
 0xa95   :  { %v2634_v53 = vpop.permute.xlu0 %2633  ;;  %8704 = vmatpush3.xpose.msk.msra.mxu1 %vm478_vm6, %v2638_v54  ;;  %8683 = vmatprep.mubr.msk.f32.mxu1 %vm9585_vm3, %v9584_v39 }
 0xa96   :  { %8705 = vmatprep.subr.mxu1 %v9584_v39 }
 0xa98   :  { %v2896_v57 = vpop.permute.xlu1 %2895  ;;  %8684 = vmatmul.mubr.msk.f32.gmra.mxu1 %vm478_vm6, %v2374_v19 }
 0xa99   :  { %8706 = vmatpush3.xpose.msk.msra.mxu1 %vm478_vm6, %v2636_v45  ;;  %8707 = vmatprep.mubr.msk.f32.mxu1 %vm9585_vm3, %v9584_v39  ;;  %v2890_v58 = vpop.permute.xlu0 %2889 }
 0xa9a   :  { %8731 = vmatprep.subr.mxu1 %v9584_v39 }
 0xa9c   :  { %v2892_v11 = vpop.permute.xlu1 %2891  ;;  %8708 = vmatmul.mubr.msk.f32.vlgmr.msra.gmra.mxu1 %vm478_vm6, %v2630_v51 }
 0xa9d   :  { %8732 = vmatpush3.xpose.msk.msra.mxu1 %vm478_vm6, %v2900_v55  ;;  %8710 = vmatprep.mubr.msk.f32.mxu1 %vm9585_vm3, %v9584_v39  ;;  %v2894_v14 = vpop.permute.xlu0 %2893 }
 0xa9e   :  { %8733 = vmatprep.subr.mxu1 %v9584_v39 }
 0xaa0   :  { %v2262_v60 = vpop.permute.xlu1 %2261  ;;  %8711 = vmatmul.mubr.msk.f32.gmra.mxu1 %vm478_vm6, %v2632_v56 }
 0xaa1   :  { %8734 = vmatpush3.xpose.msk.msra.mxu1 %vm478_vm6, %v2898_v52  ;;  %8713 = vmatprep.mubr.msk.f32.mxu1 %vm9585_vm3, %v9584_v39  ;;  %v2264_v0 = vpop.permute.xlu0 %2263 }
 0xaa2   :  { %8735 = vmatprep.subr.mxu1 %v9584_v39 }
 0xaa4   :  { %v2266_v63 = vpop.permute.xlu1 %2265  ;;  %8714 = vmatmul.mubr.msk.f32.gmra.mxu1 %vm478_vm6, %v2634_v53 }
 0xaa5   :  { %8657 = vmatpush3.msk.msra.mxu0 %vm626_vm7, %v2266_v63  ;;  %8736 = vmatpush3.xpose.msk.msra.mxu1 %vm478_vm6, %v2896_v57 }
 0xaa6   :  { %8658 = vmatprep.subr.mxu0 %v9584_v39  ;;  %8737 = vmatprep.mubr.msk.f32.mxu1 %vm9585_vm3, %v9584_v39 }
 0xaa7   :  { %8659 = vmatpush3.msra.mxu0 %v2264_v0  ;;  %8761 = vmatprep.subr.mxu1 %v9584_v39 }
 0xaa8   :  { %8660 = vmatprep.subr.mxu0 %v9584_v39  ;;  %8738 = vmatmul.mubr.msk.f32.vlgmr.msra.gmra.mxu1 %vm478_vm6, %v2890_v58 }
 0xaa9   :  { %8661 = vmatpush3.msra.mxu0 %v2262_v60  ;;  %8740 = vmatprep.mubr.msk.f32.mxu1 %vm9585_vm3, %v9584_v39 }
 0xaaa   :  { %8686 = vmatprep.subr.mxu0 %v9584_v39 }
 0xaac   :  { %8741 = vmatmul.mubr.msk.f32.gmra.mxu1 %vm478_vm6, %v2892_v11 }
 0xaad   :  { %8743 = vmatprep.mubr.msk.f32.mxu1 %vm9585_vm3, %v9584_v39 }
 0xab0   :  { %8744 = vmatmul.mubr.msk.f32.gmra.mxu1 %vm478_vm6, %v2894_v14 }
 0xab1   :  { %8769 = vmatprep.mubr.msk.f32.mxu1 %vm9585_vm3, %v9584_v39 }
 0xadc   :  { %v1936_v4 = vpop.f32.mrf.mxu1 }
 0xadd   :  { %v1937_v5 = vadd.f32 %v7793_v62, %v1936_v4 }
 0xade   :  { %v8617_v7 = vpop.f32.mrf.mxu1 }
 0xadf   :  { %v1950_v8 = vadd.f32 %v1937_v5, %v10219_v3  ;;  %v10601_v5 = vpop.permute.xlu1 %2513 }
 0xae1   :  { %v1941_v13 = vpop.f32.mrf.mxu1  ;;  %1953 = vst.msk [vmem:[#allocation2] sm:$0xff] %vm190_vm2, %v1950_v8 }
 0xae2   :  { %v1942_v15 = vadd.f32 %v7793_v62, %v1941_v13 }
 0xae3   :  { %v8620_v16 = vpop.f32.mrf.mxu1 }
 0xae4   :  { %v1951_v20 = vadd.f32 %v1942_v15, %v10223_v6 }
 0xae5   :  { %v1946_v21 = vpop.f32.mrf.mxu1 }
 0xae6   :  { %1954 = vst.msk [vmem:[#allocation2 + $0x8] sm:$0xff] %vm190_vm2, %v1951_v20  ;;  %v1947_v24 = vadd.f32 %v7793_v62, %v1946_v21 }
 0xae7   :  { %v8623_v26 = vpop.f32.mrf.mxu1 }
 0xae8   :  { %v1952_v27 = vadd.f32 %v1947_v24, %v10227_v17 }
 0xaea   :  { %1955 = vst.msk [vmem:[#allocation2 + $0x10] sm:$0x1] %vm184_vm1, %v1952_v27 }
 0xb44   :  { %v2211_v28 = vpop.f32.mrf.mxu1 }
 0xb45   :  { %v10547_v29 = vmul.f32 0.35355338, %v2211_v28 }
 0xb46   :  { %v8649_v3 = vpop.f32.mrf.mxu1 }
 0xb47   :  { %v2228_v30 = vsel %vm574_vm8, %v10547_v29, -inf }
 0xb48   :  { %2229 = vmax.xlane.f32.xlu1 %v2228_v30  ;;  %v2216_v31 = vpop.f32.mrf.mxu1 }
 0xb49   :  { %v10551_v32 = vmul.f32 0.35355338, %v2216_v31 }
 0xb4a   :  { %v8652_v6 = vpop.f32.mrf.mxu1 }
 0xb4b   :  { %v2231_v33 = vsel %vm574_vm8, %v10551_v32, -inf }
 0xb4c   :  { %2232 = vmax.xlane.f32.xlu0 %v2231_v33  ;;  %v2221_v34 = vpop.f32.mrf.mxu1 }
 0xb4d   :  { %v10555_v17 = vmul.f32 0.35355338, %v2221_v34 }
 0xb4e   :  { %v8655_v35 = vpop.f32.mrf.mxu1 }
 0xb4f   :  { %v2234_v59 = vsel %vm581_vm9, %v10555_v17, -inf }
 0xb50   :  { %2235 = vmax.xlane.f32.xlu0 %v2234_v59  ;;  %v2459_v36 = vpop.f32.mrf.mxu1 }
 0xb51   :  { %v10559_v37 = vmul.f32 0.35355338, %v2459_v36 }
 0xb52   :  { %v8679_v38 = vpop.f32.mrf.mxu1 }
 0xb53   :  { %v2476_v9 = vsel %vm574_vm8, %v10559_v37, -inf }
 0xb54   :  { %2477 = vmax.xlane.f32.xlu0 %v2476_v9  ;;  %v2464_v1 = vpop.f32.mrf.mxu1 }
 0xb55   :  { %v10563_v43 = vmul.f32 0.35355338, %v2464_v1 }
 0xb56   :  { %v8682_v61 = vpop.f32.mrf.mxu1 }
 0xb57   :  { %v2479_v44 = vsel %vm574_vm8, %v10563_v43, -inf }
 0xb58   :  { %2480 = vmax.xlane.f32.xlu1 %v2479_v44  ;;  %v2469_v46 = vpop.f32.mrf.mxu1 }
 0xb59   :  { %v10567_v22 = vmul.f32 0.35355338, %v2469_v46 }
 0xb5a   :  { %v8685_v2 = vpop.f32.mrf.mxu1 }
 0xb5b   :  { %v2482_v12 = vsel %vm581_vm9, %v10567_v22, -inf }
 0xb5c   :  { %2483 = vmax.xlane.f32.xlu0 %v2482_v12  ;;  %v2719_v47 = vpop.f32.mrf.mxu1 }
 0xb5d   :  { %v10571_v23 = vmul.f32 0.35355338, %v2719_v47 }
 0xb5e   :  { %v8709_v41 = vpop.f32.mrf.mxu1 }
 0xb5f   :  { %v2736_v49 = vsel %vm574_vm8, %v10571_v23, -inf }
 0xb60   :  { %2737 = vmax.xlane.f32.xlu1 %v2736_v49  ;;  %v2724_v50 = vpop.f32.mrf.mxu1 }
 0xb61   :  { %v10575_v18 = vmul.f32 0.35355338, %v2724_v50 }
 0xb62   :  { %v8712_v48 = vpop.f32.mrf.mxu1 }
 0xb63   :  { %v2739_v54 = vsel %vm574_vm8, %v10575_v18, -inf }
 0xb64   :  { %2740 = vmax.xlane.f32.xlu0 %v2739_v54  ;;  %v2729_v19 = vpop.f32.mrf.mxu1 }
 0xb65   :  { %v10579_v45 = vmul.f32 0.35355338, %v2729_v19 }
 0xb66   :  { %v8715_v51 = vpop.f32.mrf.mxu1 }
 0xb67   :  { %v2742_v55 = vsel %vm581_vm9, %v10579_v45, -inf }
 0xb68   :  { %2743 = vmax.xlane.f32.xlu1 %v2742_v55  ;;  %v2979_v56 = vpop.f32.mrf.mxu1 }
 0xb69   :  { %v10583_v52 = vmul.f32 0.35355338, %v2979_v56 }
 0xb6a   :  { %v8739_v53 = vpop.f32.mrf.mxu1 }
 0xb6b   :  { %v2996_v57 = vsel %vm574_vm8, %v10583_v52, -inf }
 0xb6c   :  { %2997 = vmax.xlane.f32.xlu0 %v2996_v57  ;;  %v2984_v58 = vpop.f32.mrf.mxu1 }
 0xb6d   :  { %v10593_v63 = vmul.f32 0.35355338, %v2984_v58 }
 0xb6e   :  { %v8742_v11 = vpop.f32.mrf.mxu1 }
 0xb6f   :  { %v2999_v62 = vsel %vm574_vm8, %v10593_v63, -inf }
 0xb70   :  { %v2989_v14 = vpop.f32.mrf.mxu1 }
 0xb71   :  { %v10595_v0 = vmul.f32 0.35355338, %v2989_v14 }
 0xb72   :  { %v8745_v60 = vpop.f32.mrf.mxu1 }
 0xb73   :  { %v3002_v4 = vsel %vm581_vm9, %v10595_v0, -inf }
 0xb79   :  { %2509 = vrot.lane.b32.xlu1 %v10398_v25, %s12258_s29 }
 0xb7d   :  { %2773 = vrot.lane.b32.xlu1 %v10416_v10, %s12259_s26 }
 0xb82   :  { %2511 = vrot.lane.b32.xlu0 %v10394_v42, %s12258_s29 }
 0xba1   :  { %3000 = vmax.xlane.f32.xlu1 %v2999_v62  ;;  %3003 = vmax.xlane.f32.xlu0 %v3002_v4 }
 0xbd1   :  { %v2230_v7 = vpop.xlane.xlu1 %2229 }
 0xbd2   :  { %v2237_v10 = vsub.f32 %v10547_v29, %v2230_v7 }
 0xbd4   :  { %v2240_v8 = vmul.f32 1.442695, %v2237_v10 }
 0xbd5   :  { %v2233_v13 = vpop.xlane.xlu0 %2232 }
 0xbd6   :  { %9347 = vpow2.f32 %v2240_v8  ;;  %v2238_v15 = vsub.f32 %v10551_v32, %v2233_v13 }
 0xbd8   :  { %v2242_v16 = vmul.f32 1.442695, %v2238_v15 }
 0xbd9   :  { %v2236_v27 = vpop.xlane.xlu0 %2235 }
 0xbda   :  { %9349 = vpow2.f32 %v2242_v16  ;;  %v2239_v28 = vsub.f32 %v10555_v17, %v2236_v27 }
 0xbdc   :  { %v2244_v31 = vmul.f32 1.442695, %v2239_v28 }
 0xbdd   :  { %v2478_v29 = vpop.xlane.xlu0 %2477 }
 0xbde   :  { %v2485_v30 = vsub.f32 %v10559_v37, %v2478_v29  ;;  %9351 = vpow2.f32 %v2244_v31 }
 0xbe0   :  { %v2488_v33 = vmul.f32 1.442695, %v2485_v30 }
 0xbe1   :  { %v2481_v3 = vpop.xlane.xlu1 %2480 }
 0xbe2   :  { %v2486_v32 = vsub.f32 %v10563_v43, %v2481_v3  ;;  %9353 = vpow2.f32 %v2488_v33 }
 0xbe3   :  { %v10605_v20 = vpop.eup %9347 }
 0xbe4   :  { %v2246_v21 = vsel %vm574_vm8, %v10605_v20, 0.0  ;;  %v2490_v34 = vmul.f32 1.442695, %v2486_v32 }
 0xbe5   :  { %2247 = vadd.xlane.f32.xlu1 %v2246_v21  ;;  %v2484_v6 = vpop.xlane.xlu0 %2483 }
 0xbe6   :  { %v2487_v35 = vsub.f32 %v10567_v22, %v2484_v6  ;;  %9355 = vpow2.f32 %v2490_v34 }
 0xbe7   :  { %v10609_v24 = vpop.eup %9349 }
 0xbe8   :  { %v2249_v26 = vsel %vm574_vm8, %v10609_v24, 0.0  ;;  %v2492_v36 = vmul.f32 1.442695, %v2487_v35 }
 0xbe9   :  { %2250 = vadd.xlane.f32.xlu0 %v2249_v26  ;;  %v2738_v59 = vpop.xlane.xlu1 %2737 }
 0xbea   :  { %v2745_v38 = vsub.f32 %v10571_v23, %v2738_v59  ;;  %9357 = vpow2.f32 %v2492_v36 }
 0xbeb   :  { %v10624_v46 = vpop.eup %9351 }
 0xbec   :  { %v2748_v1 = vmul.f32 1.442695, %v2745_v38  ;;  %v2252_v12 = vsel %vm581_vm9, %v10624_v46, 0.0 }
 0xbed   :  { %v2741_v17 = vpop.xlane.xlu0 %2740 }
 0xbee   :  { %9359 = vpow2.f32 %v2748_v1  ;;  %v2746_v14 = vsub.f32 %v10575_v18, %v2741_v17 }
 0xbef   :  { %v10626_v22 = vpop.eup %9353 }
 0xbf0   :  { %v2494_v41 = vsel %vm574_vm8, %v10626_v22, 0.0  ;;  %v2750_v4 = vmul.f32 1.442695, %v2746_v14 }
 0xbf1   :  { %v2744_v9 = vpop.xlane.xlu1 %2743 }
 0xbf2   :  { %v2747_v37 = vsub.f32 %v10579_v45, %v2744_v9 }
 0xbf3   :  { %v10630_v47 = vpop.eup %9355 }
 0xbf4   :  { %v2752_v43 = vmul.f32 1.442695, %v2747_v37  ;;  %v2497_v23 = vsel %vm574_vm8, %v10630_v47, 0.0 }
 0xbf5   :  { %v2998_v61 = vpop.xlane.xlu0 %2997  ;;  %v2510_v58 = vpop.permute.xlu1 %2509 }
 0xbf6   :  { %2769 = vrot.lane.b32.xlu1 %v10398_v25, %s12259_s26  ;;  %v3005_v44 = vsub.f32 %v10583_v52, %v2998_v61  ;;  %9361 = vpow2.f32 %v2752_v43 }
 0xbf7   :  { %v10636_v49 = vpop.eup %9357 }
 0xbf8   :  { %v3008_v2 = vmul.f32 1.442695, %v3005_v44  ;;  %v2500_v50 = vsel %vm581_vm9, %v10636_v49, 0.0 }
 0xbf9   :  { %v2512_v45 = vpop.permute.xlu0 %2511  ;;  %v2774_v11 = vpop.permute.xlu1 %2773 }
 0xbfa   :  { %9363 = vpow2.f32 %v3008_v2 }
 0xbfb   :  { %v10640_v48 = vpop.eup %9359 }
 0xbfc   :  { %v2754_v54 = vsel %vm574_vm8, %v10640_v48, 0.0 }
 0xbff   :  { %2771 = vrot.lane.b32.xlu0 %v10394_v42, %s12259_s26 }
 0xc03   :  { %v10644_v19 = vpop.eup %9361 }
 0xc04   :  { %v2760_v51 = vsel %vm581_vm9, %v10644_v19, 0.0 }
 0xc07   :  { %v10648_v55 = vpop.eup %9363 }
 0xc08   :  { %v3014_v57 = vsel %vm574_vm8, %v10648_v55, 0.0 }
 0xc1a   :  { %2253 = vadd.xlane.f32.xlu1 %v2252_v12 }
 0xc1e   :  { %2498 = vadd.xlane.f32.xlu1 %v2497_v23  ;;  %2495 = vadd.xlane.f32.xlu0 %v2494_v41 }
 0xc22   :  { %2501 = vadd.xlane.f32.xlu0 %v2500_v50 }
 0xc26   :  { %2755 = vadd.xlane.f32.xlu0 %v2754_v54 }
 0xc2a   :  { %2761 = vadd.xlane.f32.xlu0 %v2760_v51  ;;  %v3004_v56 = vpop.xlane.xlu0 %3003  ;;  %v3001_v60 = vpop.xlane.xlu1 %3000 }
 0xc2b   :  { %v3007_v52 = vsub.f32 %v10595_v0, %v3004_v56  ;;  %v3006_v7 = vsub.f32 %v10593_v63, %v3001_v60 }
 0xc2d   :  { %v3012_v53 = vmul.f32 1.442695, %v3007_v52  ;;  %v3010_v10 = vmul.f32 1.442695, %v3006_v7  ;;  %v3148_v7 = vld [vmem:[%s12248_s0 + $0x10] sm:$0xff] }
 0xc2e   :  { %3015 = vadd.xlane.f32.xlu0 %v3014_v57 }
 0xc2f   :  { %3033 = vrot.lane.b32.xlu1 %v10435_v40, %s12260_s27  ;;  %9365 = vpow2.f32 %v3012_v53 }
 0xc30   :  { %9367 = vpow2.f32 %v2750_v4  ;;  %v3149_v4 = vld [vmem:[%s12248_s0 + $0x18] sm:$0xff] }
 0xc31   :  { %9369 = vpow2.f32 %v3010_v10  ;;  %8762 = vmatpush3.msra.mxu1 %v3149_v4  ;;  %v3147_v10 = vld [vmem:[%s12248_s0 + $0x8] sm:$0xff] }
 0xc32   :  { %8763 = vmatprep.subr.mxu1 %v9584_v39 }
 0xc33   :  { %8764 = vmatpush3.msra.mxu1 %v3148_v7 }
 0xc34   :  { %8765 = vmatprep.subr.mxu1 %v9584_v39 }
 0xc35   :  { %8766 = vmatpush3.msra.mxu1 %v3147_v10 }
 0xc36   :  { %8767 = vmatprep.subr.mxu1 %v9584_v39 }
 0xc3c   :  { %v10656_v62 = vpop.eup %9365 }
 0xc3d   :  { %v3020_v0 = vsel %vm581_vm9, %v10656_v62, 0.0  ;;  %v10661_v8 = vpop.eup %9367 }
 0xc3e   :  { %3021 = vadd.xlane.f32.xlu0 %v3020_v0  ;;  %v2757_v40 = vsel %vm574_vm8, %v10661_v8, 0.0  ;;  %v10665_v13 = vpop.eup %9369 }
 0xc3f   :  { %v3017_v18 = vsel %vm574_vm8, %v10665_v13, 0.0 }
 0xc53   :  { %2758 = vadd.xlane.f32.xlu1 %v2757_v40 }
 0xc54   :  { %3029 = vrot.lane.b32.xlu0 %v10398_v25, %s12260_s27 }
 0xc57   :  { %3018 = vadd.xlane.f32.xlu1 %v3017_v18 }
 0xc68   :  { %3031 = vrot.lane.b32.xlu1 %v10394_v42, %s12260_s27  ;;  %s12281_s27 = sld [smem:[#allocation18_spill]] }
 0xc6e   :  { %v2248_v63 = vpop.xlane.xlu1 %2247 }
 0xc6f   :  { %9371 = vrcp.f32 %v2248_v63 }
 0xc72   :  { %v2251_v15 = vpop.xlane.xlu0 %2250  ;;  %v2770_v25 = vpop.permute.xlu1 %2769 }
 0xc73   :  { %9373 = vrcp.f32 %v2251_v15 }
 0xc7c   :  { %v9372_v16 = vpop.eup %9371 }
 0xc7d   :  { %v2258_v21 = vmul.f32 %v9372_v16, %v10605_v20 }
 0xc7f   :  { %8663 = vmatmul.mubr.msk.f32.vlgmr.msra.gmra.mxu0 %vm574_vm8, %v2258_v21 }
 0xc80   :  { %v9374_v26 = vpop.eup %9373  ;;  %8687 = vmatpush3.msk.msra.mxu0 %vm626_vm7, %v10601_v5  ;;  %8665 = vmatprep.mubr.msk.f32.mxu0 %vm9585_vm3, %v9584_v39  ;;  %v2772_v5 = vpop.permute.xlu0 %2771 }
 0xc81   :  { %8688 = vmatprep.subr.mxu0 %v9584_v39  ;;  %v2259_v42 = vmul.f32 %v9374_v26, %v10609_v24 }
 0xc82   :  { %8689 = vmatpush3.msra.mxu0 %v2512_v45 }
 0xc83   :  { %8690 = vmatprep.subr.mxu0 %v9584_v39  ;;  %8666 = vmatmul.mubr.msk.f32.gmra.mxu0 %vm574_vm8, %v2259_v42 }
 0xc84   :  { %8691 = vmatpush3.msra.mxu0 %v2510_v58  ;;  %8668 = vmatprep.mubr.msk.f32.mxu0 %vm9585_vm3, %v9584_v39 }
 0xc85   :  { %8716 = vmatprep.subr.mxu0 %v9584_v39 }
 0xca3   :  { %v2254_v20 = vpop.xlane.xlu1 %2253 }
 0xca4   :  { %9375 = vrcp.f32 %v2254_v20 }
 0xca7   :  { %v2496_v27 = vpop.xlane.xlu0 %2495  ;;  %v2499_v28 = vpop.xlane.xlu1 %2498 }
 0xca8   :  { %9377 = vrcp.f32 %v2496_v27 }
 0xca9   :  { %9379 = vrcp.f32 %v2499_v28 }
 0xcab   :  { %v2502_v24 = vpop.xlane.xlu0 %2501  ;;  %v3034_v38 = vpop.permute.xlu1 %3033 }
 0xcac   :  { %9381 = vrcp.f32 %v2502_v24 }
 0xcaf   :  { %v2756_v29 = vpop.xlane.xlu0 %2755 }
 0xcb0   :  { %9383 = vrcp.f32 %v2756_v29 }
 0xcb1   :  { %v9376_v3 = vpop.eup %9375 }
 0xcb2   :  { %v2260_v30 = vmul.f32 %v9376_v3, %v10624_v46 }
 0xcb3   :  { %v2762_v17 = vpop.xlane.xlu0 %2761 }
 0xcb4   :  { %8669 = vmatmul.mubr.msk.f32.gmra.mxu0 %vm574_vm8, %v2260_v30 }
 0xcb5   :  { %8692 = vmatprep.mubr.msk.f32.mxu0 %vm9585_vm3, %v9584_v39  ;;  %v9378_v31 = vpop.eup %9377 }
 0xcb6   :  { %v2506_v32 = vmul.f32 %v9378_v31, %v10626_v22  ;;  %v9380_v6 = vpop.eup %9379 }
 0xcb7   :  { %v2507_v33 = vmul.f32 %v9380_v6, %v10630_v47  ;;  %v3016_v9 = vpop.xlane.xlu0 %3015 }
 0xcb8   :  { %8693 = vmatmul.mubr.msk.f32.vlgmr.msra.gmra.mxu0 %vm574_vm8, %v2506_v32 }
 0xcb9   :  { %8717 = vmatpush3.msk.msra.mxu0 %vm626_vm7, %v2774_v11  ;;  %8695 = vmatprep.mubr.msk.f32.mxu0 %vm9585_vm3, %v9584_v39  ;;  %v9382_v34 = vpop.eup %9381 }
 0xcba   :  { %8718 = vmatprep.subr.mxu0 %v9584_v39  ;;  %v2508_v35 = vmul.f32 %v9382_v34, %v10636_v49 }
 0xcbb   :  { %8719 = vmatpush3.msra.mxu0 %v2772_v5 }
 0xcbc   :  { %8720 = vmatprep.subr.mxu0 %v9584_v39  ;;  %8696 = vmatmul.mubr.msk.f32.gmra.mxu0 %vm574_vm8, %v2507_v33  ;;  %v7843_v33 = vld [vmem:[%s12249_s9] ss:$0 sm:$0xff] }
 0xcbd   :  { %8721 = vmatpush3.msra.mxu0 %v2770_v25  ;;  %8698 = vmatprep.mubr.msk.f32.mxu0 %vm9585_vm3, %v9584_v39  ;;  %v9384_v59 = vpop.eup %9383 }
 0xcbe   :  { %8746 = vmatprep.subr.mxu0 %v9584_v39  ;;  %v2766_v36 = vmul.f32 %v9384_v59, %v10640_v48 }
 0xcc0   :  { %8699 = vmatmul.mubr.msk.f32.gmra.mxu0 %vm574_vm8, %v2508_v35 }
 0xcc1   :  { %8722 = vmatprep.mubr.msk.f32.mxu0 %vm9585_vm3, %v9584_v39 }
 0xcc4   :  { %8723 = vmatmul.mubr.msk.f32.vlgmr.msra.gmra.mxu0 %vm574_vm8, %v2766_v36  ;;  %v9574_v36 = vld [vmem:[#allocation2 + $0x18] sm:$0xff] }
 0xcc5   :  { %8747 = vmatpush3.msk.msra.mxu0 %vm626_vm7, %v3034_v38  ;;  %8725 = vmatprep.mubr.msk.f32.mxu0 %vm9585_vm3, %v9584_v39 }
 0xcc6   :  { %8748 = vmatprep.subr.mxu0 %v9584_v39 }
 0xcc7   :  { %v3022_v37 = vpop.xlane.xlu0 %3021 }
 0xccb   :  { %v3030_v44 = vpop.permute.xlu0 %3029 }
 0xcdc   :  { %v2759_v1 = vpop.xlane.xlu1 %2758 }
 0xcdd   :  { %9385 = vrcp.f32 %v2759_v1 }
 0xcde   :  { %9387 = vrcp.f32 %v2762_v17 }
 0xcdf   :  { %9389 = vrcp.f32 %v3016_v9 }
 0xce0   :  { %v3019_v61 = vpop.xlane.xlu1 %3018 }
 0xce1   :  { %9391 = vrcp.f32 %v3019_v61  ;;  %v9575_v61 = vld [vmem:[#allocation2 + $0x20] sm:$0xff] }
 0xce2   :  { %9393 = vrcp.f32 %v3022_v37 }
 0xce4   :  { %v3032_v43 = vpop.permute.xlu1 %3031 }
 0xce5   :  { %8749 = vmatpush3.msra.mxu0 %v3032_v43 }
 0xce6   :  { %8750 = vmatprep.subr.mxu0 %v9584_v39 }
 0xce7   :  { %8751 = vmatpush3.msra.mxu0 %v3030_v44 }
 0xce8   :  { %8778 = vmatprep.subr.mxu0 %v9584_v39 }
 0xcea   :  { %v9386_v46 = vpop.eup %9385 }
 0xceb   :  { %v2767_v22 = vmul.f32 %v9386_v46, %v10661_v8  ;;  %v9388_v2 = vpop.eup %9387  ;;  %v3146_v8 = vld [vmem:[%s12248_s0] sm:$0xff] }
 0xcec   :  { %v2768_v12 = vmul.f32 %v9388_v2, %v10644_v19  ;;  %v9390_v47 = vpop.eup %9389  ;;  %8768 = vmatpush3.msra.mxu1 %v3146_v8  ;;  %v3601_v2 = vld [vmem:[#allocation2 + $0x10] sm:$0x1] }
 0xced   :  { %8726 = vmatmul.mubr.msk.f32.gmra.mxu0 %vm574_vm8, %v2767_v22  ;;  %v3026_v23 = vmul.f32 %v9390_v47, %v10648_v55  ;;  %8795 = vmatprep.subr.mxu1 %v9584_v39  ;;  %v9576_v47 = vld [vmem:[#allocation2 + $0x28] sm:$0x1] }
 0xcee   :  { %8728 = vmatprep.mubr.msk.f32.mxu0 %vm9585_vm3, %v9584_v39  ;;  %v9392_v41 = vpop.eup %9391 }
 0xcef   :  { %v3027_v49 = vmul.f32 %v9392_v41, %v10665_v13  ;;  %v9394_v50 = vpop.eup %9393  ;;  %v3612_v41 = vsel %vm184_vm1, %v3601_v2, 0.0 }
 0xcf0   :  { %v3028_v48 = vmul.f32 %v9394_v50, %v10656_v62  ;;  %v3599_v50 = vld [vmem:[#allocation2] sm:$0xff] }
 0xcf1   :  { %8729 = vmatmul.mubr.msk.f32.gmra.mxu0 %vm574_vm8, %v2768_v12 }
 0xcf2   :  { %8752 = vmatprep.mubr.msk.f32.mxu0 %vm9585_vm3, %v9584_v39 }
 0xcf5   :  { %8753 = vmatmul.mubr.msk.f32.vlgmr.msra.gmra.mxu0 %vm574_vm8, %v3026_v23 }
 0xcf6   :  { %8755 = vmatprep.mubr.msk.f32.mxu0 %vm9585_vm3, %v9584_v39 }
 0xcf9   :  { %8756 = vmatmul.mubr.msk.f32.gmra.mxu0 %vm574_vm8, %v3027_v49 }
 0xcfa   :  { %8758 = vmatprep.mubr.msk.f32.mxu0 %vm9585_vm3, %v9584_v39 }
 0xcfd   :  { %8759 = vmatmul.mubr.msk.f32.gmra.mxu0 %vm574_vm8, %v3028_v48  ;;  %v3606_v48 = vsel %vm190_vm2, %v3599_v50, 0.0 }
 0xcfe   :  { %8786 = vmatprep.mubr.msk.f32.mxu0 %vm9585_vm3, %v9584_v39 }
 0xd3f   :  { %v2346_v54 = vpop.f32.mrf.mxu0 }
 0xd40   :  { %2360 = vst.msk [vmem:[#allocation4] sm:$0xff] %vm478_vm6, %v2346_v54  ;;  %v3600_v54 = vld [vmem:[#allocation2 + $0x8] sm:$0xff] }
 0xd41   :  { %v8664_v19 = vpop.f32.mrf.mxu0 }
 0xd42   :  { %v3609_v19 = vsel %vm190_vm2, %v3600_v54, 0.0 }
 0xd43   :  { %v2351_v45 = vpop.f32.mrf.mxu0 }
 0xd44   :  { %2361 = vst.msk [vmem:[#allocation4 + $0x8] sm:$0xff] %vm478_vm6, %v2351_v45 }
 0xd45   :  { %v8667_v51 = vpop.f32.mrf.mxu0 }
 0xd74   :  { %v2356_v55 = vpop.f32.mrf.mxu0 }
 0xd75   :  { %2362 = vst.msk [vmem:[#allocation4 + $0x10] sm:$0x1] %vm711_vm10, %v2356_v55 }
 0xd76   :  { %v8670_v56 = vpop.f32.mrf.mxu0 }
 0xd78   :  { %v2594_v52 = vpop.f32.mrf.mxu0 }
 0xd79   :  { %2611 = vrot.lane.b32.xlu1 %v2594_v52, %s12261_s24 }
 0xd7a   :  { %v8694_v53 = vpop.f32.mrf.mxu0 }
 0xd7c   :  { %v2599_v57 = vpop.f32.mrf.mxu0 }
 0xd7d   :  { %2613 = vrot.lane.b32.xlu0 %v2599_v57, %s12261_s24 }
 0xd7e   :  { %v8697_v58 = vpop.f32.mrf.mxu0 }
 0xd80   :  { %v2604_v11 = vpop.f32.mrf.mxu0 }
 0xd82   :  { %v8700_v14 = vpop.f32.mrf.mxu0 }
 0xd84   :  { %v2854_v60 = vpop.f32.mrf.mxu0 }
 0xd85   :  { %2871 = vrot.lane.b32.xlu0 %v2854_v60, %s12262_s25 }
 0xd86   :  { %v8724_v62 = vpop.f32.mrf.mxu0 }
 0xdad   :  { %v2859_v0 = vpop.f32.mrf.mxu0 }
 0xdae   :  { %2873 = vrot.lane.b32.xlu1 %v2859_v0, %s12262_s25 }
 0xdaf   :  { %v8727_v40 = vpop.f32.mrf.mxu0 }
 0xdb1   :  { %v2864_v13 = vpop.f32.mrf.mxu0 }
 0xdb3   :  { %v8730_v18 = vpop.f32.mrf.mxu0 }
 0xdb5   :  { %v3114_v63 = vpop.f32.mrf.mxu0 }
 0xdb6   :  { %3131 = vrot.lane.b32.xlu1 %v3114_v63, %s12263_s19 }
 0xdb7   :  { %v8754_v15 = vpop.f32.mrf.mxu0 }
 0xdb9   :  { %v3119_v16 = vpop.f32.mrf.mxu0 }
 0xdba   :  { %2615 = vrot.lane.b32.xlu1 %v2604_v11, %s12261_s24  ;;  %3133 = vrot.lane.b32.xlu0 %v3119_v16, %s12263_s19 }
 0xdbb   :  { %v8757_v21 = vpop.f32.mrf.mxu0 }
 0xdbd   :  { %v3124_v26 = vpop.f32.mrf.mxu0 }
 0xdbe   :  { %2875 = vrot.lane.b32.xlu0 %v2864_v13, %s12262_s25  ;;  %3135 = vrot.lane.b32.xlu1 %v3124_v26, %s12263_s19 }
 0xdbf   :  { %v8760_v42 = vpop.f32.mrf.mxu0 }
 0xdeb   :  { %v2612_v25 = vpop.permute.xlu1 %2611 }
 0xdec   :  { %2620 = vst.msk [vmem:[#allocation4] sm:$0xff] %vm970_vm11, %v2612_v25 }
 0xdef   :  { %v2614_v5 = vpop.permute.xlu0 %2613 }
 0xdf0   :  { %2621 = vst.msk [vmem:[#allocation4 + $0x8] sm:$0xff] %vm970_vm11, %v2614_v5 }
 0xdf7   :  { %v2872_v20 = vpop.permute.xlu0 %2871 }
 0xdf8   :  { %2880 = vst.msk [vmem:[#allocation4] sm:$0xff] %vm1232_vm12, %v2872_v20 }
 0xe20   :  { %v2874_v27 = vpop.permute.xlu1 %2873 }
 0xe21   :  { %2881 = vst.msk [vmem:[#allocation4 + $0x8] sm:$0xff] %vm1232_vm12, %v2874_v27 }
 0xe28   :  { %v3132_v28 = vpop.permute.xlu1 %3131 }
 0xe29   :  { %3140 = vst.msk [vmem:[#allocation4] sm:$0xff] %vm1494_vm13, %v3132_v28  ;;  %v3311_v28 = vld [vmem:[%s12250_s1 + $0x18] sm:$0xff] }
 0xe2a   :  { %8779 = vmatpush3.msra.mxu0 %v3311_v28  ;;  %v3490_v28 = vld [vmem:[%s12151_s15 + $0x8] sm:$0xff] }
 0xe2b   :  { %8780 = vmatprep.subr.mxu0 %v9584_v39 }
 0xe2c   :  { %v2616_v24 = vpop.permute.xlu1 %2615  ;;  %v3134_v29 = vpop.permute.xlu0 %3133 }
 0xe2d   :  { %2622 = vst.msk [vmem:[#allocation4 + $0x10] sm:$0x1] %vm973_vm14, %v2616_v24  ;;  %v3310_v24 = vld [vmem:[%s12250_s1 + $0x10] sm:$0xff] }
 0xe2e   :  { %3141 = vst.msk [vmem:[#allocation4 + $0x8] sm:$0xff] %vm1494_vm13, %v3134_v29  ;;  %8781 = vmatpush3.msra.mxu0 %v3310_v24  ;;  %v3309_v29 = vld [vmem:[%s12250_s1 + $0x8] sm:$0xff]  ;;  %v3489_v24 = vld [vmem:[%s12151_s15] sm:$0xff] }
 0xe2f   :  { %8782 = vmatprep.subr.mxu0 %v9584_v39 }
 0xe30   :  { %v2876_v3 = vpop.permute.xlu0 %2875  ;;  %v3136_v30 = vpop.permute.xlu1 %3135  ;;  %v3143_v31 = vld [vmem:[#allocation4] sm:$0xff]  ;;  %8783 = vmatpush3.msra.mxu0 %v3309_v29  ;;  %v7849_v29 = vld [vmem:[%s12152_s14] ss:$0 sm:$0xff] }
 0xe31   :  { %2882 = vst.msk [vmem:[#allocation4 + $0x10] sm:$0x1] %vm12212_vm15, %v2876_v3  ;;  %8770 = vmatmul.mubr.msk.f32.vlgmr.msra.gmra.mxu1 %vm190_vm2, %v3143_v31  ;;  %8784 = vmatprep.subr.mxu0 %v9584_v39  ;;  %v3308_v3 = vld [vmem:[%s12250_s1] sm:$0xff]  ;;  %vm12267_vm15 = vcmask 778240  }
 0xe32   :  { %3142 = vst.msk [vmem:[#allocation4 + $0x10] sm:$0x1] %vm12264_vm0, %v3136_v30  ;;  %8772 = vmatprep.mubr.msk.f32.mxu1 %vm9585_vm3, %v9584_v39  ;;  %8785 = vmatpush3.msra.mxu0 %v3308_v3  ;;  %vm12266_vm0 = vmmov %vm12265_vm5 }
 0xe33   :  { %8820 = vmatprep.subr.mxu0 %v9584_v39 }
 0xe35   :  { %v3144_v32 = vld [vmem:[#allocation4 + $0x8] sm:$0xff] }
 0xe36   :  { %8773 = vmatmul.mubr.msk.f32.gmra.mxu1 %vm190_vm2, %v3144_v32 }
 0xe37   :  { %8775 = vmatprep.mubr.msk.f32.mxu1 %vm9585_vm3, %v9584_v39 }
 0xe39   :  { %v3145_v6 = vld [vmem:[#allocation4 + $0x10] sm:$0x1] }
 0xe3a   :  { %8776 = vmatmul.mubr.msk.f32.gmra.mxu1 %vm190_vm2, %v3145_v6 }
 0xe3b   :  { %8811 = vmatprep.mubr.msk.f32.mxu1 %vm9585_vm3, %v9584_v39 }
 0xef1   :  { %v3232_v34 = vpop.f32.mrf.mxu1 }
 0xef2   :  { %v3233_v35 = vadd.f32 %v7843_v33, %v3232_v34 }
 0xef3   :  { %v8771_v59 = vpop.f32.mrf.mxu1 }
 0xef4   :  { %v10783_v38 = vadd.f32 %v9574_v36, %v3233_v35 }
 0xef6   :  { %v3237_v17 = vpop.f32.mrf.mxu1  ;;  %v3251_v1 = vsel %vm190_vm2, %v10783_v38, 0.0 }
 0xef7   :  { %v3238_v9 = vadd.f32 %v7843_v33, %v3237_v17  ;;  %3252 = vadd.xlane.f32.xlu0 %v3251_v1 }
 0xef8   :  { %v8774_v37 = vpop.f32.mrf.mxu1 }
 0xef9   :  { %v10787_v43 = vadd.f32 %v9575_v61, %v3238_v9 }
 0xefa   :  { %v3242_v44 = vpop.f32.mrf.mxu1 }
 0xefb   :  { %v3254_v46 = vsel %vm190_vm2, %v10787_v43, 0.0  ;;  %v3243_v22 = vadd.f32 %v7843_v33, %v3242_v44 }
 0xefc   :  { %3255 = vadd.xlane.f32.xlu1 %v3254_v46  ;;  %v8777_v12 = vpop.f32.mrf.mxu1  ;;  %v7847_v46 = vld [vmem:[%s12149_s11] ss:$0 sm:$0xff] }
 0xefd   :  { %v10791_v23 = vadd.f32 %v9576_v47, %v3243_v22 }
 0xeff   :  { %v3257_v49 = vsel %vm184_vm1, %v10791_v23, 0.0 }
 0xf00   :  { %3613 = vadd.xlane.f32.xlu1 %v3612_v41  ;;  %3258 = vadd.xlane.f32.xlu0 %v3257_v49  ;;  %v7848_v49 = vld [vmem:[%s12150_s12] ss:$0 sm:$0xff] }
 0xf04   :  { %3607 = vadd.xlane.f32.xlu0 %v3606_v48 }
 0xf08   :  { %3610 = vadd.xlane.f32.xlu0 %v3609_v19 }
 0xf80   :  { %v3253_v45 = vpop.xlane.xlu0 %3252 }
 0xf81   :  { %v3260_v51 = vmul.f32 0.03125, %v3253_v45  ;;  %v7864_v45 = vld [vmem:[%s12244_s30 + $0x38] sm:$0xff] }
 0xf83   :  { %v10799_v55 = vsub.f32 %v10783_v38, %v3260_v51 }
 0xf85   :  { %v3256_v56 = vpop.xlane.xlu1 %3255  ;;  %v3266_v53 = vmul.f32 %v10799_v55, %v10799_v55 }
 0xf86   :  { %v3261_v52 = vmul.f32 0.03125, %v3256_v56 }
 0xf87   :  { %v3269_v58 = vsel %vm190_vm2, %v3266_v53, 0.0  ;;  %v7862_v53 = vld [vmem:[%s12244_s30 + $0x28] sm:$0xff] }
 0xf88   :  { %v10804_v57 = vsub.f32 %v10787_v43, %v3261_v52  ;;  %3270 = vadd.xlane.f32.xlu0 %v3269_v58  ;;  %v7861_v58 = vld [vmem:[%s12244_s30 + $0x20] sm:$0xff] }
 0xf89   :  { %v3614_v11 = vpop.xlane.xlu1 %3613  ;;  %v3259_v14 = vpop.xlane.xlu0 %3258 }
 0xf8a   :  { %v3267_v60 = vmul.f32 %v10804_v57, %v10804_v57  ;;  %v3262_v62 = vmul.f32 0.03125, %v3259_v14  ;;  %v3617_v7 = vmul.f32 0.03125, %v3614_v11 }
 0xf8c   :  { %v3272_v4 = vsel %vm190_vm2, %v3267_v60, 0.0  ;;  %v10811_v0 = vsub.f32 %v10791_v23, %v3262_v62  ;;  %v10815_v13 = vsub.f32 %v3601_v2, %v3617_v7  ;;  %v7859_v60 = vld [vmem:[%s12245_s2 + $0x1] ss:$0 sm:$0xff] }
 0xf8d   :  { %3273 = vadd.xlane.f32.xlu1 %v3272_v4  ;;  %v3608_v10 = vpop.xlane.xlu0 %3607  ;;  %v7860_v7 = vld [vmem:[%s12246_s4 + $0x1] ss:$0 sm:$0xff] }
 0xf8e   :  { %v3615_v8 = vmul.f32 0.03125, %v3608_v10  ;;  %v3268_v40 = vmul.f32 %v10811_v0, %v10811_v0  ;;  %v3623_v25 = vmul.f32 %v10815_v13, %v10815_v13 }
 0xf90   :  { %v10817_v18 = vsub.f32 %v3599_v50, %v3615_v8  ;;  %v3275_v63 = vsel %vm184_vm1, %v3268_v40, 0.0  ;;  %v3630_v27 = vsel %vm184_vm1, %v3623_v25, 0.0  ;;  %v3494_v25 = vld [vmem:[%s12151_s15 + $0x28] sm:$0xff] }
 0xf91   :  { %3276 = vadd.xlane.f32.xlu0 %v3275_v63  ;;  %v3611_v15 = vpop.xlane.xlu0 %3610 }
 0xf92   :  { %v3616_v16 = vmul.f32 0.03125, %v3611_v15  ;;  %v3621_v21 = vmul.f32 %v10817_v18, %v10817_v18 }
 0xf94   :  { %v10822_v26 = vsub.f32 %v3600_v54, %v3616_v16  ;;  %v3624_v42 = vsel %vm190_vm2, %v3621_v21, 0.0 }
 0xf95   :  { %3625 = vadd.xlane.f32.xlu1 %v3624_v42 }
 0xf96   :  { %v3622_v5 = vmul.f32 %v10822_v26, %v10822_v26 }
 0xf98   :  { %v3627_v20 = vsel %vm190_vm2, %v3622_v5, 0.0  ;;  %v3493_v5 = vld [vmem:[%s12151_s15 + $0x20] sm:$0xff] }
 0xf99   :  { %3628 = vadd.xlane.f32.xlu0 %v3627_v20  ;;  %3631 = vadd.xlane.f32.xlu1 %v3630_v27  ;;  %v3492_v20 = vld [vmem:[%s12151_s15 + $0x18] sm:$0xff]  ;;  %v3491_v27 = vld [vmem:[%s12151_s15 + $0x10] sm:$0xff] }
0x1011   :  { %v3271_v30 = vpop.xlane.xlu0 %3270 }
0x1012   :  { %v3278_v31 = vmul.f32 0.03125, %v3271_v30 }
0x1014   :  { %v3281_v32 = vadd.f32 1e-12, %v3278_v31 }
0x1016   :  { %v3274_v6 = vpop.xlane.xlu1 %3273  ;;  %9395 = vrsqrt.f32 %v3281_v32 }
0x1017   :  { %v3279_v33 = vmul.f32 0.03125, %v3274_v6 }
0x1019   :  { %v3282_v34 = vadd.f32 1e-12, %v3279_v33 }
0x101a   :  { %v3277_v35 = vpop.xlane.xlu0 %3276 }
0x101b   :  { %9397 = vrsqrt.f32 %v3282_v34  ;;  %v3280_v59 = vmul.f32 0.03125, %v3277_v35 }
0x101d   :  { %v3283_v36 = vadd.f32 1e-12, %v3280_v59 }
0x101e   :  { %v3626_v17 = vpop.xlane.xlu1 %3625 }
0x101f   :  { %9399 = vrsqrt.f32 %v3283_v36  ;;  %v3633_v9 = vmul.f32 0.03125, %v3626_v17 }
0x1021   :  { %v3636_v1 = vadd.f32 1e-12, %v3633_v9 }
0x1022   :  { %v3629_v37 = vpop.xlane.xlu0 %3628  ;;  %v3632_v61 = vpop.xlane.xlu1 %3631 }
0x1023   :  { %v9396_v44 = vpop.eup %9395  ;;  %9401 = vrsqrt.f32 %v3636_v1  ;;  %v3634_v22 = vmul.f32 0.03125, %v3629_v37  ;;  %v3635_v2 = vmul.f32 0.03125, %v3632_v61 }
0x1024   :  { %v3287_v12 = vmul.f32 %v9396_v44, %v10799_v55  ;;  %v7863_v55 = vld [vmem:[%s12244_s30 + $0x30] sm:$0xff] }
0x1025   :  { %v3637_v47 = vadd.f32 1e-12, %v3634_v22  ;;  %v3638_v41 = vadd.f32 1e-12, %v3635_v2 }
0x1026   :  { %v3296_v50 = vmul.f32 %v7847_v46, %v3287_v12 }
0x1027   :  { %9403 = vrsqrt.f32 %v3637_v47 }
0x1028   :  { %v9398_v48 = vpop.eup %9397  ;;  %9405 = vrsqrt.f32 %v3638_v41  ;;  %v3305_v54 = vadd.f32 %v7848_v49, %v3296_v50 }
0x1029   :  { %v3288_v19 = vmul.f32 %v9398_v48, %v10804_v57 }
0x102a   :  { %8787 = vmatmul.mubr.msk.f32.vlgmr.msra.gmra.mxu0 %vm190_vm2, %v3305_v54 }
0x102b   :  { %v3297_v51 = vmul.f32 %v7847_v46, %v3288_v19  ;;  %8789 = vmatprep.mubr.msk.f32.mxu0 %vm9585_vm3, %v9584_v39  ;;  %8821 = vmatpush3.msra.mxu0 %v7864_v45 }
0x102c   :  { %v9400_v56 = vpop.eup %9399  ;;  %8822 = vmatprep.subr.mxu0 %v9584_v39 }
0x102d   :  { %v3306_v52 = vadd.f32 %v7848_v49, %v3297_v51  ;;  %8823 = vmatpush3.msra.mxu0 %v7863_v55  ;;  %v3289_v57 = vmul.f32 %v9400_v56, %v10811_v0 }
0x102e   :  { %8824 = vmatprep.subr.mxu0 %v9584_v39 }
0x102f   :  { %8790 = vmatmul.mubr.msk.f32.gmra.mxu0 %vm190_vm2, %v3306_v52  ;;  %v3298_v11 = vmul.f32 %v7847_v46, %v3289_v57  ;;  %v7866_v46 = vld [vmem:[%s12247_s28 + $0x1] ss:$0 sm:$0xff] }
0x1030   :  { %8792 = vmatprep.mubr.msk.f32.mxu0 %vm9585_vm3, %v9584_v39  ;;  %8825 = vmatpush3.msra.mxu0 %v7862_v53  ;;  %v9402_v14 = vpop.eup %9401 }
0x1031   :  { %8826 = vmatprep.subr.mxu0 %v9584_v39  ;;  %v3642_v62 = vmul.f32 %v9402_v14, %v10817_v18  ;;  %v3307_v4 = vadd.f32 %v7848_v49, %v3298_v11 }
0x1032   :  { %8827 = vmatpush3.msra.mxu0 %v7861_v58 }
0x1033   :  { %8837 = vmatprep.subr.mxu0 %v9584_v39  ;;  %v3651_v0 = vmul.f32 %v7859_v60, %v3642_v62  ;;  %8793 = vmatmul.mubr.msk.f32.gmra.mxu0 %vm190_vm2, %v3307_v4 }
0x1034   :  { %v9404_v10 = vpop.eup %9403  ;;  %8828 = vmatprep.mubr.msk.f32.mxu0 %vm9585_vm3, %v9584_v39 }
0x1035   :  { %v9406_v8 = vpop.eup %9405  ;;  %v3660_v40 = vadd.f32 %v7860_v7, %v3651_v0  ;;  %v3643_v63 = vmul.f32 %v9404_v10, %v10822_v26  ;;  %v3495_v26 = vld [vmem:[%s12151_s15 + $0x30] sm:$0xff] }
0x1036   :  { %v3644_v18 = vmul.f32 %v9406_v8, %v10815_v13  ;;  %v3496_v13 = vld [vmem:[%s12151_s15 + $0x38] sm:$0xff] }
0x1037   :  { %8829 = vmatmul.mubr.msk.f32.vlgmr.msra.gmra.mxu0 %vm190_vm2, %v3660_v40  ;;  %v3652_v15 = vmul.f32 %v7859_v60, %v3643_v63  ;;  %8796 = vmatpush3.msra.mxu1 %v3496_v13 }
0x1038   :  { %8831 = vmatprep.mubr.msk.f32.mxu0 %vm9585_vm3, %v9584_v39  ;;  %v3653_v21 = vmul.f32 %v7859_v60, %v3644_v18  ;;  %8797 = vmatprep.subr.mxu1 %v9584_v39 }
0x1039   :  { %v3661_v16 = vadd.f32 %v7860_v7, %v3652_v15  ;;  %8798 = vmatpush3.msra.mxu1 %v3495_v26 }
0x103a   :  { %v3662_v42 = vadd.f32 %v7860_v7, %v3653_v21  ;;  %8799 = vmatprep.subr.mxu1 %v9584_v39 }
0x103b   :  { %8832 = vmatmul.mubr.msk.f32.gmra.mxu0 %vm190_vm2, %v3661_v16  ;;  %8800 = vmatpush3.msra.mxu1 %v3494_v25 }
0x103c   :  { %8834 = vmatprep.mubr.msk.f32.mxu0 %vm9585_vm3, %v9584_v39  ;;  %8801 = vmatprep.subr.mxu1 %v9584_v39 }
0x103d   :  { %8802 = vmatpush3.msra.mxu1 %v3493_v5 }
0x103e   :  { %8803 = vmatprep.subr.mxu1 %v9584_v39 }
0x103f   :  { %8835 = vmatmul.mubr.msk.f32.gmra.mxu0 %vm190_vm2, %v3662_v42  ;;  %8804 = vmatpush3.msra.mxu1 %v3492_v20 }
0x1040   :  { %8843 = vmatprep.mubr.msk.f32.mxu0 %vm9585_vm3, %v9584_v39  ;;  %8805 = vmatprep.subr.mxu1 %v9584_v39 }
0x1041   :  { %8806 = vmatpush3.msra.mxu1 %v3491_v27 }
0x1042   :  { %8807 = vmatprep.subr.mxu1 %v9584_v39 }
0x1043   :  { %8808 = vmatpush3.msra.mxu1 %v3490_v28 }
0x1044   :  { %8809 = vmatprep.subr.mxu1 %v9584_v39 }
0x1045   :  { %8810 = vmatpush3.msra.mxu1 %v3489_v24 }
0x1046   :  { %8852 = vmatprep.subr.mxu1 %v9584_v39 }
0x10ea   :  { %v3394_v3 = vpop.f32.mrf.mxu0 }
0x10eb   :  { %v10934_v30 = vadd.f32 %v7849_v29, %v3394_v3 }
0x10ec   :  { %v8788_v31 = vpop.f32.mrf.mxu0 }
0x10ed   :  { %v10937_v32 = vmul.f32 0.70710677, %v10934_v30 }
0x10ef   :  { %v3399_v6 = vpop.f32.mrf.mxu0  ;;  %v3411_v33 = vand.u32 2147483647, %v10937_v32 }
0x10f0   :  { %v10940_v34 = vadd.f32 %v7849_v29, %v3399_v6 }
0x10f1   :  { %v8791_v35 = vpop.f32.mrf.mxu0  ;;  %v3414_v59 = vmul.f32 0.3275911, %v3411_v33  ;;  %v3453_v48 = vsub.f32 0.0, %v3411_v33 }
0x10f2   :  { %v10943_v36 = vmul.f32 0.70710677, %v10940_v34 }
0x10f3   :  { %v3417_v17 = vadd.f32 1.0, %v3414_v59  ;;  %v3404_v1 = vpop.f32.mrf.mxu0  ;;  %v3456_v55 = vmul.f32 %v3453_v48, %v3411_v33 }
0x10f4   :  { %v3412_v9 = vand.u32 2147483647, %v10943_v36  ;;  %v10946_v37 = vadd.f32 %v7849_v29, %v3404_v1 }
0x10f5   :  { %9407 = vrcp.f32 %v3417_v17  ;;  %v8794_v44 = vpop.f32.mrf.mxu0  ;;  %v3459_v14 = vmul.f32 1.442695, %v3456_v55 }
0x10f6   :  { %v3415_v61 = vmul.f32 0.3275911, %v3412_v9  ;;  %v10952_v22 = vmul.f32 0.70710677, %v10946_v37  ;;  %v3454_v56 = vsub.f32 0.0, %v3412_v9 }
0x10f7   :  { %v3751_v12 = vpop.f32.mrf.mxu0 }
0x10f8   :  { %v3418_v2 = vadd.f32 1.0, %v3415_v61  ;;  %v3413_v47 = vand.u32 2147483647, %v10952_v22  ;;  %v3752_v41 = vadd.f32 %v7866_v46, %v3751_v12  ;;  %v3457_v60 = vmul.f32 %v3454_v56, %v3412_v9 }
0x10f9   :  { %v8830_v49 = vpop.f32.mrf.mxu0 }
0x10fa   :  { %9409 = vrcp.f32 %v3418_v2  ;;  %v3416_v50 = vmul.f32 0.3275911, %v3413_v47  ;;  %3765 = vst.msk [vmem:[#allocation3] sm:$0xff] %vm12265_vm5, %v3752_v41  ;;  %v3455_v62 = vsub.f32 0.0, %v3413_v47  ;;  %v3461_v40 = vmul.f32 1.442695, %v3457_v60 }
0x10fb   :  { %v3756_v54 = vpop.f32.mrf.mxu0  ;;  %vm3475_vm5 = vcmp.lt.f32.partialorder %v10943_v36, 0.0 }
0x10fc   :  { %v3419_v19 = vadd.f32 1.0, %v3416_v50  ;;  %v3757_v45 = vadd.f32 %v7866_v46, %v3756_v54  ;;  %v3458_v63 = vmul.f32 %v3455_v62, %v3413_v47 }
0x10fd   :  { %v8833_v51 = vpop.f32.mrf.mxu0 }
0x10fe   :  { %9411 = vrcp.f32 %v3419_v19  ;;  %3766 = vst.msk [vmem:[#allocation3 + $0x8] sm:$0xff] %vm12266_vm0, %v3757_v45  ;;  %v3463_v5 = vmul.f32 1.442695, %v3458_v63  ;;  %v3471_v51 = vmul.f32 0.5, %v10934_v30  ;;  %vm3476_vm0 = vcmp.lt.f32.partialorder %v10952_v22, 0.0 }
0x10ff   :  { %v3761_v52 = vpop.f32.mrf.mxu0  ;;  %9413 = vpow2.f32 %v3459_v14 }
0x1100   :  { %v3762_v53 = vadd.f32 %v7866_v46, %v3761_v52  ;;  %9415 = vpow2.f32 %v3461_v40 }
0x1101   :  { %v8836_v57 = vpop.f32.mrf.mxu0  ;;  %v10962_v18 = vld [vmem:[#allocation3] sm:$0xff]  ;;  %9417 = vpow2.f32 %v3463_v5 }
0x1102   :  { %v9408_v58 = vpop.eup %9407  ;;  %3767 = vst.msk [vmem:[#allocation3 + $0x10] sm:$0x1] %vm12267_vm15, %v3762_v53  ;;  %vm3474_vm15 = vcmp.lt.f32.partialorder %v10937_v32, 0.0 }
0x1103   :  { %v3426_v11 = vmul.f32 1.0614054, %v9408_v58 }
0x1105   :  { %v3429_v4 = vadd.f32 -1.4531521, %v3426_v11  ;;  %v10958_v7 = vld [vmem:[#allocation3 + $0x8] sm:$0xff]  ;;  %v3472_v11 = vmul.f32 0.5, %v10940_v34 }
0x1106   :  { %3776 = vrot.lane.b32.xlu1 %v10958_v7, %s12268_s22 }
0x1107   :  { %v9410_v0 = vpop.eup %9409  ;;  %v3432_v10 = vmul.f32 %v9408_v58, %v3429_v4  ;;  %v3473_v4 = vmul.f32 0.5, %v10946_v37 }
0x1108   :  { %v3427_v8 = vmul.f32 1.0614054, %v9410_v0 }
0x1109   :  { %v3435_v15 = vadd.f32 1.4214138, %v3432_v10  ;;  %v10964_v21 = vld [vmem:[#allocation3 + $0x10] sm:$0x1] }
0x110a   :  { %v3430_v16 = vadd.f32 -1.4531521, %v3427_v8  ;;  %3774 = vrot.lane.b32.xlu1 %v10962_v18, %s12268_s22  ;;  %3778 = vrot.lane.b32.xlu0 %v10964_v21, %s12268_s22  ;;  %v10970_v28 = vld [vmem:[#allocation3 + $0x10] sm:$0x1] }
0x110b   :  { %v9412_v42 = vpop.eup %9411  ;;  %v3438_v13 = vmul.f32 %v9408_v58, %v3435_v15  ;;  %v10980_v46 = vld [vmem:[#allocation3 + $0x10] sm:$0x1] }
0x110c   :  { %v3433_v26 = vmul.f32 %v9410_v0, %v3430_v16  ;;  %v3428_v25 = vmul.f32 1.0614054, %v9412_v42  ;;  %v9414_v9 = vpop.eup %9413  ;;  %v10999_v30 = vld [vmem:[#allocation3 + $0x10] sm:$0x1] }
0x110d   :  { %v3441_v20 = vadd.f32 -0.28449672, %v3438_v13  ;;  %v9416_v41 = vpop.eup %9415 }
0x110e   :  { %v3436_v27 = vadd.f32 1.4214138, %v3433_v26  ;;  %v3431_v24 = vadd.f32 -1.4531521, %v3428_v25  ;;  %4026 = vrot.lane.b32.xlu1 %v10970_v28, %s12251_s5  ;;  %4024 = vrot.lane.b32.xlu0 %v10958_v7, %s12251_s5  ;;  %v9418_v52 = vpop.eup %9417 }
0x110f   :  { %v3444_v29 = vmul.f32 %v9408_v58, %v3441_v20 }
0x1110   :  { %v3439_v3 = vmul.f32 %v9410_v0, %v3436_v27  ;;  %v3434_v31 = vmul.f32 %v9412_v42, %v3431_v24 }
0x1111   :  { %v3447_v6 = vadd.f32 0.2548296, %v3444_v29 }
0x1112   :  { %v3442_v33 = vadd.f32 -0.28449672, %v3439_v3  ;;  %v3437_v35 = vadd.f32 1.4214138, %v3434_v31  ;;  %4022 = vrot.lane.b32.xlu1 %v10962_v18, %s12251_s5  ;;  %4016 = vrot.lane.b32.xlu0 %v10962_v18, %s12252_s3 }
0x1113   :  { %v3450_v59 = vmul.f32 %v9408_v58, %v3447_v6 }
0x1114   :  { %v3445_v17 = vmul.f32 %v9410_v0, %v3442_v33  ;;  %v3440_v1 = vmul.f32 %v9412_v42, %v3437_v35 }
0x1115   :  { %v3465_v61 = vmul.f32 %v9414_v9, %v3450_v59 }
0x1116   :  { %v3448_v44 = vadd.f32 0.2548296, %v3445_v17  ;;  %v3443_v2 = vadd.f32 -0.28449672, %v3440_v1  ;;  %4286 = vrot.lane.b32.xlu1 %v10980_v46, %s12253_s8  ;;  %4018 = vrot.lane.b32.xlu0 %v10958_v7, %s12252_s3  ;;  %v7853_v17 = vld [vmem:[%s12153_s16] ss:$0 sm:$0xff] }
0x1117   :  { %v3468_v12 = vsub.f32 1.0, %v3465_v61 }
0x1118   :  { %v3451_v47 = vmul.f32 %v9410_v0, %v3448_v44  ;;  %v3446_v49 = vmul.f32 %v9412_v42, %v3443_v2 }
0x1119   :  { %v3477_v50 = vsub.f32 0.0, %v3468_v12 }
0x111a   :  { %v3466_v48 = vmul.f32 %v9416_v41, %v3451_v47  ;;  %v3449_v54 = vadd.f32 0.2548296, %v3446_v49  ;;  %4284 = vrot.lane.b32.xlu1 %v10958_v7, %s12253_s8  ;;  %4020 = vrot.lane.b32.xlu0 %v10970_v28, %s12252_s3 }
0x111b   :  { %v3480_v19 = vsel %vm3474_vm15, %v3477_v50, %v3468_v12  ;;  %vm12270_vm15 = vcmask 188544  }
0x111c   :  { %v3469_v45 = vsub.f32 1.0, %v3466_v48  ;;  %v3483_v55 = vadd.f32 1.0, %v3480_v19  ;;  %v3452_v56 = vmul.f32 %v9412_v42, %v3449_v54 }
0x111e   :  { %v3478_v53 = vsub.f32 0.0, %v3469_v45  ;;  %v3486_v57 = vmul.f32 %v3483_v55, %v3471_v51  ;;  %v3467_v58 = vmul.f32 %v9418_v52, %v3452_v56  ;;  %4282 = vrot.lane.b32.xlu1 %v10962_v18, %s12253_s8  ;;  %4276 = vrot.lane.b32.xlu0 %v10962_v18, %s12254_s13 }
0x1120   :  { %v3481_v32 = vsel %vm3475_vm5, %v3478_v53, %v3469_v45  ;;  %v3470_v60 = vsub.f32 1.0, %v3467_v58  ;;  %8812 = vmatmul.mubr.msk.f32.vlgmr.msra.gmra.mxu1 %vm1860_vm4, %v3486_v57  ;;  %vm12271_vm5 = vcmask 254144  }
0x1121   :  { %v3484_v14 = vadd.f32 1.0, %v3481_v32  ;;  %8814 = vmatprep.mubr.msk.f32.mxu1 %vm9585_vm3, %v9584_v39 }
0x1122   :  { %v3479_v62 = vsub.f32 0.0, %v3470_v60  ;;  %4546 = vrot.lane.b32.xlu1 %v10999_v30, %s12255_s6  ;;  %4278 = vrot.lane.b32.xlu0 %v10958_v7, %s12254_s13 }
0x1123   :  { %v3487_v36 = vmul.f32 %v3484_v14, %v3472_v11 }
0x1124   :  { %v3482_v34 = vsel %vm3476_vm0, %v3479_v62, %v3470_v60  ;;  %vm12272_vm0 = vcmask 785408  }
0x1125   :  { %8815 = vmatmul.mubr.msk.f32.gmra.mxu1 %vm1860_vm4, %v3487_v36  ;;  %v3485_v0 = vadd.f32 1.0, %v3482_v34 }
0x1126   :  { %8817 = vmatprep.mubr.msk.f32.mxu1 %vm9585_vm3, %v9584_v39  ;;  %4544 = vrot.lane.b32.xlu1 %v10958_v7, %s12255_s6 }
0x1127   :  { %4280 = vrot.lane.b32.xlu0 %v10980_v46, %s12254_s13  ;;  %v3488_v10 = vmul.f32 %v3485_v0, %v3473_v4 }
0x1129   :  { %8818 = vmatmul.mubr.msk.f32.gmra.mxu1 %vm1860_vm4, %v3488_v10 }
0x112a   :  { %4542 = vrot.lane.b32.xlu1 %v10962_v18, %s12255_s6  ;;  %8858 = vmatprep.mubr.msk.f32.mxu1 %vm9585_vm3, %v9584_v39 }
0x112b   :  { %4536 = vrot.lane.b32.xlu0 %v10962_v18, %s12256_s7 }
0x112e   :  { %4538 = vrot.lane.b32.xlu1 %v10958_v7, %s12256_s7 }
0x112f   :  { %4540 = vrot.lane.b32.xlu0 %v10999_v30, %s12256_s7 }
0x1132   :  { %3908 = vrot.lane.b32.xlu1 %v10962_v18, %s12257_s10 }
0x1133   :  { %3910 = vrot.lane.b32.xlu0 %v10958_v7, %s12257_s10 }
0x1136   :  { %3912 = vrot.lane.b32.xlu1 %v10964_v21, %s12257_s10 }
0x113a   :  { %4160 = vrot.lane.b32.xlu1 %v10970_v28, %s12258_s29 }
0x1178   :  { %v3777_v37 = vpop.permute.xlu1 %3776 }
0x117c   :  { %v3775_v22 = vpop.permute.xlu1 %3774  ;;  %v3779_v8 = vpop.permute.xlu0 %3778 }
0x117d   :  { %8838 = vmatpush3.xpose.msk.msra.mxu0 %vm478_vm6, %v3779_v8 }
0x117e   :  { %8839 = vmatprep.subr.mxu0 %v9584_v39 }
0x1180   :  { %v4027_v40 = vpop.permute.xlu1 %4026  ;;  %v4025_v63 = vpop.permute.xlu0 %4024 }
0x1181   :  { %8840 = vmatpush3.xpose.msk.msra.mxu0 %vm478_vm6, %v3777_v37 }
0x1182   :  { %8841 = vmatprep.subr.mxu0 %v9584_v39 }
0x1184   :  { %v4023_v15 = vpop.permute.xlu1 %4022  ;;  %v4017_v16 = vpop.permute.xlu0 %4016 }
0x1185   :  { %8842 = vmatpush3.xpose.msk.msra.mxu0 %vm478_vm6, %v3775_v22 }
0x1186   :  { %8867 = vmatprep.subr.mxu0 %v9584_v39 }
0x1188   :  { %v4287_v42 = vpop.permute.xlu1 %4286  ;;  %8844 = vmatmul.mubr.msk.f32.vlgmr.msra.gmra.mxu0 %vm478_vm6, %v10962_v18  ;;  %v4019_v13 = vpop.permute.xlu0 %4018 }
0x1189   :  { %8868 = vmatpush3.xpose.msk.msra.mxu0 %vm478_vm6, %v4027_v40  ;;  %8846 = vmatprep.mubr.msk.f32.mxu0 %vm9585_vm3, %v9584_v39 }
0x118a   :  { %8869 = vmatprep.subr.mxu0 %v9584_v39 }
0x118c   :  { %v4285_v26 = vpop.permute.xlu1 %4284  ;;  %8847 = vmatmul.mubr.msk.f32.gmra.mxu0 %vm478_vm6, %v10958_v7  ;;  %v4021_v25 = vpop.permute.xlu0 %4020 }
0x118d   :  { %8870 = vmatpush3.xpose.msk.msra.mxu0 %vm478_vm6, %v4025_v63  ;;  %8849 = vmatprep.mubr.msk.f32.mxu0 %vm9585_vm3, %v9584_v39 }
0x118e   :  { %8871 = vmatprep.subr.mxu0 %v9584_v39 }
0x1190   :  { %v4283_v5 = vpop.permute.xlu1 %4282  ;;  %8850 = vmatmul.mubr.msk.f32.gmra.mxu0 %vm478_vm6, %v10964_v21  ;;  %v4277_v20 = vpop.permute.xlu0 %4276 }
0x1191   :  { %8872 = vmatpush3.xpose.msk.msra.mxu0 %vm478_vm6, %v4023_v15  ;;  %8873 = vmatprep.mubr.msk.f32.mxu0 %vm9585_vm3, %v9584_v39 }
0x1192   :  { %8897 = vmatprep.subr.mxu0 %v9584_v39 }
0x1194   :  { %v4547_v27 = vpop.permute.xlu1 %4546  ;;  %8874 = vmatmul.mubr.msk.f32.vlgmr.msra.gmra.mxu0 %vm478_vm6, %v4017_v16  ;;  %v4279_v28 = vpop.permute.xlu0 %4278 }
0x1195   :  { %8898 = vmatpush3.xpose.msk.msra.mxu0 %vm478_vm6, %v4287_v42  ;;  %8876 = vmatprep.mubr.msk.f32.mxu0 %vm9585_vm3, %v9584_v39 }
0x1196   :  { %8899 = vmatprep.subr.mxu0 %v9584_v39 }
0x1198   :  { %v4545_v21 = vpop.permute.xlu1 %4544  ;;  %8877 = vmatmul.mubr.msk.f32.gmra.mxu0 %vm478_vm6, %v4019_v13 }
0x1199   :  { %v4281_v24 = vpop.permute.xlu0 %4280  ;;  %8900 = vmatpush3.xpose.msk.msra.mxu0 %vm478_vm6, %v4285_v26  ;;  %8879 = vmatprep.mubr.msk.f32.mxu0 %vm9585_vm3, %v9584_v39 }
0x119a   :  { %8901 = vmatprep.subr.mxu0 %v9584_v39 }
0x119c   :  { %v4543_v29 = vpop.permute.xlu1 %4542  ;;  %8880 = vmatmul.mubr.msk.f32.gmra.mxu0 %vm478_vm6, %v4021_v25 }
0x119d   :  { %8902 = vmatpush3.xpose.msk.msra.mxu0 %vm478_vm6, %v4283_v5  ;;  %8903 = vmatprep.mubr.msk.f32.mxu0 %vm9585_vm3, %v9584_v39  ;;  %v4537_v3 = vpop.permute.xlu0 %4536 }
0x119e   :  { %8927 = vmatprep.subr.mxu0 %v9584_v39 }
0x11a0   :  { %v4539_v31 = vpop.permute.xlu1 %4538  ;;  %8904 = vmatmul.mubr.msk.f32.vlgmr.msra.gmra.mxu0 %vm478_vm6, %v4277_v20 }
0x11a1   :  { %8928 = vmatpush3.xpose.msk.msra.mxu0 %vm478_vm6, %v4547_v27  ;;  %8906 = vmatprep.mubr.msk.f32.mxu0 %vm9585_vm3, %v9584_v39  ;;  %v4541_v6 = vpop.permute.xlu0 %4540 }
0x11a2   :  { %8929 = vmatprep.subr.mxu0 %v9584_v39 }
0x11a4   :  { %v3909_v33 = vpop.permute.xlu1 %3908  ;;  %8907 = vmatmul.mubr.msk.f32.gmra.mxu0 %vm478_vm6, %v4279_v28 }
0x11a5   :  { %8930 = vmatpush3.xpose.msk.msra.mxu0 %vm478_vm6, %v4545_v21  ;;  %8909 = vmatprep.mubr.msk.f32.mxu0 %vm9585_vm3, %v9584_v39  ;;  %v3911_v59 = vpop.permute.xlu0 %3910 }
0x11a6   :  { %8931 = vmatprep.subr.mxu0 %v9584_v39 }
0x11a8   :  { %v3913_v35 = vpop.permute.xlu1 %3912  ;;  %8910 = vmatmul.mubr.msk.f32.gmra.mxu0 %vm478_vm6, %v4281_v24 }
0x11a9   :  { %8853 = vmatpush3.msk.msra.mxu1 %vm626_vm7, %v3913_v35  ;;  %8932 = vmatpush3.xpose.msk.msra.mxu0 %vm478_vm6, %v4543_v29 }
0x11aa   :  { %8854 = vmatprep.subr.mxu1 %v9584_v39  ;;  %8933 = vmatprep.mubr.msk.f32.mxu0 %vm9585_vm3, %v9584_v39 }
0x11ab   :  { %8855 = vmatpush3.msra.mxu1 %v3911_v59  ;;  %8957 = vmatprep.subr.mxu0 %v9584_v39 }
0x11ac   :  { %8856 = vmatprep.subr.mxu1 %v9584_v39  ;;  %8934 = vmatmul.mubr.msk.f32.vlgmr.msra.gmra.mxu0 %vm478_vm6, %v4537_v3 }
0x11ad   :  { %8857 = vmatpush3.msra.mxu1 %v3909_v33  ;;  %8936 = vmatprep.mubr.msk.f32.mxu0 %vm9585_vm3, %v9584_v39 }
0x11ae   :  { %8882 = vmatprep.subr.mxu1 %v9584_v39 }
0x11b0   :  { %8937 = vmatmul.mubr.msk.f32.gmra.mxu0 %vm478_vm6, %v4539_v31 }
0x11b1   :  { %8939 = vmatprep.mubr.msk.f32.mxu0 %vm9585_vm3, %v9584_v39 }
0x11b4   :  { %8940 = vmatmul.mubr.msk.f32.gmra.mxu0 %vm478_vm6, %v4541_v6 }
0x11b5   :  { %8965 = vmatprep.mubr.msk.f32.mxu0 %vm9585_vm3, %v9584_v39 }
0x11e0   :  { %v3579_v9 = vpop.f32.mrf.mxu1 }
0x11e1   :  { %v3580_v1 = vadd.f32 %v7853_v17, %v3579_v9 }
0x11e2   :  { %v8813_v61 = vpop.f32.mrf.mxu1 }
0x11e3   :  { %v3593_v44 = vadd.f32 %v3580_v1, %v10783_v38  ;;  %v11165_v1 = vpop.permute.xlu1 %4160 }
0x11e5   :  { %v3584_v2 = vpop.f32.mrf.mxu1  ;;  %3596 = vst.msk [vmem:[#allocation2 + $0x18] sm:$0xff] %vm190_vm2, %v3593_v44 }
0x11e6   :  { %v3585_v12 = vadd.f32 %v7853_v17, %v3584_v2 }
0x11e7   :  { %v8816_v47 = vpop.f32.mrf.mxu1 }
0x11e8   :  { %v3594_v41 = vadd.f32 %v3585_v12, %v10787_v43 }
0x11e9   :  { %v3589_v49 = vpop.f32.mrf.mxu1 }
0x11ea   :  { %3597 = vst.msk [vmem:[#allocation2 + $0x20] sm:$0xff] %vm190_vm2, %v3594_v41  ;;  %v3590_v50 = vadd.f32 %v7853_v17, %v3589_v49 }
0x11eb   :  { %v8819_v48 = vpop.f32.mrf.mxu1 }
0x11ec   :  { %v3595_v54 = vadd.f32 %v3590_v50, %v10791_v23 }
0x11ee   :  { %3598 = vst.msk [vmem:[#allocation2 + $0x28] sm:$0x1] %vm184_vm1, %v3595_v54 }
0x1248   :  { %v3858_v19 = vpop.f32.mrf.mxu0 }
0x1249   :  { %v11111_v45 = vmul.f32 0.35355338, %v3858_v19 }
0x124a   :  { %v8845_v38 = vpop.f32.mrf.mxu0 }
0x124b   :  { %v3875_v51 = vsel %vm574_vm8, %v11111_v45, -inf }
0x124c   :  { %3876 = vmax.xlane.f32.xlu1 %v3875_v51  ;;  %v3863_v55 = vpop.f32.mrf.mxu0 }
0x124d   :  { %v11115_v56 = vmul.f32 0.35355338, %v3863_v55 }
0x124e   :  { %v8848_v43 = vpop.f32.mrf.mxu0 }
0x124f   :  { %v3878_v52 = vsel %vm574_vm8, %v11115_v56, -inf }
0x1250   :  { %3879 = vmax.xlane.f32.xlu0 %v3878_v52  ;;  %v3868_v53 = vpop.f32.mrf.mxu0 }
0x1251   :  { %v11119_v23 = vmul.f32 0.35355338, %v3868_v53 }
0x1252   :  { %v8851_v57 = vpop.f32.mrf.mxu0 }
0x1253   :  { %v3881_v58 = vsel %vm581_vm9, %v11119_v23, -inf }
0x1254   :  { %3882 = vmax.xlane.f32.xlu0 %v3881_v58  ;;  %v4106_v32 = vpop.f32.mrf.mxu0 }
0x1255   :  { %v11123_v11 = vmul.f32 0.35355338, %v4106_v32 }
0x1256   :  { %v8875_v14 = vpop.f32.mrf.mxu0 }
0x1257   :  { %v4123_v60 = vsel %vm574_vm8, %v11123_v11, -inf }
0x1258   :  { %4124 = vmax.xlane.f32.xlu0 %v4123_v60  ;;  %v4111_v36 = vpop.f32.mrf.mxu0 }
0x1259   :  { %v11127_v62 = vmul.f32 0.35355338, %v4111_v36 }
0x125a   :  { %v8878_v34 = vpop.f32.mrf.mxu0 }
0x125b   :  { %v4126_v4 = vsel %vm574_vm8, %v11127_v62, -inf }
0x125c   :  { %4127 = vmax.xlane.f32.xlu1 %v4126_v4  ;;  %v4116_v0 = vpop.f32.mrf.mxu0 }
0x125d   :  { %v11131_v10 = vmul.f32 0.35355338, %v4116_v0 }
0x125e   :  { %v8881_v37 = vpop.f32.mrf.mxu0 }
0x125f   :  { %v4129_v22 = vsel %vm581_vm9, %v11131_v10, -inf }
0x1260   :  { %4130 = vmax.xlane.f32.xlu0 %v4129_v22  ;;  %v4366_v8 = vpop.f32.mrf.mxu0 }
0x1261   :  { %v11135_v40 = vmul.f32 0.35355338, %v4366_v8 }
0x1262   :  { %v8905_v63 = vpop.f32.mrf.mxu0 }
0x1263   :  { %v4383_v15 = vsel %vm574_vm8, %v11135_v40, -inf }
0x1264   :  { %4384 = vmax.xlane.f32.xlu1 %v4383_v15  ;;  %v4371_v16 = vpop.f32.mrf.mxu0 }
0x1265   :  { %v11139_v42 = vmul.f32 0.35355338, %v4371_v16 }
0x1266   :  { %v8908_v13 = vpop.f32.mrf.mxu0 }
0x1267   :  { %v4386_v26 = vsel %vm574_vm8, %v11139_v42, -inf }
0x1268   :  { %4387 = vmax.xlane.f32.xlu0 %v4386_v26  ;;  %v4376_v25 = vpop.f32.mrf.mxu0 }
0x1269   :  { %v11143_v5 = vmul.f32 0.35355338, %v4376_v25 }
0x126a   :  { %v8911_v20 = vpop.f32.mrf.mxu0 }
0x126b   :  { %v4389_v27 = vsel %vm581_vm9, %v11143_v5, -inf }
0x126c   :  { %4390 = vmax.xlane.f32.xlu1 %v4389_v27  ;;  %v4626_v28 = vpop.f32.mrf.mxu0 }
0x126d   :  { %v11147_v21 = vmul.f32 0.35355338, %v4626_v28 }
0x126e   :  { %v8935_v24 = vpop.f32.mrf.mxu0 }
0x126f   :  { %v4643_v29 = vsel %vm574_vm8, %v11147_v21, -inf }
0x1270   :  { %4644 = vmax.xlane.f32.xlu0 %v4643_v29  ;;  %v4631_v3 = vpop.f32.mrf.mxu0 }
0x1271   :  { %v11157_v35 = vmul.f32 0.35355338, %v4631_v3 }
0x1272   :  { %v8938_v31 = vpop.f32.mrf.mxu0 }
0x1273   :  { %v4646_v17 = vsel %vm574_vm8, %v11157_v35, -inf }
0x1274   :  { %v4636_v6 = vpop.f32.mrf.mxu0 }
0x1275   :  { %v11159_v59 = vmul.f32 0.35355338, %v4636_v6 }
0x1276   :  { %v8941_v33 = vpop.f32.mrf.mxu0 }
0x1277   :  { %v4649_v9 = vsel %vm581_vm9, %v11159_v59, -inf }
0x127d   :  { %4156 = vrot.lane.b32.xlu1 %v10962_v18, %s12258_s29 }
0x1281   :  { %4420 = vrot.lane.b32.xlu1 %v10980_v46, %s12259_s26 }
0x1286   :  { %4158 = vrot.lane.b32.xlu0 %v10958_v7, %s12258_s29 }
0x12a5   :  { %4647 = vmax.xlane.f32.xlu1 %v4646_v17  ;;  %4650 = vmax.xlane.f32.xlu0 %v4649_v9 }
0x12d5   :  { %v3877_v61 = vpop.xlane.xlu1 %3876 }
0x12d6   :  { %v3884_v46 = vsub.f32 %v11111_v45, %v3877_v61 }
0x12d8   :  { %v3887_v44 = vmul.f32 1.442695, %v3884_v46 }
0x12d9   :  { %v3880_v2 = vpop.xlane.xlu0 %3879 }
0x12da   :  { %9419 = vpow2.f32 %v3887_v44  ;;  %v3885_v12 = vsub.f32 %v11115_v56, %v3880_v2 }
0x12dc   :  { %v3889_v47 = vmul.f32 1.442695, %v3885_v12 }
0x12dd   :  { %v3883_v54 = vpop.xlane.xlu0 %3882 }
0x12de   :  { %9421 = vpow2.f32 %v3889_v47  ;;  %v3886_v19 = vsub.f32 %v11119_v23, %v3883_v54 }
0x12e0   :  { %v3891_v55 = vmul.f32 1.442695, %v3886_v19 }
0x12e1   :  { %v4125_v45 = vpop.xlane.xlu0 %4124 }
0x12e2   :  { %v4132_v51 = vsub.f32 %v11123_v11, %v4125_v45  ;;  %9423 = vpow2.f32 %v3891_v55 }
0x12e4   :  { %v4135_v52 = vmul.f32 1.442695, %v4132_v51 }
0x12e5   :  { %v4128_v38 = vpop.xlane.xlu1 %4127 }
0x12e6   :  { %v4133_v56 = vsub.f32 %v11127_v62, %v4128_v38  ;;  %9425 = vpow2.f32 %v4135_v52 }
0x12e7   :  { %v11169_v41 = vpop.eup %9419 }
0x12e8   :  { %v3893_v49 = vsel %vm574_vm8, %v11169_v41, 0.0  ;;  %v4137_v53 = vmul.f32 1.442695, %v4133_v56 }
0x12e9   :  { %3894 = vadd.xlane.f32.xlu1 %v3893_v49  ;;  %v4131_v43 = vpop.xlane.xlu0 %4130 }
0x12ea   :  { %v4134_v57 = vsub.f32 %v11131_v10, %v4131_v43  ;;  %9427 = vpow2.f32 %v4137_v53 }
0x12eb   :  { %v11173_v50 = vpop.eup %9421 }
0x12ec   :  { %v3896_v48 = vsel %vm574_vm8, %v11173_v50, 0.0  ;;  %v4139_v32 = vmul.f32 1.442695, %v4134_v57 }
0x12ed   :  { %3897 = vadd.xlane.f32.xlu0 %v3896_v48  ;;  %v4385_v58 = vpop.xlane.xlu1 %4384 }
0x12ee   :  { %v4392_v14 = vsub.f32 %v11135_v40, %v4385_v58  ;;  %9429 = vpow2.f32 %v4139_v32 }
0x12ef   :  { %v11188_v0 = vpop.eup %9423 }
0x12f0   :  { %v4395_v36 = vmul.f32 1.442695, %v4392_v14  ;;  %v3899_v22 = vsel %vm581_vm9, %v11188_v0, 0.0 }
0x12f1   :  { %v4388_v23 = vpop.xlane.xlu0 %4387 }
0x12f2   :  { %9431 = vpow2.f32 %v4395_v36  ;;  %v4393_v6 = vsub.f32 %v11139_v42, %v4388_v23 }
0x12f3   :  { %v11190_v10 = vpop.eup %9425 }
0x12f4   :  { %v4141_v63 = vsel %vm574_vm8, %v11190_v10, 0.0  ;;  %v4397_v9 = vmul.f32 1.442695, %v4393_v6 }
0x12f5   :  { %v4391_v60 = vpop.xlane.xlu1 %4390 }
0x12f6   :  { %v4394_v11 = vsub.f32 %v11143_v5, %v4391_v60 }
0x12f7   :  { %v11194_v8 = vpop.eup %9427 }
0x12f8   :  { %v4399_v62 = vmul.f32 1.442695, %v4394_v11  ;;  %v4144_v40 = vsel %vm574_vm8, %v11194_v8, 0.0 }
0x12f9   :  { %v4645_v34 = vpop.xlane.xlu0 %4644  ;;  %v4157_v3 = vpop.permute.xlu1 %4156 }
0x12fa   :  { %4416 = vrot.lane.b32.xlu1 %v10962_v18, %s12259_s26  ;;  %v4652_v4 = vsub.f32 %v11147_v21, %v4645_v34  ;;  %9433 = vpow2.f32 %v4399_v62 }
0x12fb   :  { %v11200_v15 = vpop.eup %9429 }
0x12fc   :  { %v4655_v37 = vmul.f32 1.442695, %v4652_v4  ;;  %v4147_v16 = vsel %vm581_vm9, %v11200_v15, 0.0 }
0x12fd   :  { %v4159_v5 = vpop.permute.xlu0 %4158  ;;  %v4421_v31 = vpop.permute.xlu1 %4420 }
0x12fe   :  { %9435 = vpow2.f32 %v4655_v37 }
0x12ff   :  { %v11204_v13 = vpop.eup %9431 }
0x1300   :  { %v4401_v26 = vsel %vm574_vm8, %v11204_v13, 0.0 }
0x1303   :  { %4418 = vrot.lane.b32.xlu0 %v10958_v7, %s12259_s26  ;;  %s12286_s26 = sld [smem:[#allocation23_spill]] }
0x1307   :  { %v11208_v25 = vpop.eup %9433 }
0x1308   :  { %v4407_v20 = vsel %vm581_vm9, %v11208_v25, 0.0 }
0x130b   :  { %v11212_v27 = vpop.eup %9435 }
0x130c   :  { %v4661_v29 = vsel %vm574_vm8, %v11212_v27, 0.0 }
0x131e   :  { %3900 = vadd.xlane.f32.xlu1 %v3899_v22 }
0x1322   :  { %4145 = vadd.xlane.f32.xlu1 %v4144_v40  ;;  %4142 = vadd.xlane.f32.xlu0 %v4141_v63 }
0x1326   :  { %4148 = vadd.xlane.f32.xlu0 %v4147_v16 }
0x132a   :  { %4402 = vadd.xlane.f32.xlu0 %v4401_v26 }
0x132e   :  { %4408 = vadd.xlane.f32.xlu0 %v4407_v20  ;;  %v4651_v28 = vpop.xlane.xlu0 %4650  ;;  %v4648_v33 = vpop.xlane.xlu1 %4647 }
0x132f   :  { %v4654_v21 = vsub.f32 %v11159_v59, %v4651_v28  ;;  %v4653_v61 = vsub.f32 %v11157_v35, %v4648_v33 }
0x1331   :  { %v4659_v24 = vmul.f32 1.442695, %v4654_v21  ;;  %v4657_v46 = vmul.f32 1.442695, %v4653_v61  ;;  %v7912_v61 = vld [vmem:[%s12248_s0 + $0x30] sm:$0xff] }
0x1332   :  { %4662 = vadd.xlane.f32.xlu0 %v4661_v29 }
0x1333   :  { %4680 = vrot.lane.b32.xlu1 %v10999_v30, %s12269_s17  ;;  %9437 = vpow2.f32 %v4659_v24 }
0x1334   :  { %9439 = vpow2.f32 %v4397_v9  ;;  %v7913_v9 = vld [vmem:[%s12248_s0 + $0x38] sm:$0xff] }
0x1335   :  { %9441 = vpow2.f32 %v4657_v46  ;;  %8958 = vmatpush3.msra.mxu0 %v7913_v9  ;;  %v7911_v46 = vld [vmem:[%s12248_s0 + $0x28] sm:$0xff] }
0x1336   :  { %8959 = vmatprep.subr.mxu0 %v9584_v39 }
0x1337   :  { %8960 = vmatpush3.msra.mxu0 %v7912_v61 }
0x1338   :  { %8961 = vmatprep.subr.mxu0 %v9584_v39 }
0x1339   :  { %8962 = vmatpush3.msra.mxu0 %v7911_v46 }
0x133a   :  { %8963 = vmatprep.subr.mxu0 %v9584_v39 }
0x1340   :  { %v11220_v17 = vpop.eup %9437 }
0x1341   :  { %v4667_v59 = vsel %vm581_vm9, %v11220_v17, 0.0  ;;  %v11225_v44 = vpop.eup %9439 }
0x1342   :  { %4668 = vadd.xlane.f32.xlu0 %v4667_v59  ;;  %v4404_v30 = vsel %vm574_vm8, %v11225_v44, 0.0  ;;  %v11229_v2 = vpop.eup %9441 }
0x1343   :  { %v4664_v42 = vsel %vm574_vm8, %v11229_v2, 0.0 }
0x1357   :  { %4405 = vadd.xlane.f32.xlu1 %v4404_v30 }
0x1358   :  { %4676 = vrot.lane.b32.xlu0 %v10962_v18, %s12269_s17 }
0x135b   :  { %4665 = vadd.xlane.f32.xlu1 %v4664_v42 }
0x136c   :  { %4678 = vrot.lane.b32.xlu1 %v10958_v7, %s12269_s17 }
0x1372   :  { %v3895_v35 = vpop.xlane.xlu1 %3894 }
0x1373   :  { %9443 = vrcp.f32 %v3895_v35 }
0x1376   :  { %v3898_v12 = vpop.xlane.xlu0 %3897  ;;  %v4417_v18 = vpop.permute.xlu1 %4416 }
0x1377   :  { %9445 = vrcp.f32 %v3898_v12 }
0x1380   :  { %v9444_v47 = vpop.eup %9443 }
0x1381   :  { %v3905_v49 = vmul.f32 %v9444_v47, %v11169_v41 }
0x1383   :  { %8859 = vmatmul.mubr.msk.f32.vlgmr.msra.gmra.mxu1 %vm574_vm8, %v3905_v49 }
0x1384   :  { %v9446_v48 = vpop.eup %9445  ;;  %8883 = vmatpush3.msk.msra.mxu1 %vm626_vm7, %v11165_v1  ;;  %8861 = vmatprep.mubr.msk.f32.mxu1 %vm9585_vm3, %v9584_v39  ;;  %v4419_v1 = vpop.permute.xlu0 %4418 }
0x1385   :  { %8884 = vmatprep.subr.mxu1 %v9584_v39  ;;  %v3906_v7 = vmul.f32 %v9446_v48, %v11173_v50 }
0x1386   :  { %8885 = vmatpush3.msra.mxu1 %v4159_v5 }
0x1387   :  { %8886 = vmatprep.subr.mxu1 %v9584_v39  ;;  %8862 = vmatmul.mubr.msk.f32.gmra.mxu1 %vm574_vm8, %v3906_v7 }
0x1388   :  { %8887 = vmatpush3.msra.mxu1 %v4157_v3  ;;  %8864 = vmatprep.mubr.msk.f32.mxu1 %vm9585_vm3, %v9584_v39 }
0x1389   :  { %8912 = vmatprep.subr.mxu1 %v9584_v39 }
0x13a7   :  { %v3901_v41 = vpop.xlane.xlu1 %3900 }
0x13a8   :  { %9447 = vrcp.f32 %v3901_v41 }
0x13ab   :  { %v4143_v54 = vpop.xlane.xlu0 %4142  ;;  %v4146_v19 = vpop.xlane.xlu1 %4145 }
0x13ac   :  { %9449 = vrcp.f32 %v4143_v54 }
0x13ad   :  { %9451 = vrcp.f32 %v4146_v19 }
0x13af   :  { %v4149_v50 = vpop.xlane.xlu0 %4148  ;;  %v4681_v14 = vpop.permute.xlu1 %4680 }
0x13b0   :  { %9453 = vrcp.f32 %v4149_v50 }
0x13b3   :  { %v4403_v45 = vpop.xlane.xlu0 %4402 }
0x13b4   :  { %9455 = vrcp.f32 %v4403_v45 }
0x13b5   :  { %v9448_v38 = vpop.eup %9447 }
0x13b6   :  { %v3907_v51 = vmul.f32 %v9448_v38, %v11188_v0 }
0x13b7   :  { %v4409_v23 = vpop.xlane.xlu0 %4408 }
0x13b8   :  { %8865 = vmatmul.mubr.msk.f32.gmra.mxu1 %vm574_vm8, %v3907_v51 }
0x13b9   :  { %8888 = vmatprep.mubr.msk.f32.mxu1 %vm9585_vm3, %v9584_v39  ;;  %v9450_v55 = vpop.eup %9449 }
0x13ba   :  { %v4153_v56 = vmul.f32 %v9450_v55, %v11190_v10  ;;  %v9452_v43 = vpop.eup %9451 }
0x13bb   :  { %v4154_v52 = vmul.f32 %v9452_v43, %v11194_v8  ;;  %v4663_v60 = vpop.xlane.xlu0 %4662 }
0x13bc   :  { %8889 = vmatmul.mubr.msk.f32.vlgmr.msra.gmra.mxu1 %vm574_vm8, %v4153_v56 }
0x13bd   :  { %8913 = vmatpush3.msk.msra.mxu1 %vm626_vm7, %v4421_v31  ;;  %8891 = vmatprep.mubr.msk.f32.mxu1 %vm9585_vm3, %v9584_v39  ;;  %v9454_v53 = vpop.eup %9453 }
0x13be   :  { %8914 = vmatprep.subr.mxu1 %v9584_v39  ;;  %v4155_v57 = vmul.f32 %v9454_v53, %v11200_v15 }
0x13bf   :  { %8915 = vmatpush3.msra.mxu1 %v4419_v1 }
0x13c0   :  { %8916 = vmatprep.subr.mxu1 %v9584_v39  ;;  %8892 = vmatmul.mubr.msk.f32.gmra.mxu1 %vm574_vm8, %v4154_v52  ;;  %v7915_v52 = vld [vmem:[%s12249_s9 + $0x1] ss:$0 sm:$0xff] }
0x13c1   :  { %8917 = vmatpush3.msra.mxu1 %v4417_v18  ;;  %8894 = vmatprep.mubr.msk.f32.mxu1 %vm9585_vm3, %v9584_v39  ;;  %v9456_v58 = vpop.eup %9455 }
0x13c2   :  { %8942 = vmatprep.subr.mxu1 %v9584_v39  ;;  %v4413_v32 = vmul.f32 %v9456_v58, %v11204_v13 }
0x13c4   :  { %8895 = vmatmul.mubr.msk.f32.gmra.mxu1 %vm574_vm8, %v4155_v57 }
0x13c5   :  { %8918 = vmatprep.mubr.msk.f32.mxu1 %vm9585_vm3, %v9584_v39 }
0x13c8   :  { %8919 = vmatmul.mubr.msk.f32.vlgmr.msra.gmra.mxu1 %vm574_vm8, %v4413_v32  ;;  %v9577_v32 = vld [vmem:[#allocation2] sm:$0xff] }
0x13c9   :  { %8943 = vmatpush3.msk.msra.mxu1 %vm626_vm7, %v4681_v14  ;;  %8921 = vmatprep.mubr.msk.f32.mxu1 %vm9585_vm3, %v9584_v39 }
0x13ca   :  { %8944 = vmatprep.subr.mxu1 %v9584_v39 }
0x13cb   :  { %v4669_v11 = vpop.xlane.xlu0 %4668 }
0x13cf   :  { %v4677_v4 = vpop.permute.xlu0 %4676 }
0x13e0   :  { %v4406_v36 = vpop.xlane.xlu1 %4405 }
0x13e1   :  { %9457 = vrcp.f32 %v4406_v36 }
0x13e2   :  { %9459 = vrcp.f32 %v4409_v23 }
0x13e3   :  { %9461 = vrcp.f32 %v4663_v60 }
0x13e4   :  { %v4666_v34 = vpop.xlane.xlu1 %4665 }
0x13e5   :  { %9463 = vrcp.f32 %v4666_v34  ;;  %v9578_v34 = vld [vmem:[#allocation2 + $0x8] sm:$0xff] }
0x13e6   :  { %9465 = vrcp.f32 %v4669_v11 }
0x13e8   :  { %v4679_v62 = vpop.permute.xlu1 %4678 }
0x13e9   :  { %8945 = vmatpush3.msra.mxu1 %v4679_v62 }
0x13ea   :  { %8946 = vmatprep.subr.mxu1 %v9584_v39 }
0x13eb   :  { %8947 = vmatpush3.msra.mxu1 %v4677_v4 }
0x13ec   :  { %8974 = vmatprep.subr.mxu1 %v9584_v39 }
0x13ee   :  { %v9458_v0 = vpop.eup %9457 }
0x13ef   :  { %v4414_v10 = vmul.f32 %v9458_v0, %v11225_v44  ;;  %v9460_v37 = vpop.eup %9459  ;;  %v7910_v44 = vld [vmem:[%s12248_s0 + $0x20] sm:$0xff] }
0x13f0   :  { %v4415_v22 = vmul.f32 %v9460_v37, %v11208_v25  ;;  %v9462_v8 = vpop.eup %9461  ;;  %8964 = vmatpush3.msra.mxu0 %v7910_v44  ;;  %v5256_v37 = vld [vmem:[#allocation2 + $0x28] sm:$0x1] }
0x13f1   :  { %8922 = vmatmul.mubr.msk.f32.gmra.mxu1 %vm574_vm8, %v4414_v10  ;;  %v4673_v40 = vmul.f32 %v9462_v8, %v11212_v27  ;;  %8991 = vmatprep.subr.mxu0 %v9584_v39  ;;  %v9579_v8 = vld [vmem:[#allocation2 + $0x10] sm:$0x1] }
0x13f2   :  { %8924 = vmatprep.mubr.msk.f32.mxu1 %vm9585_vm3, %v9584_v39  ;;  %v9464_v63 = vpop.eup %9463 }
0x13f3   :  { %v4674_v15 = vmul.f32 %v9464_v63, %v11229_v2  ;;  %v9466_v16 = vpop.eup %9465  ;;  %v5265_v63 = vsel %vm184_vm1, %v5256_v37, 0.0 }
0x13f4   :  { %v4675_v13 = vmul.f32 %v9466_v16, %v11220_v17  ;;  %v5254_v16 = vld [vmem:[#allocation2 + $0x18] sm:$0xff] }
0x13f5   :  { %8925 = vmatmul.mubr.msk.f32.gmra.mxu1 %vm574_vm8, %v4415_v22 }
0x13f6   :  { %8948 = vmatprep.mubr.msk.f32.mxu1 %vm9585_vm3, %v9584_v39 }
0x13f9   :  { %8949 = vmatmul.mubr.msk.f32.vlgmr.msra.gmra.mxu1 %vm574_vm8, %v4673_v40 }
0x13fa   :  { %8951 = vmatprep.mubr.msk.f32.mxu1 %vm9585_vm3, %v9584_v39 }
0x13fd   :  { %8952 = vmatmul.mubr.msk.f32.gmra.mxu1 %vm574_vm8, %v4674_v15 }
0x13fe   :  { %8954 = vmatprep.mubr.msk.f32.mxu1 %vm9585_vm3, %v9584_v39 }
0x1401   :  { %8955 = vmatmul.mubr.msk.f32.gmra.mxu1 %vm574_vm8, %v4675_v13  ;;  %v5259_v13 = vsel %vm190_vm2, %v5254_v16, 0.0 }
0x1402   :  { %8982 = vmatprep.mubr.msk.f32.mxu1 %vm9585_vm3, %v9584_v39 }
0x1443   :  { %v3993_v26 = vpop.f32.mrf.mxu1 }
0x1444   :  { %4007 = vst.msk [vmem:[#allocation4] sm:$0xff] %vm478_vm6, %v3993_v26  ;;  %v5255_v26 = vld [vmem:[#allocation2 + $0x20] sm:$0xff] }
0x1445   :  { %v8860_v25 = vpop.f32.mrf.mxu1 }
0x1446   :  { %v5262_v25 = vsel %vm190_vm2, %v5255_v26, 0.0 }
0x1447   :  { %v3998_v5 = vpop.f32.mrf.mxu1 }
0x1448   :  { %4008 = vst.msk [vmem:[#allocation4 + $0x8] sm:$0xff] %vm478_vm6, %v3998_v5 }
0x1449   :  { %v8863_v20 = vpop.f32.mrf.mxu1 }
0x1478   :  { %v4003_v27 = vpop.f32.mrf.mxu1 }
0x1479   :  { %4009 = vst.msk [vmem:[#allocation4 + $0x10] sm:$0x1] %vm711_vm10, %v4003_v27 }
0x147a   :  { %v8866_v28 = vpop.f32.mrf.mxu1 }
0x147c   :  { %v4241_v21 = vpop.f32.mrf.mxu1 }
0x147d   :  { %4258 = vrot.lane.b32.xlu1 %v4241_v21, %s12261_s24 }
0x147e   :  { %v8890_v24 = vpop.f32.mrf.mxu1 }
0x1480   :  { %v4246_v29 = vpop.f32.mrf.mxu1 }
0x1481   :  { %4260 = vrot.lane.b32.xlu0 %v4246_v29, %s12261_s24 }
0x1482   :  { %v8893_v3 = vpop.f32.mrf.mxu1 }
0x1484   :  { %v4251_v31 = vpop.f32.mrf.mxu1 }
0x1486   :  { %v8896_v6 = vpop.f32.mrf.mxu1 }
0x1488   :  { %v4501_v33 = vpop.f32.mrf.mxu1 }
0x1489   :  { %4518 = vrot.lane.b32.xlu0 %v4501_v33, %s12262_s25 }
0x148a   :  { %v8920_v17 = vpop.f32.mrf.mxu1 }
0x14b1   :  { %v4506_v59 = vpop.f32.mrf.mxu1 }
0x14b2   :  { %4520 = vrot.lane.b32.xlu1 %v4506_v59, %s12262_s25 }
0x14b3   :  { %v8923_v30 = vpop.f32.mrf.mxu1 }
0x14b5   :  { %v4511_v2 = vpop.f32.mrf.mxu1 }
0x14b7   :  { %v8926_v42 = vpop.f32.mrf.mxu1 }
0x14b9   :  { %v4761_v35 = vpop.f32.mrf.mxu1 }
0x14ba   :  { %4778 = vrot.lane.b32.xlu1 %v4761_v35, %s12263_s19 }
0x14bb   :  { %v8950_v12 = vpop.f32.mrf.mxu1 }
0x14bd   :  { %v4766_v47 = vpop.f32.mrf.mxu1 }
0x14be   :  { %4262 = vrot.lane.b32.xlu1 %v4251_v31, %s12261_s24  ;;  %4780 = vrot.lane.b32.xlu0 %v4766_v47, %s12263_s19 }
0x14bf   :  { %v8953_v49 = vpop.f32.mrf.mxu1 }
0x14c1   :  { %v4771_v48 = vpop.f32.mrf.mxu1 }
0x14c2   :  { %4522 = vrot.lane.b32.xlu0 %v4511_v2, %s12262_s25  ;;  %4782 = vrot.lane.b32.xlu1 %v4771_v48, %s12263_s19 }
0x14c3   :  { %v8956_v7 = vpop.f32.mrf.mxu1 }
0x14ef   :  { %v4259_v18 = vpop.permute.xlu1 %4258 }
0x14f0   :  { %4267 = vst.msk [vmem:[#allocation4] sm:$0xff] %vm970_vm11, %v4259_v18 }
0x14f3   :  { %v4261_v1 = vpop.permute.xlu0 %4260 }
0x14f4   :  { %4268 = vst.msk [vmem:[#allocation4 + $0x8] sm:$0xff] %vm970_vm11, %v4261_v1 }
0x14fb   :  { %v4519_v41 = vpop.permute.xlu0 %4518 }
0x14fc   :  { %4527 = vst.msk [vmem:[#allocation4] sm:$0xff] %vm1232_vm12, %v4519_v41 }
0x1524   :  { %v4521_v54 = vpop.permute.xlu1 %4520 }
0x1525   :  { %4528 = vst.msk [vmem:[#allocation4 + $0x8] sm:$0xff] %vm1232_vm12, %v4521_v54 }
0x152c   :  { %v4779_v19 = vpop.permute.xlu1 %4778 }
0x152d   :  { %4787 = vst.msk [vmem:[#allocation4] sm:$0xff] %vm1494_vm13, %v4779_v19  ;;  %v7926_v19 = vld [vmem:[%s12250_s1 + $0x38] sm:$0xff] }
0x152e   :  { %8975 = vmatpush3.msra.mxu1 %v7926_v19  ;;  %v7933_v19 = vld [vmem:[%s12151_s15 + $0x48] sm:$0xff] }
0x152f   :  { %8976 = vmatprep.subr.mxu1 %v9584_v39 }
0x1530   :  { %v4263_v50 = vpop.permute.xlu1 %4262  ;;  %v4781_v45 = vpop.permute.xlu0 %4780 }
0x1531   :  { %4269 = vst.msk [vmem:[#allocation4 + $0x10] sm:$0x1] %vm973_vm14, %v4263_v50  ;;  %v7925_v50 = vld [vmem:[%s12250_s1 + $0x30] sm:$0xff] }
0x1532   :  { %4788 = vst.msk [vmem:[#allocation4 + $0x8] sm:$0xff] %vm1494_vm13, %v4781_v45  ;;  %8977 = vmatpush3.msra.mxu1 %v7925_v50  ;;  %v7924_v45 = vld [vmem:[%s12250_s1 + $0x28] sm:$0xff]  ;;  %v7932_v50 = vld [vmem:[%s12151_s15 + $0x40] sm:$0xff] }
0x1533   :  { %8978 = vmatprep.subr.mxu1 %v9584_v39 }
0x1534   :  { %v4783_v38 = vpop.permute.xlu1 %4782  ;;  %v4523_v51 = vpop.permute.xlu0 %4522  ;;  %v4790_v55 = vld [vmem:[#allocation4] sm:$0xff]  ;;  %8979 = vmatpush3.msra.mxu1 %v7924_v45  ;;  %v7928_v45 = vld [vmem:[%s12152_s14 + $0x1] ss:$0 sm:$0xff] }
0x1535   :  { %4529 = vst.msk [vmem:[#allocation4 + $0x10] sm:$0x1] %vm12270_vm15, %v4523_v51  ;;  %8966 = vmatmul.mubr.msk.f32.vlgmr.msra.gmra.mxu0 %vm190_vm2, %v4790_v55  ;;  %8980 = vmatprep.subr.mxu1 %v9584_v39  ;;  %vm12273_vm15 = vmmov %vm12272_vm0 }
0x1536   :  { %4789 = vst.msk [vmem:[#allocation4 + $0x10] sm:$0x1] %vm12271_vm5, %v4783_v38  ;;  %8968 = vmatprep.mubr.msk.f32.mxu0 %vm9585_vm3, %v9584_v39  ;;  %v7923_v38 = vld [vmem:[%s12250_s1 + $0x20] sm:$0xff]  ;;  %vm12274_vm5 = vcmask 778240  }
0x1537   :  { %8981 = vmatpush3.msra.mxu1 %v7923_v38 }
0x1538   :  { %9016 = vmatprep.subr.mxu1 %v9584_v39 }
0x1539   :  { %v4791_v56 = vld [vmem:[#allocation4 + $0x8] sm:$0xff] }
0x153a   :  { %8969 = vmatmul.mubr.msk.f32.gmra.mxu0 %vm190_vm2, %v4791_v56 }
0x153b   :  { %8971 = vmatprep.mubr.msk.f32.mxu0 %vm9585_vm3, %v9584_v39 }
0x153d   :  { %v4792_v43 = vld [vmem:[#allocation4 + $0x10] sm:$0x1] }
0x153e   :  { %8972 = vmatmul.mubr.msk.f32.gmra.mxu0 %vm190_vm2, %v4792_v43 }
0x153f   :  { %9007 = vmatprep.mubr.msk.f32.mxu0 %vm9585_vm3, %v9584_v39 }
0x15f5   :  { %v4881_v53 = vpop.f32.mrf.mxu0 }
0x15f6   :  { %v4882_v57 = vadd.f32 %v7915_v52, %v4881_v53 }
0x15f7   :  { %v8967_v58 = vpop.f32.mrf.mxu0 }
0x15f8   :  { %v11347_v14 = vadd.f32 %v9577_v32, %v4882_v57 }
0x15fa   :  { %v4886_v23 = vpop.f32.mrf.mxu0  ;;  %v4902_v36 = vsel %vm190_vm2, %v11347_v14, 0.0 }
0x15fb   :  { %v4887_v60 = vadd.f32 %v7915_v52, %v4886_v23  ;;  %4903 = vadd.xlane.f32.xlu0 %v4902_v36 }
0x15fc   :  { %v8970_v11 = vpop.f32.mrf.mxu0 }
0x15fd   :  { %v11351_v62 = vadd.f32 %v9578_v34, %v4887_v60 }
0x15fe   :  { %v4891_v4 = vpop.f32.mrf.mxu0 }
0x15ff   :  { %v4905_v0 = vsel %vm190_vm2, %v11351_v62, 0.0  ;;  %v4892_v10 = vadd.f32 %v7915_v52, %v4891_v4 }
0x1600   :  { %4906 = vadd.xlane.f32.xlu1 %v4905_v0  ;;  %v8973_v22 = vpop.f32.mrf.mxu0  ;;  %v7921_v0 = vld [vmem:[%s12149_s11 + $0x1] ss:$0 sm:$0xff] }
0x1601   :  { %v11355_v40 = vadd.f32 %v9579_v8, %v4892_v10 }
0x1603   :  { %v4908_v15 = vsel %vm184_vm1, %v11355_v40, 0.0 }
0x1604   :  { %5266 = vadd.xlane.f32.xlu1 %v5265_v63  ;;  %4909 = vadd.xlane.f32.xlu0 %v4908_v15  ;;  %v7922_v15 = vld [vmem:[%s12150_s12 + $0x1] ss:$0 sm:$0xff] }
0x1608   :  { %5260 = vadd.xlane.f32.xlu0 %v5259_v13 }
0x160c   :  { %5263 = vadd.xlane.f32.xlu0 %v5262_v25 }
0x1684   :  { %v4904_v5 = vpop.xlane.xlu0 %4903 }
0x1685   :  { %v4911_v20 = vmul.f32 0.03125, %v4904_v5  ;;  %v7952_v5 = vld [vmem:[%s12244_s30 + $0x38] sm:$0xff] }
0x1687   :  { %v11363_v27 = vsub.f32 %v11347_v14, %v4911_v20 }
0x1689   :  { %v4907_v28 = vpop.xlane.xlu1 %4906  ;;  %v4917_v24 = vmul.f32 %v11363_v27, %v11363_v27 }
0x168a   :  { %v4912_v21 = vmul.f32 0.03125, %v4907_v28 }
0x168b   :  { %v4920_v3 = vsel %vm190_vm2, %v4917_v24, 0.0  ;;  %v7950_v24 = vld [vmem:[%s12244_s30 + $0x28] sm:$0xff] }
0x168c   :  { %v11368_v29 = vsub.f32 %v11351_v62, %v4912_v21  ;;  %4921 = vadd.xlane.f32.xlu0 %v4920_v3  ;;  %v7949_v3 = vld [vmem:[%s12244_s30 + $0x20] sm:$0xff] }
0x168d   :  { %v5267_v31 = vpop.xlane.xlu1 %5266  ;;  %v4910_v6 = vpop.xlane.xlu0 %4909 }
0x168e   :  { %v4918_v33 = vmul.f32 %v11368_v29, %v11368_v29  ;;  %v4913_v17 = vmul.f32 0.03125, %v4910_v6  ;;  %v5270_v61 = vmul.f32 0.03125, %v5267_v31 }
0x1690   :  { %v4923_v9 = vsel %vm190_vm2, %v4918_v33, 0.0  ;;  %v11375_v59 = vsub.f32 %v11355_v40, %v4913_v17  ;;  %v11379_v2 = vsub.f32 %v5256_v37, %v5270_v61  ;;  %v7947_v33 = vld [vmem:[%s12245_s2 + $0x1] ss:$0 sm:$0xff] }
0x1691   :  { %4924 = vadd.xlane.f32.xlu1 %v4923_v9  ;;  %v5261_v46 = vpop.xlane.xlu0 %5260  ;;  %v7948_v61 = vld [vmem:[%s12246_s4 + $0x1] ss:$0 sm:$0xff]  ;;  %s12287_s4 = sld [smem:[#allocation24_spill]] }
0x1692   :  { %v5268_v44 = vmul.f32 0.03125, %v5261_v46  ;;  %v4919_v30 = vmul.f32 %v11375_v59, %v11375_v59  ;;  %v5276_v18 = vmul.f32 %v11379_v2, %v11379_v2 }
0x1694   :  { %v11381_v42 = vsub.f32 %v5254_v16, %v5268_v44  ;;  %v4926_v35 = vsel %vm184_vm1, %v4919_v30, 0.0  ;;  %v5283_v41 = vsel %vm184_vm1, %v5276_v18, 0.0  ;;  %v7937_v18 = vld [vmem:[%s12151_s15 + $0x68] sm:$0xff] }
0x1695   :  { %4927 = vadd.xlane.f32.xlu0 %v4926_v35  ;;  %v5264_v12 = vpop.xlane.xlu0 %5263 }
0x1696   :  { %v5269_v47 = vmul.f32 0.03125, %v5264_v12  ;;  %v5274_v49 = vmul.f32 %v11381_v42, %v11381_v42 }
0x1698   :  { %v11386_v48 = vsub.f32 %v5255_v26, %v5269_v47  ;;  %v5277_v7 = vsel %vm190_vm2, %v5274_v49, 0.0 }
0x1699   :  { %5278 = vadd.xlane.f32.xlu1 %v5277_v7 }
0x169a   :  { %v5275_v1 = vmul.f32 %v11386_v48, %v11386_v48 }
0x169c   :  { %v5280_v54 = vsel %vm190_vm2, %v5275_v1, 0.0  ;;  %v7936_v1 = vld [vmem:[%s12151_s15 + $0x60] sm:$0xff] }
0x169d   :  { %5284 = vadd.xlane.f32.xlu1 %v5283_v41  ;;  %5281 = vadd.xlane.f32.xlu0 %v5280_v54  ;;  %v7935_v41 = vld [vmem:[%s12151_s15 + $0x58] sm:$0xff]  ;;  %v7934_v54 = vld [vmem:[%s12151_s15 + $0x50] sm:$0xff] }
0x1715   :  { %v4922_v51 = vpop.xlane.xlu0 %4921 }
0x1716   :  { %v4929_v55 = vmul.f32 0.03125, %v4922_v51 }
0x1718   :  { %v4932_v56 = vadd.f32 1e-12, %v4929_v55 }
0x171a   :  { %v4925_v43 = vpop.xlane.xlu1 %4924  ;;  %9467 = vrsqrt.f32 %v4932_v56 }
0x171b   :  { %v4930_v52 = vmul.f32 0.03125, %v4925_v43 }
0x171d   :  { %v4933_v53 = vadd.f32 1e-12, %v4930_v52 }
0x171e   :  { %v4928_v57 = vpop.xlane.xlu0 %4927 }
0x171f   :  { %9469 = vrsqrt.f32 %v4933_v53  ;;  %v4931_v58 = vmul.f32 0.03125, %v4928_v57 }
0x1721   :  { %v4934_v32 = vadd.f32 1e-12, %v4931_v58 }
0x1722   :  { %v5279_v23 = vpop.xlane.xlu1 %5278 }
0x1723   :  { %9471 = vrsqrt.f32 %v4934_v32  ;;  %v5286_v60 = vmul.f32 0.03125, %v5279_v23 }
0x1725   :  { %v5289_v36 = vadd.f32 1e-12, %v5286_v60 }
0x1726   :  { %v5285_v11 = vpop.xlane.xlu1 %5284  ;;  %v5282_v34 = vpop.xlane.xlu0 %5281 }
0x1727   :  { %v9468_v4 = vpop.eup %9467  ;;  %9473 = vrsqrt.f32 %v5289_v36  ;;  %v5288_v10 = vmul.f32 0.03125, %v5285_v11  ;;  %v5287_v37 = vmul.f32 0.03125, %v5282_v34 }
0x1728   :  { %v4938_v22 = vmul.f32 %v9468_v4, %v11363_v27  ;;  %v7951_v27 = vld [vmem:[%s12244_s30 + $0x30] sm:$0xff] }
0x1729   :  { %v5291_v8 = vadd.f32 1e-12, %v5288_v10  ;;  %v5290_v63 = vadd.f32 1e-12, %v5287_v37 }
0x172a   :  { %v4947_v16 = vmul.f32 %v7921_v0, %v4938_v22 }
0x172b   :  { %9475 = vrsqrt.f32 %v5291_v8 }
0x172c   :  { %v9470_v13 = vpop.eup %9469  ;;  %9477 = vrsqrt.f32 %v5290_v63  ;;  %v4956_v26 = vadd.f32 %v7922_v15, %v4947_v16 }
0x172d   :  { %v4939_v25 = vmul.f32 %v9470_v13, %v11368_v29 }
0x172e   :  { %8983 = vmatmul.mubr.msk.f32.vlgmr.msra.gmra.mxu1 %vm190_vm2, %v4956_v26 }
0x172f   :  { %v4948_v20 = vmul.f32 %v7921_v0, %v4939_v25  ;;  %8985 = vmatprep.mubr.msk.f32.mxu1 %vm9585_vm3, %v9584_v39  ;;  %9017 = vmatpush3.msra.mxu1 %v7952_v5 }
0x1730   :  { %v9472_v28 = vpop.eup %9471  ;;  %9018 = vmatprep.subr.mxu1 %v9584_v39 }
0x1731   :  { %v4957_v21 = vadd.f32 %v7922_v15, %v4948_v20  ;;  %9019 = vmatpush3.msra.mxu1 %v7951_v27  ;;  %v4940_v29 = vmul.f32 %v9472_v28, %v11375_v59 }
0x1732   :  { %9020 = vmatprep.subr.mxu1 %v9584_v39 }
0x1733   :  { %8986 = vmatmul.mubr.msk.f32.gmra.mxu1 %vm190_vm2, %v4957_v21  ;;  %v4949_v31 = vmul.f32 %v7921_v0, %v4940_v29  ;;  %v7954_v0 = vld [vmem:[%s12247_s28 + $0x1] ss:$0 sm:$0xff] }
0x1734   :  { %8988 = vmatprep.mubr.msk.f32.mxu1 %vm9585_vm3, %v9584_v39  ;;  %9021 = vmatpush3.msra.mxu1 %v7950_v24  ;;  %v9474_v6 = vpop.eup %9473 }
0x1735   :  { %9022 = vmatprep.subr.mxu1 %v9584_v39  ;;  %v5295_v17 = vmul.f32 %v9474_v6, %v11381_v42  ;;  %v4958_v9 = vadd.f32 %v7922_v15, %v4949_v31 }
0x1736   :  { %9023 = vmatpush3.msra.mxu1 %v7949_v3 }
0x1737   :  { %9033 = vmatprep.subr.mxu1 %v9584_v39  ;;  %v5304_v59 = vmul.f32 %v7947_v33, %v5295_v17  ;;  %8989 = vmatmul.mubr.msk.f32.gmra.mxu1 %vm190_vm2, %v4958_v9 }
0x1738   :  { %v9476_v46 = vpop.eup %9475  ;;  %9024 = vmatprep.mubr.msk.f32.mxu1 %vm9585_vm3, %v9584_v39 }
0x1739   :  { %v9478_v44 = vpop.eup %9477  ;;  %v5313_v30 = vadd.f32 %v7948_v61, %v5304_v59  ;;  %v5297_v42 = vmul.f32 %v9476_v46, %v11379_v2  ;;  %v7939_v2 = vld [vmem:[%s12151_s15 + $0x78] sm:$0xff] }
0x173a   :  { %v5296_v35 = vmul.f32 %v9478_v44, %v11386_v48  ;;  %8992 = vmatpush3.msra.mxu0 %v7939_v2  ;;  %v7938_v48 = vld [vmem:[%s12151_s15 + $0x70] sm:$0xff] }
0x173b   :  { %9025 = vmatmul.mubr.msk.f32.vlgmr.msra.gmra.mxu1 %vm190_vm2, %v5313_v30  ;;  %v5306_v49 = vmul.f32 %v7947_v33, %v5297_v42  ;;  %8993 = vmatprep.subr.mxu0 %v9584_v39 }
0x173c   :  { %9027 = vmatprep.mubr.msk.f32.mxu1 %vm9585_vm3, %v9584_v39  ;;  %v5305_v12 = vmul.f32 %v7947_v33, %v5296_v35  ;;  %8994 = vmatpush3.msra.mxu0 %v7938_v48 }
0x173d   :  { %v5315_v7 = vadd.f32 %v7948_v61, %v5306_v49  ;;  %8995 = vmatprep.subr.mxu0 %v9584_v39 }
0x173e   :  { %v5314_v47 = vadd.f32 %v7948_v61, %v5305_v12  ;;  %8996 = vmatpush3.msra.mxu0 %v7937_v18 }
0x173f   :  { %8997 = vmatprep.subr.mxu0 %v9584_v39 }
0x1740   :  { %9028 = vmatmul.mubr.msk.f32.gmra.mxu1 %vm190_vm2, %v5314_v47  ;;  %8998 = vmatpush3.msra.mxu0 %v7936_v1 }
0x1741   :  { %9030 = vmatprep.mubr.msk.f32.mxu1 %vm9585_vm3, %v9584_v39  ;;  %8999 = vmatprep.subr.mxu0 %v9584_v39 }
0x1742   :  { %9000 = vmatpush3.msra.mxu0 %v7935_v41 }
0x1743   :  { %9001 = vmatprep.subr.mxu0 %v9584_v39 }
0x1744   :  { %9031 = vmatmul.mubr.msk.f32.gmra.mxu1 %vm190_vm2, %v5315_v7  ;;  %9002 = vmatpush3.msra.mxu0 %v7934_v54 }
0x1745   :  { %9039 = vmatprep.mubr.msk.f32.mxu1 %vm9585_vm3, %v9584_v39  ;;  %9003 = vmatprep.subr.mxu0 %v9584_v39 }
0x1746   :  { %9004 = vmatpush3.msra.mxu0 %v7933_v19 }
0x1747   :  { %9005 = vmatprep.subr.mxu0 %v9584_v39 }
0x1748   :  { %9006 = vmatpush3.msra.mxu0 %v7932_v50 }
0x1749   :  { %9048 = vmatprep.subr.mxu0 %v9584_v39 }
0x17ee   :  { %v5047_v38 = vpop.f32.mrf.mxu1 }
0x17ef   :  { %v11498_v51 = vadd.f32 %v7928_v45, %v5047_v38 }
0x17f0   :  { %v8984_v55 = vpop.f32.mrf.mxu1 }
0x17f1   :  { %v11501_v56 = vmul.f32 0.70710677, %v11498_v51 }
0x17f3   :  { %v5052_v43 = vpop.f32.mrf.mxu1  ;;  %v5064_v52 = vand.u32 2147483647, %v11501_v56 }
0x17f4   :  { %v11504_v53 = vadd.f32 %v7928_v45, %v5052_v43 }
0x17f5   :  { %v8987_v57 = vpop.f32.mrf.mxu1  ;;  %v5067_v58 = vmul.f32 0.3275911, %v5064_v52  ;;  %v5106_v13 = vsub.f32 0.0, %v5064_v52 }
0x17f6   :  { %v11507_v32 = vmul.f32 0.70710677, %v11504_v53 }
0x17f7   :  { %v5070_v23 = vadd.f32 1.0, %v5067_v58  ;;  %v5057_v36 = vpop.f32.mrf.mxu1  ;;  %v5109_v27 = vmul.f32 %v5106_v13, %v5064_v52 }
0x17f8   :  { %v5065_v60 = vand.u32 2147483647, %v11507_v32  ;;  %v11510_v11 = vadd.f32 %v7928_v45, %v5057_v36 }
0x17f9   :  { %9479 = vrcp.f32 %v5070_v23  ;;  %v8990_v4 = vpop.f32.mrf.mxu1  ;;  %v5112_v6 = vmul.f32 1.442695, %v5109_v27 }
0x17fa   :  { %v5068_v34 = vmul.f32 0.3275911, %v5065_v60  ;;  %v11516_v10 = vmul.f32 0.70710677, %v11510_v11  ;;  %v5107_v28 = vsub.f32 0.0, %v5065_v60 }
0x17fb   :  { %v5402_v22 = vpop.f32.mrf.mxu1 }
0x17fc   :  { %v5071_v37 = vadd.f32 1.0, %v5068_v34  ;;  %v5066_v8 = vand.u32 2147483647, %v11516_v10  ;;  %v5403_v63 = vadd.f32 %v7954_v0, %v5402_v22  ;;  %v5110_v33 = vmul.f32 %v5107_v28, %v5065_v60 }
0x17fd   :  { %v9026_v15 = vpop.f32.mrf.mxu1 }
0x17fe   :  { %9481 = vrcp.f32 %v5071_v37  ;;  %v5069_v16 = vmul.f32 0.3275911, %v5066_v8  ;;  %5416 = vst.msk [vmem:[#allocation3] sm:$0xff] %vm12272_vm0, %v5403_v63  ;;  %v5108_v17 = vsub.f32 0.0, %v5066_v8  ;;  %v5114_v30 = vmul.f32 1.442695, %v5110_v33 }
0x17ff   :  { %vm5127_vm0 = vcmp.lt.f32.partialorder %v11501_v56, 0.0 }
0x1800   :  { %v5072_v26 = vadd.f32 1.0, %v5069_v16  ;;  %v5407_v25 = vpop.f32.mrf.mxu1  ;;  %v5111_v35 = vmul.f32 %v5108_v17, %v5066_v8 }
0x1801   :  { %v5408_v5 = vadd.f32 %v7954_v0, %v5407_v25 }
0x1802   :  { %9483 = vrcp.f32 %v5072_v26  ;;  %v9029_v20 = vpop.f32.mrf.mxu1  ;;  %v5116_v1 = vmul.f32 1.442695, %v5111_v35 }
0x1803   :  { %5417 = vst.msk [vmem:[#allocation3 + $0x8] sm:$0xff] %vm12273_vm15, %v5408_v5  ;;  %9485 = vpow2.f32 %v5112_v6  ;;  %v5124_v20 = vmul.f32 0.5, %v11498_v51  ;;  %vm5128_vm15 = vcmp.lt.f32.partialorder %v11507_v32, 0.0 }
0x1804   :  { %v5412_v21 = vpop.f32.mrf.mxu1  ;;  %9487 = vpow2.f32 %v5114_v30 }
0x1805   :  { %v5413_v24 = vadd.f32 %v7954_v0, %v5412_v21  ;;  %v11526_v47 = vld [vmem:[#allocation3] sm:$0xff]  ;;  %9489 = vpow2.f32 %v5116_v1 }
0x1806   :  { %v9480_v29 = vpop.eup %9479  ;;  %v9032_v3 = vpop.f32.mrf.mxu1 }
0x1807   :  { %v5079_v31 = vmul.f32 1.0614054, %v9480_v29  ;;  %5418 = vst.msk [vmem:[#allocation3 + $0x10] sm:$0x1] %vm12274_vm5, %v5413_v24  ;;  %vm5129_vm5 = vcmp.lt.f32.partialorder %v11516_v10, 0.0 }
0x1809   :  { %v5082_v9 = vadd.f32 -1.4531521, %v5079_v31  ;;  %v5125_v31 = vmul.f32 0.5, %v11504_v53 }
0x180a   :  { %v11522_v59 = vld [vmem:[#allocation3 + $0x8] sm:$0xff] }
0x180b   :  { %v9482_v61 = vpop.eup %9481  ;;  %v5085_v46 = vmul.f32 %v9480_v29, %v5082_v9  ;;  %5427 = vrot.lane.b32.xlu1 %v11522_v59, %s12268_s22  ;;  %v5126_v9 = vmul.f32 0.5, %v11510_v11 }
0x180c   :  { %v5080_v44 = vmul.f32 1.0614054, %v9482_v61 }
0x180d   :  { %v5088_v42 = vadd.f32 1.4214138, %v5085_v46 }
0x180e   :  { %v5083_v12 = vadd.f32 -1.4531521, %v5080_v44  ;;  %v11528_v49 = vld [vmem:[#allocation3 + $0x10] sm:$0x1] }
0x180f   :  { %v9484_v7 = vpop.eup %9483  ;;  %v5091_v2 = vmul.f32 %v9480_v29, %v5088_v42  ;;  %5425 = vrot.lane.b32.xlu1 %v11526_v47, %s12268_s22  ;;  %5429 = vrot.lane.b32.xlu0 %v11528_v49, %s12268_s22  ;;  %v11534_v50 = vld [vmem:[#allocation3 + $0x10] sm:$0x1] }
0x1810   :  { %v5086_v48 = vmul.f32 %v9482_v61, %v5083_v12  ;;  %v5081_v18 = vmul.f32 1.0614054, %v9484_v7  ;;  %v9486_v60 = vpop.eup %9485  ;;  %v11544_v37 = vld [vmem:[#allocation3 + $0x10] sm:$0x1] }
0x1811   :  { %v5094_v41 = vadd.f32 -0.28449672, %v5091_v2  ;;  %v9488_v63 = vpop.eup %9487  ;;  %v11565_v32 = vld [vmem:[#allocation3 + $0x10] sm:$0x1] }
0x1812   :  { %v5089_v54 = vadd.f32 1.4214138, %v5086_v48  ;;  %v5084_v19 = vadd.f32 -1.4531521, %v5081_v18  ;;  %v9490_v21 = vpop.eup %9489 }
0x1813   :  { %v5097_v45 = vmul.f32 %v9480_v29, %v5094_v41  ;;  %5677 = vrot.lane.b32.xlu1 %v11534_v50, %s12251_s5  ;;  %5675 = vrot.lane.b32.xlu0 %v11522_v59, %s12251_s5 }
0x1814   :  { %v5092_v38 = vmul.f32 %v9482_v61, %v5089_v54  ;;  %v5087_v55 = vmul.f32 %v9484_v7, %v5084_v19 }
0x1815   :  { %v5100_v43 = vadd.f32 0.2548296, %v5097_v45 }
0x1816   :  { %v5095_v52 = vadd.f32 -0.28449672, %v5092_v38  ;;  %v5090_v57 = vadd.f32 1.4214138, %v5087_v55 }
0x1817   :  { %v5103_v58 = vmul.f32 %v9480_v29, %v5100_v43  ;;  %5673 = vrot.lane.b32.xlu1 %v11526_v47, %s12251_s5  ;;  %5667 = vrot.lane.b32.xlu0 %v11526_v47, %s12252_s3 }
0x1818   :  { %v5098_v23 = vmul.f32 %v9482_v61, %v5095_v52  ;;  %v5093_v36 = vmul.f32 %v9484_v7, %v5090_v57  ;;  %v7941_v57 = vld [vmem:[%s12153_s16 + $0x1] ss:$0 sm:$0xff] }
0x1819   :  { %v5118_v34 = vmul.f32 %v9486_v60, %v5103_v58 }
0x181a   :  { %v5101_v4 = vadd.f32 0.2548296, %v5098_v23  ;;  %v5096_v0 = vadd.f32 -0.28449672, %v5093_v36 }
0x181b   :  { %v5121_v22 = vsub.f32 1.0, %v5118_v34  ;;  %5937 = vrot.lane.b32.xlu1 %v11544_v37, %s12253_s8  ;;  %5669 = vrot.lane.b32.xlu0 %v11522_v59, %s12252_s3 }
0x181c   :  { %v5104_v8 = vmul.f32 %v9482_v61, %v5101_v4  ;;  %v5099_v15 = vmul.f32 %v9484_v7, %v5096_v0 }
0x181d   :  { %v5130_v16 = vsub.f32 0.0, %v5121_v22 }
0x181e   :  { %v5119_v13 = vmul.f32 %v9488_v63, %v5104_v8  ;;  %v5102_v26 = vadd.f32 0.2548296, %v5099_v15 }
0x181f   :  { %v5133_v25 = vsel %vm5127_vm0, %v5130_v16, %v5121_v22  ;;  %5935 = vrot.lane.b32.xlu1 %v11522_v59, %s12253_s8  ;;  %5671 = vrot.lane.b32.xlu0 %v11534_v50, %s12252_s3  ;;  %s12275_s3 = smov 56  }
0x1820   :  { %v5122_v5 = vsub.f32 1.0, %v5119_v13  ;;  %v5136_v27 = vadd.f32 1.0, %v5133_v25  ;;  %v5105_v28 = vmul.f32 %v9484_v7, %v5102_v26 }
0x1822   :  { %v5131_v24 = vsub.f32 0.0, %v5122_v5  ;;  %v5139_v29 = vmul.f32 %v5136_v27, %v5124_v20  ;;  %v5120_v3 = vmul.f32 %v9490_v21, %v5105_v28 }
0x1823   :  { %5933 = vrot.lane.b32.xlu1 %v11526_v47, %s12253_s8  ;;  %5927 = vrot.lane.b32.xlu0 %v11526_v47, %s12254_s13  ;;  %s12276_s8 = smov 48  }
0x1824   :  { %v5134_v56 = vsel %vm5128_vm15, %v5131_v24, %v5122_v5  ;;  %v5123_v33 = vsub.f32 1.0, %v5120_v3  ;;  %9008 = vmatmul.mubr.msk.f32.vlgmr.msra.gmra.mxu0 %vm1860_vm4, %v5139_v29 }
0x1825   :  { %v5137_v6 = vadd.f32 1.0, %v5134_v56  ;;  %9010 = vmatprep.mubr.msk.f32.mxu0 %vm9585_vm3, %v9584_v39 }
0x1826   :  { %v5132_v17 = vsub.f32 0.0, %v5123_v33 }
0x1827   :  { %v5140_v51 = vmul.f32 %v5137_v6, %v5125_v31  ;;  %6197 = vrot.lane.b32.xlu1 %v11565_v32, %s12255_s6  ;;  %5929 = vrot.lane.b32.xlu0 %v11522_v59, %s12254_s13 }
0x1828   :  { %v5135_v53 = vsel %vm5129_vm5, %v5132_v17, %v5123_v33 }
0x1829   :  { %9011 = vmatmul.mubr.msk.f32.gmra.mxu0 %vm1860_vm4, %v5140_v51  ;;  %v5138_v61 = vadd.f32 1.0, %v5135_v53 }
0x182a   :  { %9013 = vmatprep.mubr.msk.f32.mxu0 %vm9585_vm3, %v9584_v39 }
0x182b   :  { %v5141_v46 = vmul.f32 %v5138_v61, %v5126_v9  ;;  %6195 = vrot.lane.b32.xlu1 %v11522_v59, %s12255_s6  ;;  %5931 = vrot.lane.b32.xlu0 %v11544_v37, %s12254_s13 }
0x182d   :  { %9014 = vmatmul.mubr.msk.f32.gmra.mxu0 %vm1860_vm4, %v5141_v46 }
0x182e   :  { %9054 = vmatprep.mubr.msk.f32.mxu0 %vm9585_vm3, %v9584_v39 }
0x182f   :  { %6193 = vrot.lane.b32.xlu1 %v11526_v47, %s12255_s6  ;;  %6187 = vrot.lane.b32.xlu0 %v11526_v47, %s12256_s7  ;;  %s12277_s6 = smov 40  }
0x1833   :  { %6189 = vrot.lane.b32.xlu1 %v11522_v59, %s12256_s7 }
0x1837   :  { %5563 = vrot.lane.b32.xlu1 %v11528_v49, %s12257_s10 }
0x183b   :  { %5559 = vrot.lane.b32.xlu1 %v11526_v47, %s12257_s10 }
0x187d   :  { %v5428_v11 = vpop.permute.xlu1 %5427 }
0x1881   :  { %v5426_v10 = vpop.permute.xlu1 %5425  ;;  %v5430_v44 = vpop.permute.xlu0 %5429 }
0x1882   :  { %9034 = vmatpush3.xpose.msk.msra.mxu1 %vm478_vm6, %v5430_v44 }
0x1883   :  { %9035 = vmatprep.subr.mxu1 %v9584_v39 }
0x1885   :  { %v5678_v30 = vpop.permute.xlu1 %5677  ;;  %v5676_v35 = vpop.permute.xlu0 %5675 }
0x1886   :  { %9036 = vmatpush3.xpose.msk.msra.mxu1 %vm478_vm6, %v5428_v11 }
0x1887   :  { %9037 = vmatprep.subr.mxu1 %v9584_v39 }
0x1889   :  { %v5674_v42 = vpop.permute.xlu1 %5673  ;;  %v5668_v12 = vpop.permute.xlu0 %5667 }
0x188a   :  { %9038 = vmatpush3.xpose.msk.msra.mxu1 %vm478_vm6, %v5426_v10 }
0x188b   :  { %9063 = vmatprep.subr.mxu1 %v9584_v39 }
0x188d   :  { %v5938_v7 = vpop.permute.xlu1 %5937  ;;  %9040 = vmatmul.mubr.msk.f32.vlgmr.msra.gmra.mxu1 %vm478_vm6, %v11526_v47  ;;  %v5670_v48 = vpop.permute.xlu0 %5669 }
0x188e   :  { %9064 = vmatpush3.xpose.msk.msra.mxu1 %vm478_vm6, %v5678_v30  ;;  %9042 = vmatprep.mubr.msk.f32.mxu1 %vm9585_vm3, %v9584_v39 }
0x188f   :  { %9065 = vmatprep.subr.mxu1 %v9584_v39 }
0x1891   :  { %v5936_v2 = vpop.permute.xlu1 %5935  ;;  %9043 = vmatmul.mubr.msk.f32.gmra.mxu1 %vm478_vm6, %v11522_v59  ;;  %v5672_v1 = vpop.permute.xlu0 %5671 }
0x1892   :  { %9066 = vmatpush3.xpose.msk.msra.mxu1 %vm478_vm6, %v5676_v35  ;;  %9045 = vmatprep.mubr.msk.f32.mxu1 %vm9585_vm3, %v9584_v39 }
0x1893   :  { %9067 = vmatprep.subr.mxu1 %v9584_v39 }
0x1895   :  { %v5934_v18 = vpop.permute.xlu1 %5933  ;;  %9046 = vmatmul.mubr.msk.f32.gmra.mxu1 %vm478_vm6, %v11528_v49  ;;  %v5928_v49 = vpop.permute.xlu0 %5927 }
0x1896   :  { %9068 = vmatpush3.xpose.msk.msra.mxu1 %vm478_vm6, %v5674_v42  ;;  %9069 = vmatprep.mubr.msk.f32.mxu1 %vm9585_vm3, %v9584_v39 }
0x1897   :  { %9093 = vmatprep.subr.mxu1 %v9584_v39 }
0x1899   :  { %v6198_v41 = vpop.permute.xlu1 %6197  ;;  %9070 = vmatmul.mubr.msk.f32.vlgmr.msra.gmra.mxu1 %vm478_vm6, %v5668_v12  ;;  %v5930_v45 = vpop.permute.xlu0 %5929 }
0x189a   :  { %9094 = vmatpush3.xpose.msk.msra.mxu1 %vm478_vm6, %v5938_v7  ;;  %9072 = vmatprep.mubr.msk.f32.mxu1 %vm9585_vm3, %v9584_v39 }
0x189b   :  { %9095 = vmatprep.subr.mxu1 %v9584_v39 }
0x189d   :  { %v6196_v54 = vpop.permute.xlu1 %6195  ;;  %9073 = vmatmul.mubr.msk.f32.gmra.mxu1 %vm478_vm6, %v5670_v48  ;;  %v5932_v43 = vpop.permute.xlu0 %5931 }
0x189e   :  { %9096 = vmatpush3.xpose.msk.msra.mxu1 %vm478_vm6, %v5936_v2  ;;  %9075 = vmatprep.mubr.msk.f32.mxu1 %vm9585_vm3, %v9584_v39 }
0x189f   :  { %9097 = vmatprep.subr.mxu1 %v9584_v39 }
0x18a1   :  { %v6194_v19 = vpop.permute.xlu1 %6193  ;;  %9076 = vmatmul.mubr.msk.f32.gmra.mxu1 %vm478_vm6, %v5672_v1  ;;  %v6188_v52 = vpop.permute.xlu0 %6187 }
0x18a2   :  { %9098 = vmatpush3.xpose.msk.msra.mxu1 %vm478_vm6, %v5934_v18  ;;  %9099 = vmatprep.mubr.msk.f32.mxu1 %vm9585_vm3, %v9584_v39 }
0x18a3   :  { %9123 = vmatprep.subr.mxu1 %v9584_v39 }
0x18a5   :  { %v6190_v38 = vpop.permute.xlu1 %6189  ;;  %9100 = vmatmul.mubr.msk.f32.vlgmr.msra.gmra.mxu1 %vm478_vm6, %v5928_v49 }
0x18a6   :  { %9124 = vmatpush3.xpose.msk.msra.mxu1 %vm478_vm6, %v6198_v41  ;;  %9102 = vmatprep.mubr.msk.f32.mxu1 %vm9585_vm3, %v9584_v39 }
0x18a7   :  { %9125 = vmatprep.subr.mxu1 %v9584_v39 }
0x18a9   :  { %v5564_v55 = vpop.permute.xlu1 %5563  ;;  %9103 = vmatmul.mubr.msk.f32.gmra.mxu1 %vm478_vm6, %v5930_v45 }
0x18aa   :  { %9049 = vmatpush3.msk.msra.mxu0 %vm626_vm7, %v5564_v55  ;;  %9126 = vmatpush3.xpose.msk.msra.mxu1 %vm478_vm6, %v6196_v54 }
0x18ab   :  { %9105 = vmatprep.mubr.msk.f32.mxu1 %vm9585_vm3, %v9584_v39  ;;  %9127 = vmatprep.subr.mxu1 %v9584_v39 }
0x18ac   :  { %9050 = vmatprep.subr.mxu0 %v9584_v39 }
0x18ad   :  { %9106 = vmatmul.mubr.msk.f32.gmra.mxu1 %vm478_vm6, %v5932_v43  ;;  %v5560_v43 = vpop.permute.xlu1 %5559 }
0x18ae   :  { %9128 = vmatpush3.xpose.msk.msra.mxu1 %vm478_vm6, %v6194_v19  ;;  %9129 = vmatprep.mubr.msk.f32.mxu1 %vm9585_vm3, %v9584_v39 }
0x18af   :  { %9153 = vmatprep.subr.mxu1 %v9584_v39 }
0x18b1   :  { %9130 = vmatmul.mubr.msk.f32.vlgmr.msra.gmra.mxu1 %vm478_vm6, %v6188_v52 }
0x18b2   :  { %9132 = vmatprep.mubr.msk.f32.mxu1 %vm9585_vm3, %v9584_v39 }
0x18b5   :  { %9133 = vmatmul.mubr.msk.f32.gmra.mxu1 %vm478_vm6, %v6190_v38 }
0x18b6   :  { %9135 = vmatprep.mubr.msk.f32.mxu1 %vm9585_vm3, %v9584_v39 }
0x18e4   :  { %v5234_v58 = vpop.f32.mrf.mxu0 }
0x18e5   :  { %v5235_v23 = vadd.f32 %v7941_v57, %v5234_v58 }
0x18e6   :  { %v9009_v60 = vpop.f32.mrf.mxu0 }
0x18e7   :  { %v5248_v36 = vadd.f32 %v5235_v23, %v11347_v14 }
0x18e9   :  { %v5239_v34 = vpop.f32.mrf.mxu0  ;;  %5251 = vst.msk [vmem:[#allocation2] sm:$0xff] %vm190_vm2, %v5248_v36 }
0x18ea   :  { %v5240_v4 = vadd.f32 %v7941_v57, %v5239_v34 }
0x18eb   :  { %v9012_v0 = vpop.f32.mrf.mxu0 }
0x18ec   :  { %v5249_v22 = vadd.f32 %v5240_v4, %v11351_v62 }
0x18ed   :  { %v5244_v8 = vpop.f32.mrf.mxu0 }
0x18ee   :  { %5252 = vst.msk [vmem:[#allocation2 + $0x8] sm:$0xff] %vm190_vm2, %v5249_v22  ;;  %v5245_v63 = vadd.f32 %v7941_v57, %v5244_v8 }
0x18ef   :  { %v9015_v15 = vpop.f32.mrf.mxu0 }
0x18f0   :  { %v5250_v16 = vadd.f32 %v5245_v63, %v11355_v40 }
0x18f2   :  { %5253 = vst.msk [vmem:[#allocation2 + $0x10] sm:$0x1] %vm184_vm1, %v5250_v16 }
0x194d   :  { %v5509_v13 = vpop.f32.mrf.mxu1 }
0x194e   :  { %v5523_v26 = vmul.f32 0.35355338, %v5509_v13 }
0x194f   :  { %v9041_v25 = vpop.f32.mrf.mxu1 }
0x1950   :  { %v5526_v14 = vsel %vm574_vm8, %v5523_v26, -inf }
0x1951   :  { %5527 = vmax.xlane.f32.xlu0 %v5526_v14  ;;  %v5514_v5 = vpop.f32.mrf.mxu1 }
0x1952   :  { %v5524_v20 = vmul.f32 0.35355338, %v5514_v5 }
0x1953   :  { %v9044_v27 = vpop.f32.mrf.mxu1 }
0x1954   :  { %v5529_v62 = vsel %vm574_vm8, %v5524_v20, -inf }
0x1955   :  { %5530 = vmax.xlane.f32.xlu1 %v5529_v62  ;;  %v5519_v28 = vpop.f32.mrf.mxu1 }
0x1956   :  { %v5525_v2 = vmul.f32 0.35355338, %v5519_v28 }
0x1957   :  { %v9047_v21 = vpop.f32.mrf.mxu1 }
0x1958   :  { %v5532_v18 = vsel %vm581_vm9, %v5525_v2, -inf }
0x1959   :  { %v5757_v24 = vpop.f32.mrf.mxu1 }
0x195a   :  { %v5771_v48 = vmul.f32 0.35355338, %v5757_v24 }
0x195b   :  { %v9071_v29 = vpop.f32.mrf.mxu1 }
0x195c   :  { %v5774_v41 = vsel %vm574_vm8, %v5771_v48, -inf }
0x195d   :  { %v5762_v3 = vpop.f32.mrf.mxu1 }
0x195e   :  { %v5772_v1 = vmul.f32 0.35355338, %v5762_v3 }
0x195f   :  { %v9074_v40 = vpop.f32.mrf.mxu1 }
0x1960   :  { %v5777_v49 = vsel %vm574_vm8, %v5772_v1, -inf }
0x1961   :  { %v5767_v56 = vpop.f32.mrf.mxu1 }
0x1962   :  { %v11666_v31 = vmul.f32 0.35355338, %v5767_v56 }
0x1963   :  { %v9077_v6 = vpop.f32.mrf.mxu1 }
0x1964   :  { %v5780_v33 = vsel %vm581_vm9, %v11666_v31, -inf }
0x1965   :  { %5781 = vmax.xlane.f32.xlu1 %v5780_v33  ;;  %v6017_v51 = vpop.f32.mrf.mxu1 }
0x1966   :  { %v6031_v54 = vmul.f32 0.35355338, %v6017_v51 }
0x1967   :  { %5561 = vrot.lane.b32.xlu0 %v11522_v59, %s12257_s10  ;;  %v9101_v17 = vpop.f32.mrf.mxu1  ;;  %s12285_s10 = sld [smem:[#allocation22_spill]] }
0x1968   :  { %v6034_v45 = vsel %vm574_vm8, %v6031_v54, -inf }
0x1969   :  { %v6022_v53 = vpop.f32.mrf.mxu1 }
0x196a   :  { %v11672_v9 = vmul.f32 0.35355338, %v6022_v53 }
0x196b   :  { %v9104_v61 = vpop.f32.mrf.mxu1 }
0x196c   :  { %v6037_v46 = vsel %vm574_vm8, %v11672_v9, -inf }
0x196d   :  { %6038 = vmax.xlane.f32.xlu1 %v6037_v46  ;;  %v6027_v11 = vpop.f32.mrf.mxu1 }
0x196e   :  { %v6033_v19 = vmul.f32 0.35355338, %v6027_v11 }
0x196f   :  { %v9107_v10 = vpop.f32.mrf.mxu1 }
0x1970   :  { %v6040_v55 = vsel %vm581_vm9, %v6033_v19, -inf }
0x1971   :  { %v6277_v44 = vpop.f32.mrf.mxu1 }
0x1972   :  { %v11676_v30 = vmul.f32 0.35355338, %v6277_v44 }
0x1973   :  { %v9131_v35 = vpop.f32.mrf.mxu1 }
0x1974   :  { %v6294_v42 = vsel %vm574_vm8, %v11676_v30, -inf }
0x1975   :  { %6295 = vmax.xlane.f32.xlu1 %v6294_v42  ;;  %v6282_v12 = vpop.f32.mrf.mxu1 }
0x1976   :  { %v11686_v38 = vmul.f32 0.35355338, %v6282_v12 }
0x1977   :  { %v9134_v7 = vpop.f32.mrf.mxu1 }
0x1986   :  { %5533 = vmax.xlane.f32.xlu0 %v5532_v18  ;;  %5811 = vrot.lane.b32.xlu1 %v11534_v50, %s12275_s3  ;;  %v6297_v50 = vsel %vm574_vm8, %v11686_v38, -inf }
0x198a   :  { %5775 = vmax.xlane.f32.xlu0 %v5774_v41 }
0x198e   :  { %5778 = vmax.xlane.f32.xlu0 %v5777_v49 }
0x1992   :  { %6035 = vmax.xlane.f32.xlu0 %v6034_v45 }
0x1996   :  { %6041 = vmax.xlane.f32.xlu0 %v6040_v55 }
0x199a   :  { %6298 = vmax.xlane.f32.xlu0 %v6297_v50 }
0x19b0   :  { %5809 = vrot.lane.b32.xlu0 %v11522_v59, %s12275_s3 }
0x19da   :  { %v5528_v52 = vpop.xlane.xlu0 %5527 }
0x19db   :  { %v5535_v57 = vsub.f32 %v5523_v26, %v5528_v52 }
0x19dd   :  { %v5538_v58 = vmul.f32 1.442695, %v5535_v57 }
0x19de   :  { %v5562_v23 = vpop.permute.xlu0 %5561  ;;  %v5531_v60 = vpop.xlane.xlu1 %5530 }
0x19df   :  { %9491 = vpow2.f32 %v5538_v58  ;;  %v5536_v36 = vsub.f32 %v5524_v20, %v5531_v60  ;;  %9051 = vmatpush3.msra.mxu0 %v5562_v23 }
0x19e0   :  { %9052 = vmatprep.subr.mxu0 %v9584_v39 }
0x19e1   :  { %v5540_v34 = vmul.f32 1.442695, %v5536_v36  ;;  %9053 = vmatpush3.msra.mxu0 %v5560_v43 }
0x19e2   :  { %9078 = vmatprep.subr.mxu0 %v9584_v39 }
0x19e3   :  { %9493 = vpow2.f32 %v5540_v34 }
0x19ec   :  { %v11695_v4 = vpop.eup %9491 }
0x19ed   :  { %v5544_v0 = vsel %vm574_vm8, %v11695_v4, 0.0 }
0x19ee   :  { %5545 = vadd.xlane.f32.xlu1 %v5544_v0  ;;  %v5782_v63 = vpop.xlane.xlu1 %5781 }
0x19ef   :  { %v5785_v13 = vsub.f32 %v11666_v31, %v5782_v63 }
0x19f0   :  { %v11699_v22 = vpop.eup %9493 }
0x19f1   :  { %v5547_v8 = vsel %vm574_vm8, %v11699_v22, 0.0  ;;  %v5790_v20 = vmul.f32 1.442695, %v5785_v13 }
0x19f2   :  { %5548 = vadd.xlane.f32.xlu0 %v5547_v8 }
0x19f6   :  { %v6039_v25 = vpop.xlane.xlu1 %6038 }
0x19f7   :  { %v6044_v27 = vsub.f32 %v11672_v9, %v6039_v25 }
0x19f9   :  { %v6048_v24 = vmul.f32 1.442695, %v6044_v27 }
0x19fe   :  { %v6296_v3 = vpop.xlane.xlu1 %6295 }
0x19ff   :  { %v6303_v31 = vsub.f32 %v11676_v30, %v6296_v3 }
0x1a01   :  { %v6306_v53 = vmul.f32 1.442695, %v6303_v31 }
0x1a0f   :  { %v5534_v15 = vpop.xlane.xlu0 %5533 }
0x1a10   :  { %v5537_v16 = vsub.f32 %v5525_v2, %v5534_v15 }
0x1a12   :  { %v5542_v26 = vmul.f32 1.442695, %v5537_v16 }
0x1a13   :  { %v5776_v14 = vpop.xlane.xlu0 %5775 }
0x1a14   :  { %9495 = vpow2.f32 %v5542_v26  ;;  %v5783_v5 = vsub.f32 %v5771_v48, %v5776_v14 }
0x1a16   :  { %v5786_v62 = vmul.f32 1.442695, %v5783_v5 }
0x1a17   :  { %v5779_v28 = vpop.xlane.xlu0 %5778 }
0x1a18   :  { %9497 = vpow2.f32 %v5786_v62  ;;  %v5784_v21 = vsub.f32 %v5772_v1, %v5779_v28 }
0x1a19   :  { %9499 = vpow2.f32 %v5790_v20 }
0x1a1a   :  { %v5788_v29 = vmul.f32 1.442695, %v5784_v21 }
0x1a1b   :  { %v6036_v40 = vpop.xlane.xlu0 %6035 }
0x1a1c   :  { %9501 = vpow2.f32 %v5788_v29  ;;  %v6043_v56 = vsub.f32 %v6031_v54, %v6036_v40 }
0x1a1d   :  { %9503 = vpow2.f32 %v6048_v24 }
0x1a1e   :  { %v6046_v6 = vmul.f32 1.442695, %v6043_v56 }
0x1a1f   :  { %v6042_v33 = vpop.xlane.xlu0 %6041 }
0x1a20   :  { %9505 = vpow2.f32 %v6046_v6  ;;  %v6045_v51 = vsub.f32 %v6033_v19, %v6042_v33 }
0x1a21   :  { %v11706_v17 = vpop.eup %9495 }
0x1a22   :  { %v6050_v9 = vmul.f32 1.442695, %v6045_v51  ;;  %v5550_v61 = vsel %vm581_vm9, %v11706_v17, 0.0 }
0x1a23   :  { %5551 = vadd.xlane.f32.xlu1 %v5550_v61  ;;  %v6299_v54 = vpop.xlane.xlu0 %6298 }
0x1a24   :  { %9507 = vpow2.f32 %v6050_v9  ;;  %v6304_v49 = vsub.f32 %v11686_v38, %v6299_v54  ;;  %v5812_v38 = vpop.permute.xlu1 %5811 }
0x1a25   :  { %v11710_v46 = vpop.eup %9497  ;;  %9509 = vpow2.f32 %v6306_v53 }
0x1a26   :  { %v5792_v11 = vsel %vm574_vm8, %v11710_v46, 0.0  ;;  %v11714_v10 = vpop.eup %9499  ;;  %v6308_v19 = vmul.f32 1.442695, %v6304_v49  ;;  %v7999_v49 = vld [vmem:[%s12248_s0 + $0x28] sm:$0xff] }
0x1a27   :  { %5793 = vadd.xlane.f32.xlu0 %v5792_v11  ;;  %v5798_v35 = vsel %vm581_vm9, %v11714_v10, 0.0  ;;  %v5810_v55 = vpop.permute.xlu0 %5809 }
0x1a28   :  { %9511 = vpow2.f32 %v6308_v19 }
0x1a29   :  { %v11716_v44 = vpop.eup %9501 }
0x1a2a   :  { %v5795_v30 = vsel %vm574_vm8, %v11716_v44, 0.0  ;;  %v11722_v42 = vpop.eup %9503 }
0x1a2b   :  { %5796 = vadd.xlane.f32.xlu1 %v5795_v30  ;;  %5799 = vadd.xlane.f32.xlu0 %v5798_v35  ;;  %v6055_v7 = vsel %vm574_vm8, %v11722_v42, 0.0 }
0x1a2d   :  { %v11724_v12 = vpop.eup %9505 }
0x1a2e   :  { %v6052_v2 = vsel %vm574_vm8, %v11724_v12, 0.0 }
0x1a2f   :  { %6056 = vadd.xlane.f32.xlu1 %v6055_v7  ;;  %6053 = vadd.xlane.f32.xlu0 %v6052_v2 }
0x1a31   :  { %v11730_v48 = vpop.eup %9507 }
0x1a32   :  { %v6058_v18 = vsel %vm581_vm9, %v11730_v48, 0.0  ;;  %v11734_v1 = vpop.eup %9509 }
0x1a33   :  { %6059 = vadd.xlane.f32.xlu0 %v6058_v18  ;;  %v6312_v41 = vsel %vm574_vm8, %v11734_v1, 0.0 }
0x1a35   :  { %v11751_v45 = vpop.eup %9511 }
0x1a37   :  { %6313 = vadd.xlane.f32.xlu0 %v6312_v41  ;;  %v8000_v41 = vld [vmem:[%s12248_s0 + $0x30] sm:$0xff] }
0x1a40   :  { %5807 = vrot.lane.b32.xlu1 %v11526_v47, %s12275_s3 }
0x1a4d   :  { %6071 = vrot.lane.b32.xlu0 %v11544_v37, %s12276_s8  ;;  %v6315_v37 = vsel %vm574_vm8, %v11751_v45, 0.0 }
0x1a51   :  { %6069 = vrot.lane.b32.xlu0 %v11522_v59, %s12276_s8 }
0x1a55   :  { %6067 = vrot.lane.b32.xlu0 %v11526_v47, %s12276_s8 }
0x1a59   :  { %6331 = vrot.lane.b32.xlu0 %v11565_v32, %s12277_s6 }
0x1a5d   :  { %6329 = vrot.lane.b32.xlu0 %v11522_v59, %s12277_s6 }
0x1a61   :  { %6327 = vrot.lane.b32.xlu0 %v11526_v47, %s12277_s6  ;;  %s12284_s6 = sld [smem:[#allocation21_spill]] }
0x1a64   :  { %6316 = vadd.xlane.f32.xlu1 %v6315_v37 }
0x1a65   :  { %6191 = vrot.lane.b32.xlu0 %v11565_v32, %s12256_s7 }
0x1a77   :  { %v5546_v50 = vpop.xlane.xlu1 %5545 }
0x1a78   :  { %9513 = vrcp.f32 %v5546_v50 }
0x1a7b   :  { %v5549_v43 = vpop.xlane.xlu0 %5548 }
0x1a7c   :  { %9515 = vrcp.f32 %v5549_v43 }
0x1a85   :  { %v9514_v52 = vpop.eup %9513 }
0x1a86   :  { %v5556_v59 = vmul.f32 %v9514_v52, %v11695_v4 }
0x1a88   :  { %9055 = vmatmul.mubr.msk.f32.vlgmr.msra.gmra.mxu0 %vm574_vm8, %v5556_v59 }
0x1a89   :  { %v9516_v57 = vpop.eup %9515  ;;  %9079 = vmatpush3.msk.msra.mxu0 %vm626_vm7, %v5812_v38  ;;  %9057 = vmatprep.mubr.msk.f32.mxu0 %vm9585_vm3, %v9584_v39 }
0x1a8a   :  { %9080 = vmatprep.subr.mxu0 %v9584_v39  ;;  %v5557_v47 = vmul.f32 %v9516_v57, %v11699_v22 }
0x1a8b   :  { %9081 = vmatpush3.msra.mxu0 %v5810_v55 }
0x1a8c   :  { %9058 = vmatmul.mubr.msk.f32.gmra.mxu0 %vm574_vm8, %v5557_v47  ;;  %9082 = vmatprep.subr.mxu0 %v9584_v39 }
0x1a8d   :  { %9060 = vmatprep.mubr.msk.f32.mxu0 %vm9585_vm3, %v9584_v39 }
0x1aac   :  { %v5552_v32 = vpop.xlane.xlu1 %5551 }
0x1aad   :  { %9517 = vrcp.f32 %v5552_v32 }
0x1ab0   :  { %v5794_v58 = vpop.xlane.xlu0 %5793 }
0x1ab1   :  { %9519 = vrcp.f32 %v5794_v58 }
0x1ab4   :  { %v5797_v23 = vpop.xlane.xlu1 %5796  ;;  %v5800_v60 = vpop.xlane.xlu0 %5799 }
0x1ab5   :  { %9521 = vrcp.f32 %v5797_v23 }
0x1ab6   :  { %9523 = vrcp.f32 %v5800_v60 }
0x1ab8   :  { %v6057_v36 = vpop.xlane.xlu1 %6056  ;;  %v6054_v34 = vpop.xlane.xlu0 %6053 }
0x1ab9   :  { %9525 = vrcp.f32 %v6054_v34 }
0x1aba   :  { %v9518_v4 = vpop.eup %9517  ;;  %9527 = vrcp.f32 %v6057_v36 }
0x1abb   :  { %v5558_v0 = vmul.f32 %v9518_v4, %v11706_v17 }
0x1abc   :  { %v5808_v22 = vpop.permute.xlu1 %5807  ;;  %v6060_v8 = vpop.xlane.xlu0 %6059 }
0x1abd   :  { %9061 = vmatmul.mubr.msk.f32.gmra.mxu0 %vm574_vm8, %v5558_v0  ;;  %9529 = vrcp.f32 %v6060_v8 }
0x1abe   :  { %v9520_v63 = vpop.eup %9519  ;;  %9083 = vmatpush3.msra.mxu0 %v5808_v22  ;;  %9084 = vmatprep.mubr.msk.f32.mxu0 %vm9585_vm3, %v9584_v39 }
0x1abf   :  { %v5804_v15 = vmul.f32 %v9520_v63, %v11710_v46  ;;  %9108 = vmatprep.subr.mxu0 %v9584_v39 }
0x1ac0   :  { %v6314_v16 = vpop.xlane.xlu0 %6313 }
0x1ac1   :  { %9085 = vmatmul.mubr.msk.f32.vlgmr.msra.gmra.mxu0 %vm574_vm8, %v5804_v15  ;;  %9531 = vrcp.f32 %v6314_v16 }
0x1ac2   :  { %v9522_v13 = vpop.eup %9521  ;;  %9087 = vmatprep.mubr.msk.f32.mxu0 %vm9585_vm3, %v9584_v39 }
0x1ac3   :  { %v5805_v26 = vmul.f32 %v9522_v13, %v11716_v44  ;;  %v9524_v25 = vpop.eup %9523 }
0x1ac4   :  { %v6072_v14 = vpop.permute.xlu0 %6071  ;;  %v5806_v5 = vmul.f32 %v9524_v25, %v11714_v10 }
0x1ac5   :  { %9088 = vmatmul.mubr.msk.f32.gmra.mxu0 %vm574_vm8, %v5805_v26 }
0x1ac6   :  { %9109 = vmatpush3.msk.msra.mxu0 %vm626_vm7, %v6072_v14  ;;  %9090 = vmatprep.mubr.msk.f32.mxu0 %vm9585_vm3, %v9584_v39  ;;  %v9526_v27 = vpop.eup %9525  ;;  %v11864_v14 = vld [vmem:[%s12249_s9 + $0x1] ss:$0 sm:$0xff] }
0x1ac7   :  { %9110 = vmatprep.subr.mxu0 %v9584_v39  ;;  %v6064_v62 = vmul.f32 %v9526_v27, %v11724_v12  ;;  %v9528_v21 = vpop.eup %9527 }
0x1ac8   :  { %v6070_v20 = vpop.permute.xlu0 %6069  ;;  %v6065_v29 = vmul.f32 %v9528_v21, %v11722_v42 }
0x1ac9   :  { %9091 = vmatmul.mubr.msk.f32.gmra.mxu0 %vm574_vm8, %v5806_v5 }
0x1aca   :  { %9111 = vmatpush3.msra.mxu0 %v6070_v20  ;;  %9114 = vmatprep.mubr.msk.f32.mxu0 %vm9585_vm3, %v9584_v39  ;;  %v9530_v3 = vpop.eup %9529 }
0x1acb   :  { %9112 = vmatprep.subr.mxu0 %v9584_v39  ;;  %v6066_v56 = vmul.f32 %v9530_v3, %v11730_v48 }
0x1acc   :  { %v6068_v28 = vpop.permute.xlu0 %6067 }
0x1acd   :  { %9113 = vmatpush3.msra.mxu0 %v6068_v28 }
0x1ace   :  { %9115 = vmatmul.mubr.msk.f32.vlgmr.msra.gmra.mxu0 %vm574_vm8, %v6064_v62  ;;  %9138 = vmatprep.subr.mxu0 %v9584_v39  ;;  %v9532_v31 = vpop.eup %9531  ;;  %v9580_v62 = vld [vmem:[#allocation2 + $0x18] sm:$0xff] }
0x1acf   :  { %9117 = vmatprep.mubr.msk.f32.mxu0 %vm9585_vm3, %v9584_v39  ;;  %v6324_v6 = vmul.f32 %v9532_v31, %v11734_v1  ;;  %v8001_v1 = vld [vmem:[%s12248_s0 + $0x38] sm:$0xff]  ;;  %v9581_v31 = vld [vmem:[#allocation2 + $0x20] sm:$0xff] }
0x1ad0   :  { %v6332_v24 = vpop.permute.xlu0 %6331  ;;  %9154 = vmatpush3.msra.mxu1 %v8001_v1 }
0x1ad1   :  { %9139 = vmatpush3.msk.msra.mxu0 %vm626_vm7, %v6332_v24  ;;  %9155 = vmatprep.subr.mxu1 %v9584_v39  ;;  %vm12278_vm7 = vcmask 188544  }
0x1ad2   :  { %9118 = vmatmul.mubr.msk.f32.gmra.mxu0 %vm574_vm8, %v6065_v29  ;;  %9140 = vmatprep.subr.mxu0 %v9584_v39 }
0x1ad3   :  { %9120 = vmatprep.mubr.msk.f32.mxu0 %vm9585_vm3, %v9584_v39  ;;  %9156 = vmatpush3.msra.mxu1 %v8000_v41  ;;  %v11908_v41 = vld [vmem:[#allocation2] sm:$0xff] }
0x1ad4   :  { %v6330_v40 = vpop.permute.xlu0 %6329  ;;  %9157 = vmatprep.subr.mxu1 %v9584_v39 }
0x1ad5   :  { %9141 = vmatpush3.msra.mxu0 %v6330_v40  ;;  %9158 = vmatpush3.msra.mxu1 %v7999_v49 }
0x1ad6   :  { %9121 = vmatmul.mubr.msk.f32.gmra.mxu0 %vm574_vm8, %v6066_v56  ;;  %9142 = vmatprep.subr.mxu0 %v9584_v39 }
0x1ad7   :  { %9144 = vmatprep.mubr.msk.f32.mxu0 %vm9585_vm3, %v9584_v39  ;;  %9159 = vmatprep.subr.mxu1 %v9584_v39 }
0x1ad8   :  { %v6328_v33 = vpop.permute.xlu0 %6327 }
0x1ad9   :  { %9143 = vmatpush3.msra.mxu0 %v6328_v33 }
0x1ada   :  { %9145 = vmatmul.mubr.msk.f32.vlgmr.msra.gmra.mxu0 %vm574_vm8, %v6324_v6  ;;  %9170 = vmatprep.subr.mxu0 %v9584_v39 }
0x1adb   :  { %9147 = vmatprep.mubr.msk.f32.mxu0 %vm9585_vm3, %v9584_v39 }
0x1adc   :  { %v6192_v51 = vpop.permute.xlu0 %6191 }
0x1add   :  { %9136 = vmatmul.mubr.msk.f32.gmra.mxu1 %vm478_vm6, %v6192_v51 }
0x1ade   :  { %9161 = vmatprep.mubr.msk.f32.mxu1 %vm9585_vm3, %v9584_v39 }
0x1aed   :  { %v6317_v17 = vpop.xlane.xlu1 %6316 }
0x1aee   :  { %9533 = vrcp.f32 %v6317_v17 }
0x1afb   :  { %v9534_v53 = vpop.eup %9533 }
0x1afc   :  { %v6325_v9 = vmul.f32 %v9534_v53, %v11751_v45  ;;  %v7998_v45 = vld [vmem:[%s12248_s0 + $0x20] sm:$0xff] }
0x1afd   :  { %9160 = vmatpush3.msra.mxu1 %v7998_v45 }
0x1afe   :  { %9148 = vmatmul.mubr.msk.f32.gmra.mxu0 %vm574_vm8, %v6325_v9  ;;  %9187 = vmatprep.subr.mxu1 %v9584_v39 }
0x1aff   :  { %9150 = vmatprep.mubr.msk.f32.mxu0 %vm9585_vm3, %v9584_v39 }
0x1b48   :  { %v5644_v61 = vpop.f32.mrf.mxu0 }
0x1b49   :  { %5658 = vst.msk [vmem:[#allocation4] sm:$0xff] %vm478_vm6, %v5644_v61 }
0x1b4a   :  { %v9056_v46 = vpop.f32.mrf.mxu0 }
0x1b4b   :  { %v8014_v46 = vld [vmem:[%s12250_s1 + $0x38] sm:$0xff] }
0x1b4c   :  { %v5649_v11 = vpop.f32.mrf.mxu0  ;;  %9171 = vmatpush3.msra.mxu0 %v8014_v46 }
0x1b4d   :  { %5659 = vst.msk [vmem:[#allocation4 + $0x8] sm:$0xff] %vm478_vm6, %v5649_v11  ;;  %9172 = vmatprep.subr.mxu0 %v9584_v39 }
0x1b4e   :  { %v9059_v10 = vpop.f32.mrf.mxu0 }
0x1b7d   :  { %v5654_v44 = vpop.f32.mrf.mxu0 }
0x1b7e   :  { %5660 = vst.msk [vmem:[#allocation4 + $0x10] sm:$0x1] %vm711_vm10, %v5654_v44  ;;  %v8013_v44 = vld [vmem:[%s12250_s1 + $0x30] sm:$0xff] }
0x1b7f   :  { %v9062_v30 = vpop.f32.mrf.mxu0  ;;  %9173 = vmatpush3.msra.mxu0 %v8013_v44 }
0x1b80   :  { %9174 = vmatprep.subr.mxu0 %v9584_v39 }
0x1b81   :  { %v5892_v35 = vpop.f32.mrf.mxu0 }
0x1b82   :  { %5909 = vrot.lane.b32.xlu1 %v5892_v35, %s12261_s24  ;;  %v8012_v35 = vld [vmem:[%s12250_s1 + $0x28] sm:$0xff] }
0x1b83   :  { %v9086_v42 = vpop.f32.mrf.mxu0  ;;  %9175 = vmatpush3.msra.mxu0 %v8012_v35  ;;  %v9582_v35 = vld [vmem:[#allocation2 + $0x28] sm:$0x1] }
0x1b84   :  { %v8011_v42 = vld [vmem:[%s12250_s1 + $0x20] sm:$0xff]  ;;  %9176 = vmatprep.subr.mxu0 %v9584_v39 }
0x1b85   :  { %v5897_v12 = vpop.f32.mrf.mxu0  ;;  %9177 = vmatpush3.msra.mxu0 %v8011_v42 }
0x1b86   :  { %5911 = vrot.lane.b32.xlu0 %v5897_v12, %s12261_s24  ;;  %9212 = vmatprep.subr.mxu0 %v9584_v39 }
0x1b87   :  { %v9089_v7 = vpop.f32.mrf.mxu0 }
0x1b89   :  { %v11823_v2 = vpop.f32.mrf.mxu0 }
0x1b8b   :  { %v9092_v48 = vpop.f32.mrf.mxu0 }
0x1b8c   :  { %v11901_v48 = vld [vmem:[#allocation2 + $0x8] sm:$0xff] }
0x1b8d   :  { %v6905_v1 = vsel %vm190_vm2, %v11901_v48, 0.0 }
0x1b8e   :  { %v6152_v18 = vpop.f32.mrf.mxu0 }
0x1b8f   :  { %6169 = vrot.lane.b32.xlu0 %v6152_v18, %s12262_s25 }
0x1b90   :  { %v9116_v54 = vpop.f32.mrf.mxu0 }
0x1b91   :  { %v6902_v54 = vsel %vm190_vm2, %v11908_v41, 0.0 }
0x1b92   :  { %v6157_v19 = vpop.f32.mrf.mxu0 }
0x1b93   :  { %6171 = vrot.lane.b32.xlu0 %v6157_v19, %s12262_s25 }
0x1b94   :  { %v9119_v37 = vpop.f32.mrf.mxu0 }
0x1b96   :  { %v11842_v38 = vpop.f32.mrf.mxu0 }
0x1b98   :  { %v9122_v55 = vpop.f32.mrf.mxu0 }
0x1b9a   :  { %v6412_v50 = vpop.f32.mrf.mxu0 }
0x1b9b   :  { %6429 = vrot.lane.b32.xlu0 %v6412_v50, %s12263_s19 }
0x1b9c   :  { %v9146_v43 = vpop.f32.mrf.mxu0 }
0x1b9d   :  { %v6287_v52 = vpop.f32.mrf.mxu1  ;;  %v11921_v43 = vld [vmem:[%s12150_s12 + $0x1] ss:$0 sm:$0xff]  ;;  %s12283_s12 = sld [smem:[#allocation19_spill]] }
0x1b9e   :  { %v6293_v57 = vmul.f32 0.35355338, %v6287_v52 }
0x1b9f   :  { %v9137_v59 = vpop.f32.mrf.mxu1 }
0x1ba0   :  { %v6300_v47 = vsel %vm581_vm9, %v6293_v57, -inf }
0x1ba6   :  { %6301 = vmax.xlane.f32.xlu1 %v6300_v47 }
0x1bbe   :  { %v6417_v32 = vpop.f32.mrf.mxu0 }
0x1bbf   :  { %6431 = vrot.lane.b32.xlu0 %v6417_v32, %s12263_s19 }
0x1bc0   :  { %v9149_v58 = vpop.f32.mrf.mxu0 }
0x1bf4   :  { %v5910_v23 = vpop.permute.xlu1 %5909 }
0x1bf5   :  { %5918 = vst.msk [vmem:[#allocation4] sm:$0xff] %vm970_vm11, %v5910_v23 }
0x1bf8   :  { %v5912_v60 = vpop.permute.xlu0 %5911 }
0x1bf9   :  { %5919 = vst.msk [vmem:[#allocation4 + $0x8] sm:$0xff] %vm970_vm11, %v5912_v60  ;;  %vm7039_vm11 = vcmask 130048  }
0x1c01   :  { %v6170_v36 = vpop.permute.xlu0 %6169 }
0x1c02   :  { %6178 = vst.msk [vmem:[#allocation4] sm:$0xff] %vm1232_vm12, %v6170_v36 }
0x1c05   :  { %v6172_v34 = vpop.permute.xlu0 %6171 }
0x1c06   :  { %6179 = vst.msk [vmem:[#allocation4 + $0x8] sm:$0xff] %vm1232_vm12, %v6172_v34 }
0x1c0d   :  { %v6430_v4 = vpop.permute.xlu0 %6429 }
0x1c0e   :  { %6438 = vst.msk [vmem:[#allocation4] sm:$0xff] %vm1494_vm13, %v6430_v4 }
0x1c15   :  { %v6441_v0 = vld [vmem:[#allocation4] sm:$0xff] }
0x1c16   :  { %9162 = vmatmul.mubr.msk.f32.vlgmr.msra.gmra.mxu1 %vm190_vm2, %v6441_v0 }
0x1c17   :  { %9164 = vmatprep.mubr.msk.f32.mxu1 %vm9585_vm3, %v9584_v39 }
0x1c2f   :  { %v6302_v22 = vpop.xlane.xlu1 %6301 }
0x1c30   :  { %v6305_v8 = vsub.f32 %v6293_v57, %v6302_v22  ;;  %v8027_v22 = vld [vmem:[%s12151_s15 + $0x78] sm:$0xff] }
0x1c31   :  { %v6432_v63 = vpop.permute.xlu0 %6431  ;;  %9188 = vmatpush3.msra.mxu1 %v8027_v22 }
0x1c32   :  { %v6310_v15 = vmul.f32 1.442695, %v6305_v8  ;;  %6439 = vst.msk [vmem:[#allocation4 + $0x8] sm:$0xff] %vm1494_vm13, %v6432_v63  ;;  %9189 = vmatprep.subr.mxu1 %v9584_v39  ;;  %v8026_v8 = vld [vmem:[%s12151_s15 + $0x70] sm:$0xff]  ;;  %v8025_v63 = vld [vmem:[%s12151_s15 + $0x68] sm:$0xff] }
0x1c33   :  { %9190 = vmatpush3.msra.mxu1 %v8026_v8 }
0x1c34   :  { %9535 = vpow2.f32 %v6310_v15  ;;  %9191 = vmatprep.subr.mxu1 %v9584_v39  ;;  %v8024_v15 = vld [vmem:[%s12151_s15 + $0x60] sm:$0xff] }
0x1c35   :  { %9192 = vmatpush3.msra.mxu1 %v8025_v63 }
0x1c36   :  { %9193 = vmatprep.subr.mxu1 %v9584_v39 }
0x1c37   :  { %9194 = vmatpush3.msra.mxu1 %v8024_v15 }
0x1c38   :  { %9195 = vmatprep.subr.mxu1 %v9584_v39 }
0x1c39   :  { %v6442_v16 = vld [vmem:[#allocation4 + $0x8] sm:$0xff] }
0x1c3a   :  { %9165 = vmatmul.mubr.msk.f32.gmra.mxu1 %vm190_vm2, %v6442_v16  ;;  %v8023_v16 = vld [vmem:[%s12151_s15 + $0x58] sm:$0xff] }
0x1c3b   :  { %9167 = vmatprep.mubr.msk.f32.mxu1 %vm9585_vm3, %v9584_v39  ;;  %9196 = vmatpush3.msra.mxu1 %v8023_v16 }
0x1c3c   :  { %9197 = vmatprep.subr.mxu1 %v9584_v39 }
0x1c41   :  { %v9536_v13 = vpop.eup %9535 }
0x1c42   :  { %v6318_v26 = vsel %vm581_vm9, %v9536_v13, 0.0 }
0x1c43   :  { %6319 = vadd.xlane.f32.xlu1 %v6318_v26  ;;  %v8021_v26 = vld [vmem:[%s12151_s15 + $0x48] sm:$0xff] }
0x1ccc   :  { %v6320_v25 = vpop.xlane.xlu1 %6319 }
0x1ccd   :  { %9537 = vrcp.f32 %v6320_v25  ;;  %v8020_v25 = vld [vmem:[%s12151_s15 + $0x40] sm:$0xff] }
0x1cd6   :  { %v6530_v5 = vpop.f32.mrf.mxu1 }
0x1cd7   :  { %v6531_v20 = vadd.f32 %v11864_v14, %v6530_v5  ;;  %v11973_v5 = vld [vmem:[%s12152_s14 + $0x1] ss:$0 sm:$0xff] }
0x1cd8   :  { %v9163_v27 = vpop.f32.mrf.mxu1 }
0x1cd9   :  { %v11867_v28 = vadd.f32 %v9580_v62, %v6531_v20 }
0x1cda   :  { %v9538_v21 = vpop.eup %9537 }
0x1cdb   :  { %v6549_v24 = vsel %vm190_vm2, %v11867_v28, 0.0  ;;  %v6326_v29 = vmul.f32 %v9538_v21, %v9536_v13  ;;  %v8022_v13 = vld [vmem:[%s12151_s15 + $0x50] sm:$0xff] }
0x1cdc   :  { %6550 = vadd.xlane.f32.xlu0 %v6549_v24  ;;  %9198 = vmatpush3.msra.mxu1 %v8022_v13 }
0x1cdd   :  { %9151 = vmatmul.mubr.msk.f32.gmra.mxu0 %vm574_vm8, %v6326_v29  ;;  %vm12279_vm8 = vcmask 254144   ;;  %9199 = vmatprep.subr.mxu1 %v9584_v39 }
0x1cde   :  { %9178 = vmatprep.mubr.msk.f32.mxu0 %vm9585_vm3, %v9584_v39  ;;  %9200 = vmatpush3.msra.mxu1 %v8021_v26 }
0x1cdf   :  { %9201 = vmatprep.subr.mxu1 %v9584_v39 }
0x1ce0   :  { %9202 = vmatpush3.msra.mxu1 %v8020_v25 }
0x1ce1   :  { %9240 = vmatprep.subr.mxu1 %v9584_v39 }
0x1cfa   :  { %v6535_v3 = vpop.f32.mrf.mxu1 }
0x1cfb   :  { %v6536_v40 = vadd.f32 %v11864_v14, %v6535_v3 }
0x1cfc   :  { %v9166_v56 = vpop.f32.mrf.mxu1 }
0x1cfd   :  { %v11875_v6 = vadd.f32 %v9581_v31, %v6536_v40 }
0x1cff   :  { %v6552_v33 = vsel %vm190_vm2, %v11875_v6, 0.0 }
0x1d00   :  { %6553 = vadd.xlane.f32.xlu0 %v6552_v33 }
0x1d65   :  { %v6551_v51 = vpop.xlane.xlu0 %6550 }
0x1d66   :  { %v6558_v17 = vmul.f32 0.03125, %v6551_v51 }
0x1d68   :  { %v6561_v53 = vsub.f32 %v11867_v28, %v6558_v17 }
0x1d6a   :  { %v6564_v9 = vmul.f32 %v6561_v53, %v6561_v53 }
0x1d6c   :  { %v6567_v61 = vsel %vm190_vm2, %v6564_v9, 0.0 }
0x1d6d   :  { %6568 = vadd.xlane.f32.xlu0 %v6567_v61 }
0x1d83   :  { %5913 = vrot.lane.b32.xlu0 %v11823_v2, %s12261_s24  ;;  %s12289_s24 = sld [smem:[#allocation26_spill]] }
0x1d89   :  { %v6554_v11 = vpop.xlane.xlu0 %6553 }
0x1d8a   :  { %v6559_v10 = vmul.f32 0.03125, %v6554_v11 }
0x1d8c   :  { %v6562_v30 = vsub.f32 %v11875_v6, %v6559_v10 }
0x1d8e   :  { %v6565_v12 = vmul.f32 %v6562_v30, %v6562_v30 }
0x1d90   :  { %v6570_v7 = vsel %vm190_vm2, %v6565_v12, 0.0 }
0x1d91   :  { %6571 = vadd.xlane.f32.xlu1 %v6570_v7 }
0x1d9d   :  { %v6422_v2 = vpop.f32.mrf.mxu0 }
0x1d9f   :  { %v9152_v18 = vpop.f32.mrf.mxu0 }
0x1da2   :  { %6906 = vadd.xlane.f32.xlu0 %v6905_v1  ;;  %6173 = vrot.lane.b32.xlu1 %v11842_v38, %s12262_s25  ;;  %v11916_v38 = vld [vmem:[%s12149_s11 + $0x1] ss:$0 sm:$0xff]  ;;  %s12282_s25 = sld [smem:[#allocation20_spill]] }
0x1da6   :  { %6433 = vrot.lane.b32.xlu1 %v6422_v2, %s12263_s19 }
0x1dca   :  { %6903 = vadd.xlane.f32.xlu1 %v6902_v54 }
0x1df6   :  { %v6569_v49 = vpop.xlane.xlu0 %6568 }
0x1df7   :  { %v6576_v19 = vmul.f32 0.03125, %v6569_v49 }
0x1df9   :  { %v6579_v45 = vadd.f32 1e-12, %v6576_v19 }
0x1dfa   :  { %v5914_v37 = vpop.permute.xlu0 %5913 }
0x1dfb   :  { %9539 = vrsqrt.f32 %v6579_v45  ;;  %5920 = vst.msk [vmem:[#allocation4 + $0x10] sm:$0x1] %vm973_vm14, %v5914_v37 }
0x1e08   :  { %v9540_v55 = vpop.eup %9539 }
0x1e09   :  { %v6585_v50 = vmul.f32 %v9540_v55, %v6561_v53 }
0x1e0b   :  { %v6594_v52 = vmul.f32 %v11916_v38, %v6585_v50 }
0x1e0d   :  { %v6603_v59 = vadd.f32 %v11921_v43, %v6594_v52 }
0x1e0f   :  { %9179 = vmatmul.mubr.msk.f32.vlgmr.msra.gmra.mxu0 %vm190_vm2, %v6603_v59 }
0x1e10   :  { %9181 = vmatprep.mubr.msk.f32.mxu0 %vm9585_vm3, %v9584_v39 }
0x1e1a   :  { %v6572_v57 = vpop.xlane.xlu1 %6571 }
0x1e1b   :  { %v6577_v47 = vmul.f32 0.03125, %v6572_v57 }
0x1e1d   :  { %v6580_v32 = vadd.f32 1e-12, %v6577_v47 }
0x1e1e   :  { %v6174_v58 = vpop.permute.xlu1 %6173 }
0x1e1f   :  { %9541 = vrsqrt.f32 %v6580_v32  ;;  %6180 = vst.msk [vmem:[#allocation4 + $0x10] sm:$0x1] %vm12278_vm7, %v6174_v58 }
0x1e22   :  { %v6434_v23 = vpop.permute.xlu1 %6433 }
0x1e23   :  { %6440 = vst.msk [vmem:[#allocation4 + $0x10] sm:$0x1] %vm12279_vm8, %v6434_v23 }
0x1e2a   :  { %v6443_v60 = vld [vmem:[#allocation4 + $0x10] sm:$0x1] }
0x1e2b   :  { %9168 = vmatmul.mubr.msk.f32.gmra.mxu1 %vm190_vm2, %v6443_v60 }
0x1e2c   :  { %v9542_v36 = vpop.eup %9541  ;;  %9203 = vmatprep.mubr.msk.f32.mxu1 %vm9585_vm3, %v9584_v39 }
0x1e2d   :  { %v6586_v34 = vmul.f32 %v9542_v36, %v6562_v30 }
0x1e2f   :  { %v6595_v4 = vmul.f32 %v11916_v38, %v6586_v34 }
0x1e31   :  { %v6604_v0 = vadd.f32 %v11921_v43, %v6595_v4 }
0x1e33   :  { %9182 = vmatmul.mubr.msk.f32.gmra.mxu0 %vm190_vm2, %v6604_v0 }
0x1e34   :  { %9184 = vmatprep.mubr.msk.f32.mxu0 %vm9585_vm3, %v9584_v39 }
0x1e53   :  { %v6904_v31 = vpop.xlane.xlu1 %6903 }
0x1e54   :  { %v6911_v51 = vmul.f32 0.03125, %v6904_v31 }
0x1e56   :  { %v11977_v46 = vsub.f32 %v11908_v41, %v6911_v51 }
0x1e58   :  { %v6917_v2 = vmul.f32 %v11977_v46, %v11977_v46 }
0x1ecf   :  { %v6692_v20 = vpop.f32.mrf.mxu0 }
0x1ed0   :  { %v6693_v27 = vadd.f32 %v11973_v5, %v6692_v20 }
0x1ed1   :  { %v9180_v62 = vpop.f32.mrf.mxu0 }
0x1ed2   :  { %v6706_v21 = vmul.f32 0.70710677, %v6693_v27  ;;  %v6769_v23 = vmul.f32 0.5, %v6693_v27 }
0x1ed4   :  { %v6709_v24 = vand.u32 2147483647, %v6706_v21  ;;  %vm6772_vm9 = vcmp.lt.f32.partialorder %v6706_v21, 0.0 }
0x1ed6   :  { %v6712_v29 = vmul.f32 0.3275911, %v6709_v24  ;;  %v6751_v40 = vsub.f32 0.0, %v6709_v24 }
0x1ed8   :  { %v6715_v3 = vadd.f32 1.0, %v6712_v29  ;;  %v6754_v56 = vmul.f32 %v6751_v40, %v6709_v24 }
0x1eda   :  { %9543 = vrcp.f32 %v6715_v3  ;;  %v6757_v53 = vmul.f32 1.442695, %v6754_v56 }
0x1edc   :  { %9545 = vpow2.f32 %v6757_v53 }
0x1ee7   :  { %v9544_v33 = vpop.eup %9543 }
0x1ee8   :  { %v6724_v17 = vmul.f32 1.0614054, %v9544_v33 }
0x1ee9   :  { %v9546_v50 = vpop.eup %9545 }
0x1eea   :  { %v6727_v9 = vadd.f32 -1.4531521, %v6724_v17 }
0x1eeb   :  { %v6540_v61 = vpop.f32.mrf.mxu1 }
0x1eec   :  { %v6730_v11 = vmul.f32 %v9544_v33, %v6727_v9  ;;  %v6541_v10 = vadd.f32 %v11864_v14, %v6540_v61  ;;  %v6920_v14 = vsel %vm190_vm2, %v6917_v2, 0.0  ;;  %v11997_v61 = vld [vmem:[%s12280_s21] ss:$0 sm:$0xff] }
0x1eed   :  { %v9169_v44 = vpop.f32.mrf.mxu1 }
0x1eee   :  { %v6733_v30 = vadd.f32 1.4214138, %v6730_v11  ;;  %v11980_v42 = vadd.f32 %v9582_v35, %v6541_v10  ;;  %v12003_v10 = vld [vmem:[%s12281_s27] ss:$0 sm:$0xff] }
0x1ef0   :  { %v6736_v12 = vmul.f32 %v9544_v33, %v6733_v30  ;;  %v6555_v7 = vsel %vm184_vm1, %v11980_v42, 0.0 }
0x1ef1   :  { %6556 = vadd.xlane.f32.xlu1 %v6555_v7 }
0x1ef2   :  { %v6739_v18 = vadd.f32 -0.28449672, %v6736_v12  ;;  %v12011_v12 = vld [vmem:[%s12153_s16 + $0x1] ss:$0 sm:$0xff] }
0x1ef3   :  { %v6697_v1 = vpop.f32.mrf.mxu0 }
0x1ef4   :  { %v6742_v41 = vmul.f32 %v9544_v33, %v6739_v18  ;;  %v6698_v54 = vadd.f32 %v11973_v5, %v6697_v1 }
0x1ef5   :  { %6921 = vadd.xlane.f32.xlu1 %v6920_v14  ;;  %v9183_v49 = vpop.f32.mrf.mxu0  ;;  %v6907_v14 = vpop.xlane.xlu0 %6906 }
0x1ef6   :  { %v6745_v19 = vadd.f32 0.2548296, %v6742_v41  ;;  %v6707_v45 = vmul.f32 0.70710677, %v6698_v54  ;;  %v6770_v40 = vmul.f32 0.5, %v6698_v54  ;;  %v6912_v49 = vmul.f32 0.03125, %v6907_v14 }
0x1ef7   :  { %v7186_v14 = vld [vmem:[%s12282_s25] sm:$0xff] }
0x1ef8   :  { %v6748_v37 = vmul.f32 %v9544_v33, %v6745_v19  ;;  %v6710_v55 = vand.u32 2147483647, %v6707_v45  ;;  %vm6773_vm10 = vcmp.lt.f32.partialorder %v6707_v45, 0.0  ;;  %v6915_v45 = vsub.f32 %v11901_v48, %v6912_v49  ;;  %v7029_v49 = vld [vmem:[%s12284_s6] sm:$0xff] }
0x1efa   :  { %v6763_v52 = vmul.f32 %v9546_v50, %v6748_v37  ;;  %v6713_v59 = vmul.f32 0.3275911, %v6710_v55  ;;  %v6752_v34 = vsub.f32 0.0, %v6710_v55  ;;  %v6918_v50 = vmul.f32 %v6915_v45, %v6915_v45 }
0x1efc   :  { %v6766_v57 = vsub.f32 1.0, %v6763_v52  ;;  %v6716_v47 = vadd.f32 1.0, %v6713_v59  ;;  %v6755_v4 = vmul.f32 %v6752_v34, %v6710_v55  ;;  %v6923_v52 = vsel %vm190_vm2, %v6918_v50, 0.0 }
0x1efe   :  { %v6775_v32 = vsub.f32 0.0, %v6766_v57  ;;  %9547 = vrcp.f32 %v6716_v47  ;;  %v6759_v8 = vmul.f32 1.442695, %v6755_v4 }
0x1f00   :  { %v6778_v58 = vsel %vm6772_vm9, %v6775_v32, %v6766_v57  ;;  %9549 = vpow2.f32 %v6759_v8 }
0x1f01   :  { %v6781_v60 = vadd.f32 1.0, %v6778_v58 }
0x1f03   :  { %v6784_v36 = vmul.f32 %v6781_v60, %v6769_v23 }
0x1f05   :  { %9204 = vmatmul.mubr.msk.f32.vlgmr.msra.gmra.mxu1 %vm1860_vm4, %v6784_v36 }
0x1f06   :  { %9206 = vmatprep.mubr.msk.f32.mxu1 %vm9585_vm3, %v9584_v39 }
0x1f0b   :  { %v9548_v0 = vpop.eup %9547 }
0x1f0c   :  { %v6725_v22 = vmul.f32 1.0614054, %v9548_v0 }
0x1f0d   :  { %v9550_v62 = vpop.eup %9549 }
0x1f0e   :  { %v6728_v63 = vadd.f32 -1.4531521, %v6725_v22 }
0x1f10   :  { %v6731_v15 = vmul.f32 %v9548_v0, %v6728_v63 }
0x1f12   :  { %v6734_v16 = vadd.f32 1.4214138, %v6731_v15 }
0x1f14   :  { %v6737_v13 = vmul.f32 %v9548_v0, %v6734_v16 }
0x1f16   :  { %v6740_v26 = vadd.f32 -0.28449672, %v6737_v13 }
0x1f18   :  { %v6743_v25 = vmul.f32 %v9548_v0, %v6740_v26 }
0x1f1a   :  { %v6746_v20 = vadd.f32 0.2548296, %v6743_v25 }
0x1f1c   :  { %v6749_v27 = vmul.f32 %v9548_v0, %v6746_v20 }
0x1f1e   :  { %v6764_v21 = vmul.f32 %v9550_v62, %v6749_v27 }
0x1f20   :  { %v6767_v24 = vsub.f32 1.0, %v6764_v21 }
0x1f22   :  { %v6776_v29 = vsub.f32 0.0, %v6767_v24 }
0x1f24   :  { %v6779_v3 = vsel %vm6773_vm10, %v6776_v29, %v6767_v24 }
0x1f25   :  { %v6782_v56 = vadd.f32 1.0, %v6779_v3 }
0x1f27   :  { %v6785_v31 = vmul.f32 %v6782_v56, %v6770_v40 }
0x1f29   :  { %9207 = vmatmul.mubr.msk.f32.gmra.mxu1 %vm1860_vm4, %v6785_v31 }
0x1f2a   :  { %9209 = vmatprep.mubr.msk.f32.mxu1 %vm9585_vm3, %v9584_v39 }
0x1f7a   :  { %v6557_v33 = vpop.xlane.xlu1 %6556 }
0x1f7b   :  { %v6560_v59 = vmul.f32 0.03125, %v6557_v33 }
0x1f7d   :  { %v6563_v47 = vsub.f32 %v11980_v42, %v6560_v59 }
0x1f7e   :  { %v6922_v51 = vpop.xlane.xlu1 %6921 }
0x1f7f   :  { %v6929_v17 = vmul.f32 0.03125, %v6922_v51  ;;  %v6566_v34 = vmul.f32 %v6563_v47, %v6563_v47 }
0x1f81   :  { %v6932_v53 = vadd.f32 1e-12, %v6929_v17  ;;  %v6573_v63 = vsel %vm184_vm1, %v6566_v34, 0.0 }
0x1f83   :  { %9551 = vrsqrt.f32 %v6932_v53 }
0x1f90   :  { %v9552_v9 = vpop.eup %9551 }
0x1f91   :  { %v6938_v11 = vmul.f32 %v9552_v9, %v11977_v46 }
0x1f93   :  { %v6947_v44 = vmul.f32 %v11997_v61, %v6938_v11 }
0x1f95   :  { %v6956_v30 = vadd.f32 %v12003_v10, %v6947_v44 }
0x1f97   :  { %6959 = vst.msk [vmem:[#allocation2] sm:$0xff] %vm190_vm2, %v6956_v30 }
0x1f9e   :  { %v7027_v20 = vld [vmem:[#allocation2] sm:$0xff] }
0x1fc5   :  { %v6877_v35 = vpop.f32.mrf.mxu1 }
0x1fc6   :  { %v6878_v7 = vadd.f32 %v12011_v12, %v6877_v35 }
0x1fc7   :  { %v9205_v46 = vpop.f32.mrf.mxu1 }
0x1fc8   :  { %v6891_v2 = vadd.f32 %v6878_v7, %v11867_v28 }
0x1fca   :  { %6894 = vst.msk [vmem:[#allocation2 + $0x18] sm:$0xff] %vm190_vm2, %v6891_v2 }
0x1fd1   :  { %v6962_v55 = vld [vmem:[#allocation2 + $0x18] sm:$0xff] }
0x1fd2   :  { %v6967_v28 = vsel %vm190_vm2, %v6962_v55, 0.0 }
0x1fe9   :  { %v6882_v18 = vpop.f32.mrf.mxu1 }
0x1fea   :  { %v6883_v1 = vadd.f32 %v12011_v12, %v6882_v18 }
0x1feb   :  { %v9208_v41 = vpop.f32.mrf.mxu1 }
0x1fec   :  { %v6892_v54 = vadd.f32 %v6883_v1, %v11875_v6 }
0x1fee   :  { %6895 = vst.msk [vmem:[#allocation2 + $0x20] sm:$0xff] %vm190_vm2, %v6892_v54  ;;  %v9600_v54 = vmov 0  }
0x1fef   :  { %9267 = vset.pattern.permute.xlu0 %v9600_v54  ;;  %9268 = vset.pattern.permute.xlu1 %v9600_v54 }
0x1ff5   :  { %v6963_v19 = vld [vmem:[#allocation2 + $0x20] sm:$0xff] }
0x1ff6   :  { %v6970_v37 = vsel %vm190_vm2, %v6963_v19, 0.0 }
0x1ff7   :  { %6971 = vadd.xlane.f32.xlu0 %v6970_v37 }
0x1ffb   :  { %6968 = vadd.xlane.f32.xlu0 %v6967_v28 }
0x1fff   :  { %6924 = vadd.xlane.f32.xlu0 %v6923_v52 }
0x2080   :  { %v6972_v6 = vpop.xlane.xlu0 %6971 }
0x2081   :  { %v6977_v57 = vmul.f32 0.03125, %v6972_v6 }
0x2083   :  { %v6980_v32 = vsub.f32 %v6963_v19, %v6977_v57 }
0x2084   :  { %v6969_v58 = vpop.xlane.xlu0 %6968 }
0x2085   :  { %v6976_v23 = vmul.f32 0.03125, %v6969_v58  ;;  %v6983_v48 = vmul.f32 %v6980_v32, %v6980_v32 }
0x2087   :  { %v6979_v60 = vsub.f32 %v6962_v55, %v6976_v23  ;;  %v6988_v36 = vsel %vm190_vm2, %v6983_v48, 0.0 }
0x2088   :  { %6989 = vadd.xlane.f32.xlu0 %v6988_v36  ;;  %v6925_v4 = vpop.xlane.xlu0 %6924 }
0x2089   :  { %v6930_v0 = vmul.f32 0.03125, %v6925_v4  ;;  %v6982_v22 = vmul.f32 %v6979_v60, %v6979_v60 }
0x208b   :  { %v6933_v8 = vadd.f32 1e-12, %v6930_v0  ;;  %v6985_v15 = vsel %vm190_vm2, %v6982_v22, 0.0 }
0x208c   :  { %6574 = vadd.xlane.f32.xlu0 %v6573_v63  ;;  %6986 = vadd.xlane.f32.xlu1 %v6985_v15  ;;  %v7369_v15 = vld [vmem:[%s12285_s10] sm:$0xff] }
0x208d   :  { %9553 = vrsqrt.f32 %v6933_v8 }
0x209a   :  { %v9554_v16 = vpop.eup %9553 }
0x209b   :  { %v6939_v13 = vmul.f32 %v9554_v16, %v6915_v45 }
0x209d   :  { %v6948_v26 = vmul.f32 %v11997_v61, %v6939_v13 }
0x209f   :  { %v6957_v25 = vadd.f32 %v12003_v10, %v6948_v26 }
0x20a1   :  { %6960 = vst.msk [vmem:[#allocation2 + $0x8] sm:$0xff] %vm190_vm2, %v6957_v25 }
0x20a2   :  { %7033 = vrot.lane.b32.xlu0 %v7027_v20, %s12254_s13 }
0x20a6   :  { %7189 = vperm.xlu0 %9267, %v7186_v14  }
0x20a8   :  { %v7028_v27 = vld [vmem:[#allocation2 + $0x8] sm:$0xff] }
0x20a9   :  { %7035 = vrot.lane.b32.xlu1 %v7028_v27, %s12254_s13 }
0x2111   :  { %v6990_v62 = vpop.xlane.xlu0 %6989 }
0x2112   :  { %v6995_v21 = vmul.f32 0.03125, %v6990_v62 }
0x2114   :  { %v6998_v24 = vadd.f32 1e-12, %v6995_v21 }
0x2115   :  { %v6987_v29 = vpop.xlane.xlu1 %6986  ;;  %v6575_v3 = vpop.xlane.xlu0 %6574 }
0x2116   :  { %9555 = vrsqrt.f32 %v6998_v24  ;;  %v6994_v40 = vmul.f32 0.03125, %v6987_v29  ;;  %v6578_v56 = vmul.f32 0.03125, %v6575_v3 }
0x2118   :  { %v6997_v31 = vadd.f32 1e-12, %v6994_v40  ;;  %v6581_v33 = vadd.f32 1e-12, %v6578_v56 }
0x2119   :  { %v7034_v17 = vpop.permute.xlu0 %7033 }
0x211a   :  { %9557 = vrsqrt.f32 %v6997_v31 }
0x211b   :  { %9559 = vrsqrt.f32 %v6581_v33  ;;  %v7036_v51 = vpop.permute.xlu1 %7035 }
0x211c   :  { %9213 = vmatpush3.msra.mxu0 %v7036_v51 }
0x211d   :  { %9214 = vmatprep.subr.mxu0 %v9584_v39 }
0x211e   :  { %9215 = vmatpush3.msra.mxu0 %v7034_v17 }
0x211f   :  { %9219 = vmatprep.subr.mxu0 %v9584_v39 }
0x2121   :  { %v7190_v58 = vpop.permute.xlu0 %7189 }
0x2123   :  { %v9556_v53 = vpop.eup %9555 }
0x2124   :  { %v7004_v9 = vmul.f32 %v9556_v53, %v6980_v32 }
0x2126   :  { %v7013_v11 = vmul.f32 %v11997_v61, %v7004_v9 }
0x2127   :  { %v9558_v44 = vpop.eup %9557 }
0x2128   :  { %v9560_v30 = vpop.eup %9559  ;;  %v7022_v35 = vadd.f32 %v12003_v10, %v7013_v11  ;;  %v7003_v7 = vmul.f32 %v9558_v44, %v6979_v60 }
0x2129   :  { %v6587_v46 = vmul.f32 %v9560_v30, %v6563_v47 }
0x212a   :  { %7025 = vst.msk [vmem:[#allocation2 + $0x20] sm:$0xff] %vm190_vm2, %v7022_v35  ;;  %v7012_v2 = vmul.f32 %v11997_v61, %v7003_v7 }
0x212b   :  { %v6596_v18 = vmul.f32 %v11916_v38, %v6587_v46  ;;  %v7030_v38 = vld [vmem:[%s12283_s12] sm:$0xff]  ;;  %s12290_s12 = sld [smem:[#allocation27_spill]] }
0x212c   :  { %v7021_v1 = vadd.f32 %v12003_v10, %v7012_v2 }
0x212d   :  { %v6605_v41 = vadd.f32 %v11921_v43, %v6596_v18 }
0x212e   :  { %7024 = vst.msk [vmem:[#allocation2 + $0x18] sm:$0xff] %vm190_vm2, %v7021_v1 }
0x212f   :  { %9185 = vmatmul.mubr.msk.f32.gmra.mxu0 %vm190_vm2, %v6605_v41 }
0x2130   :  { %9216 = vmatprep.mubr.msk.f32.mxu0 %vm9585_vm3, %v9584_v39 }
0x2131   :  { %v7194_v43 = vld [vmem:[#allocation2 + $0x20] sm:$0xff] }
0x2132   :  { %7199 = vrot.lane.b32.xlu1 %v7194_v43, %s12254_s13 }
0x2133   :  { %9217 = vmatmul.mubr.msk.f32.vlgmr.msra.gmra.mxu0 %vm7039_vm11, %v7030_v38 }
0x2134   :  { %9220 = vmatpush3.msra.mxu0 %v7028_v27  ;;  %9223 = vmatprep.mubr.msk.f32.mxu0 %vm9585_vm3, %v9584_v39 }
0x2135   :  { %9221 = vmatprep.subr.mxu0 %v9584_v39  ;;  %v7193_v19 = vld [vmem:[#allocation2 + $0x18] sm:$0xff] }
0x2136   :  { %9222 = vmatpush3.msra.mxu0 %v7027_v20  ;;  %7197 = vrot.lane.b32.xlu1 %v7193_v19, %s12254_s13 }
0x2137   :  { %9224 = vmatmul.mubr.msk.f32.vlgmr.msra.gmra.mxu0 %vm7039_vm11, %v7029_v49  ;;  %9226 = vmatprep.subr.mxu0 %v9584_v39 }
0x2138   :  { %9230 = vmatprep.mubr.msk.f32.mxu0 %vm9585_vm3, %v9584_v39 }
0x21a4   :  { %v7200_v45 = vpop.permute.xlu1 %7199 }
0x21a5   :  { %9227 = vmatpush3.msra.mxu0 %v7200_v45 }
0x21a6   :  { %9228 = vmatprep.subr.mxu0 %v9584_v39 }
0x21a8   :  { %v7198_v37 = vpop.permute.xlu1 %7197 }
0x21a9   :  { %9229 = vmatpush3.msra.mxu0 %v7198_v37  ;;  %v7385_v37 = vld [vmem:[%s12287_s4] sm:$0x7] }
0x21aa   :  { %9231 = vmatmul.mubr.msk.f32.vlgmr.msra.gmra.mxu0 %vm7039_vm11, %v7030_v38  ;;  %9233 = vmatprep.subr.mxu0 %v9584_v39 }
0x21ab   :  { %9234 = vmatpush3.msra.mxu0 %v7194_v43  ;;  %9237 = vmatprep.mubr.msk.f32.mxu0 %vm9585_vm3, %v9584_v39 }
0x21ac   :  { %9235 = vmatprep.subr.mxu0 %v9584_v39 }
0x21ad   :  { %9236 = vmatpush3.msra.mxu0 %v7193_v19 }
0x21ae   :  { %9238 = vmatmul.mubr.msk.f32.vlgmr.msra.gmra.mxu0 %vm7039_vm11, %v7029_v49 }
0x21af   :  { %7535 = vmatprep.mubr.f32.mxu0 %v9584_v39 }
0x21ef   :  { %v6702_v55 = vpop.f32.mrf.mxu0 }
0x21f0   :  { %v6703_v28 = vadd.f32 %v11973_v5, %v6702_v55  ;;  %v6899_v55 = vld [vmem:[#allocation2 + $0x10] sm:$0x1] }
0x21f1   :  { %v9186_v50 = vpop.f32.mrf.mxu0 }
0x21f2   :  { %v6708_v52 = vmul.f32 0.70710677, %v6703_v28  ;;  %v6771_v56 = vmul.f32 0.5, %v6703_v28  ;;  %v6908_v28 = vsel %vm184_vm1, %v6899_v55, 0.0 }
0x21f3   :  { %v7109_v59 = vpop.f32.mrf.mxu0 }
0x21f4   :  { %v6711_v6 = vand.u32 2147483647, %v6708_v52  ;;  %vm6774_vm2 = vcmp.lt.f32.partialorder %v6708_v52, 0.0 }
0x21f5   :  { %v9218_v57 = vpop.f32.mrf.mxu0 }
0x21f6   :  { %v6714_v47 = vmul.f32 0.3275911, %v6711_v6  ;;  %v6753_v4 = vsub.f32 0.0, %v6711_v6 }
0x21f7   :  { %v7182_v32 = vpop.f32.mrf.mxu0 }
0x21f8   :  { %v6717_v23 = vadd.f32 1.0, %v6714_v47  ;;  %v7183_v48 = vadd.f32 %v7182_v32, %v7109_v59  ;;  %v6756_v0 = vmul.f32 %v6753_v4, %v6711_v6 }
0x21f9   :  { %v9225_v60 = vpop.f32.mrf.mxu0 }
0x21fa   :  { %9561 = vrcp.f32 %v6717_v23  ;;  %v7192_v36 = vadd.f32 %v7190_v58, %v7183_v48  ;;  %v6761_v8 = vmul.f32 1.442695, %v6756_v0 }
0x21fc   :  { %v7344_v34 = vsel %vm7039_vm11, %v7192_v36, 0.0  ;;  %9563 = vpow2.f32 %v6761_v8 }
0x21fd   :  { %7345 = vadd.xlane.f32.xlu1 %v7344_v34 }
0x2207   :  { %v9562_v22 = vpop.eup %9561 }
0x2208   :  { %v6726_v5 = vmul.f32 1.0614054, %v9562_v22 }
0x2209   :  { %v9564_v21 = vpop.eup %9563 }
0x220a   :  { %v6729_v63 = vadd.f32 -1.4531521, %v6726_v5 }
0x220c   :  { %v6732_v16 = vmul.f32 %v9562_v22, %v6729_v63 }
0x220e   :  { %v6735_v13 = vadd.f32 1.4214138, %v6732_v16  ;;  %7372 = vperm.xlu1 %9268, %v7369_v15  }
0x2210   :  { %v6738_v26 = vmul.f32 %v9562_v22, %v6735_v13  ;;  %v7563_v13 = vld [vmem:[%s12288_s20] sm:$0x7] }
0x2212   :  { %v6741_v25 = vadd.f32 -0.28449672, %v6738_v26 }
0x2214   :  { %v6744_v20 = vmul.f32 %v9562_v22, %v6741_v25 }
0x2216   :  { %v6747_v27 = vadd.f32 0.2548296, %v6744_v20 }
0x2218   :  { %v6750_v62 = vmul.f32 %v9562_v22, %v6747_v27 }
0x221a   :  { %v6765_v24 = vmul.f32 %v9564_v21, %v6750_v62 }
0x221c   :  { %v6768_v29 = vsub.f32 1.0, %v6765_v24 }
0x221e   :  { %v6777_v3 = vsub.f32 0.0, %v6768_v29 }
0x2220   :  { %v6780_v40 = vsel %vm6774_vm2, %v6777_v3, %v6768_v29 }
0x2221   :  { %v6783_v31 = vadd.f32 1.0, %v6780_v40 }
0x2223   :  { %v6786_v33 = vmul.f32 %v6783_v31, %v6771_v56 }
0x2225   :  { %9210 = vmatmul.mubr.msk.f32.gmra.mxu1 %vm1860_vm4, %v6786_v33  ;;  %v7467_v33 = vld [vmem:[%s12289_s24 + $0x18] sm:$0xff] }
0x2226   :  { %9242 = vmatprep.mubr.msk.f32.mxu1 %vm9585_vm3, %v9584_v39  ;;  %7499 = vmatprep.subr.mxu0 %v7467_v33 }
0x226a   :  { %v7269_v51 = vpop.f32.mrf.mxu0 }
0x226c   :  { %v9232_v17 = vpop.f32.mrf.mxu0 }
0x226d   :  { %v7465_v17 = vld [vmem:[%s12289_s24 + $0x8] sm:$0xff] }
0x226e   :  { %v7339_v53 = vpop.f32.mrf.mxu0 }
0x226f   :  { %v7340_v9 = vadd.f32 %v7339_v53, %v7269_v51  ;;  %v7466_v51 = vld [vmem:[%s12289_s24 + $0x10] sm:$0xff]  ;;  %v7464_v53 = vld [vmem:[%s12289_s24] sm:$0xff] }
0x2270   :  { %v9239_v11 = vpop.f32.mrf.mxu0  ;;  %7500 = vmatpush1.msra.mxu0 %v7466_v51 }
0x2271   :  { %v7343_v44 = vadd.f32 %v7340_v9, %v7190_v58  ;;  %7501 = vmatprep.subr.mxu0 %v7465_v17 }
0x2272   :  { %7502 = vmatpush1.msra.mxu0 %v7464_v53 }
0x2273   :  { %v7348_v30 = vsel %vm7039_vm11, %v7343_v44, 0.0  ;;  %7678 = vmatprep.subr.mxu0 %v7467_v33 }
0x2274   :  { %7349 = vadd.xlane.f32.xlu0 %v7348_v30 }
0x2286   :  { %v7346_v18 = vpop.xlane.xlu1 %7345 }
0x228a   :  { %v7373_v59 = vpop.permute.xlu1 %7372 }
0x22e5   :  { %v6887_v35 = vpop.f32.mrf.mxu1 }
0x22e6   :  { %v6888_v7 = vadd.f32 %v12011_v12, %v6887_v35  ;;  %v7564_v12 = vld [vmem:[%s12287_s4] sm:$0x7] }
0x22e7   :  { %v9211_v46 = vpop.f32.mrf.mxu1 }
0x22e8   :  { %v6893_v2 = vadd.f32 %v6888_v7, %v11980_v42  ;;  %v7555_v42 = vld [vmem:[%s12286_s26] sm:$0xff] }
0x22ea   :  { %6896 = vst.msk [vmem:[#allocation2 + $0x28] sm:$0x1] %vm184_vm1, %v6893_v2 }
0x22f1   :  { %v6964_v50 = vld [vmem:[#allocation2 + $0x28] sm:$0x1] }
0x22f2   :  { %v6973_v52 = vsel %vm184_vm1, %v6964_v50, 0.0 }
0x22fd   :  { %v7350_v1 = vpop.xlane.xlu0 %7349 }
0x22fe   :  { %v7351_v41 = vadd.f32 %v7350_v1, %v7346_v18 }
0x2300   :  { %v7352_v54 = vmul.f32 0.03125, %v7351_v41 }
0x2302   :  { %v7353_v14 = vsub.f32 %v7192_v36, %v7352_v54  ;;  %v7354_v38 = vsub.f32 %v7343_v44, %v7352_v54 }
0x2304   :  { %v7360_v43 = vmul.f32 %v7354_v38, %v7354_v38  ;;  %v7355_v49 = vmul.f32 %v7353_v14, %v7353_v14 }
0x2306   :  { %v7361_v19 = vsel %vm7039_vm11, %v7360_v43, 0.0  ;;  %v7356_v45 = vsel %vm7039_vm11, %v7355_v49, 0.0 }
0x2307   :  { %7362 = vadd.xlane.f32.xlu0 %v7361_v19  ;;  %7357 = vadd.xlane.f32.xlu1 %v7356_v45 }
0x2318   :  { %7551 = vperm.xlu1 %9268, %v7369_v15   ;;  %v7384_v15 = vld [vmem:[%s12288_s20] sm:$0x7] }
0x231c   :  { %7558 = vperm.xlu1 %9268, %v7555_v42  }
0x231d   :  { %7379 = vperm.xlu0 %9267, %v7555_v42  }
0x2320   :  { %7567 = vperm.xlu1 %9268, %v7564_v12  }
0x2321   :  { %7388 = vperm.xlu0 %9267, %v7385_v37  }
0x2340   :  { %6909 = vadd.xlane.f32.xlu0 %v6908_v28 }
0x2344   :  { %6974 = vadd.xlane.f32.xlu1 %v6973_v52 }
0x2390   :  { %v7363_v6 = vpop.xlane.xlu0 %7362  ;;  %v7358_v57 = vpop.xlane.xlu1 %7357 }
0x2391   :  { %v7364_v47 = vadd.f32 %v7363_v6, %v7358_v57 }
0x2393   :  { %v7365_v32 = vmul.f32 0.03125, %v7364_v47 }
0x2394   :  { %v7552_v23 = vpop.permute.xlu1 %7551 }
0x2395   :  { %v7366_v58 = vadd.f32 1e-05, %v7365_v32 }
0x2397   :  { %9565 = vrsqrt.f32 %v7366_v58 }
0x2398   :  { %v7380_v0 = vpop.permute.xlu0 %7379  ;;  %v7559_v22 = vpop.permute.xlu1 %7558 }
0x239c   :  { %v7389_v26 = vpop.permute.xlu0 %7388  ;;  %v7568_v25 = vpop.permute.xlu1 %7567 }
0x23a4   :  { %v9566_v48 = vpop.eup %9565 }
0x23a5   :  { %v7547_v60 = vmul.f32 %v9566_v48, %v7354_v38  ;;  %v7368_v36 = vmul.f32 %v9566_v48, %v7353_v14 }
0x23a7   :  { %v7554_v34 = vmul.f32 %v7552_v23, %v7547_v60  ;;  %v7375_v4 = vmul.f32 %v7373_v59, %v7368_v36 }
0x23a9   :  { %v7382_v5 = vadd.f32 %v7380_v0, %v7375_v4  ;;  %v7561_v8 = vadd.f32 %v7559_v22, %v7554_v34 }
0x23ab   :  { %v7383_v63 = vmax.f32 %v7382_v5, 0.0  ;;  %v7562_v16 = vmax.f32 %v7561_v8, 0.0 }
0x23ad   :  { %9241 = vmatpush3.msra.mxu1 %v7383_v63 }
0x23ae   :  { %9243 = vmatmul.mubr.msk.f32.vlgmr.msra.gmra.mxu1 %vm478_vm6, %v7384_v15  ;;  %9245 = vmatprep.subr.mxu1 %v9584_v39 }
0x23af   :  { %9246 = vmatpush3.msra.mxu1 %v7562_v16  ;;  %9247 = vmatprep.mubr.msk.f32.mxu1 %vm9585_vm3, %v9584_v39 }
0x23b2   :  { %9248 = vmatmul.mubr.msk.f32.vlgmr.msra.gmra.mxu1 %vm478_vm6, %v7563_v13 }
0x23c9   :  { %v6910_v20 = vpop.xlane.xlu0 %6909 }
0x23ca   :  { %v6913_v27 = vmul.f32 0.03125, %v6910_v20 }
0x23cc   :  { %v6916_v62 = vsub.f32 %v6899_v55, %v6913_v27 }
0x23cd   :  { %v6975_v21 = vpop.xlane.xlu1 %6974 }
0x23ce   :  { %v6978_v24 = vmul.f32 0.03125, %v6975_v21  ;;  %v6919_v29 = vmul.f32 %v6916_v62, %v6916_v62 }
0x23d0   :  { %v6981_v3 = vsub.f32 %v6964_v50, %v6978_v24  ;;  %v6926_v40 = vsel %vm184_vm1, %v6919_v29, 0.0 }
0x23d1   :  { %6927 = vadd.xlane.f32.xlu0 %v6926_v40 }
0x23d2   :  { %v6984_v56 = vmul.f32 %v6981_v3, %v6981_v3 }
0x23d4   :  { %v6991_v31 = vsel %vm184_vm1, %v6984_v56, 0.0 }
0x23d5   :  { %6992 = vadd.xlane.f32.xlu0 %v6991_v31 }
0x245a   :  { %v6928_v9 = vpop.xlane.xlu0 %6927 }
0x245b   :  { %v6931_v11 = vmul.f32 0.03125, %v6928_v9 }
0x245d   :  { %v6934_v44 = vadd.f32 1e-12, %v6931_v11 }
0x245e   :  { %v6993_v30 = vpop.xlane.xlu0 %6992 }
0x245f   :  { %9567 = vrsqrt.f32 %v6934_v44  ;;  %v6996_v35 = vmul.f32 0.03125, %v6993_v30 }
0x2461   :  { %v6999_v7 = vadd.f32 1e-12, %v6996_v35 }
0x2463   :  { %9569 = vrsqrt.f32 %v6999_v7 }
0x246c   :  { %v9568_v46 = vpop.eup %9567 }
0x246d   :  { %v6940_v2 = vmul.f32 %v9568_v46, %v6916_v62 }
0x246e   :  { %v7460_v18 = vpop.f32.mrf.mxu1 }
0x246f   :  { %v6949_v1 = vmul.f32 %v11997_v61, %v6940_v2  ;;  %v7461_v41 = vadd.f32 %v7460_v18, %v7389_v26 }
0x2470   :  { %v9570_v54 = vpop.eup %9569  ;;  %v9244_v14 = vpop.f32.mrf.mxu1 }
0x2471   :  { %v6958_v38 = vadd.f32 %v12003_v10, %v6949_v1  ;;  %v7005_v43 = vmul.f32 %v9570_v54, %v6981_v3  ;;  %8042 = vmatmul.mubr.msk.f32.vlgmr.msra.gmra.mxu0 %vm7039_vm11, %v7461_v41 }
0x2472   :  { %v7639_v49 = vpop.f32.mrf.mxu1  ;;  %7679 = vmatpush1.msra.mxu0 %v7466_v51  ;;  %7714 = vmatprep.mubr.f32.mxu0 %v9584_v39 }
0x2473   :  { %6961 = vst.msk [vmem:[#allocation2 + $0x10] sm:$0x1] %vm184_vm1, %v6958_v38  ;;  %v7014_v19 = vmul.f32 %v11997_v61, %v7005_v43  ;;  %v7640_v45 = vadd.f32 %v7639_v49, %v7568_v25  ;;  %7680 = vmatprep.subr.mxu0 %v7465_v17 }
0x2474   :  { %7681 = vmatpush1.msra.mxu0 %v7464_v53  ;;  %v9249_v42 = vpop.f32.mrf.mxu1 }
0x2475   :  { %v7023_v12 = vadd.f32 %v12003_v10, %v7014_v19  ;;  %8044 = vmatmul.mubr.msk.f32.vlgmr.msra.gmra.mxu0 %vm7039_vm11, %v7640_v45 }
0x2477   :  { %7026 = vst.msk [vmem:[#allocation2 + $0x28] sm:$0x1] %vm184_vm1, %v7023_v12 }
0x2531   :  { %v7537_v37 = vpop.f32.mrf.mxu0 }
0x2533   :  { %v7539_v55 = vpop.f32.mrf.mxu0 }
0x2534   :  { %v7544_v28 = vcombine.low %v7537_v37, %v7539_v55 }
0x2535   :  { %v7716_v50 = vpop.f32.mrf.mxu0 }
0x2536   :  { %7546 = vst [vmem:[%s12290_s12] sm:$0x77] %v7544_v28 }
0x2537   :  { %v7718_v39 = vpop.f32.mrf.mxu0 }
0x2538   :  { %v7723_v61 = vcombine.low %v7716_v50, %v7718_v39 }
0x253a   :  { %8045 = vst [vmem:[%s12290_s12 + $0x8] sm:$0x77] %v7723_v61 }

</bundles_post_ra>
